<compile_context>
chip_gen: v6e
topology: v6e:2x2x1
jax: 0.10.0
libtpu: 0.0.40
codegen_flags: <defaults>
</compile_context>

<pallas_src>
import numpy as np
import jax
import jax.numpy as jnp
from jax import lax
from jax.experimental import pallas as pl
from jax.experimental.pallas import tpu as pltpu

NEG_SLOPE = 0.01              # nn.LeakyReLU() default negative_slope
BN_EPS = 1e-5                 # nn.BatchNorm2d default eps
COMPUTE_DTYPE = jnp.float32   # bf16 = footprint-only win on v6e/v7x (see NOTE)
LANE_PAD = 128                # left/right zero extension of the flat activation


# --------------------------------------------------------------------------
# Fused ConvBlock (+ optional PCS) kernel
#   Conv3x3 -> BN -> LeakyReLU -> (Dropout=id) -> Conv3x3 -> BN -> LeakyReLU
#   [-> avg/max pool + MLPs + sigmoid gate  (PersonalizedChannelSelection)]
# All activations are (C, S) with S = H*W on lanes.
# --------------------------------------------------------------------------
def _make_conv_block_kernel(H, W, Cin, Cout, with_pcs):
    S = H * W

    def kernel(*refs):
        if with_pcs:
            (x_ref, w1_ref, s1_ref, b1_ref, w2_ref, s2_ref, b2_ref,
             ml_ref, mr_ref, emb_ref, f1a_ref, f1b_ref, f2p_ref, f2e_ref,
             f2o_ref, o_ref, h_ref, xe1_ref, p1_ref, xe2_ref, p2_ref) = refs
        else:
            (x_ref, w1_ref, s1_ref, b1_ref, w2_ref, s2_ref, b2_ref,
             ml_ref, mr_ref, o_ref, xe1_ref, p1_ref, xe2_ref, p2_ref) = refs

        ml = ml_ref[...]          # (1, S) zero where w == 0
        mr = mr_ref[...]          # (1, S) zero where w == W-1

        def fill_ext(xe_ref, val, c):
            # Flat zero-extended activation: [0 x LANE_PAD | x | 0 x LANE_PAD].
            # Left/right pads are aligned full-lane stores; interior store is
            # lane-aligned (offset = LANE_PAD = 128) and lane-dense.
            xe_ref[:, 0:LANE_PAD] = jnp.zeros((c, LANE_PAD), xe_ref.dtype)
            xe_ref[:, LANE_PAD + S:LANE_PAD + S + LANE_PAD] = (
                jnp.zeros((c, LANE_PAD), xe_ref.dtype))
            xe_ref[:, LANE_PAD:LANE_PAD + S] = val.astype(xe_ref.dtype)

        def im2col(xe_ref, p_ref, c):
            # Tap (dy,dx) of a 3x3 / pad-1 conv in flat coords is a lane-window
            # shifted by (dy-1)*W + (dx-1); row overflow is handled by the zero
            # extension, column wrap-around by the (1,S) masks.  Each tap write
            # is a full-lane (unmasked) store of (c, S).
            for dy in range(3):
                for dx in range(3):
                    t = dy * 3 + dx
                    off = (dy - 1) * W + (dx - 1)
                    tap = xe_ref[:, LANE_PAD + off:LANE_PAD + off + S]
                    if dx == 0:
                        tap = tap * ml
                    elif dx == 2:
                        tap = tap * mr
                    p_ref[t * c:(t + 1) * c, :] = tap.astype(p_ref.dtype)

        # ---- conv1 (one MXU matmul, K = 9*Cin, N = S lane-dense) -----------
        fill_ext(xe1_ref, x_ref[...], Cin)
        im2col(xe1_ref, p1_ref, Cin)
        y = jnp.dot(w1_ref[...], p1_ref[...], preferred_element_type=jnp.float32)
        y = y * s1_ref[...] + b1_ref[...]            # folded conv-bias + BN
        y = jnp.where(y > 0, y, NEG_SLOPE * y)       # LeakyReLU
        # eval-mode nn.Dropout == identity

        # ---- conv2 ----------------------------------------------------------
        fill_ext(xe2_ref, y, Cout)
        im2col(xe2_ref, p2_ref, Cout)
        z = jnp.dot(w2_ref[...], p2_ref[...], preferred_element_type=jnp.float32)
        z = z * s2_ref[...] + b2_ref[...]
        z = jnp.where(z > 0, z, NEG_SLOPE * z)       # (Cout, S)

        # ---- fused PersonalizedChannelSelection epilogue --------------------
        if with_pcs:
            e = emb_ref[...]                                          # (E, 1)
            h1 = jnp.maximum(
                jnp.dot(f1a_ref[...], e, preferred_element_type=jnp.float32), 0.0)
            eb = jnp.dot(f1b_ref[...], h1, preferred_element_type=jnp.float32)
            eterm = jnp.dot(f2e_ref[...], eb, preferred_element_type=jnp.float32)

            avg = jnp.mean(z, axis=1, keepdims=True)                  # (C, 1)
            mx = jnp.max(z, axis=1, keepdims=True)                    # (C, 1)

            def fc2(pooled):
                t = jnp.dot(f2p_ref[...], pooled,
                            preferred_element_type=jnp.float32) + eterm
                t = jnp.maximum(t, 0.0)
                return jnp.dot(f2o_ref[...], t, preferred_element_type=jnp.float32)

            logits = fc2(avg) + fc2(mx)                               # (C, 1)
            hmap = 1.0 / (1.0 + jnp.exp(-logits))                     # sigmoid
            h_ref[...] = hmap.astype(h_ref.dtype)
            z = z * hmap + z                                          # gate

        o_ref[...] = z.astype(o_ref.dtype)

    return kernel


# --------------------------------------------------------------------------
# Wrapper: one pallas_call per stage, grid over batch.
# --------------------------------------------------------------------------
def _padded_bytes(shape, dtype):
    dims = [int(d) for d in shape]
    if len(dims) == 1:
        dims = [1] + dims
    dims[-1] = pl.cdiv(dims[-1], 128) * 128
    dims[-2] = pl.cdiv(dims[-2], 8) * 8
    n = 1
    for d in dims:
        n *= d
    return n * jnp.dtype(dtype).itemsize


def _run_conv_block(x_flat, cp, H, W, pcs_p=None, emb=None):
    """x_flat: (N, Cin, H*W) f32.  Returns (N, Cout, H*W) [and (N, Cout, 1)]."""
    N, Cin, S = x_flat.shape
    assert S == H * W
    Cout = cp["w1m"].shape[0]
    with_pcs = pcs_p is not None

    # Column-wrap masks (host-built constants; fold under jit).
    col = np.arange(S) % max(W, 1)
    ml = jnp.asarray((col != 0).astype(np.float32)).reshape(1, S)
    mr = jnp.asarray((col != W - 1).astype(np.float32)).reshape(1, S)

    def const_spec(shape):
        return pl.BlockSpec(shape, lambda n, _s=shape: (0,) * len(_s))

    in_specs = [
        pl.BlockSpec((None, Cin, S), lambda n: (n, 0, 0)),
        const_spec((Cout, 9 * Cin)),
        const_spec((Cout, 1)),
        const_spec((Cout, 1)),
        const_spec((Cout, 9 * Cout)),
        const_spec((Cout, 1)),
        const_spec((Cout, 1)),
        const_spec((1, S)),
        const_spec((1, S)),
    ]
    inputs = [x_flat, cp["w1m"], cp["s1"], cp["b1"], cp["w2m"], cp["s2"],
              cp["b2"], ml, mr]
    io_shapes = [(Cin, S), (Cout, 9 * Cin), (Cout, 1), (Cout, 1),
                 (Cout, 9 * Cout), (Cout, 1), (Cout, 1), (1, S), (1, S),
                 (Cout, S)]

    out_shape = jax.ShapeDtypeStruct((N, Cout, S), jnp.float32)
    out_specs = pl.BlockSpec((None, Cout, S), lambda n: (n, 0, 0))

    if with_pcs:
        E = emb.shape[1]
        C16 = pcs_p["f2p"].shape[0]
        in_specs += [
            pl.BlockSpec((None, E, 1), lambda n: (n, 0, 0)),
            const_spec((Cout, E)),
            const_spec((Cout, Cout)),
            const_spec((C16, Cout)),
            const_spec((C16, Cout)),
            const_spec((Cout, C16)),
        ]
        inputs += [emb, pcs_p["f1a"], pcs_p["f1b"], pcs_p["f2p"],
                   pcs_p["f2e"], pcs_p["f2o"]]
        io_shapes += [(E, 1), (Cout, E), (Cout, Cout), (C16, Cout),
                      (C16, Cout), (Cout, C16), (Cout, 1)]
        out_shape = (out_shape, jax.ShapeDtypeStruct((N, Cout, 1), jnp.float32))
        out_specs = (out_specs, pl.BlockSpec((None, Cout, 1), lambda n: (n, 0, 0)))

    scratch_defs = [
        ((Cin, S + 2 * LANE_PAD), COMPUTE_DTYPE),    # flat zero-extended input
        ((9 * Cin, S), COMPUTE_DTYPE),               # im2col patches conv1
        ((Cout, S + 2 * LANE_PAD), COMPUTE_DTYPE),   # flat zero-extended mid act
        ((9 * Cout, S), COMPUTE_DTYPE),              # im2col patches conv2
    ]
    scratch_shapes = [pltpu.VMEM(s, d) for s, d in scratch_defs]

    # VMEM budget from actual padded tile sizes (double-buffered I/O + scratch).
    io_bytes = sum(_padded_bytes(s, jnp.float32) for s in io_shapes)
    sc_bytes = sum(_padded_bytes(s, d) for s, d in scratch_defs)
    vmem_limit = min(64 * 1024 * 1024,
                     max(32 * 1024 * 1024, 2 * (2 * io_bytes + sc_bytes)))

    flops = 2 * N * S * 9 * (Cin * Cout + Cout * Cout)
    bytes_accessed = 4 * (N * S * (Cin + Cout)
                          + 9 * Cin * Cout + 9 * Cout * Cout + 4 * Cout)
    transcendentals = 2 * N * Cout if with_pcs else 0

    kernel = _make_conv_block_kernel(H, W, Cin, Cout, with_pcs)
    return pl.pallas_call(
        kernel,
        out_shape=out_shape,
        grid=(N,),
        in_specs=in_specs,
        out_specs=out_specs,
        scratch_shapes=scratch_shapes,
        compiler_params=pltpu.CompilerParams(
            dimension_semantics=("parallel",),
            vmem_limit_bytes=int(vmem_limit)),
        cost_estimate=pl.CostEstimate(flops=flops,
                                      transcendentals=transcendentals,
                                      bytes_accessed=bytes_accessed),
    )(*inputs)


# --------------------------------------------------------------------------
# One-time weight preparation (folded conv+BN, im2col weight layout, PCS split)
# --------------------------------------------------------------------------
def _fold_conv_bn(w_oihw, conv_b, gamma, beta, mean, var):
    cout, cin = w_oihw.shape[0], w_oihw.shape[1]
    # W[o, (dy*3+dx)*cin + i] = w[o, i, dy, dx]
    wm = jnp.transpose(w_oihw, (0, 2, 3, 1)).reshape(cout, 9 * cin)
    scale = gamma / jnp.sqrt(var + BN_EPS)
    bias = beta + (conv_b - mean) * scale
    return (wm.astype(COMPUTE_DTYPE),
            scale.reshape(cout, 1).astype(jnp.float32),
            bias.reshape(cout, 1).astype(jnp.float32))


def prepare_lc_encoder_params(params):
    conv = []
    for p in params["conv"]:
        w1m, s1, b1 = _fold_conv_bn(p["w1"], p["b1"], p["g1"], p["be1"],
                                    p["m1"], p["v1"])
        w2m, s2, b2 = _fold_conv_bn(p["w2"], p["b2"], p["g2"], p["be2"],
                                    p["m2"], p["v2"])
        conv.append(dict(w1m=w1m, s1=s1, b1=b1, w2m=w2m, s2=s2, b2=b2))
    pcs = []
    for p in params["pcs"]:
        C = p["fc1_w2"].shape[0]
        pcs.append(dict(
            f1a=p["fc1_w1"].astype(jnp.float32),          # (C, E)
            f1b=p["fc1_w2"].astype(jnp.float32),          # (C, C)
            f2p=p["fc2_w1"][:, :C].astype(jnp.float32),   # (C16, C) pooled half
            f2e=p["fc2_w1"][:, C:].astype(jnp.float32),   # (C16, C) emb half
            f2o=p["fc2_w2"].astype(jnp.float32),          # (C, C16)
        ))
    return dict(conv=conv, pcs=pcs)


# --------------------------------------------------------------------------
# LCEncoder forward (Pallas path).  Input/outputs are NCHW like the module.
# --------------------------------------------------------------------------
def lc_encoder_forward(x_nchw, prep, cfg, emb_idx=None):
    n_stage, n_pcs = 5, cfg["pcs_num"]
    N, Cin0, H, W = x_nchw.shape
    # Mirrors torch `if not emb_idx:` (emb_idx=0 falls back to client_id).
    cid = cfg["client_id"] if not emb_idx else emb_idx
    emb = jnp.zeros((N, cfg["client_num"], 1), jnp.float32).at[:, cid, 0].set(1.0)

    x = x_nchw.reshape(N, Cin0, H * W).astype(jnp.float32)   # free reshape
    h_cur, w_cur = H, W
    features, heatmaps = [], []
    for i in range(n_stage):
        if i > 0:
            # nn.MaxPool2d(2) on the NCHW view (tiny XLA op; TODO(synk): fuse).
            C = x.shape[1]
            x = x.reshape(N, C, h_cur, w_cur)
            x = jnp.max(x.reshape(N, C, h_cur // 2, 2, w_cur // 2, 2),
                        axis=(3, 5))
            h_cur //= 2
            w_cur //= 2
            x = x.reshape(N, C, h_cur * w_cur)
        j = i - (n_stage - n_pcs)
        if j >= 0:
            x, hflat = _run_conv_block(x, prep["conv"][i], h_cur, w_cur,
                                       pcs_p=prep["pcs"][j], emb=emb)
            hmap = hflat.reshape(N, -1, 1, 1)
        else:
            x = _run_conv_block(x, prep["conv"][i], h_cur, w_cur)
            hmap = None
        features.append(x.reshape(N, -1, h_cur, w_cur))      # NCHW, free reshape
        heatmaps.append(hmap)
    return features, heatmaps


# --------------------------------------------------------------------------
# Pure-JAX reference (mirrors the PyTorch modules in eval mode)
# --------------------------------------------------------------------------
def _conv_block_ref(x, p):
    def conv(h, w, b):
        y = lax.conv_general_dilated(h, w, (1, 1), ((1, 1), (1, 1)),
                                     dimension_numbers=("NCHW", "OIHW", "NCHW"))
        return y + b[None, :, None, None]

    def bn(h, g, be, m, v):
        sc = g / jnp.sqrt(v + BN_EPS)
        return (h - m[None, :, None, None]) * sc[None, :, None, None] + be[None, :, None, None]

    lrelu = lambda h: jnp.where(h > 0, h, NEG_SLOPE * h)
    y = lrelu(bn(conv(x, p["w1"], p["b1"]), p["g1"], p["be1"], p["m1"], p["v1"]))
    y = lrelu(bn(conv(y, p["w2"], p["b2"]), p["g2"], p["be2"], p["m2"], p["v2"]))
    return y


def _pcs_ref(x, emb, p):
    avg = jnp.mean(x, axis=(2, 3))
    mx = jnp.max(x, axis=(2, 3))
    e = jnp.maximum(emb @ p["fc1_w1"].T, 0.0) @ p["fc1_w2"].T

    def fc2(v):
        t = jnp.maximum(jnp.concatenate([v, e], axis=1) @ p["fc2_w1"].T, 0.0)
        return t @ p["fc2_w2"].T

    hmap = jax.nn.sigmoid(fc2(avg) + fc2(mx))
    xg = x * hmap[:, :, None, None] + x
    return xg, hmap[:, :, None, None]


def lc_encoder_reference(x_nchw, params, cfg, emb_idx=None):
    n_stage, n_pcs = 5, cfg["pcs_num"]
    N = x_nchw.shape[0]
    cid = cfg["client_id"] if not emb_idx else emb_idx
    emb = jnp.zeros((N, cfg["client_num"]), jnp.float32).at[:, cid].set(1.0)
    x = x_nchw
    features, heatmaps = [], []
    for i in range(n_stage):
        if i > 0:
            Nn, C, H, W = x.shape
            x = jnp.max(x.reshape(Nn, C, H // 2, 2, W // 2, 2), axis=(3, 5))
        x = _conv_block_ref(x, params["conv"][i])
        if i >= n_stage - n_pcs:
            x, hmap = _pcs_ref(x, emb, params["pcs"][i - n_stage + n_pcs])
        else:
            hmap = None
        features.append(x)
        heatmaps.append(hmap)
    return features, heatmaps


# --------------------------------------------------------------------------
# Parameter construction (torch-layout weights)
# --------------------------------------------------------------------------
def _init_conv_block_params(key, cin, cout):
    ks = jax.random.split(key, 12)
    return dict(
        w1=0.1 * jax.random.normal(ks[0], (cout, cin, 3, 3), jnp.float32),
        b1=0.1 * jax.random.normal(ks[1], (cout,), jnp.float32),
        g1=1.0 + 0.1 * jax.random.normal(ks[2], (cout,), jnp.float32),
        be1=0.1 * jax.random.normal(ks[3], (cout,), jnp.float32),
        m1=0.1 * jax.random.normal(ks[4], (cout,), jnp.float32),
        v1=0.5 + jax.random.uniform(ks[5], (cout,), jnp.float32),
        w2=0.1 * jax.random.normal(ks[6], (cout, cout, 3, 3), jnp.float32),
        b2=0.1 * jax.random.normal(ks[7], (cout,), jnp.float32),
        g2=1.0 + 0.1 * jax.random.normal(ks[8], (cout,), jnp.float32),
        be2=0.1 * jax.random.normal(ks[9], (cout,), jnp.float32),
        m2=0.1 * jax.random.normal(ks[10], (cout,), jnp.float32),
        v2=0.5 + jax.random.uniform(ks[11], (cout,), jnp.float32),
    )


def _init_pcs_params(key, f_dim, emb_dim):
    ks = jax.random.split(key, 4)
    c16 = max(f_dim // 16, 1)
    return dict(
        fc1_w1=0.2 * jax.random.normal(ks[0], (f_dim, emb_dim), jnp.float32),
        fc1_w2=0.2 * jax.random.normal(ks[1], (f_dim, f_dim), jnp.float32),
        fc2_w1=0.2 * jax.random.normal(ks[2], (c16, 2 * f_dim), jnp.float32),
        fc2_w2=0.2 * jax.random.normal(ks[3], (f_dim, c16), jnp.float32),
    )


def init_lc_encoder_params(key, cfg):
    ft = cfg["feature_chns"]
    assert len(ft) == 5
    chans = [cfg["in_chns"]] + list(ft)
    keys = jax.random.split(key, 5 + cfg["pcs_num"])
    conv = [_init_conv_block_params(keys[i], chans[i], chans[i + 1]) for i in range(5)]
    pcs = [_init_pcs_params(keys[5 + i], ft[5 - cfg["pcs_num"] + i], cfg["emb_num"])
           for i in range(cfg["pcs_num"])]
    return dict(conv=conv, pcs=pcs)


# --------------------------------------------------------------------------
if __name__ == "__main__":
    key = jax.random.PRNGKey(0)
    cfg = {
        "in_chns": 4,
        "feature_chns": [8, 16, 16, 32, 32],
        "class_num": 2,
        "bilinear": True,
        "dropout": [0.05, 0.1, 0.2, 0.3, 0.5],   # eval mode -> identity
        "pcs_num": 2,
        "emb_num": 4,      # == client_num (required by the torch module's one-hot emb)
        "client_num": 4,
        "client_id": 1,
    }
    N, H, W = 2, 32, 32

    k_x, k_p = jax.random.split(key)
    x = jax.random.normal(k_x, (N, cfg["in_chns"], H, W), jnp.float32)
    params = init_lc_encoder_params(k_p, cfg)

    prep = prepare_lc_encoder_params(params)          # one-time weight prep
    fwd = jax.jit(lambda xx: lc_encoder_forward(xx, prep, cfg))

    feats, hmaps = fwd(x)
    feats, hmaps = jax.block_until_ready((feats, hmaps))

    rfeats, rhmaps = lc_encoder_reference(x, params, cfg)
    for i in range(5):
        assert feats[i].shape == rfeats[i].shape, (feats[i].shape, rfeats[i].shape)
        ferr = float(jnp.max(jnp.abs(feats[i] - rfeats[i])))
        assert jnp.allclose(feats[i], rfeats[i], rtol=1e-3, atol=1e-3), \
            f"feature {i}: max abs err {ferr}"
        if rhmaps[i] is not None:
            assert hmaps[i] is not None and hmaps[i].shape == rhmaps[i].shape
            herr = float(jnp.max(jnp.abs(hmaps[i] - rhmaps[i])))
            assert jnp.allclose(hmaps[i], rhmaps[i], rtol=1e-3, atol=1e-3), \
                f"heatmap {i}: max abs err {herr}"
        else:
            assert hmaps[i] is None

    print("KERNEL_OK")
</pallas_src>

<mosaic_0001>
module attributes {stable_mosaic.version = 11 : i64} {
  func.func @kernel(%arg0: i32, %arg1: memref<1x4x1024xf32, #tpu.memory_space<vmem>>, %arg2: memref<8x36xf32, #tpu.memory_space<vmem>>, %arg3: memref<8x1xf32, #tpu.memory_space<vmem>>, %arg4: memref<8x1xf32, #tpu.memory_space<vmem>>, %arg5: memref<8x72xf32, #tpu.memory_space<vmem>>, %arg6: memref<8x1xf32, #tpu.memory_space<vmem>>, %arg7: memref<8x1xf32, #tpu.memory_space<vmem>>, %arg8: memref<1x1024xf32, #tpu.memory_space<vmem>>, %arg9: memref<1x1024xf32, #tpu.memory_space<vmem>>, %arg10: memref<1x8x1024xf32, #tpu.memory_space<vmem>>, %arg11: memref<4x1280xf32, #tpu.memory_space<vmem>>, %arg12: memref<36x1024xf32, #tpu.memory_space<vmem>>, %arg13: memref<8x1280xf32, #tpu.memory_space<vmem>>, %arg14: memref<72x1024xf32, #tpu.memory_space<vmem>>) attributes {dimension_semantics = [#tpu.dimension_semantics<parallel>], iteration_bounds = array<i64: 2>, scalar_prefetch = 0 : i64, scratch_operands = 4 : i64, tpu.core_type = #tpu.core_type<tc>, window_params = [{transform_indices = @transform_0, window_bounds = array<i64: 1, 4, 1024>}, {pipeline_mode = #tpu.pipeline_mode<synchronous>, transform_indices = @transform_1, window_bounds = array<i64: 8, 36>}, {pipeline_mode = #tpu.pipeline_mode<synchronous>, transform_indices = @transform_2, window_bounds = array<i64: 8, 1>}, {pipeline_mode = #tpu.pipeline_mode<synchronous>, transform_indices = @transform_3, window_bounds = array<i64: 8, 1>}, {pipeline_mode = #tpu.pipeline_mode<synchronous>, transform_indices = @transform_4, window_bounds = array<i64: 8, 72>}, {pipeline_mode = #tpu.pipeline_mode<synchronous>, transform_indices = @transform_5, window_bounds = array<i64: 8, 1>}, {pipeline_mode = #tpu.pipeline_mode<synchronous>, transform_indices = @transform_6, window_bounds = array<i64: 8, 1>}, {pipeline_mode = #tpu.pipeline_mode<synchronous>, transform_indices = @transform_7, window_bounds = array<i64: 1, 1024>}, {pipeline_mode = #tpu.pipeline_mode<synchronous>, transform_indices = @transform_8, window_bounds = array<i64: 1, 1024>}, {transform_indices = @transform_9, window_bounds = array<i64: 1, 8, 1024>}]} {
    %c0 = arith.constant 0 : index
    %c0_0 = arith.constant 0 : index
    %0 = vector.load %arg8[%c0, %c0_0] : memref<1x1024xf32, #tpu.memory_space<vmem>>, vector<1x1024xf32>
    %c0_1 = arith.constant 0 : index
    %c0_2 = arith.constant 0 : index
    %1 = vector.load %arg9[%c0_1, %c0_2] : memref<1x1024xf32, #tpu.memory_space<vmem>>, vector<1x1024xf32>
    %c0_3 = arith.constant 0 : index
    %c0_4 = arith.constant 0 : index
    %c0_5 = arith.constant 0 : index
    %2 = vector.load %arg1[%c0_3, %c0_4, %c0_5] : memref<1x4x1024xf32, #tpu.memory_space<vmem>>, vector<1x4x1024xf32>
    %3 = vector.shape_cast %2 : vector<1x4x1024xf32> to vector<4x1024xf32>
    %cst = arith.constant 0.000000e+00 : f32
    %4 = vector.broadcast %cst : f32 to vector<4x128xf32>
    %c0_6 = arith.constant 0 : index
    %c0_7 = arith.constant 0 : index
    %5 = vector.load %arg11[%c0_6, %c0_7] : memref<4x1280xf32, #tpu.memory_space<vmem>>, vector<4x128xf32>
    tpu.vector_store %arg11[%c0_6, %c0_7], %4 {strides = array<i32>} : memref<4x1280xf32, #tpu.memory_space<vmem>>, vector<4x128xf32>,
    %cst_8 = arith.constant 0.000000e+00 : f32
    %6 = vector.broadcast %cst_8 : f32 to vector<4x128xf32>
    %c0_9 = arith.constant 0 : index
    %c1152 = arith.constant 1152 : index
    %7 = vector.load %arg11[%c0_9, %c1152] : memref<4x1280xf32, #tpu.memory_space<vmem>>, vector<4x128xf32>
    tpu.vector_store %arg11[%c0_9, %c1152], %6 {strides = array<i32>} : memref<4x1280xf32, #tpu.memory_space<vmem>>, vector<4x128xf32>,
    %c0_10 = arith.constant 0 : index
    %c128 = arith.constant 128 : index
    %8 = vector.load %arg11[%c0_10, %c128] : memref<4x1280xf32, #tpu.memory_space<vmem>>, vector<4x1024xf32>
    tpu.vector_store %arg11[%c0_10, %c128], %3 {strides = array<i32>} : memref<4x1280xf32, #tpu.memory_space<vmem>>, vector<4x1024xf32>,
    %c0_11 = arith.constant 0 : index
    %c95 = arith.constant 95 : index
    %9 = vector.load %arg11[%c0_11, %c95] : memref<4x1280xf32, #tpu.memory_space<vmem>>, vector<4x1024xf32>
    %10 = vector.broadcast %0 : vector<1x1024xf32> to vector<4x1024xf32>
    %11 = arith.mulf %9, %10 : vector<4x1024xf32>
    %c0_12 = arith.constant 0 : index
    %c0_13 = arith.constant 0 : index
    %12 = vector.load %arg12[%c0_12, %c0_13] : memref<36x1024xf32, #tpu.memory_space<vmem>>, vector<4x1024xf32>
    tpu.vector_store %arg12[%c0_12, %c0_13], %11 {strides = array<i32>} : memref<36x1024xf32, #tpu.memory_space<vmem>>, vector<4x1024xf32>,
    %c0_14 = arith.constant 0 : index
    %c96 = arith.constant 96 : index
    %13 = vector.load %arg11[%c0_14, %c96] : memref<4x1280xf32, #tpu.memory_space<vmem>>, vector<4x1024xf32>
    %c4 = arith.constant 4 : index
    %c0_15 = arith.constant 0 : index
    %14 = vector.load %arg12[%c4, %c0_15] : memref<36x1024xf32, #tpu.memory_space<vmem>>, vector<4x1024xf32>
    tpu.vector_store %arg12[%c4, %c0_15], %13 {strides = array<i32>} : memref<36x1024xf32, #tpu.memory_space<vmem>>, vector<4x1024xf32>,
    %c0_16 = arith.constant 0 : index
    %c97 = arith.constant 97 : index
    %15 = vector.load %arg11[%c0_16, %c97] : memref<4x1280xf32, #tpu.memory_space<vmem>>, vector<4x1024xf32>
    %16 = vector.broadcast %1 : vector<1x1024xf32> to vector<4x1024xf32>
    %17 = arith.mulf %15, %16 : vector<4x1024xf32>
    %c8 = arith.constant 8 : index
    %c0_17 = arith.constant 0 : index
    %18 = vector.load %arg12[%c8, %c0_17] : memref<36x1024xf32, #tpu.memory_space<vmem>>, vector<4x1024xf32>
    tpu.vector_store %arg12[%c8, %c0_17], %17 {strides = array<i32>} : memref<36x1024xf32, #tpu.memory_space<vmem>>, vector<4x1024xf32>,
    %c0_18 = arith.constant 0 : index
    %c127 = arith.constant 127 : index
    %19 = vector.load %arg11[%c0_18, %c127] : memref<4x1280xf32, #tpu.memory_space<vmem>>, vector<4x1024xf32>
    %20 = vector.broadcast %0 : vector<1x1024xf32> to vector<4x1024xf32>
    %21 = arith.mulf %19, %20 : vector<4x1024xf32>
    %c12 = arith.constant 12 : index
    %c0_19 = arith.constant 0 : index
    %22 = vector.load %arg12[%c12, %c0_19] : memref<36x1024xf32, #tpu.memory_space<vmem>>, vector<4x1024xf32>
    tpu.vector_store %arg12[%c12, %c0_19], %21 {strides = array<i32>} : memref<36x1024xf32, #tpu.memory_space<vmem>>, vector<4x1024xf32>,
    %c0_20 = arith.constant 0 : index
    %c128_21 = arith.constant 128 : index
    %23 = vector.load %arg11[%c0_20, %c128_21] : memref<4x1280xf32, #tpu.memory_space<vmem>>, vector<4x1024xf32>
    %c16 = arith.constant 16 : index
    %c0_22 = arith.constant 0 : index
    %24 = vector.load %arg12[%c16, %c0_22] : memref<36x1024xf32, #tpu.memory_space<vmem>>, vector<4x1024xf32>
    tpu.vector_store %arg12[%c16, %c0_22], %23 {strides = array<i32>} : memref<36x1024xf32, #tpu.memory_space<vmem>>, vector<4x1024xf32>,
    %c0_23 = arith.constant 0 : index
    %c129 = arith.constant 129 : index
    %25 = vector.load %arg11[%c0_23, %c129] : memref<4x1280xf32, #tpu.memory_space<vmem>>, vector<4x1024xf32>
    %26 = vector.broadcast %1 : vector<1x1024xf32> to vector<4x1024xf32>
    %27 = arith.mulf %25, %26 : vector<4x1024xf32>
    %c20 = arith.constant 20 : index
    %c0_24 = arith.constant 0 : index
    %28 = vector.load %arg12[%c20, %c0_24] : memref<36x1024xf32, #tpu.memory_space<vmem>>, vector<4x1024xf32>
    tpu.vector_store %arg12[%c20, %c0_24], %27 {strides = array<i32>} : memref<36x1024xf32, #tpu.memory_space<vmem>>, vector<4x1024xf32>,
    %c0_25 = arith.constant 0 : index
    %c159 = arith.constant 159 : index
    %29 = vector.load %arg11[%c0_25, %c159] : memref<4x1280xf32, #tpu.memory_space<vmem>>, vector<4x1024xf32>
    %30 = vector.broadcast %0 : vector<1x1024xf32> to vector<4x1024xf32>
    %31 = arith.mulf %29, %30 : vector<4x1024xf32>
    %c24 = arith.constant 24 : index
    %c0_26 = arith.constant 0 : index
    %32 = vector.load %arg12[%c24, %c0_26] : memref<36x1024xf32, #tpu.memory_space<vmem>>, vector<4x1024xf32>
    tpu.vector_store %arg12[%c24, %c0_26], %31 {strides = array<i32>} : memref<36x1024xf32, #tpu.memory_space<vmem>>, vector<4x1024xf32>,
    %c0_27 = arith.constant 0 : index
    %c160 = arith.constant 160 : index
    %33 = vector.load %arg11[%c0_27, %c160] : memref<4x1280xf32, #tpu.memory_space<vmem>>, vector<4x1024xf32>
    %c28 = arith.constant 28 : index
    %c0_28 = arith.constant 0 : index
    %34 = vector.load %arg12[%c28, %c0_28] : memref<36x1024xf32, #tpu.memory_space<vmem>>, vector<4x1024xf32>
    tpu.vector_store %arg12[%c28, %c0_28], %33 {strides = array<i32>} : memref<36x1024xf32, #tpu.memory_space<vmem>>, vector<4x1024xf32>,
    %c0_29 = arith.constant 0 : index
    %c161 = arith.constant 161 : index
    %35 = vector.load %arg11[%c0_29, %c161] : memref<4x1280xf32, #tpu.memory_space<vmem>>, vector<4x1024xf32>
    %36 = vector.broadcast %1 : vector<1x1024xf32> to vector<4x1024xf32>
    %37 = arith.mulf %35, %36 : vector<4x1024xf32>
    %c32 = arith.constant 32 : index
    %c0_30 = arith.constant 0 : index
    %38 = vector.load %arg12[%c32, %c0_30] : memref<36x1024xf32, #tpu.memory_space<vmem>>, vector<4x1024xf32>
    tpu.vector_store %arg12[%c32, %c0_30], %37 {strides = array<i32>} : memref<36x1024xf32, #tpu.memory_space<vmem>>, vector<4x1024xf32>,
    %c0_31 = arith.constant 0 : index
    %c0_32 = arith.constant 0 : index
    %39 = vector.load %arg2[%c0_31, %c0_32] : memref<8x36xf32, #tpu.memory_space<vmem>>, vector<8x36xf32>
    %c0_33 = arith.constant 0 : index
    %c0_34 = arith.constant 0 : index
    %40 = vector.load %arg12[%c0_33, %c0_34] : memref<36x1024xf32, #tpu.memory_space<vmem>>, vector<36x1024xf32>
    %cst_35 = arith.constant dense<0.000000e+00> : vector<8x1024xf32>
    %41 = tpu.matmul %39, %40, %cst_35 {dimension_numbers = #tpu.dot_dimension_numbers<[1], [0], [0], [1], [0, 0, 1, 1], [], []>} : vector<8x36xf32>, vector<36x1024xf32>, vector<8x1024xf32> -> vector<8x1024xf32>
    %c0_36 = arith.constant 0 : index
    %c0_37 = arith.constant 0 : index
    %42 = vector.load %arg3[%c0_36, %c0_37] : memref<8x1xf32, #tpu.memory_space<vmem>>, vector<8x1xf32>
    %43 = vector.broadcast %42 : vector<8x1xf32> to vector<8x1024xf32>
    %44 = arith.mulf %41, %43 : vector<8x1024xf32>
    %c0_38 = arith.constant 0 : index
    %c0_39 = arith.constant 0 : index
    %45 = vector.load %arg4[%c0_38, %c0_39] : memref<8x1xf32, #tpu.memory_space<vmem>>, vector<8x1xf32>
    %46 = vector.broadcast %45 : vector<8x1xf32> to vector<8x1024xf32>
    %47 = arith.addf %44, %46 : vector<8x1024xf32>
    %cst_40 = arith.constant 0.000000e+00 : f32
    %48 = vector.broadcast %cst_40 : f32 to vector<8x1024xf32>
    %49 = arith.cmpf ogt, %47, %48 : vector<8x1024xf32>
    %cst_41 = arith.constant 0.00999999977 : f32
    %50 = vector.broadcast %cst_41 : f32 to vector<8x1024xf32>
    %51 = arith.mulf %50, %47 : vector<8x1024xf32>
    %52 = arith.select %49, %47, %51 : vector<8x1024xi1>, vector<8x1024xf32>
    %cst_42 = arith.constant 0.000000e+00 : f32
    %53 = vector.broadcast %cst_42 : f32 to vector<8x128xf32>
    %c0_43 = arith.constant 0 : index
    %c0_44 = arith.constant 0 : index
    %54 = vector.load %arg13[%c0_43, %c0_44] : memref<8x1280xf32, #tpu.memory_space<vmem>>, vector<8x128xf32>
    tpu.vector_store %arg13[%c0_43, %c0_44], %53 {strides = array<i32>} : memref<8x1280xf32, #tpu.memory_space<vmem>>, vector<8x128xf32>,
    %cst_45 = arith.constant 0.000000e+00 : f32
    %55 = vector.broadcast %cst_45 : f32 to vector<8x128xf32>
    %c0_46 = arith.constant 0 : index
    %c1152_47 = arith.constant 1152 : index
    %56 = vector.load %arg13[%c0_46, %c1152_47] : memref<8x1280xf32, #tpu.memory_space<vmem>>, vector<8x128xf32>
    tpu.vector_store %arg13[%c0_46, %c1152_47], %55 {strides = array<i32>} : memref<8x1280xf32, #tpu.memory_space<vmem>>, vector<8x128xf32>,
    %c0_48 = arith.constant 0 : index
    %c128_49 = arith.constant 128 : index
    %57 = vector.load %arg13[%c0_48, %c128_49] : memref<8x1280xf32, #tpu.memory_space<vmem>>, vector<8x1024xf32>
    tpu.vector_store %arg13[%c0_48, %c128_49], %52 {strides = array<i32>} : memref<8x1280xf32, #tpu.memory_space<vmem>>, vector<8x1024xf32>,
    %c0_50 = arith.constant 0 : index
    %c95_51 = arith.constant 95 : index
    %58 = vector.load %arg13[%c0_50, %c95_51] : memref<8x1280xf32, #tpu.memory_space<vmem>>, vector<8x1024xf32>
    %59 = vector.broadcast %0 : vector<1x1024xf32> to vector<8x1024xf32>
    %60 = arith.mulf %58, %59 : vector<8x1024xf32>
    %c0_52 = arith.constant 0 : index
    %c0_53 = arith.constant 0 : index
    %61 = vector.load %arg14[%c0_52, %c0_53] : memref<72x1024xf32, #tpu.memory_space<vmem>>, vector<8x1024xf32>
    tpu.vector_store %arg14[%c0_52, %c0_53], %60 {strides = array<i32>} : memref<72x1024xf32, #tpu.memory_space<vmem>>, vector<8x1024xf32>,
    %c0_54 = arith.constant 0 : index
    %c96_55 = arith.constant 96 : index
    %62 = vector.load %arg13[%c0_54, %c96_55] : memref<8x1280xf32, #tpu.memory_space<vmem>>, vector<8x1024xf32>
    %c8_56 = arith.constant 8 : index
    %c0_57 = arith.constant 0 : index
    %63 = vector.load %arg14[%c8_56, %c0_57] : memref<72x1024xf32, #tpu.memory_space<vmem>>, vector<8x1024xf32>
    tpu.vector_store %arg14[%c8_56, %c0_57], %62 {strides = array<i32>} : memref<72x1024xf32, #tpu.memory_space<vmem>>, vector<8x1024xf32>,
    %c0_58 = arith.constant 0 : index
    %c97_59 = arith.constant 97 : index
    %64 = vector.load %arg13[%c0_58, %c97_59] : memref<8x1280xf32, #tpu.memory_space<vmem>>, vector<8x1024xf32>
    %65 = vector.broadcast %1 : vector<1x1024xf32> to vector<8x1024xf32>
    %66 = arith.mulf %64, %65 : vector<8x1024xf32>
    %c16_60 = arith.constant 16 : index
    %c0_61 = arith.constant 0 : index
    %67 = vector.load %arg14[%c16_60, %c0_61] : memref<72x1024xf32, #tpu.memory_space<vmem>>, vector<8x1024xf32>
    tpu.vector_store %arg14[%c16_60, %c0_61], %66 {strides = array<i32>} : memref<72x1024xf32, #tpu.memory_space<vmem>>, vector<8x1024xf32>,
    %c0_62 = arith.constant 0 : index
    %c127_63 = arith.constant 127 : index
    %68 = vector.load %arg13[%c0_62, %c127_63] : memref<8x1280xf32, #tpu.memory_space<vmem>>, vector<8x1024xf32>
    %69 = vector.broadcast %0 : vector<1x1024xf32> to vector<8x1024xf32>
    %70 = arith.mulf %68, %69 : vector<8x1024xf32>
    %c24_64 = arith.constant 24 : index
    %c0_65 = arith.constant 0 : index
    %71 = vector.load %arg14[%c24_64, %c0_65] : memref<72x1024xf32, #tpu.memory_space<vmem>>, vector<8x1024xf32>
    tpu.vector_store %arg14[%c24_64, %c0_65], %70 {strides = array<i32>} : memref<72x1024xf32, #tpu.memory_space<vmem>>, vector<8x1024xf32>,
    %c0_66 = arith.constant 0 : index
    %c128_67 = arith.constant 128 : index
    %72 = vector.load %arg13[%c0_66, %c128_67] : memref<8x1280xf32, #tpu.memory_space<vmem>>, vector<8x1024xf32>
    %c32_68 = arith.constant 32 : index
    %c0_69 = arith.constant 0 : index
    %73 = vector.load %arg14[%c32_68, %c0_69] : memref<72x1024xf32, #tpu.memory_space<vmem>>, vector<8x1024xf32>
    tpu.vector_store %arg14[%c32_68, %c0_69], %72 {strides = array<i32>} : memref<72x1024xf32, #tpu.memory_space<vmem>>, vector<8x1024xf32>,
    %c0_70 = arith.constant 0 : index
    %c129_71 = arith.constant 129 : index
    %74 = vector.load %arg13[%c0_70, %c129_71] : memref<8x1280xf32, #tpu.memory_space<vmem>>, vector<8x1024xf32>
    %75 = vector.broadcast %1 : vector<1x1024xf32> to vector<8x1024xf32>
    %76 = arith.mulf %74, %75 : vector<8x1024xf32>
    %c40 = arith.constant 40 : index
    %c0_72 = arith.constant 0 : index
    %77 = vector.load %arg14[%c40, %c0_72] : memref<72x1024xf32, #tpu.memory_space<vmem>>, vector<8x1024xf32>
    tpu.vector_store %arg14[%c40, %c0_72], %76 {strides = array<i32>} : memref<72x1024xf32, #tpu.memory_space<vmem>>, vector<8x1024xf32>,
    %c0_73 = arith.constant 0 : index
    %c159_74 = arith.constant 159 : index
    %78 = vector.load %arg13[%c0_73, %c159_74] : memref<8x1280xf32, #tpu.memory_space<vmem>>, vector<8x1024xf32>
    %79 = vector.broadcast %0 : vector<1x1024xf32> to vector<8x1024xf32>
    %80 = arith.mulf %78, %79 : vector<8x1024xf32>
    %c48 = arith.constant 48 : index
    %c0_75 = arith.constant 0 : index
    %81 = vector.load %arg14[%c48, %c0_75] : memref<72x1024xf32, #tpu.memory_space<vmem>>, vector<8x1024xf32>
    tpu.vector_store %arg14[%c48, %c0_75], %80 {strides = array<i32>} : memref<72x1024xf32, #tpu.memory_space<vmem>>, vector<8x1024xf32>,
    %c0_76 = arith.constant 0 : index
    %c160_77 = arith.constant 160 : index
    %82 = vector.load %arg13[%c0_76, %c160_77] : memref<8x1280xf32, #tpu.memory_space<vmem>>, vector<8x1024xf32>
    %c56 = arith.constant 56 : index
    %c0_78 = arith.constant 0 : index
    %83 = vector.load %arg14[%c56, %c0_78] : memref<72x1024xf32, #tpu.memory_space<vmem>>, vector<8x1024xf32>
    tpu.vector_store %arg14[%c56, %c0_78], %82 {strides = array<i32>} : memref<72x1024xf32, #tpu.memory_space<vmem>>, vector<8x1024xf32>,
    %c0_79 = arith.constant 0 : index
    %c161_80 = arith.constant 161 : index
    %84 = vector.load %arg13[%c0_79, %c161_80] : memref<8x1280xf32, #tpu.memory_space<vmem>>, vector<8x1024xf32>
    %85 = vector.broadcast %1 : vector<1x1024xf32> to vector<8x1024xf32>
    %86 = arith.mulf %84, %85 : vector<8x1024xf32>
    %c64 = arith.constant 64 : index
    %c0_81 = arith.constant 0 : index
    %87 = vector.load %arg14[%c64, %c0_81] : memref<72x1024xf32, #tpu.memory_space<vmem>>, vector<8x1024xf32>
    tpu.vector_store %arg14[%c64, %c0_81], %86 {strides = array<i32>} : memref<72x1024xf32, #tpu.memory_space<vmem>>, vector<8x1024xf32>,
    %c0_82 = arith.constant 0 : index
    %c0_83 = arith.constant 0 : index
    %88 = vector.load %arg5[%c0_82, %c0_83] : memref<8x72xf32, #tpu.memory_space<vmem>>, vector<8x72xf32>
    %c0_84 = arith.constant 0 : index
    %c0_85 = arith.constant 0 : index
    %89 = vector.load %arg14[%c0_84, %c0_85] : memref<72x1024xf32, #tpu.memory_space<vmem>>, vector<72x1024xf32>
    %cst_86 = arith.constant dense<0.000000e+00> : vector<8x1024xf32>
    %90 = tpu.matmul %88, %89, %cst_86 {dimension_numbers = #tpu.dot_dimension_numbers<[1], [0], [0], [1], [0, 0, 1, 1], [], []>} : vector<8x72xf32>, vector<72x1024xf32>, vector<8x1024xf32> -> vector<8x1024xf32>
    %c0_87 = arith.constant 0 : index
    %c0_88 = arith.constant 0 : index
    %91 = vector.load %arg6[%c0_87, %c0_88] : memref<8x1xf32, #tpu.memory_space<vmem>>, vector<8x1xf32>
    %92 = vector.broadcast %91 : vector<8x1xf32> to vector<8x1024xf32>
    %93 = arith.mulf %90, %92 : vector<8x1024xf32>
    %c0_89 = arith.constant 0 : index
    %c0_90 = arith.constant 0 : index
    %94 = vector.load %arg7[%c0_89, %c0_90] : memref<8x1xf32, #tpu.memory_space<vmem>>, vector<8x1xf32>
    %95 = vector.broadcast %94 : vector<8x1xf32> to vector<8x1024xf32>
    %96 = arith.addf %93, %95 : vector<8x1024xf32>
    %cst_91 = arith.constant 0.000000e+00 : f32
    %97 = vector.broadcast %cst_91 : f32 to vector<8x1024xf32>
    %98 = arith.cmpf ogt, %96, %97 : vector<8x1024xf32>
    %cst_92 = arith.constant 0.00999999977 : f32
    %99 = vector.broadcast %cst_92 : f32 to vector<8x1024xf32>
    %100 = arith.mulf %99, %96 : vector<8x1024xf32>
    %101 = arith.select %98, %96, %100 : vector<8x1024xi1>, vector<8x1024xf32>
    %c0_93 = arith.constant 0 : index
    %c0_94 = arith.constant 0 : index
    %c0_95 = arith.constant 0 : index
    %102 = vector.load %arg10[%c0_93, %c0_94, %c0_95] : memref<1x8x1024xf32, #tpu.memory_space<vmem>>, vector<1x8x1024xf32>
    %103 = vector.shape_cast %102 : vector<1x8x1024xf32> to vector<8x1024xf32>
    %104 = vector.shape_cast %101 : vector<8x1024xf32> to vector<1x8x1024xf32>
    tpu.vector_store %arg10[%c0_93, %c0_94, %c0_95], %104 {strides = array<i32>} : memref<1x8x1024xf32, #tpu.memory_space<vmem>>, vector<1x8x1024xf32>,
    return
  }
  func.func @transform_0(%arg0: i32) -> (i32, i32, i32) {
    %c0_i32 = arith.constant 0 : i32
    %c0_i32_0 = arith.constant 0 : i32
    %c0_i32_1 = arith.constant 0 : i32
    return %arg0, %c0_i32, %c0_i32_0 : i32, i32, i32
  }
  func.func @transform_1(%arg0: i32) -> (i32, i32) {
    %c0_i32 = arith.constant 0 : i32
    %c0_i32_0 = arith.constant 0 : i32
    %c0_i32_1 = arith.constant 0 : i32
    return %c0_i32, %c0_i32_0 : i32, i32
  }
  func.func @transform_2(%arg0: i32) -> (i32, i32) {
    %c0_i32 = arith.constant 0 : i32
    %c0_i32_0 = arith.constant 0 : i32
    %c0_i32_1 = arith.constant 0 : i32
    return %c0_i32, %c0_i32_0 : i32, i32
  }
  func.func @transform_3(%arg0: i32) -> (i32, i32) {
    %c0_i32 = arith.constant 0 : i32
    %c0_i32_0 = arith.constant 0 : i32
    %c0_i32_1 = arith.constant 0 : i32
    return %c0_i32, %c0_i32_0 : i32, i32
  }
  func.func @transform_4(%arg0: i32) -> (i32, i32) {
    %c0_i32 = arith.constant 0 : i32
    %c0_i32_0 = arith.constant 0 : i32
    %c0_i32_1 = arith.constant 0 : i32
    return %c0_i32, %c0_i32_0 : i32, i32
  }
  func.func @transform_5(%arg0: i32) -> (i32, i32) {
    %c0_i32 = arith.constant 0 : i32
    %c0_i32_0 = arith.constant 0 : i32
    %c0_i32_1 = arith.constant 0 : i32
    return %c0_i32, %c0_i32_0 : i32, i32
  }
  func.func @transform_6(%arg0: i32) -> (i32, i32) {
    %c0_i32 = arith.constant 0 : i32
    %c0_i32_0 = arith.constant 0 : i32
    %c0_i32_1 = arith.constant 0 : i32
    return %c0_i32, %c0_i32_0 : i32, i32
  }
  func.func @transform_7(%arg0: i32) -> (i32, i32) {
    %c0_i32 = arith.constant 0 : i32
    %c0_i32_0 = arith.constant 0 : i32
    %c0_i32_1 = arith.constant 0 : i32
    return %c0_i32, %c0_i32_0 : i32, i32
  }
  func.func @transform_8(%arg0: i32) -> (i32, i32) {
    %c0_i32 = arith.constant 0 : i32
    %c0_i32_0 = arith.constant 0 : i32
    %c0_i32_1 = arith.constant 0 : i32
    return %c0_i32, %c0_i32_0 : i32, i32
  }
  func.func @transform_9(%arg0: i32) -> (i32, i32, i32) {
    %c0_i32 = arith.constant 0 : i32
    %c0_i32_0 = arith.constant 0 : i32
    %c0_i32_1 = arith.constant 0 : i32
    return %arg0, %c0_i32, %c0_i32_0 : i32, i32, i32
  }
}

module attributes {stable_mosaic.version = 11 : i64} {
  func.func @kernel(%arg0: i32, %arg1: memref<1x8x256xf32, #tpu.memory_space<vmem>>, %arg2: memref<16x72xf32, #tpu.memory_space<vmem>>, %arg3: memref<16x1xf32, #tpu.memory_space<vmem>>, %arg4: memref<16x1xf32, #tpu.memory_space<vmem>>, %arg5: memref<16x144xf32, #tpu.memory_space<vmem>>, %arg6: memref<16x1xf32, #tpu.memory_space<vmem>>, %arg7: memref<16x1xf32, #tpu.memory_space<vmem>>, %arg8: memref<1x256xf32, #tpu.memory_space<vmem>>, %arg9: memref<1x256xf32, #tpu.memory_space<vmem>>, %arg10: memref<1x16x256xf32, #tpu.memory_space<vmem>>, %arg11: memref<8x512xf32, #tpu.memory_space<vmem>>, %arg12: memref<72x256xf32, #tpu.memory_space<vmem>>, %arg13: memref<16x512xf32, #tpu.memory_space<vmem>>, %arg14: memref<144x256xf32, #tpu.memory_space<vmem>>) attributes {dimension_semantics = [#tpu.dimension_semantics<parallel>], iteration_bounds = array<i64: 2>, scalar_prefetch = 0 : i64, scratch_operands = 4 : i64, tpu.core_type = #tpu.core_type<tc>, window_params = [{transform_indices = @transform_0, window_bounds = array<i64: 1, 8, 256>}, {pipeline_mode = #tpu.pipeline_mode<synchronous>, transform_indices = @transform_1, window_bounds = array<i64: 16, 72>}, {pipeline_mode = #tpu.pipeline_mode<synchronous>, transform_indices = @transform_2, window_bounds = array<i64: 16, 1>}, {pipeline_mode = #tpu.pipeline_mode<synchronous>, transform_indices = @transform_3, window_bounds = array<i64: 16, 1>}, {pipeline_mode = #tpu.pipeline_mode<synchronous>, transform_indices = @transform_4, window_bounds = array<i64: 16, 144>}, {pipeline_mode = #tpu.pipeline_mode<synchronous>, transform_indices = @transform_5, window_bounds = array<i64: 16, 1>}, {pipeline_mode = #tpu.pipeline_mode<synchronous>, transform_indices = @transform_6, window_bounds = array<i64: 16, 1>}, {pipeline_mode = #tpu.pipeline_mode<synchronous>, transform_indices = @transform_7, window_bounds = array<i64: 1, 256>}, {pipeline_mode = #tpu.pipeline_mode<synchronous>, transform_indices = @transform_8, window_bounds = array<i64: 1, 256>}, {transform_indices = @transform_9, window_bounds = array<i64: 1, 16, 256>}]} {
    %c0 = arith.constant 0 : index
    %c0_0 = arith.constant 0 : index
    %0 = vector.load %arg8[%c0, %c0_0] : memref<1x256xf32, #tpu.memory_space<vmem>>, vector<1x256xf32>
    %c0_1 = arith.constant 0 : index
    %c0_2 = arith.constant 0 : index
    %1 = vector.load %arg9[%c0_1, %c0_2] : memref<1x256xf32, #tpu.memory_space<vmem>>, vector<1x256xf32>
    %c0_3 = arith.constant 0 : index
    %c0_4 = arith.constant 0 : index
    %c0_5 = arith.constant 0 : index
    %2 = vector.load %arg1[%c0_3, %c0_4, %c0_5] : memref<1x8x256xf32, #tpu.memory_space<vmem>>, vector<1x8x256xf32>
    %3 = vector.shape_cast %2 : vector<1x8x256xf32> to vector<8x256xf32>
    %cst = arith.constant 0.000000e+00 : f32
    %4 = vector.broadcast %cst : f32 to vector<8x128xf32>
    %c0_6 = arith.constant 0 : index
    %c0_7 = arith.constant 0 : index
    %5 = vector.load %arg11[%c0_6, %c0_7] : memref<8x512xf32, #tpu.memory_space<vmem>>, vector<8x128xf32>
    tpu.vector_store %arg11[%c0_6, %c0_7], %4 {strides = array<i32>} : memref<8x512xf32, #tpu.memory_space<vmem>>, vector<8x128xf32>,
    %cst_8 = arith.constant 0.000000e+00 : f32
    %6 = vector.broadcast %cst_8 : f32 to vector<8x128xf32>
    %c0_9 = arith.constant 0 : index
    %c384 = arith.constant 384 : index
    %7 = vector.load %arg11[%c0_9, %c384] : memref<8x512xf32, #tpu.memory_space<vmem>>, vector<8x128xf32>
    tpu.vector_store %arg11[%c0_9, %c384], %6 {strides = array<i32>} : memref<8x512xf32, #tpu.memory_space<vmem>>, vector<8x128xf32>,
    %c0_10 = arith.constant 0 : index
    %c128 = arith.constant 128 : index
    %8 = vector.load %arg11[%c0_10, %c128] : memref<8x512xf32, #tpu.memory_space<vmem>>, vector<8x256xf32>
    tpu.vector_store %arg11[%c0_10, %c128], %3 {strides = array<i32>} : memref<8x512xf32, #tpu.memory_space<vmem>>, vector<8x256xf32>,
    %c0_11 = arith.constant 0 : index
    %c111 = arith.constant 111 : index
    %9 = vector.load %arg11[%c0_11, %c111] : memref<8x512xf32, #tpu.memory_space<vmem>>, vector<8x256xf32>
    %10 = vector.broadcast %0 : vector<1x256xf32> to vector<8x256xf32>
    %11 = arith.mulf %9, %10 : vector<8x256xf32>
    %c0_12 = arith.constant 0 : index
    %c0_13 = arith.constant 0 : index
    %12 = vector.load %arg12[%c0_12, %c0_13] : memref<72x256xf32, #tpu.memory_space<vmem>>, vector<8x256xf32>
    tpu.vector_store %arg12[%c0_12, %c0_13], %11 {strides = array<i32>} : memref<72x256xf32, #tpu.memory_space<vmem>>, vector<8x256xf32>,
    %c0_14 = arith.constant 0 : index
    %c112 = arith.constant 112 : index
    %13 = vector.load %arg11[%c0_14, %c112] : memref<8x512xf32, #tpu.memory_space<vmem>>, vector<8x256xf32>
    %c8 = arith.constant 8 : index
    %c0_15 = arith.constant 0 : index
    %14 = vector.load %arg12[%c8, %c0_15] : memref<72x256xf32, #tpu.memory_space<vmem>>, vector<8x256xf32>
    tpu.vector_store %arg12[%c8, %c0_15], %13 {strides = array<i32>} : memref<72x256xf32, #tpu.memory_space<vmem>>, vector<8x256xf32>,
    %c0_16 = arith.constant 0 : index
    %c113 = arith.constant 113 : index
    %15 = vector.load %arg11[%c0_16, %c113] : memref<8x512xf32, #tpu.memory_space<vmem>>, vector<8x256xf32>
    %16 = vector.broadcast %1 : vector<1x256xf32> to vector<8x256xf32>
    %17 = arith.mulf %15, %16 : vector<8x256xf32>
    %c16 = arith.constant 16 : index
    %c0_17 = arith.constant 0 : index
    %18 = vector.load %arg12[%c16, %c0_17] : memref<72x256xf32, #tpu.memory_space<vmem>>, vector<8x256xf32>
    tpu.vector_store %arg12[%c16, %c0_17], %17 {strides = array<i32>} : memref<72x256xf32, #tpu.memory_space<vmem>>, vector<8x256xf32>,
    %c0_18 = arith.constant 0 : index
    %c127 = arith.constant 127 : index
    %19 = vector.load %arg11[%c0_18, %c127] : memref<8x512xf32, #tpu.memory_space<vmem>>, vector<8x256xf32>
    %20 = vector.broadcast %0 : vector<1x256xf32> to vector<8x256xf32>
    %21 = arith.mulf %19, %20 : vector<8x256xf32>
    %c24 = arith.constant 24 : index
    %c0_19 = arith.constant 0 : index
    %22 = vector.load %arg12[%c24, %c0_19] : memref<72x256xf32, #tpu.memory_space<vmem>>, vector<8x256xf32>
    tpu.vector_store %arg12[%c24, %c0_19], %21 {strides = array<i32>} : memref<72x256xf32, #tpu.memory_space<vmem>>, vector<8x256xf32>,
    %c0_20 = arith.constant 0 : index
    %c128_21 = arith.constant 128 : index
    %23 = vector.load %arg11[%c0_20, %c128_21] : memref<8x512xf32, #tpu.memory_space<vmem>>, vector<8x256xf32>
    %c32 = arith.constant 32 : index
    %c0_22 = arith.constant 0 : index
    %24 = vector.load %arg12[%c32, %c0_22] : memref<72x256xf32, #tpu.memory_space<vmem>>, vector<8x256xf32>
    tpu.vector_store %arg12[%c32, %c0_22], %23 {strides = array<i32>} : memref<72x256xf32, #tpu.memory_space<vmem>>, vector<8x256xf32>,
    %c0_23 = arith.constant 0 : index
    %c129 = arith.constant 129 : index
    %25 = vector.load %arg11[%c0_23, %c129] : memref<8x512xf32, #tpu.memory_space<vmem>>, vector<8x256xf32>
    %26 = vector.broadcast %1 : vector<1x256xf32> to vector<8x256xf32>
    %27 = arith.mulf %25, %26 : vector<8x256xf32>
    %c40 = arith.constant 40 : index
    %c0_24 = arith.constant 0 : index
    %28 = vector.load %arg12[%c40, %c0_24] : memref<72x256xf32, #tpu.memory_space<vmem>>, vector<8x256xf32>
    tpu.vector_store %arg12[%c40, %c0_24], %27 {strides = array<i32>} : memref<72x256xf32, #tpu.memory_space<vmem>>, vector<8x256xf32>,
    %c0_25 = arith.constant 0 : index
    %c143 = arith.constant 143 : index
    %29 = vector.load %arg11[%c0_25, %c143] : memref<8x512xf32, #tpu.memory_space<vmem>>, vector<8x256xf32>
    %30 = vector.broadcast %0 : vector<1x256xf32> to vector<8x256xf32>
    %31 = arith.mulf %29, %30 : vector<8x256xf32>
    %c48 = arith.constant 48 : index
    %c0_26 = arith.constant 0 : index
    %32 = vector.load %arg12[%c48, %c0_26] : memref<72x256xf32, #tpu.memory_space<vmem>>, vector<8x256xf32>
    tpu.vector_store %arg12[%c48, %c0_26], %31 {strides = array<i32>} : memref<72x256xf32, #tpu.memory_space<vmem>>, vector<8x256xf32>,
    %c0_27 = arith.constant 0 : index
    %c144 = arith.constant 144 : index
    %33 = vector.load %arg11[%c0_27, %c144] : memref<8x512xf32, #tpu.memory_space<vmem>>, vector<8x256xf32>
    %c56 = arith.constant 56 : index
    %c0_28 = arith.constant 0 : index
    %34 = vector.load %arg12[%c56, %c0_28] : memref<72x256xf32, #tpu.memory_space<vmem>>, vector<8x256xf32>
    tpu.vector_store %arg12[%c56, %c0_28], %33 {strides = array<i32>} : memref<72x256xf32, #tpu.memory_space<vmem>>, vector<8x256xf32>,
    %c0_29 = arith.constant 0 : index
    %c145 = arith.constant 145 : index
    %35 = vector.load %arg11[%c0_29, %c145] : memref<8x512xf32, #tpu.memory_space<vmem>>, vector<8x256xf32>
    %36 = vector.broadcast %1 : vector<1x256xf32> to vector<8x256xf32>
    %37 = arith.mulf %35, %36 : vector<8x256xf32>
    %c64 = arith.constant 64 : index
    %c0_30 = arith.constant 0 : index
    %38 = vector.load %arg12[%c64, %c0_30] : memref<72x256xf32, #tpu.memory_space<vmem>>, vector<8x256xf32>
    tpu.vector_store %arg12[%c64, %c0_30], %37 {strides = array<i32>} : memref<72x256xf32, #tpu.memory_space<vmem>>, vector<8x256xf32>,
    %c0_31 = arith.constant 0 : index
    %c0_32 = arith.constant 0 : index
    %39 = vector.load %arg2[%c0_31, %c0_32] : memref<16x72xf32, #tpu.memory_space<vmem>>, vector<16x72xf32>
    %c0_33 = arith.constant 0 : index
    %c0_34 = arith.constant 0 : index
    %40 = vector.load %arg12[%c0_33, %c0_34] : memref<72x256xf32, #tpu.memory_space<vmem>>, vector<72x256xf32>
    %cst_35 = arith.constant dense<0.000000e+00> : vector<16x256xf32>
    %41 = tpu.matmul %39, %40, %cst_35 {dimension_numbers = #tpu.dot_dimension_numbers<[1], [0], [0], [1], [0, 0, 1, 1], [], []>} : vector<16x72xf32>, vector<72x256xf32>, vector<16x256xf32> -> vector<16x256xf32>
    %c0_36 = arith.constant 0 : index
    %c0_37 = arith.constant 0 : index
    %42 = vector.load %arg3[%c0_36, %c0_37] : memref<16x1xf32, #tpu.memory_space<vmem>>, vector<16x1xf32>
    %43 = vector.broadcast %42 : vector<16x1xf32> to vector<16x256xf32>
    %44 = arith.mulf %41, %43 : vector<16x256xf32>
    %c0_38 = arith.constant 0 : index
    %c0_39 = arith.constant 0 : index
    %45 = vector.load %arg4[%c0_38, %c0_39] : memref<16x1xf32, #tpu.memory_space<vmem>>, vector<16x1xf32>
    %46 = vector.broadcast %45 : vector<16x1xf32> to vector<16x256xf32>
    %47 = arith.addf %44, %46 : vector<16x256xf32>
    %cst_40 = arith.constant 0.000000e+00 : f32
    %48 = vector.broadcast %cst_40 : f32 to vector<16x256xf32>
    %49 = arith.cmpf ogt, %47, %48 : vector<16x256xf32>
    %cst_41 = arith.constant 0.00999999977 : f32
    %50 = vector.broadcast %cst_41 : f32 to vector<16x256xf32>
    %51 = arith.mulf %50, %47 : vector<16x256xf32>
    %52 = arith.select %49, %47, %51 : vector<16x256xi1>, vector<16x256xf32>
    %cst_42 = arith.constant 0.000000e+00 : f32
    %53 = vector.broadcast %cst_42 : f32 to vector<16x128xf32>
    %c0_43 = arith.constant 0 : index
    %c0_44 = arith.constant 0 : index
    %54 = vector.load %arg13[%c0_43, %c0_44] : memref<16x512xf32, #tpu.memory_space<vmem>>, vector<16x128xf32>
    tpu.vector_store %arg13[%c0_43, %c0_44], %53 {strides = array<i32>} : memref<16x512xf32, #tpu.memory_space<vmem>>, vector<16x128xf32>,
    %cst_45 = arith.constant 0.000000e+00 : f32
    %55 = vector.broadcast %cst_45 : f32 to vector<16x128xf32>
    %c0_46 = arith.constant 0 : index
    %c384_47 = arith.constant 384 : index
    %56 = vector.load %arg13[%c0_46, %c384_47] : memref<16x512xf32, #tpu.memory_space<vmem>>, vector<16x128xf32>
    tpu.vector_store %arg13[%c0_46, %c384_47], %55 {strides = array<i32>} : memref<16x512xf32, #tpu.memory_space<vmem>>, vector<16x128xf32>,
    %c0_48 = arith.constant 0 : index
    %c128_49 = arith.constant 128 : index
    %57 = vector.load %arg13[%c0_48, %c128_49] : memref<16x512xf32, #tpu.memory_space<vmem>>, vector<16x256xf32>
    tpu.vector_store %arg13[%c0_48, %c128_49], %52 {strides = array<i32>} : memref<16x512xf32, #tpu.memory_space<vmem>>, vector<16x256xf32>,
    %c0_50 = arith.constant 0 : index
    %c111_51 = arith.constant 111 : index
    %58 = vector.load %arg13[%c0_50, %c111_51] : memref<16x512xf32, #tpu.memory_space<vmem>>, vector<16x256xf32>
    %59 = vector.broadcast %0 : vector<1x256xf32> to vector<16x256xf32>
    %60 = arith.mulf %58, %59 : vector<16x256xf32>
    %c0_52 = arith.constant 0 : index
    %c0_53 = arith.constant 0 : index
    %61 = vector.load %arg14[%c0_52, %c0_53] : memref<144x256xf32, #tpu.memory_space<vmem>>, vector<16x256xf32>
    tpu.vector_store %arg14[%c0_52, %c0_53], %60 {strides = array<i32>} : memref<144x256xf32, #tpu.memory_space<vmem>>, vector<16x256xf32>,
    %c0_54 = arith.constant 0 : index
    %c112_55 = arith.constant 112 : index
    %62 = vector.load %arg13[%c0_54, %c112_55] : memref<16x512xf32, #tpu.memory_space<vmem>>, vector<16x256xf32>
    %c16_56 = arith.constant 16 : index
    %c0_57 = arith.constant 0 : index
    %63 = vector.load %arg14[%c16_56, %c0_57] : memref<144x256xf32, #tpu.memory_space<vmem>>, vector<16x256xf32>
    tpu.vector_store %arg14[%c16_56, %c0_57], %62 {strides = array<i32>} : memref<144x256xf32, #tpu.memory_space<vmem>>, vector<16x256xf32>,
    %c0_58 = arith.constant 0 : index
    %c113_59 = arith.constant 113 : index
    %64 = vector.load %arg13[%c0_58, %c113_59] : memref<16x512xf32, #tpu.memory_space<vmem>>, vector<16x256xf32>
    %65 = vector.broadcast %1 : vector<1x256xf32> to vector<16x256xf32>
    %66 = arith.mulf %64, %65 : vector<16x256xf32>
    %c32_60 = arith.constant 32 : index
    %c0_61 = arith.constant 0 : index
    %67 = vector.load %arg14[%c32_60, %c0_61] : memref<144x256xf32, #tpu.memory_space<vmem>>, vector<16x256xf32>
    tpu.vector_store %arg14[%c32_60, %c0_61], %66 {strides = array<i32>} : memref<144x256xf32, #tpu.memory_space<vmem>>, vector<16x256xf32>,
    %c0_62 = arith.constant 0 : index
    %c127_63 = arith.constant 127 : index
    %68 = vector.load %arg13[%c0_62, %c127_63] : memref<16x512xf32, #tpu.memory_space<vmem>>, vector<16x256xf32>
    %69 = vector.broadcast %0 : vector<1x256xf32> to vector<16x256xf32>
    %70 = arith.mulf %68, %69 : vector<16x256xf32>
    %c48_64 = arith.constant 48 : index
    %c0_65 = arith.constant 0 : index
    %71 = vector.load %arg14[%c48_64, %c0_65] : memref<144x256xf32, #tpu.memory_space<vmem>>, vector<16x256xf32>
    tpu.vector_store %arg14[%c48_64, %c0_65], %70 {strides = array<i32>} : memref<144x256xf32, #tpu.memory_space<vmem>>, vector<16x256xf32>,
    %c0_66 = arith.constant 0 : index
    %c128_67 = arith.constant 128 : index
    %72 = vector.load %arg13[%c0_66, %c128_67] : memref<16x512xf32, #tpu.memory_space<vmem>>, vector<16x256xf32>
    %c64_68 = arith.constant 64 : index
    %c0_69 = arith.constant 0 : index
    %73 = vector.load %arg14[%c64_68, %c0_69] : memref<144x256xf32, #tpu.memory_space<vmem>>, vector<16x256xf32>
    tpu.vector_store %arg14[%c64_68, %c0_69], %72 {strides = array<i32>} : memref<144x256xf32, #tpu.memory_space<vmem>>, vector<16x256xf32>,
    %c0_70 = arith.constant 0 : index
    %c129_71 = arith.constant 129 : index
    %74 = vector.load %arg13[%c0_70, %c129_71] : memref<16x512xf32, #tpu.memory_space<vmem>>, vector<16x256xf32>
    %75 = vector.broadcast %1 : vector<1x256xf32> to vector<16x256xf32>
    %76 = arith.mulf %74, %75 : vector<16x256xf32>
    %c80 = arith.constant 80 : index
    %c0_72 = arith.constant 0 : index
    %77 = vector.load %arg14[%c80, %c0_72] : memref<144x256xf32, #tpu.memory_space<vmem>>, vector<16x256xf32>
    tpu.vector_store %arg14[%c80, %c0_72], %76 {strides = array<i32>} : memref<144x256xf32, #tpu.memory_space<vmem>>, vector<16x256xf32>,
    %c0_73 = arith.constant 0 : index
    %c143_74 = arith.constant 143 : index
    %78 = vector.load %arg13[%c0_73, %c143_74] : memref<16x512xf32, #tpu.memory_space<vmem>>, vector<16x256xf32>
    %79 = vector.broadcast %0 : vector<1x256xf32> to vector<16x256xf32>
    %80 = arith.mulf %78, %79 : vector<16x256xf32>
    %c96 = arith.constant 96 : index
    %c0_75 = arith.constant 0 : index
    %81 = vector.load %arg14[%c96, %c0_75] : memref<144x256xf32, #tpu.memory_space<vmem>>, vector<16x256xf32>
    tpu.vector_store %arg14[%c96, %c0_75], %80 {strides = array<i32>} : memref<144x256xf32, #tpu.memory_space<vmem>>, vector<16x256xf32>,
    %c0_76 = arith.constant 0 : index
    %c144_77 = arith.constant 144 : index
    %82 = vector.load %arg13[%c0_76, %c144_77] : memref<16x512xf32, #tpu.memory_space<vmem>>, vector<16x256xf32>
    %c112_78 = arith.constant 112 : index
    %c0_79 = arith.constant 0 : index
    %83 = vector.load %arg14[%c112_78, %c0_79] : memref<144x256xf32, #tpu.memory_space<vmem>>, vector<16x256xf32>
    tpu.vector_store %arg14[%c112_78, %c0_79], %82 {strides = array<i32>} : memref<144x256xf32, #tpu.memory_space<vmem>>, vector<16x256xf32>,
    %c0_80 = arith.constant 0 : index
    %c145_81 = arith.constant 145 : index
    %84 = vector.load %arg13[%c0_80, %c145_81] : memref<16x512xf32, #tpu.memory_space<vmem>>, vector<16x256xf32>
    %85 = vector.broadcast %1 : vector<1x256xf32> to vector<16x256xf32>
    %86 = arith.mulf %84, %85 : vector<16x256xf32>
    %c128_82 = arith.constant 128 : index
    %c0_83 = arith.constant 0 : index
    %87 = vector.load %arg14[%c128_82, %c0_83] : memref<144x256xf32, #tpu.memory_space<vmem>>, vector<16x256xf32>
    tpu.vector_store %arg14[%c128_82, %c0_83], %86 {strides = array<i32>} : memref<144x256xf32, #tpu.memory_space<vmem>>, vector<16x256xf32>,
    %c0_84 = arith.constant 0 : index
    %c0_85 = arith.constant 0 : index
    %88 = vector.load %arg5[%c0_84, %c0_85] : memref<16x144xf32, #tpu.memory_space<vmem>>, vector<16x144xf32>
    %c0_86 = arith.constant 0 : index
    %c0_87 = arith.constant 0 : index
    %89 = vector.load %arg14[%c0_86, %c0_87] : memref<144x256xf32, #tpu.memory_space<vmem>>, vector<144x256xf32>
    %cst_88 = arith.constant dense<0.000000e+00> : vector<16x256xf32>
    %90 = tpu.matmul %88, %89, %cst_88 {dimension_numbers = #tpu.dot_dimension_numbers<[1], [0], [0], [1], [0, 0, 1, 1], [], []>} : vector<16x144xf32>, vector<144x256xf32>, vector<16x256xf32> -> vector<16x256xf32>
    %c0_89 = arith.constant 0 : index
    %c0_90 = arith.constant 0 : index
    %91 = vector.load %arg6[%c0_89, %c0_90] : memref<16x1xf32, #tpu.memory_space<vmem>>, vector<16x1xf32>
    %92 = vector.broadcast %91 : vector<16x1xf32> to vector<16x256xf32>
    %93 = arith.mulf %90, %92 : vector<16x256xf32>
    %c0_91 = arith.constant 0 : index
    %c0_92 = arith.constant 0 : index
    %94 = vector.load %arg7[%c0_91, %c0_92] : memref<16x1xf32, #tpu.memory_space<vmem>>, vector<16x1xf32>
    %95 = vector.broadcast %94 : vector<16x1xf32> to vector<16x256xf32>
    %96 = arith.addf %93, %95 : vector<16x256xf32>
    %cst_93 = arith.constant 0.000000e+00 : f32
    %97 = vector.broadcast %cst_93 : f32 to vector<16x256xf32>
    %98 = arith.cmpf ogt, %96, %97 : vector<16x256xf32>
    %cst_94 = arith.constant 0.00999999977 : f32
    %99 = vector.broadcast %cst_94 : f32 to vector<16x256xf32>
    %100 = arith.mulf %99, %96 : vector<16x256xf32>
    %101 = arith.select %98, %96, %100 : vector<16x256xi1>, vector<16x256xf32>
    %c0_95 = arith.constant 0 : index
    %c0_96 = arith.constant 0 : index
    %c0_97 = arith.constant 0 : index
    %102 = vector.load %arg10[%c0_95, %c0_96, %c0_97] : memref<1x16x256xf32, #tpu.memory_space<vmem>>, vector<1x16x256xf32>
    %103 = vector.shape_cast %102 : vector<1x16x256xf32> to vector<16x256xf32>
    %104 = vector.shape_cast %101 : vector<16x256xf32> to vector<1x16x256xf32>
    tpu.vector_store %arg10[%c0_95, %c0_96, %c0_97], %104 {strides = array<i32>} : memref<1x16x256xf32, #tpu.memory_space<vmem>>, vector<1x16x256xf32>,
    return
  }
  func.func @transform_0(%arg0: i32) -> (i32, i32, i32) {
    %c0_i32 = arith.constant 0 : i32
    %c0_i32_0 = arith.constant 0 : i32
    %c0_i32_1 = arith.constant 0 : i32
    return %arg0, %c0_i32, %c0_i32_0 : i32, i32, i32
  }
  func.func @transform_1(%arg0: i32) -> (i32, i32) {
    %c0_i32 = arith.constant 0 : i32
    %c0_i32_0 = arith.constant 0 : i32
    %c0_i32_1 = arith.constant 0 : i32
    return %c0_i32, %c0_i32_0 : i32, i32
  }
  func.func @transform_2(%arg0: i32) -> (i32, i32) {
    %c0_i32 = arith.constant 0 : i32
    %c0_i32_0 = arith.constant 0 : i32
    %c0_i32_1 = arith.constant 0 : i32
    return %c0_i32, %c0_i32_0 : i32, i32
  }
  func.func @transform_3(%arg0: i32) -> (i32, i32) {
    %c0_i32 = arith.constant 0 : i32
    %c0_i32_0 = arith.constant 0 : i32
    %c0_i32_1 = arith.constant 0 : i32
    return %c0_i32, %c0_i32_0 : i32, i32
  }
  func.func @transform_4(%arg0: i32) -> (i32, i32) {
    %c0_i32 = arith.constant 0 : i32
    %c0_i32_0 = arith.constant 0 : i32
    %c0_i32_1 = arith.constant 0 : i32
    return %c0_i32, %c0_i32_0 : i32, i32
  }
  func.func @transform_5(%arg0: i32) -> (i32, i32) {
    %c0_i32 = arith.constant 0 : i32
    %c0_i32_0 = arith.constant 0 : i32
    %c0_i32_1 = arith.constant 0 : i32
    return %c0_i32, %c0_i32_0 : i32, i32
  }
  func.func @transform_6(%arg0: i32) -> (i32, i32) {
    %c0_i32 = arith.constant 0 : i32
    %c0_i32_0 = arith.constant 0 : i32
    %c0_i32_1 = arith.constant 0 : i32
    return %c0_i32, %c0_i32_0 : i32, i32
  }
  func.func @transform_7(%arg0: i32) -> (i32, i32) {
    %c0_i32 = arith.constant 0 : i32
    %c0_i32_0 = arith.constant 0 : i32
    %c0_i32_1 = arith.constant 0 : i32
    return %c0_i32, %c0_i32_0 : i32, i32
  }
  func.func @transform_8(%arg0: i32) -> (i32, i32) {
    %c0_i32 = arith.constant 0 : i32
    %c0_i32_0 = arith.constant 0 : i32
    %c0_i32_1 = arith.constant 0 : i32
    return %c0_i32, %c0_i32_0 : i32, i32
  }
  func.func @transform_9(%arg0: i32) -> (i32, i32, i32) {
    %c0_i32 = arith.constant 0 : i32
    %c0_i32_0 = arith.constant 0 : i32
    %c0_i32_1 = arith.constant 0 : i32
    return %arg0, %c0_i32, %c0_i32_0 : i32, i32, i32
  }
}

module attributes {stable_mosaic.version = 11 : i64} {
  func.func @kernel(%arg0: i32, %arg1: memref<1x16x64xf32, #tpu.memory_space<vmem>>, %arg2: memref<16x144xf32, #tpu.memory_space<vmem>>, %arg3: memref<16x1xf32, #tpu.memory_space<vmem>>, %arg4: memref<16x1xf32, #tpu.memory_space<vmem>>, %arg5: memref<16x144xf32, #tpu.memory_space<vmem>>, %arg6: memref<16x1xf32, #tpu.memory_space<vmem>>, %arg7: memref<16x1xf32, #tpu.memory_space<vmem>>, %arg8: memref<1x64xf32, #tpu.memory_space<vmem>>, %arg9: memref<1x64xf32, #tpu.memory_space<vmem>>, %arg10: memref<1x16x64xf32, #tpu.memory_space<vmem>>, %arg11: memref<16x320xf32, #tpu.memory_space<vmem>>, %arg12: memref<144x64xf32, #tpu.memory_space<vmem>>, %arg13: memref<16x320xf32, #tpu.memory_space<vmem>>, %arg14: memref<144x64xf32, #tpu.memory_space<vmem>>) attributes {dimension_semantics = [#tpu.dimension_semantics<parallel>], iteration_bounds = array<i64: 2>, scalar_prefetch = 0 : i64, scratch_operands = 4 : i64, tpu.core_type = #tpu.core_type<tc>, window_params = [{transform_indices = @transform_0, window_bounds = array<i64: 1, 16, 64>}, {pipeline_mode = #tpu.pipeline_mode<synchronous>, transform_indices = @transform_1, window_bounds = array<i64: 16, 144>}, {pipeline_mode = #tpu.pipeline_mode<synchronous>, transform_indices = @transform_2, window_bounds = array<i64: 16, 1>}, {pipeline_mode = #tpu.pipeline_mode<synchronous>, transform_indices = @transform_3, window_bounds = array<i64: 16, 1>}, {pipeline_mode = #tpu.pipeline_mode<synchronous>, transform_indices = @transform_4, window_bounds = array<i64: 16, 144>}, {pipeline_mode = #tpu.pipeline_mode<synchronous>, transform_indices = @transform_5, window_bounds = array<i64: 16, 1>}, {pipeline_mode = #tpu.pipeline_mode<synchronous>, transform_indices = @transform_6, window_bounds = array<i64: 16, 1>}, {pipeline_mode = #tpu.pipeline_mode<synchronous>, transform_indices = @transform_7, window_bounds = array<i64: 1, 64>}, {pipeline_mode = #tpu.pipeline_mode<synchronous>, transform_indices = @transform_8, window_bounds = array<i64: 1, 64>}, {transform_indices = @transform_9, window_bounds = array<i64: 1, 16, 64>}]} {
    %c0 = arith.constant 0 : index
    %c0_0 = arith.constant 0 : index
    %0 = vector.load %arg8[%c0, %c0_0] : memref<1x64xf32, #tpu.memory_space<vmem>>, vector<1x64xf32>
    %c0_1 = arith.constant 0 : index
    %c0_2 = arith.constant 0 : index
    %1 = vector.load %arg9[%c0_1, %c0_2] : memref<1x64xf32, #tpu.memory_space<vmem>>, vector<1x64xf32>
    %c0_3 = arith.constant 0 : index
    %c0_4 = arith.constant 0 : index
    %c0_5 = arith.constant 0 : index
    %2 = vector.load %arg1[%c0_3, %c0_4, %c0_5] : memref<1x16x64xf32, #tpu.memory_space<vmem>>, vector<1x16x64xf32>
    %3 = vector.shape_cast %2 : vector<1x16x64xf32> to vector<16x64xf32>
    %cst = arith.constant 0.000000e+00 : f32
    %4 = vector.broadcast %cst : f32 to vector<16x128xf32>
    %c0_6 = arith.constant 0 : index
    %c0_7 = arith.constant 0 : index
    %5 = vector.load %arg11[%c0_6, %c0_7] : memref<16x320xf32, #tpu.memory_space<vmem>>, vector<16x128xf32>
    tpu.vector_store %arg11[%c0_6, %c0_7], %4 {strides = array<i32>} : memref<16x320xf32, #tpu.memory_space<vmem>>, vector<16x128xf32>,
    %cst_8 = arith.constant 0.000000e+00 : f32
    %6 = vector.broadcast %cst_8 : f32 to vector<16x128xf32>
    %c0_9 = arith.constant 0 : index
    %c192 = arith.constant 192 : index
    %7 = vector.load %arg11[%c0_9, %c192] : memref<16x320xf32, #tpu.memory_space<vmem>>, vector<16x128xf32>
    tpu.vector_store %arg11[%c0_9, %c192], %6 {strides = array<i32>} : memref<16x320xf32, #tpu.memory_space<vmem>>, vector<16x128xf32>,
    %c0_10 = arith.constant 0 : index
    %c128 = arith.constant 128 : index
    %8 = vector.load %arg11[%c0_10, %c128] : memref<16x320xf32, #tpu.memory_space<vmem>>, vector<16x64xf32>
    tpu.vector_store %arg11[%c0_10, %c128], %3 {strides = array<i32>} : memref<16x320xf32, #tpu.memory_space<vmem>>, vector<16x64xf32>,
    %c0_11 = arith.constant 0 : index
    %c119 = arith.constant 119 : index
    %9 = vector.load %arg11[%c0_11, %c119] : memref<16x320xf32, #tpu.memory_space<vmem>>, vector<16x64xf32>
    %10 = vector.broadcast %0 : vector<1x64xf32> to vector<16x64xf32>
    %11 = arith.mulf %9, %10 : vector<16x64xf32>
    %c0_12 = arith.constant 0 : index
    %c0_13 = arith.constant 0 : index
    %12 = vector.load %arg12[%c0_12, %c0_13] : memref<144x64xf32, #tpu.memory_space<vmem>>, vector<16x64xf32>
    tpu.vector_store %arg12[%c0_12, %c0_13], %11 {strides = array<i32>} : memref<144x64xf32, #tpu.memory_space<vmem>>, vector<16x64xf32>,
    %c0_14 = arith.constant 0 : index
    %c120 = arith.constant 120 : index
    %13 = vector.load %arg11[%c0_14, %c120] : memref<16x320xf32, #tpu.memory_space<vmem>>, vector<16x64xf32>
    %c16 = arith.constant 16 : index
    %c0_15 = arith.constant 0 : index
    %14 = vector.load %arg12[%c16, %c0_15] : memref<144x64xf32, #tpu.memory_space<vmem>>, vector<16x64xf32>
    tpu.vector_store %arg12[%c16, %c0_15], %13 {strides = array<i32>} : memref<144x64xf32, #tpu.memory_space<vmem>>, vector<16x64xf32>,
    %c0_16 = arith.constant 0 : index
    %c121 = arith.constant 121 : index
    %15 = vector.load %arg11[%c0_16, %c121] : memref<16x320xf32, #tpu.memory_space<vmem>>, vector<16x64xf32>
    %16 = vector.broadcast %1 : vector<1x64xf32> to vector<16x64xf32>
    %17 = arith.mulf %15, %16 : vector<16x64xf32>
    %c32 = arith.constant 32 : index
    %c0_17 = arith.constant 0 : index
    %18 = vector.load %arg12[%c32, %c0_17] : memref<144x64xf32, #tpu.memory_space<vmem>>, vector<16x64xf32>
    tpu.vector_store %arg12[%c32, %c0_17], %17 {strides = array<i32>} : memref<144x64xf32, #tpu.memory_space<vmem>>, vector<16x64xf32>,
    %c0_18 = arith.constant 0 : index
    %c127 = arith.constant 127 : index
    %19 = vector.load %arg11[%c0_18, %c127] : memref<16x320xf32, #tpu.memory_space<vmem>>, vector<16x64xf32>
    %20 = vector.broadcast %0 : vector<1x64xf32> to vector<16x64xf32>
    %21 = arith.mulf %19, %20 : vector<16x64xf32>
    %c48 = arith.constant 48 : index
    %c0_19 = arith.constant 0 : index
    %22 = vector.load %arg12[%c48, %c0_19] : memref<144x64xf32, #tpu.memory_space<vmem>>, vector<16x64xf32>
    tpu.vector_store %arg12[%c48, %c0_19], %21 {strides = array<i32>} : memref<144x64xf32, #tpu.memory_space<vmem>>, vector<16x64xf32>,
    %c0_20 = arith.constant 0 : index
    %c128_21 = arith.constant 128 : index
    %23 = vector.load %arg11[%c0_20, %c128_21] : memref<16x320xf32, #tpu.memory_space<vmem>>, vector<16x64xf32>
    %c64 = arith.constant 64 : index
    %c0_22 = arith.constant 0 : index
    %24 = vector.load %arg12[%c64, %c0_22] : memref<144x64xf32, #tpu.memory_space<vmem>>, vector<16x64xf32>
    tpu.vector_store %arg12[%c64, %c0_22], %23 {strides = array<i32>} : memref<144x64xf32, #tpu.memory_space<vmem>>, vector<16x64xf32>,
    %c0_23 = arith.constant 0 : index
    %c129 = arith.constant 129 : index
    %25 = vector.load %arg11[%c0_23, %c129] : memref<16x320xf32, #tpu.memory_space<vmem>>, vector<16x64xf32>
    %26 = vector.broadcast %1 : vector<1x64xf32> to vector<16x64xf32>
    %27 = arith.mulf %25, %26 : vector<16x64xf32>
    %c80 = arith.constant 80 : index
    %c0_24 = arith.constant 0 : index
    %28 = vector.load %arg12[%c80, %c0_24] : memref<144x64xf32, #tpu.memory_space<vmem>>, vector<16x64xf32>
    tpu.vector_store %arg12[%c80, %c0_24], %27 {strides = array<i32>} : memref<144x64xf32, #tpu.memory_space<vmem>>, vector<16x64xf32>,
    %c0_25 = arith.constant 0 : index
    %c135 = arith.constant 135 : index
    %29 = vector.load %arg11[%c0_25, %c135] : memref<16x320xf32, #tpu.memory_space<vmem>>, vector<16x64xf32>
    %30 = vector.broadcast %0 : vector<1x64xf32> to vector<16x64xf32>
    %31 = arith.mulf %29, %30 : vector<16x64xf32>
    %c96 = arith.constant 96 : index
    %c0_26 = arith.constant 0 : index
    %32 = vector.load %arg12[%c96, %c0_26] : memref<144x64xf32, #tpu.memory_space<vmem>>, vector<16x64xf32>
    tpu.vector_store %arg12[%c96, %c0_26], %31 {strides = array<i32>} : memref<144x64xf32, #tpu.memory_space<vmem>>, vector<16x64xf32>,
    %c0_27 = arith.constant 0 : index
    %c136 = arith.constant 136 : index
    %33 = vector.load %arg11[%c0_27, %c136] : memref<16x320xf32, #tpu.memory_space<vmem>>, vector<16x64xf32>
    %c112 = arith.constant 112 : index
    %c0_28 = arith.constant 0 : index
    %34 = vector.load %arg12[%c112, %c0_28] : memref<144x64xf32, #tpu.memory_space<vmem>>, vector<16x64xf32>
    tpu.vector_store %arg12[%c112, %c0_28], %33 {strides = array<i32>} : memref<144x64xf32, #tpu.memory_space<vmem>>, vector<16x64xf32>,
    %c0_29 = arith.constant 0 : index
    %c137 = arith.constant 137 : index
    %35 = vector.load %arg11[%c0_29, %c137] : memref<16x320xf32, #tpu.memory_space<vmem>>, vector<16x64xf32>
    %36 = vector.broadcast %1 : vector<1x64xf32> to vector<16x64xf32>
    %37 = arith.mulf %35, %36 : vector<16x64xf32>
    %c128_30 = arith.constant 128 : index
    %c0_31 = arith.constant 0 : index
    %38 = vector.load %arg12[%c128_30, %c0_31] : memref<144x64xf32, #tpu.memory_space<vmem>>, vector<16x64xf32>
    tpu.vector_store %arg12[%c128_30, %c0_31], %37 {strides = array<i32>} : memref<144x64xf32, #tpu.memory_space<vmem>>, vector<16x64xf32>,
    %c0_32 = arith.constant 0 : index
    %c0_33 = arith.constant 0 : index
    %39 = vector.load %arg2[%c0_32, %c0_33] : memref<16x144xf32, #tpu.memory_space<vmem>>, vector<16x144xf32>
    %c0_34 = arith.constant 0 : index
    %c0_35 = arith.constant 0 : index
    %40 = vector.load %arg12[%c0_34, %c0_35] : memref<144x64xf32, #tpu.memory_space<vmem>>, vector<144x64xf32>
    %cst_36 = arith.constant dense<0.000000e+00> : vector<16x64xf32>
    %41 = tpu.matmul %39, %40, %cst_36 {dimension_numbers = #tpu.dot_dimension_numbers<[1], [0], [0], [1], [0, 0, 1, 1], [], []>} : vector<16x144xf32>, vector<144x64xf32>, vector<16x64xf32> -> vector<16x64xf32>
    %c0_37 = arith.constant 0 : index
    %c0_38 = arith.constant 0 : index
    %42 = vector.load %arg3[%c0_37, %c0_38] : memref<16x1xf32, #tpu.memory_space<vmem>>, vector<16x1xf32>
    %43 = vector.broadcast %42 : vector<16x1xf32> to vector<16x64xf32>
    %44 = arith.mulf %41, %43 : vector<16x64xf32>
    %c0_39 = arith.constant 0 : index
    %c0_40 = arith.constant 0 : index
    %45 = vector.load %arg4[%c0_39, %c0_40] : memref<16x1xf32, #tpu.memory_space<vmem>>, vector<16x1xf32>
    %46 = vector.broadcast %45 : vector<16x1xf32> to vector<16x64xf32>
    %47 = arith.addf %44, %46 : vector<16x64xf32>
    %cst_41 = arith.constant 0.000000e+00 : f32
    %48 = vector.broadcast %cst_41 : f32 to vector<16x64xf32>
    %49 = arith.cmpf ogt, %47, %48 : vector<16x64xf32>
    %cst_42 = arith.constant 0.00999999977 : f32
    %50 = vector.broadcast %cst_42 : f32 to vector<16x64xf32>
    %51 = arith.mulf %50, %47 : vector<16x64xf32>
    %52 = arith.select %49, %47, %51 : vector<16x64xi1>, vector<16x64xf32>
    %cst_43 = arith.constant 0.000000e+00 : f32
    %53 = vector.broadcast %cst_43 : f32 to vector<16x128xf32>
    %c0_44 = arith.constant 0 : index
    %c0_45 = arith.constant 0 : index
    %54 = vector.load %arg13[%c0_44, %c0_45] : memref<16x320xf32, #tpu.memory_space<vmem>>, vector<16x128xf32>
    tpu.vector_store %arg13[%c0_44, %c0_45], %53 {strides = array<i32>} : memref<16x320xf32, #tpu.memory_space<vmem>>, vector<16x128xf32>,
    %cst_46 = arith.constant 0.000000e+00 : f32
    %55 = vector.broadcast %cst_46 : f32 to vector<16x128xf32>
    %c0_47 = arith.constant 0 : index
    %c192_48 = arith.constant 192 : index
    %56 = vector.load %arg13[%c0_47, %c192_48] : memref<16x320xf32, #tpu.memory_space<vmem>>, vector<16x128xf32>
    tpu.vector_store %arg13[%c0_47, %c192_48], %55 {strides = array<i32>} : memref<16x320xf32, #tpu.memory_space<vmem>>, vector<16x128xf32>,
    %c0_49 = arith.constant 0 : index
    %c128_50 = arith.constant 128 : index
    %57 = vector.load %arg13[%c0_49, %c128_50] : memref<16x320xf32, #tpu.memory_space<vmem>>, vector<16x64xf32>
    tpu.vector_store %arg13[%c0_49, %c128_50], %52 {strides = array<i32>} : memref<16x320xf32, #tpu.memory_space<vmem>>, vector<16x64xf32>,
    %c0_51 = arith.constant 0 : index
    %c119_52 = arith.constant 119 : index
    %58 = vector.load %arg13[%c0_51, %c119_52] : memref<16x320xf32, #tpu.memory_space<vmem>>, vector<16x64xf32>
    %59 = vector.broadcast %0 : vector<1x64xf32> to vector<16x64xf32>
    %60 = arith.mulf %58, %59 : vector<16x64xf32>
    %c0_53 = arith.constant 0 : index
    %c0_54 = arith.constant 0 : index
    %61 = vector.load %arg14[%c0_53, %c0_54] : memref<144x64xf32, #tpu.memory_space<vmem>>, vector<16x64xf32>
    tpu.vector_store %arg14[%c0_53, %c0_54], %60 {strides = array<i32>} : memref<144x64xf32, #tpu.memory_space<vmem>>, vector<16x64xf32>,
    %c0_55 = arith.constant 0 : index
    %c120_56 = arith.constant 120 : index
    %62 = vector.load %arg13[%c0_55, %c120_56] : memref<16x320xf32, #tpu.memory_space<vmem>>, vector<16x64xf32>
    %c16_57 = arith.constant 16 : index
    %c0_58 = arith.constant 0 : index
    %63 = vector.load %arg14[%c16_57, %c0_58] : memref<144x64xf32, #tpu.memory_space<vmem>>, vector<16x64xf32>
    tpu.vector_store %arg14[%c16_57, %c0_58], %62 {strides = array<i32>} : memref<144x64xf32, #tpu.memory_space<vmem>>, vector<16x64xf32>,
    %c0_59 = arith.constant 0 : index
    %c121_60 = arith.constant 121 : index
    %64 = vector.load %arg13[%c0_59, %c121_60] : memref<16x320xf32, #tpu.memory_space<vmem>>, vector<16x64xf32>
    %65 = vector.broadcast %1 : vector<1x64xf32> to vector<16x64xf32>
    %66 = arith.mulf %64, %65 : vector<16x64xf32>
    %c32_61 = arith.constant 32 : index
    %c0_62 = arith.constant 0 : index
    %67 = vector.load %arg14[%c32_61, %c0_62] : memref<144x64xf32, #tpu.memory_space<vmem>>, vector<16x64xf32>
    tpu.vector_store %arg14[%c32_61, %c0_62], %66 {strides = array<i32>} : memref<144x64xf32, #tpu.memory_space<vmem>>, vector<16x64xf32>,
    %c0_63 = arith.constant 0 : index
    %c127_64 = arith.constant 127 : index
    %68 = vector.load %arg13[%c0_63, %c127_64] : memref<16x320xf32, #tpu.memory_space<vmem>>, vector<16x64xf32>
    %69 = vector.broadcast %0 : vector<1x64xf32> to vector<16x64xf32>
    %70 = arith.mulf %68, %69 : vector<16x64xf32>
    %c48_65 = arith.constant 48 : index
    %c0_66 = arith.constant 0 : index
    %71 = vector.load %arg14[%c48_65, %c0_66] : memref<144x64xf32, #tpu.memory_space<vmem>>, vector<16x64xf32>
    tpu.vector_store %arg14[%c48_65, %c0_66], %70 {strides = array<i32>} : memref<144x64xf32, #tpu.memory_space<vmem>>, vector<16x64xf32>,
    %c0_67 = arith.constant 0 : index
    %c128_68 = arith.constant 128 : index
    %72 = vector.load %arg13[%c0_67, %c128_68] : memref<16x320xf32, #tpu.memory_space<vmem>>, vector<16x64xf32>
    %c64_69 = arith.constant 64 : index
    %c0_70 = arith.constant 0 : index
    %73 = vector.load %arg14[%c64_69, %c0_70] : memref<144x64xf32, #tpu.memory_space<vmem>>, vector<16x64xf32>
    tpu.vector_store %arg14[%c64_69, %c0_70], %72 {strides = array<i32>} : memref<144x64xf32, #tpu.memory_space<vmem>>, vector<16x64xf32>,
    %c0_71 = arith.constant 0 : index
    %c129_72 = arith.constant 129 : index
    %74 = vector.load %arg13[%c0_71, %c129_72] : memref<16x320xf32, #tpu.memory_space<vmem>>, vector<16x64xf32>
    %75 = vector.broadcast %1 : vector<1x64xf32> to vector<16x64xf32>
    %76 = arith.mulf %74, %75 : vector<16x64xf32>
    %c80_73 = arith.constant 80 : index
    %c0_74 = arith.constant 0 : index
    %77 = vector.load %arg14[%c80_73, %c0_74] : memref<144x64xf32, #tpu.memory_space<vmem>>, vector<16x64xf32>
    tpu.vector_store %arg14[%c80_73, %c0_74], %76 {strides = array<i32>} : memref<144x64xf32, #tpu.memory_space<vmem>>, vector<16x64xf32>,
    %c0_75 = arith.constant 0 : index
    %c135_76 = arith.constant 135 : index
    %78 = vector.load %arg13[%c0_75, %c135_76] : memref<16x320xf32, #tpu.memory_space<vmem>>, vector<16x64xf32>
    %79 = vector.broadcast %0 : vector<1x64xf32> to vector<16x64xf32>
    %80 = arith.mulf %78, %79 : vector<16x64xf32>
    %c96_77 = arith.constant 96 : index
    %c0_78 = arith.constant 0 : index
    %81 = vector.load %arg14[%c96_77, %c0_78] : memref<144x64xf32, #tpu.memory_space<vmem>>, vector<16x64xf32>
    tpu.vector_store %arg14[%c96_77, %c0_78], %80 {strides = array<i32>} : memref<144x64xf32, #tpu.memory_space<vmem>>, vector<16x64xf32>,
    %c0_79 = arith.constant 0 : index
    %c136_80 = arith.constant 136 : index
    %82 = vector.load %arg13[%c0_79, %c136_80] : memref<16x320xf32, #tpu.memory_space<vmem>>, vector<16x64xf32>
    %c112_81 = arith.constant 112 : index
    %c0_82 = arith.constant 0 : index
    %83 = vector.load %arg14[%c112_81, %c0_82] : memref<144x64xf32, #tpu.memory_space<vmem>>, vector<16x64xf32>
    tpu.vector_store %arg14[%c112_81, %c0_82], %82 {strides = array<i32>} : memref<144x64xf32, #tpu.memory_space<vmem>>, vector<16x64xf32>,
    %c0_83 = arith.constant 0 : index
    %c137_84 = arith.constant 137 : index
    %84 = vector.load %arg13[%c0_83, %c137_84] : memref<16x320xf32, #tpu.memory_space<vmem>>, vector<16x64xf32>
    %85 = vector.broadcast %1 : vector<1x64xf32> to vector<16x64xf32>
    %86 = arith.mulf %84, %85 : vector<16x64xf32>
    %c128_85 = arith.constant 128 : index
    %c0_86 = arith.constant 0 : index
    %87 = vector.load %arg14[%c128_85, %c0_86] : memref<144x64xf32, #tpu.memory_space<vmem>>, vector<16x64xf32>
    tpu.vector_store %arg14[%c128_85, %c0_86], %86 {strides = array<i32>} : memref<144x64xf32, #tpu.memory_space<vmem>>, vector<16x64xf32>,
    %c0_87 = arith.constant 0 : index
    %c0_88 = arith.constant 0 : index
    %88 = vector.load %arg5[%c0_87, %c0_88] : memref<16x144xf32, #tpu.memory_space<vmem>>, vector<16x144xf32>
    %c0_89 = arith.constant 0 : index
    %c0_90 = arith.constant 0 : index
    %89 = vector.load %arg14[%c0_89, %c0_90] : memref<144x64xf32, #tpu.memory_space<vmem>>, vector<144x64xf32>
    %cst_91 = arith.constant dense<0.000000e+00> : vector<16x64xf32>
    %90 = tpu.matmul %88, %89, %cst_91 {dimension_numbers = #tpu.dot_dimension_numbers<[1], [0], [0], [1], [0, 0, 1, 1], [], []>} : vector<16x144xf32>, vector<144x64xf32>, vector<16x64xf32> -> vector<16x64xf32>
    %c0_92 = arith.constant 0 : index
    %c0_93 = arith.constant 0 : index
    %91 = vector.load %arg6[%c0_92, %c0_93] : memref<16x1xf32, #tpu.memory_space<vmem>>, vector<16x1xf32>
    %92 = vector.broadcast %91 : vector<16x1xf32> to vector<16x64xf32>
    %93 = arith.mulf %90, %92 : vector<16x64xf32>
    %c0_94 = arith.constant 0 : index
    %c0_95 = arith.constant 0 : index
    %94 = vector.load %arg7[%c0_94, %c0_95] : memref<16x1xf32, #tpu.memory_space<vmem>>, vector<16x1xf32>
    %95 = vector.broadcast %94 : vector<16x1xf32> to vector<16x64xf32>
    %96 = arith.addf %93, %95 : vector<16x64xf32>
    %cst_96 = arith.constant 0.000000e+00 : f32
    %97 = vector.broadcast %cst_96 : f32 to vector<16x64xf32>
    %98 = arith.cmpf ogt, %96, %97 : vector<16x64xf32>
    %cst_97 = arith.constant 0.00999999977 : f32
    %99 = vector.broadcast %cst_97 : f32 to vector<16x64xf32>
    %100 = arith.mulf %99, %96 : vector<16x64xf32>
    %101 = arith.select %98, %96, %100 : vector<16x64xi1>, vector<16x64xf32>
    %c0_98 = arith.constant 0 : index
    %c0_99 = arith.constant 0 : index
    %c0_100 = arith.constant 0 : index
    %102 = vector.load %arg10[%c0_98, %c0_99, %c0_100] : memref<1x16x64xf32, #tpu.memory_space<vmem>>, vector<1x16x64xf32>
    %103 = vector.shape_cast %102 : vector<1x16x64xf32> to vector<16x64xf32>
    %104 = vector.shape_cast %101 : vector<16x64xf32> to vector<1x16x64xf32>
    tpu.vector_store %arg10[%c0_98, %c0_99, %c0_100], %104 {strides = array<i32>} : memref<1x16x64xf32, #tpu.memory_space<vmem>>, vector<1x16x64xf32>,
    return
  }
  func.func @transform_0(%arg0: i32) -> (i32, i32, i32) {
    %c0_i32 = arith.constant 0 : i32
    %c0_i32_0 = arith.constant 0 : i32
    %c0_i32_1 = arith.constant 0 : i32
    return %arg0, %c0_i32, %c0_i32_0 : i32, i32, i32
  }
  func.func @transform_1(%arg0: i32) -> (i32, i32) {
    %c0_i32 = arith.constant 0 : i32
    %c0_i32_0 = arith.constant 0 : i32
    %c0_i32_1 = arith.constant 0 : i32
    return %c0_i32, %c0_i32_0 : i32, i32
  }
  func.func @transform_2(%arg0: i32) -> (i32, i32) {
    %c0_i32 = arith.constant 0 : i32
    %c0_i32_0 = arith.constant 0 : i32
    %c0_i32_1 = arith.constant 0 : i32
    return %c0_i32, %c0_i32_0 : i32, i32
  }
  func.func @transform_3(%arg0: i32) -> (i32, i32) {
    %c0_i32 = arith.constant 0 : i32
    %c0_i32_0 = arith.constant 0 : i32
    %c0_i32_1 = arith.constant 0 : i32
    return %c0_i32, %c0_i32_0 : i32, i32
  }
  func.func @transform_4(%arg0: i32) -> (i32, i32) {
    %c0_i32 = arith.constant 0 : i32
    %c0_i32_0 = arith.constant 0 : i32
    %c0_i32_1 = arith.constant 0 : i32
    return %c0_i32, %c0_i32_0 : i32, i32
  }
  func.func @transform_5(%arg0: i32) -> (i32, i32) {
    %c0_i32 = arith.constant 0 : i32
    %c0_i32_0 = arith.constant 0 : i32
    %c0_i32_1 = arith.constant 0 : i32
    return %c0_i32, %c0_i32_0 : i32, i32
  }
  func.func @transform_6(%arg0: i32) -> (i32, i32) {
    %c0_i32 = arith.constant 0 : i32
    %c0_i32_0 = arith.constant 0 : i32
    %c0_i32_1 = arith.constant 0 : i32
    return %c0_i32, %c0_i32_0 : i32, i32
  }
  func.func @transform_7(%arg0: i32) -> (i32, i32) {
    %c0_i32 = arith.constant 0 : i32
    %c0_i32_0 = arith.constant 0 : i32
    %c0_i32_1 = arith.constant 0 : i32
    return %c0_i32, %c0_i32_0 : i32, i32
  }
  func.func @transform_8(%arg0: i32) -> (i32, i32) {
    %c0_i32 = arith.constant 0 : i32
    %c0_i32_0 = arith.constant 0 : i32
    %c0_i32_1 = arith.constant 0 : i32
    return %c0_i32, %c0_i32_0 : i32, i32
  }
  func.func @transform_9(%arg0: i32) -> (i32, i32, i32) {
    %c0_i32 = arith.constant 0 : i32
    %c0_i32_0 = arith.constant 0 : i32
    %c0_i32_1 = arith.constant 0 : i32
    return %arg0, %c0_i32, %c0_i32_0 : i32, i32, i32
  }
}

module attributes {stable_mosaic.version = 11 : i64} {
  func.func @kernel(%arg0: i32, %arg1: memref<1x16x16xf32, #tpu.memory_space<vmem>>, %arg2: memref<32x144xf32, #tpu.memory_space<vmem>>, %arg3: memref<32x1xf32, #tpu.memory_space<vmem>>, %arg4: memref<32x1xf32, #tpu.memory_space<vmem>>, %arg5: memref<32x288xf32, #tpu.memory_space<vmem>>, %arg6: memref<32x1xf32, #tpu.memory_space<vmem>>, %arg7: memref<32x1xf32, #tpu.memory_space<vmem>>, %arg8: memref<1x16xf32, #tpu.memory_space<vmem>>, %arg9: memref<1x16xf32, #tpu.memory_space<vmem>>, %arg10: memref<1x4x1xf32, #tpu.memory_space<vmem>>, %arg11: memref<32x4xf32, #tpu.memory_space<vmem>>, %arg12: memref<32x32xf32, #tpu.memory_space<vmem>>, %arg13: memref<2x32xf32, #tpu.memory_space<vmem>>, %arg14: memref<2x32xf32, #tpu.memory_space<vmem>>, %arg15: memref<32x2xf32, #tpu.memory_space<vmem>>, %arg16: memref<1x32x16xf32, #tpu.memory_space<vmem>>, %arg17: memref<1x32x1xf32, #tpu.memory_space<vmem>>, %arg18: memref<16x272xf32, #tpu.memory_space<vmem>>, %arg19: memref<144x16xf32, #tpu.memory_space<vmem>>, %arg20: memref<32x272xf32, #tpu.memory_space<vmem>>, %arg21: memref<288x16xf32, #tpu.memory_space<vmem>>) attributes {dimension_semantics = [#tpu.dimension_semantics<parallel>], iteration_bounds = array<i64: 2>, scalar_prefetch = 0 : i64, scratch_operands = 4 : i64, tpu.core_type = #tpu.core_type<tc>, window_params = [{transform_indices = @transform_0, window_bounds = array<i64: 1, 16, 16>}, {pipeline_mode = #tpu.pipeline_mode<synchronous>, transform_indices = @transform_1, window_bounds = array<i64: 32, 144>}, {pipeline_mode = #tpu.pipeline_mode<synchronous>, transform_indices = @transform_2, window_bounds = array<i64: 32, 1>}, {pipeline_mode = #tpu.pipeline_mode<synchronous>, transform_indices = @transform_3, window_bounds = array<i64: 32, 1>}, {pipeline_mode = #tpu.pipeline_mode<synchronous>, transform_indices = @transform_4, window_bounds = array<i64: 32, 288>}, {pipeline_mode = #tpu.pipeline_mode<synchronous>, transform_indices = @transform_5, window_bounds = array<i64: 32, 1>}, {pipeline_mode = #tpu.pipeline_mode<synchronous>, transform_indices = @transform_6, window_bounds = array<i64: 32, 1>}, {pipeline_mode = #tpu.pipeline_mode<synchronous>, transform_indices = @transform_7, window_bounds = array<i64: 1, 16>}, {pipeline_mode = #tpu.pipeline_mode<synchronous>, transform_indices = @transform_8, window_bounds = array<i64: 1, 16>}, {transform_indices = @transform_9, window_bounds = array<i64: 1, 4, 1>}, {pipeline_mode = #tpu.pipeline_mode<synchronous>, transform_indices = @transform_10, window_bounds = array<i64: 32, 4>}, {pipeline_mode = #tpu.pipeline_mode<synchronous>, transform_indices = @transform_11, window_bounds = array<i64: 32, 32>}, {pipeline_mode = #tpu.pipeline_mode<synchronous>, transform_indices = @transform_12, window_bounds = array<i64: 2, 32>}, {pipeline_mode = #tpu.pipeline_mode<synchronous>, transform_indices = @transform_13, window_bounds = array<i64: 2, 32>}, {pipeline_mode = #tpu.pipeline_mode<synchronous>, transform_indices = @transform_14, window_bounds = array<i64: 32, 2>}, {transform_indices = @transform_15, window_bounds = array<i64: 1, 32, 16>}, {transform_indices = @transform_16, window_bounds = array<i64: 1, 32, 1>}]} {
    %c0 = arith.constant 0 : index
    %c0_0 = arith.constant 0 : index
    %0 = vector.load %arg8[%c0, %c0_0] : memref<1x16xf32, #tpu.memory_space<vmem>>, vector<1x16xf32>
    %c0_1 = arith.constant 0 : index
    %c0_2 = arith.constant 0 : index
    %1 = vector.load %arg9[%c0_1, %c0_2] : memref<1x16xf32, #tpu.memory_space<vmem>>, vector<1x16xf32>
    %c0_3 = arith.constant 0 : index
    %c0_4 = arith.constant 0 : index
    %c0_5 = arith.constant 0 : index
    %2 = vector.load %arg1[%c0_3, %c0_4, %c0_5] : memref<1x16x16xf32, #tpu.memory_space<vmem>>, vector<1x16x16xf32>
    %3 = vector.shape_cast %2 : vector<1x16x16xf32> to vector<16x16xf32>
    %cst = arith.constant 0.000000e+00 : f32
    %4 = vector.broadcast %cst : f32 to vector<16x128xf32>
    %c0_6 = arith.constant 0 : index
    %c0_7 = arith.constant 0 : index
    %5 = vector.load %arg18[%c0_6, %c0_7] : memref<16x272xf32, #tpu.memory_space<vmem>>, vector<16x128xf32>
    tpu.vector_store %arg18[%c0_6, %c0_7], %4 {strides = array<i32>} : memref<16x272xf32, #tpu.memory_space<vmem>>, vector<16x128xf32>,
    %cst_8 = arith.constant 0.000000e+00 : f32
    %6 = vector.broadcast %cst_8 : f32 to vector<16x128xf32>
    %c0_9 = arith.constant 0 : index
    %c144 = arith.constant 144 : index
    %7 = vector.load %arg18[%c0_9, %c144] : memref<16x272xf32, #tpu.memory_space<vmem>>, vector<16x128xf32>
    tpu.vector_store %arg18[%c0_9, %c144], %6 {strides = array<i32>} : memref<16x272xf32, #tpu.memory_space<vmem>>, vector<16x128xf32>,
    %c0_10 = arith.constant 0 : index
    %c128 = arith.constant 128 : index
    %8 = vector.load %arg18[%c0_10, %c128] : memref<16x272xf32, #tpu.memory_space<vmem>>, vector<16x16xf32>
    tpu.vector_store %arg18[%c0_10, %c128], %3 {strides = array<i32>} : memref<16x272xf32, #tpu.memory_space<vmem>>, vector<16x16xf32>,
    %c0_11 = arith.constant 0 : index
    %c123 = arith.constant 123 : index
    %9 = vector.load %arg18[%c0_11, %c123] : memref<16x272xf32, #tpu.memory_space<vmem>>, vector<16x16xf32>
    %10 = vector.broadcast %0 : vector<1x16xf32> to vector<16x16xf32>
    %11 = arith.mulf %9, %10 : vector<16x16xf32>
    %c0_12 = arith.constant 0 : index
    %c0_13 = arith.constant 0 : index
    %12 = vector.load %arg19[%c0_12, %c0_13] : memref<144x16xf32, #tpu.memory_space<vmem>>, vector<16x16xf32>
    tpu.vector_store %arg19[%c0_12, %c0_13], %11 {strides = array<i32>} : memref<144x16xf32, #tpu.memory_space<vmem>>, vector<16x16xf32>,
    %c0_14 = arith.constant 0 : index
    %c124 = arith.constant 124 : index
    %13 = vector.load %arg18[%c0_14, %c124] : memref<16x272xf32, #tpu.memory_space<vmem>>, vector<16x16xf32>
    %c16 = arith.constant 16 : index
    %c0_15 = arith.constant 0 : index
    %14 = vector.load %arg19[%c16, %c0_15] : memref<144x16xf32, #tpu.memory_space<vmem>>, vector<16x16xf32>
    tpu.vector_store %arg19[%c16, %c0_15], %13 {strides = array<i32>} : memref<144x16xf32, #tpu.memory_space<vmem>>, vector<16x16xf32>,
    %c0_16 = arith.constant 0 : index
    %c125 = arith.constant 125 : index
    %15 = vector.load %arg18[%c0_16, %c125] : memref<16x272xf32, #tpu.memory_space<vmem>>, vector<16x16xf32>
    %16 = vector.broadcast %1 : vector<1x16xf32> to vector<16x16xf32>
    %17 = arith.mulf %15, %16 : vector<16x16xf32>
    %c32 = arith.constant 32 : index
    %c0_17 = arith.constant 0 : index
    %18 = vector.load %arg19[%c32, %c0_17] : memref<144x16xf32, #tpu.memory_space<vmem>>, vector<16x16xf32>
    tpu.vector_store %arg19[%c32, %c0_17], %17 {strides = array<i32>} : memref<144x16xf32, #tpu.memory_space<vmem>>, vector<16x16xf32>,
    %c0_18 = arith.constant 0 : index
    %c127 = arith.constant 127 : index
    %19 = vector.load %arg18[%c0_18, %c127] : memref<16x272xf32, #tpu.memory_space<vmem>>, vector<16x16xf32>
    %20 = vector.broadcast %0 : vector<1x16xf32> to vector<16x16xf32>
    %21 = arith.mulf %19, %20 : vector<16x16xf32>
    %c48 = arith.constant 48 : index
    %c0_19 = arith.constant 0 : index
    %22 = vector.load %arg19[%c48, %c0_19] : memref<144x16xf32, #tpu.memory_space<vmem>>, vector<16x16xf32>
    tpu.vector_store %arg19[%c48, %c0_19], %21 {strides = array<i32>} : memref<144x16xf32, #tpu.memory_space<vmem>>, vector<16x16xf32>,
    %c0_20 = arith.constant 0 : index
    %c128_21 = arith.constant 128 : index
    %23 = vector.load %arg18[%c0_20, %c128_21] : memref<16x272xf32, #tpu.memory_space<vmem>>, vector<16x16xf32>
    %c64 = arith.constant 64 : index
    %c0_22 = arith.constant 0 : index
    %24 = vector.load %arg19[%c64, %c0_22] : memref<144x16xf32, #tpu.memory_space<vmem>>, vector<16x16xf32>
    tpu.vector_store %arg19[%c64, %c0_22], %23 {strides = array<i32>} : memref<144x16xf32, #tpu.memory_space<vmem>>, vector<16x16xf32>,
    %c0_23 = arith.constant 0 : index
    %c129 = arith.constant 129 : index
    %25 = vector.load %arg18[%c0_23, %c129] : memref<16x272xf32, #tpu.memory_space<vmem>>, vector<16x16xf32>
    %26 = vector.broadcast %1 : vector<1x16xf32> to vector<16x16xf32>
    %27 = arith.mulf %25, %26 : vector<16x16xf32>
    %c80 = arith.constant 80 : index
    %c0_24 = arith.constant 0 : index
    %28 = vector.load %arg19[%c80, %c0_24] : memref<144x16xf32, #tpu.memory_space<vmem>>, vector<16x16xf32>
    tpu.vector_store %arg19[%c80, %c0_24], %27 {strides = array<i32>} : memref<144x16xf32, #tpu.memory_space<vmem>>, vector<16x16xf32>,
    %c0_25 = arith.constant 0 : index
    %c131 = arith.constant 131 : index
    %29 = vector.load %arg18[%c0_25, %c131] : memref<16x272xf32, #tpu.memory_space<vmem>>, vector<16x16xf32>
    %30 = vector.broadcast %0 : vector<1x16xf32> to vector<16x16xf32>
    %31 = arith.mulf %29, %30 : vector<16x16xf32>
    %c96 = arith.constant 96 : index
    %c0_26 = arith.constant 0 : index
    %32 = vector.load %arg19[%c96, %c0_26] : memref<144x16xf32, #tpu.memory_space<vmem>>, vector<16x16xf32>
    tpu.vector_store %arg19[%c96, %c0_26], %31 {strides = array<i32>} : memref<144x16xf32, #tpu.memory_space<vmem>>, vector<16x16xf32>,
    %c0_27 = arith.constant 0 : index
    %c132 = arith.constant 132 : index
    %33 = vector.load %arg18[%c0_27, %c132] : memref<16x272xf32, #tpu.memory_space<vmem>>, vector<16x16xf32>
    %c112 = arith.constant 112 : index
    %c0_28 = arith.constant 0 : index
    %34 = vector.load %arg19[%c112, %c0_28] : memref<144x16xf32, #tpu.memory_space<vmem>>, vector<16x16xf32>
    tpu.vector_store %arg19[%c112, %c0_28], %33 {strides = array<i32>} : memref<144x16xf32, #tpu.memory_space<vmem>>, vector<16x16xf32>,
    %c0_29 = arith.constant 0 : index
    %c133 = arith.constant 133 : index
    %35 = vector.load %arg18[%c0_29, %c133] : memref<16x272xf32, #tpu.memory_space<vmem>>, vector<16x16xf32>
    %36 = vector.broadcast %1 : vector<1x16xf32> to vector<16x16xf32>
    %37 = arith.mulf %35, %36 : vector<16x16xf32>
    %c128_30 = arith.constant 128 : index
    %c0_31 = arith.constant 0 : index
    %38 = vector.load %arg19[%c128_30, %c0_31] : memref<144x16xf32, #tpu.memory_space<vmem>>, vector<16x16xf32>
    tpu.vector_store %arg19[%c128_30, %c0_31], %37 {strides = array<i32>} : memref<144x16xf32, #tpu.memory_space<vmem>>, vector<16x16xf32>,
    %c0_32 = arith.constant 0 : index
    %c0_33 = arith.constant 0 : index
    %39 = vector.load %arg2[%c0_32, %c0_33] : memref<32x144xf32, #tpu.memory_space<vmem>>, vector<32x144xf32>
    %c0_34 = arith.constant 0 : index
    %c0_35 = arith.constant 0 : index
    %40 = vector.load %arg19[%c0_34, %c0_35] : memref<144x16xf32, #tpu.memory_space<vmem>>, vector<144x16xf32>
    %cst_36 = arith.constant dense<0.000000e+00> : vector<32x16xf32>
    %41 = tpu.matmul %39, %40, %cst_36 {dimension_numbers = #tpu.dot_dimension_numbers<[1], [0], [0], [1], [0, 0, 1, 1], [], []>} : vector<32x144xf32>, vector<144x16xf32>, vector<32x16xf32> -> vector<32x16xf32>
    %c0_37 = arith.constant 0 : index
    %c0_38 = arith.constant 0 : index
    %42 = vector.load %arg3[%c0_37, %c0_38] : memref<32x1xf32, #tpu.memory_space<vmem>>, vector<32x1xf32>
    %43 = vector.broadcast %42 : vector<32x1xf32> to vector<32x16xf32>
    %44 = arith.mulf %41, %43 : vector<32x16xf32>
    %c0_39 = arith.constant 0 : index
    %c0_40 = arith.constant 0 : index
    %45 = vector.load %arg4[%c0_39, %c0_40] : memref<32x1xf32, #tpu.memory_space<vmem>>, vector<32x1xf32>
    %46 = vector.broadcast %45 : vector<32x1xf32> to vector<32x16xf32>
    %47 = arith.addf %44, %46 : vector<32x16xf32>
    %cst_41 = arith.constant 0.000000e+00 : f32
    %48 = vector.broadcast %cst_41 : f32 to vector<32x16xf32>
    %49 = arith.cmpf ogt, %47, %48 : vector<32x16xf32>
    %cst_42 = arith.constant 0.00999999977 : f32
    %50 = vector.broadcast %cst_42 : f32 to vector<32x16xf32>
    %51 = arith.mulf %50, %47 : vector<32x16xf32>
    %52 = arith.select %49, %47, %51 : vector<32x16xi1>, vector<32x16xf32>
    %cst_43 = arith.constant 0.000000e+00 : f32
    %53 = vector.broadcast %cst_43 : f32 to vector<32x128xf32>
    %c0_44 = arith.constant 0 : index
    %c0_45 = arith.constant 0 : index
    %54 = vector.load %arg20[%c0_44, %c0_45] : memref<32x272xf32, #tpu.memory_space<vmem>>, vector<32x128xf32>
    tpu.vector_store %arg20[%c0_44, %c0_45], %53 {strides = array<i32>} : memref<32x272xf32, #tpu.memory_space<vmem>>, vector<32x128xf32>,
    %cst_46 = arith.constant 0.000000e+00 : f32
    %55 = vector.broadcast %cst_46 : f32 to vector<32x128xf32>
    %c0_47 = arith.constant 0 : index
    %c144_48 = arith.constant 144 : index
    %56 = vector.load %arg20[%c0_47, %c144_48] : memref<32x272xf32, #tpu.memory_space<vmem>>, vector<32x128xf32>
    tpu.vector_store %arg20[%c0_47, %c144_48], %55 {strides = array<i32>} : memref<32x272xf32, #tpu.memory_space<vmem>>, vector<32x128xf32>,
    %c0_49 = arith.constant 0 : index
    %c128_50 = arith.constant 128 : index
    %57 = vector.load %arg20[%c0_49, %c128_50] : memref<32x272xf32, #tpu.memory_space<vmem>>, vector<32x16xf32>
    tpu.vector_store %arg20[%c0_49, %c128_50], %52 {strides = array<i32>} : memref<32x272xf32, #tpu.memory_space<vmem>>, vector<32x16xf32>,
    %c0_51 = arith.constant 0 : index
    %c123_52 = arith.constant 123 : index
    %58 = vector.load %arg20[%c0_51, %c123_52] : memref<32x272xf32, #tpu.memory_space<vmem>>, vector<32x16xf32>
    %59 = vector.broadcast %0 : vector<1x16xf32> to vector<32x16xf32>
    %60 = arith.mulf %58, %59 : vector<32x16xf32>
    %c0_53 = arith.constant 0 : index
    %c0_54 = arith.constant 0 : index
    %61 = vector.load %arg21[%c0_53, %c0_54] : memref<288x16xf32, #tpu.memory_space<vmem>>, vector<32x16xf32>
    tpu.vector_store %arg21[%c0_53, %c0_54], %60 {strides = array<i32>} : memref<288x16xf32, #tpu.memory_space<vmem>>, vector<32x16xf32>,
    %c0_55 = arith.constant 0 : index
    %c124_56 = arith.constant 124 : index
    %62 = vector.load %arg20[%c0_55, %c124_56] : memref<32x272xf32, #tpu.memory_space<vmem>>, vector<32x16xf32>
    %c32_57 = arith.constant 32 : index
    %c0_58 = arith.constant 0 : index
    %63 = vector.load %arg21[%c32_57, %c0_58] : memref<288x16xf32, #tpu.memory_space<vmem>>, vector<32x16xf32>
    tpu.vector_store %arg21[%c32_57, %c0_58], %62 {strides = array<i32>} : memref<288x16xf32, #tpu.memory_space<vmem>>, vector<32x16xf32>,
    %c0_59 = arith.constant 0 : index
    %c125_60 = arith.constant 125 : index
    %64 = vector.load %arg20[%c0_59, %c125_60] : memref<32x272xf32, #tpu.memory_space<vmem>>, vector<32x16xf32>
    %65 = vector.broadcast %1 : vector<1x16xf32> to vector<32x16xf32>
    %66 = arith.mulf %64, %65 : vector<32x16xf32>
    %c64_61 = arith.constant 64 : index
    %c0_62 = arith.constant 0 : index
    %67 = vector.load %arg21[%c64_61, %c0_62] : memref<288x16xf32, #tpu.memory_space<vmem>>, vector<32x16xf32>
    tpu.vector_store %arg21[%c64_61, %c0_62], %66 {strides = array<i32>} : memref<288x16xf32, #tpu.memory_space<vmem>>, vector<32x16xf32>,
    %c0_63 = arith.constant 0 : index
    %c127_64 = arith.constant 127 : index
    %68 = vector.load %arg20[%c0_63, %c127_64] : memref<32x272xf32, #tpu.memory_space<vmem>>, vector<32x16xf32>
    %69 = vector.broadcast %0 : vector<1x16xf32> to vector<32x16xf32>
    %70 = arith.mulf %68, %69 : vector<32x16xf32>
    %c96_65 = arith.constant 96 : index
    %c0_66 = arith.constant 0 : index
    %71 = vector.load %arg21[%c96_65, %c0_66] : memref<288x16xf32, #tpu.memory_space<vmem>>, vector<32x16xf32>
    tpu.vector_store %arg21[%c96_65, %c0_66], %70 {strides = array<i32>} : memref<288x16xf32, #tpu.memory_space<vmem>>, vector<32x16xf32>,
    %c0_67 = arith.constant 0 : index
    %c128_68 = arith.constant 128 : index
    %72 = vector.load %arg20[%c0_67, %c128_68] : memref<32x272xf32, #tpu.memory_space<vmem>>, vector<32x16xf32>
    %c128_69 = arith.constant 128 : index
    %c0_70 = arith.constant 0 : index
    %73 = vector.load %arg21[%c128_69, %c0_70] : memref<288x16xf32, #tpu.memory_space<vmem>>, vector<32x16xf32>
    tpu.vector_store %arg21[%c128_69, %c0_70], %72 {strides = array<i32>} : memref<288x16xf32, #tpu.memory_space<vmem>>, vector<32x16xf32>,
    %c0_71 = arith.constant 0 : index
    %c129_72 = arith.constant 129 : index
    %74 = vector.load %arg20[%c0_71, %c129_72] : memref<32x272xf32, #tpu.memory_space<vmem>>, vector<32x16xf32>
    %75 = vector.broadcast %1 : vector<1x16xf32> to vector<32x16xf32>
    %76 = arith.mulf %74, %75 : vector<32x16xf32>
    %c160 = arith.constant 160 : index
    %c0_73 = arith.constant 0 : index
    %77 = vector.load %arg21[%c160, %c0_73] : memref<288x16xf32, #tpu.memory_space<vmem>>, vector<32x16xf32>
    tpu.vector_store %arg21[%c160, %c0_73], %76 {strides = array<i32>} : memref<288x16xf32, #tpu.memory_space<vmem>>, vector<32x16xf32>,
    %c0_74 = arith.constant 0 : index
    %c131_75 = arith.constant 131 : index
    %78 = vector.load %arg20[%c0_74, %c131_75] : memref<32x272xf32, #tpu.memory_space<vmem>>, vector<32x16xf32>
    %79 = vector.broadcast %0 : vector<1x16xf32> to vector<32x16xf32>
    %80 = arith.mulf %78, %79 : vector<32x16xf32>
    %c192 = arith.constant 192 : index
    %c0_76 = arith.constant 0 : index
    %81 = vector.load %arg21[%c192, %c0_76] : memref<288x16xf32, #tpu.memory_space<vmem>>, vector<32x16xf32>
    tpu.vector_store %arg21[%c192, %c0_76], %80 {strides = array<i32>} : memref<288x16xf32, #tpu.memory_space<vmem>>, vector<32x16xf32>,
    %c0_77 = arith.constant 0 : index
    %c132_78 = arith.constant 132 : index
    %82 = vector.load %arg20[%c0_77, %c132_78] : memref<32x272xf32, #tpu.memory_space<vmem>>, vector<32x16xf32>
    %c224 = arith.constant 224 : index
    %c0_79 = arith.constant 0 : index
    %83 = vector.load %arg21[%c224, %c0_79] : memref<288x16xf32, #tpu.memory_space<vmem>>, vector<32x16xf32>
    tpu.vector_store %arg21[%c224, %c0_79], %82 {strides = array<i32>} : memref<288x16xf32, #tpu.memory_space<vmem>>, vector<32x16xf32>,
    %c0_80 = arith.constant 0 : index
    %c133_81 = arith.constant 133 : index
    %84 = vector.load %arg20[%c0_80, %c133_81] : memref<32x272xf32, #tpu.memory_space<vmem>>, vector<32x16xf32>
    %85 = vector.broadcast %1 : vector<1x16xf32> to vector<32x16xf32>
    %86 = arith.mulf %84, %85 : vector<32x16xf32>
    %c256 = arith.constant 256 : index
    %c0_82 = arith.constant 0 : index
    %87 = vector.load %arg21[%c256, %c0_82] : memref<288x16xf32, #tpu.memory_space<vmem>>, vector<32x16xf32>
    tpu.vector_store %arg21[%c256, %c0_82], %86 {strides = array<i32>} : memref<288x16xf32, #tpu.memory_space<vmem>>, vector<32x16xf32>,
    %c0_83 = arith.constant 0 : index
    %c0_84 = arith.constant 0 : index
    %88 = vector.load %arg5[%c0_83, %c0_84] : memref<32x288xf32, #tpu.memory_space<vmem>>, vector<32x288xf32>
    %c0_85 = arith.constant 0 : index
    %c0_86 = arith.constant 0 : index
    %89 = vector.load %arg21[%c0_85, %c0_86] : memref<288x16xf32, #tpu.memory_space<vmem>>, vector<288x16xf32>
    %cst_87 = arith.constant dense<0.000000e+00> : vector<32x16xf32>
    %90 = tpu.matmul %88, %89, %cst_87 {dimension_numbers = #tpu.dot_dimension_numbers<[1], [0], [0], [1], [0, 0, 1, 1], [], []>} : vector<32x288xf32>, vector<288x16xf32>, vector<32x16xf32> -> vector<32x16xf32>
    %c0_88 = arith.constant 0 : index
    %c0_89 = arith.constant 0 : index
    %91 = vector.load %arg6[%c0_88, %c0_89] : memref<32x1xf32, #tpu.memory_space<vmem>>, vector<32x1xf32>
    %92 = vector.broadcast %91 : vector<32x1xf32> to vector<32x16xf32>
    %93 = arith.mulf %90, %92 : vector<32x16xf32>
    %c0_90 = arith.constant 0 : index
    %c0_91 = arith.constant 0 : index
    %94 = vector.load %arg7[%c0_90, %c0_91] : memref<32x1xf32, #tpu.memory_space<vmem>>, vector<32x1xf32>
    %95 = vector.broadcast %94 : vector<32x1xf32> to vector<32x16xf32>
    %96 = arith.addf %93, %95 : vector<32x16xf32>
    %cst_92 = arith.constant 0.000000e+00 : f32
    %97 = vector.broadcast %cst_92 : f32 to vector<32x16xf32>
    %98 = arith.cmpf ogt, %96, %97 : vector<32x16xf32>
    %cst_93 = arith.constant 0.00999999977 : f32
    %99 = vector.broadcast %cst_93 : f32 to vector<32x16xf32>
    %100 = arith.mulf %99, %96 : vector<32x16xf32>
    %101 = arith.select %98, %96, %100 : vector<32x16xi1>, vector<32x16xf32>
    %c0_94 = arith.constant 0 : index
    %c0_95 = arith.constant 0 : index
    %c0_96 = arith.constant 0 : index
    %102 = vector.load %arg10[%c0_94, %c0_95, %c0_96] : memref<1x4x1xf32, #tpu.memory_space<vmem>>, vector<1x4x1xf32>
    %103 = vector.shape_cast %102 : vector<1x4x1xf32> to vector<4x1xf32>
    %c0_97 = arith.constant 0 : index
    %c0_98 = arith.constant 0 : index
    %104 = vector.load %arg11[%c0_97, %c0_98] : memref<32x4xf32, #tpu.memory_space<vmem>>, vector<32x4xf32>
    %cst_99 = arith.constant dense<0.000000e+00> : vector<32x1xf32>
    %105 = tpu.matmul %104, %103, %cst_99 {dimension_numbers = #tpu.dot_dimension_numbers<[1], [0], [0], [1], [0, 0, 1, 1], [], []>} : vector<32x4xf32>, vector<4x1xf32>, vector<32x1xf32> -> vector<32x1xf32>
    %cst_100 = arith.constant 0.000000e+00 : f32
    %106 = vector.broadcast %cst_100 : f32 to vector<32x1xf32>
    %107 = arith.maximumf %105, %106 : vector<32x1xf32>
    %c0_101 = arith.constant 0 : index
    %c0_102 = arith.constant 0 : index
    %108 = vector.load %arg12[%c0_101, %c0_102] : memref<32x32xf32, #tpu.memory_space<vmem>>, vector<32x32xf32>
    %cst_103 = arith.constant dense<0.000000e+00> : vector<32x1xf32>
    %109 = tpu.matmul %108, %107, %cst_103 {dimension_numbers = #tpu.dot_dimension_numbers<[1], [0], [0], [1], [0, 0, 1, 1], [], []>} : vector<32x32xf32>, vector<32x1xf32>, vector<32x1xf32> -> vector<32x1xf32>
    %c0_104 = arith.constant 0 : index
    %c0_105 = arith.constant 0 : index
    %110 = vector.load %arg14[%c0_104, %c0_105] : memref<2x32xf32, #tpu.memory_space<vmem>>, vector<2x32xf32>
    %cst_106 = arith.constant dense<0.000000e+00> : vector<2x1xf32>
    %111 = tpu.matmul %110, %109, %cst_106 {dimension_numbers = #tpu.dot_dimension_numbers<[1], [0], [0], [1], [0, 0, 1, 1], [], []>} : vector<2x32xf32>, vector<32x1xf32>, vector<2x1xf32> -> vector<2x1xf32>
    %cst_107 = arith.constant dense<0.000000e+00> : vector<32xf32>
    %112 = vector.multi_reduction <add>, %101, %cst_107 [1] : vector<32x16xf32> to vector<32xf32>
    %113 = vector.shape_cast %112 : vector<32xf32> to vector<32x1xf32>
    %cst_108 = arith.constant 1.600000e+01 : f32
    %114 = vector.broadcast %cst_108 : f32 to vector<32x1xf32>
    %115 = arith.divf %113, %114 : vector<32x1xf32>
    %cst_109 = arith.constant dense<0xFF800000> : vector<32xf32>
    %116 = vector.multi_reduction <maximumf>, %101, %cst_109 [1] : vector<32x16xf32> to vector<32xf32>
    %117 = vector.shape_cast %116 : vector<32xf32> to vector<32x1xf32>
    %c0_110 = arith.constant 0 : index
    %c0_111 = arith.constant 0 : index
    %118 = vector.load %arg13[%c0_110, %c0_111] : memref<2x32xf32, #tpu.memory_space<vmem>>, vector<2x32xf32>
    %cst_112 = arith.constant dense<0.000000e+00> : vector<2x1xf32>
    %119 = tpu.matmul %118, %115, %cst_112 {dimension_numbers = #tpu.dot_dimension_numbers<[1], [0], [0], [1], [0, 0, 1, 1], [], []>} : vector<2x32xf32>, vector<32x1xf32>, vector<2x1xf32> -> vector<2x1xf32>
    %120 = arith.addf %119, %111 : vector<2x1xf32>
    %cst_113 = arith.constant 0.000000e+00 : f32
    %121 = vector.broadcast %cst_113 : f32 to vector<2x1xf32>
    %122 = arith.maximumf %120, %121 : vector<2x1xf32>
    %c0_114 = arith.constant 0 : index
    %c0_115 = arith.constant 0 : index
    %123 = vector.load %arg15[%c0_114, %c0_115] : memref<32x2xf32, #tpu.memory_space<vmem>>, vector<32x2xf32>
    %cst_116 = arith.constant dense<0.000000e+00> : vector<32x1xf32>
    %124 = tpu.matmul %123, %122, %cst_116 {dimension_numbers = #tpu.dot_dimension_numbers<[1], [0], [0], [1], [0, 0, 1, 1], [], []>} : vector<32x2xf32>, vector<2x1xf32>, vector<32x1xf32> -> vector<32x1xf32>
    %c0_117 = arith.constant 0 : index
    %c0_118 = arith.constant 0 : index
    %125 = vector.load %arg13[%c0_117, %c0_118] : memref<2x32xf32, #tpu.memory_space<vmem>>, vector<2x32xf32>
    %cst_119 = arith.constant dense<0.000000e+00> : vector<2x1xf32>
    %126 = tpu.matmul %125, %117, %cst_119 {dimension_numbers = #tpu.dot_dimension_numbers<[1], [0], [0], [1], [0, 0, 1, 1], [], []>} : vector<2x32xf32>, vector<32x1xf32>, vector<2x1xf32> -> vector<2x1xf32>
    %127 = arith.addf %126, %111 : vector<2x1xf32>
    %cst_120 = arith.constant 0.000000e+00 : f32
    %128 = vector.broadcast %cst_120 : f32 to vector<2x1xf32>
    %129 = arith.maximumf %127, %128 : vector<2x1xf32>
    %c0_121 = arith.constant 0 : index
    %c0_122 = arith.constant 0 : index
    %130 = vector.load %arg15[%c0_121, %c0_122] : memref<32x2xf32, #tpu.memory_space<vmem>>, vector<32x2xf32>
    %cst_123 = arith.constant dense<0.000000e+00> : vector<32x1xf32>
    %131 = tpu.matmul %130, %129, %cst_123 {dimension_numbers = #tpu.dot_dimension_numbers<[1], [0], [0], [1], [0, 0, 1, 1], [], []>} : vector<32x2xf32>, vector<2x1xf32>, vector<32x1xf32> -> vector<32x1xf32>
    %132 = arith.addf %124, %131 : vector<32x1xf32>
    %cst_124 = arith.constant 0.000000e+00 : f32
    %133 = vector.broadcast %cst_124 : f32 to vector<32x1xf32>
    %134 = arith.subf %133, %132 : vector<32x1xf32>
    %135 = math.exp %134 : vector<32x1xf32>
    %cst_125 = arith.constant 1.000000e+00 : f32
    %136 = vector.broadcast %cst_125 : f32 to vector<32x1xf32>
    %137 = arith.addf %136, %135 : vector<32x1xf32>
    %cst_126 = arith.constant 1.000000e+00 : f32
    %138 = vector.broadcast %cst_126 : f32 to vector<32x1xf32>
    %139 = arith.divf %138, %137 : vector<32x1xf32>
    %c0_127 = arith.constant 0 : index
    %c0_128 = arith.constant 0 : index
    %c0_129 = arith.constant 0 : index
    %140 = vector.load %arg17[%c0_127, %c0_128, %c0_129] : memref<1x32x1xf32, #tpu.memory_space<vmem>>, vector<1x32x1xf32>
    %141 = vector.shape_cast %140 : vector<1x32x1xf32> to vector<32x1xf32>
    %142 = vector.shape_cast %139 : vector<32x1xf32> to vector<1x32x1xf32>
    tpu.vector_store %arg17[%c0_127, %c0_128, %c0_129], %142 {strides = array<i32>} : memref<1x32x1xf32, #tpu.memory_space<vmem>>, vector<1x32x1xf32>,
    %143 = vector.broadcast %139 : vector<32x1xf32> to vector<32x16xf32>
    %144 = arith.mulf %101, %143 : vector<32x16xf32>
    %145 = arith.addf %144, %101 : vector<32x16xf32>
    %c0_130 = arith.constant 0 : index
    %c0_131 = arith.constant 0 : index
    %c0_132 = arith.constant 0 : index
    %146 = vector.load %arg16[%c0_130, %c0_131, %c0_132] : memref<1x32x16xf32, #tpu.memory_space<vmem>>, vector<1x32x16xf32>
    %147 = vector.shape_cast %146 : vector<1x32x16xf32> to vector<32x16xf32>
    %148 = vector.shape_cast %145 : vector<32x16xf32> to vector<1x32x16xf32>
    tpu.vector_store %arg16[%c0_130, %c0_131, %c0_132], %148 {strides = array<i32>} : memref<1x32x16xf32, #tpu.memory_space<vmem>>, vector<1x32x16xf32>,
    return
  }
  func.func @transform_0(%arg0: i32) -> (i32, i32, i32) {
    %c0_i32 = arith.constant 0 : i32
    %c0_i32_0 = arith.constant 0 : i32
    %c0_i32_1 = arith.constant 0 : i32
    return %arg0, %c0_i32, %c0_i32_0 : i32, i32, i32
  }
  func.func @transform_1(%arg0: i32) -> (i32, i32) {
    %c0_i32 = arith.constant 0 : i32
    %c0_i32_0 = arith.constant 0 : i32
    %c0_i32_1 = arith.constant 0 : i32
    return %c0_i32, %c0_i32_0 : i32, i32
  }
  func.func @transform_2(%arg0: i32) -> (i32, i32) {
    %c0_i32 = arith.constant 0 : i32
    %c0_i32_0 = arith.constant 0 : i32
    %c0_i32_1 = arith.constant 0 : i32
    return %c0_i32, %c0_i32_0 : i32, i32
  }
  func.func @transform_3(%arg0: i32) -> (i32, i32) {
    %c0_i32 = arith.constant 0 : i32
    %c0_i32_0 = arith.constant 0 : i32
    %c0_i32_1 = arith.constant 0 : i32
    return %c0_i32, %c0_i32_0 : i32, i32
  }
  func.func @transform_4(%arg0: i32) -> (i32, i32) {
    %c0_i32 = arith.constant 0 : i32
    %c0_i32_0 = arith.constant 0 : i32
    %c0_i32_1 = arith.constant 0 : i32
    return %c0_i32, %c0_i32_0 : i32, i32
  }
  func.func @transform_5(%arg0: i32) -> (i32, i32) {
    %c0_i32 = arith.constant 0 : i32
    %c0_i32_0 = arith.constant 0 : i32
    %c0_i32_1 = arith.constant 0 : i32
    return %c0_i32, %c0_i32_0 : i32, i32
  }
  func.func @transform_6(%arg0: i32) -> (i32, i32) {
    %c0_i32 = arith.constant 0 : i32
    %c0_i32_0 = arith.constant 0 : i32
    %c0_i32_1 = arith.constant 0 : i32
    return %c0_i32, %c0_i32_0 : i32, i32
  }
  func.func @transform_7(%arg0: i32) -> (i32, i32) {
    %c0_i32 = arith.constant 0 : i32
    %c0_i32_0 = arith.constant 0 : i32
    %c0_i32_1 = arith.constant 0 : i32
    return %c0_i32, %c0_i32_0 : i32, i32
  }
  func.func @transform_8(%arg0: i32) -> (i32, i32) {
    %c0_i32 = arith.constant 0 : i32
    %c0_i32_0 = arith.constant 0 : i32
    %c0_i32_1 = arith.constant 0 : i32
    return %c0_i32, %c0_i32_0 : i32, i32
  }
  func.func @transform_9(%arg0: i32) -> (i32, i32, i32) {
    %c0_i32 = arith.constant 0 : i32
    %c0_i32_0 = arith.constant 0 : i32
    %c0_i32_1 = arith.constant 0 : i32
    return %arg0, %c0_i32, %c0_i32_0 : i32, i32, i32
  }
  func.func @transform_10(%arg0: i32) -> (i32, i32) {
    %c0_i32 = arith.constant 0 : i32
    %c0_i32_0 = arith.constant 0 : i32
    %c0_i32_1 = arith.constant 0 : i32
    return %c0_i32, %c0_i32_0 : i32, i32
  }
  func.func @transform_11(%arg0: i32) -> (i32, i32) {
    %c0_i32 = arith.constant 0 : i32
    %c0_i32_0 = arith.constant 0 : i32
    %c0_i32_1 = arith.constant 0 : i32
    return %c0_i32, %c0_i32_0 : i32, i32
  }
  func.func @transform_12(%arg0: i32) -> (i32, i32) {
    %c0_i32 = arith.constant 0 : i32
    %c0_i32_0 = arith.constant 0 : i32
    %c0_i32_1 = arith.constant 0 : i32
    return %c0_i32, %c0_i32_0 : i32, i32
  }
  func.func @transform_13(%arg0: i32) -> (i32, i32) {
    %c0_i32 = arith.constant 0 : i32
    %c0_i32_0 = arith.constant 0 : i32
    %c0_i32_1 = arith.constant 0 : i32
    return %c0_i32, %c0_i32_0 : i32, i32
  }
  func.func @transform_14(%arg0: i32) -> (i32, i32) {
    %c0_i32 = arith.constant 0 : i32
    %c0_i32_0 = arith.constant 0 : i32
    %c0_i32_1 = arith.constant 0 : i32
    return %c0_i32, %c0_i32_0 : i32, i32
  }
  func.func @transform_15(%arg0: i32) -> (i32, i32, i32) {
    %c0_i32 = arith.constant 0 : i32
    %c0_i32_0 = arith.constant 0 : i32
    %c0_i32_1 = arith.constant 0 : i32
    return %arg0, %c0_i32, %c0_i32_0 : i32, i32, i32
  }
  func.func @transform_16(%arg0: i32) -> (i32, i32, i32) {
    %c0_i32 = arith.constant 0 : i32
    %c0_i32_0 = arith.constant 0 : i32
    %c0_i32_1 = arith.constant 0 : i32
    return %arg0, %c0_i32, %c0_i32_0 : i32, i32, i32
  }
}

module attributes {stable_mosaic.version = 11 : i64} {
  func.func @kernel(%arg0: i32, %arg1: memref<1x32x4xf32, #tpu.memory_space<vmem>>, %arg2: memref<32x288xf32, #tpu.memory_space<vmem>>, %arg3: memref<32x1xf32, #tpu.memory_space<vmem>>, %arg4: memref<32x1xf32, #tpu.memory_space<vmem>>, %arg5: memref<32x288xf32, #tpu.memory_space<vmem>>, %arg6: memref<32x1xf32, #tpu.memory_space<vmem>>, %arg7: memref<32x1xf32, #tpu.memory_space<vmem>>, %arg8: memref<1x4xf32, #tpu.memory_space<vmem>>, %arg9: memref<1x4xf32, #tpu.memory_space<vmem>>, %arg10: memref<1x4x1xf32, #tpu.memory_space<vmem>>, %arg11: memref<32x4xf32, #tpu.memory_space<vmem>>, %arg12: memref<32x32xf32, #tpu.memory_space<vmem>>, %arg13: memref<2x32xf32, #tpu.memory_space<vmem>>, %arg14: memref<2x32xf32, #tpu.memory_space<vmem>>, %arg15: memref<32x2xf32, #tpu.memory_space<vmem>>, %arg16: memref<1x32x4xf32, #tpu.memory_space<vmem>>, %arg17: memref<1x32x1xf32, #tpu.memory_space<vmem>>, %arg18: memref<32x260xf32, #tpu.memory_space<vmem>>, %arg19: memref<288x4xf32, #tpu.memory_space<vmem>>, %arg20: memref<32x260xf32, #tpu.memory_space<vmem>>, %arg21: memref<288x4xf32, #tpu.memory_space<vmem>>) attributes {dimension_semantics = [#tpu.dimension_semantics<parallel>], iteration_bounds = array<i64: 2>, scalar_prefetch = 0 : i64, scratch_operands = 4 : i64, tpu.core_type = #tpu.core_type<tc>, window_params = [{transform_indices = @transform_0, window_bounds = array<i64: 1, 32, 4>}, {pipeline_mode = #tpu.pipeline_mode<synchronous>, transform_indices = @transform_1, window_bounds = array<i64: 32, 288>}, {pipeline_mode = #tpu.pipeline_mode<synchronous>, transform_indices = @transform_2, window_bounds = array<i64: 32, 1>}, {pipeline_mode = #tpu.pipeline_mode<synchronous>, transform_indices = @transform_3, window_bounds = array<i64: 32, 1>}, {pipeline_mode = #tpu.pipeline_mode<synchronous>, transform_indices = @transform_4, window_bounds = array<i64: 32, 288>}, {pipeline_mode = #tpu.pipeline_mode<synchronous>, transform_indices = @transform_5, window_bounds = array<i64: 32, 1>}, {pipeline_mode = #tpu.pipeline_mode<synchronous>, transform_indices = @transform_6, window_bounds = array<i64: 32, 1>}, {pipeline_mode = #tpu.pipeline_mode<synchronous>, transform_indices = @transform_7, window_bounds = array<i64: 1, 4>}, {pipeline_mode = #tpu.pipeline_mode<synchronous>, transform_indices = @transform_8, window_bounds = array<i64: 1, 4>}, {transform_indices = @transform_9, window_bounds = array<i64: 1, 4, 1>}, {pipeline_mode = #tpu.pipeline_mode<synchronous>, transform_indices = @transform_10, window_bounds = array<i64: 32, 4>}, {pipeline_mode = #tpu.pipeline_mode<synchronous>, transform_indices = @transform_11, window_bounds = array<i64: 32, 32>}, {pipeline_mode = #tpu.pipeline_mode<synchronous>, transform_indices = @transform_12, window_bounds = array<i64: 2, 32>}, {pipeline_mode = #tpu.pipeline_mode<synchronous>, transform_indices = @transform_13, window_bounds = array<i64: 2, 32>}, {pipeline_mode = #tpu.pipeline_mode<synchronous>, transform_indices = @transform_14, window_bounds = array<i64: 32, 2>}, {transform_indices = @transform_15, window_bounds = array<i64: 1, 32, 4>}, {transform_indices = @transform_16, window_bounds = array<i64: 1, 32, 1>}]} {
    %c0 = arith.constant 0 : index
    %c0_0 = arith.constant 0 : index
    %0 = vector.load %arg8[%c0, %c0_0] : memref<1x4xf32, #tpu.memory_space<vmem>>, vector<1x4xf32>
    %c0_1 = arith.constant 0 : index
    %c0_2 = arith.constant 0 : index
    %1 = vector.load %arg9[%c0_1, %c0_2] : memref<1x4xf32, #tpu.memory_space<vmem>>, vector<1x4xf32>
    %c0_3 = arith.constant 0 : index
    %c0_4 = arith.constant 0 : index
    %c0_5 = arith.constant 0 : index
    %2 = vector.load %arg1[%c0_3, %c0_4, %c0_5] : memref<1x32x4xf32, #tpu.memory_space<vmem>>, vector<1x32x4xf32>
    %3 = vector.shape_cast %2 : vector<1x32x4xf32> to vector<32x4xf32>
    %cst = arith.constant 0.000000e+00 : f32
    %4 = vector.broadcast %cst : f32 to vector<32x128xf32>
    %c0_6 = arith.constant 0 : index
    %c0_7 = arith.constant 0 : index
    %5 = vector.load %arg18[%c0_6, %c0_7] : memref<32x260xf32, #tpu.memory_space<vmem>>, vector<32x128xf32>
    tpu.vector_store %arg18[%c0_6, %c0_7], %4 {strides = array<i32>} : memref<32x260xf32, #tpu.memory_space<vmem>>, vector<32x128xf32>,
    %cst_8 = arith.constant 0.000000e+00 : f32
    %6 = vector.broadcast %cst_8 : f32 to vector<32x128xf32>
    %c0_9 = arith.constant 0 : index
    %c132 = arith.constant 132 : index
    %7 = vector.load %arg18[%c0_9, %c132] : memref<32x260xf32, #tpu.memory_space<vmem>>, vector<32x128xf32>
    tpu.vector_store %arg18[%c0_9, %c132], %6 {strides = array<i32>} : memref<32x260xf32, #tpu.memory_space<vmem>>, vector<32x128xf32>,
    %c0_10 = arith.constant 0 : index
    %c128 = arith.constant 128 : index
    %8 = vector.load %arg18[%c0_10, %c128] : memref<32x260xf32, #tpu.memory_space<vmem>>, vector<32x4xf32>
    tpu.vector_store %arg18[%c0_10, %c128], %3 {strides = array<i32>} : memref<32x260xf32, #tpu.memory_space<vmem>>, vector<32x4xf32>,
    %c0_11 = arith.constant 0 : index
    %c125 = arith.constant 125 : index
    %9 = vector.load %arg18[%c0_11, %c125] : memref<32x260xf32, #tpu.memory_space<vmem>>, vector<32x4xf32>
    %10 = vector.broadcast %0 : vector<1x4xf32> to vector<32x4xf32>
    %11 = arith.mulf %9, %10 : vector<32x4xf32>
    %c0_12 = arith.constant 0 : index
    %c0_13 = arith.constant 0 : index
    %12 = vector.load %arg19[%c0_12, %c0_13] : memref<288x4xf32, #tpu.memory_space<vmem>>, vector<32x4xf32>
    tpu.vector_store %arg19[%c0_12, %c0_13], %11 {strides = array<i32>} : memref<288x4xf32, #tpu.memory_space<vmem>>, vector<32x4xf32>,
    %c0_14 = arith.constant 0 : index
    %c126 = arith.constant 126 : index
    %13 = vector.load %arg18[%c0_14, %c126] : memref<32x260xf32, #tpu.memory_space<vmem>>, vector<32x4xf32>
    %c32 = arith.constant 32 : index
    %c0_15 = arith.constant 0 : index
    %14 = vector.load %arg19[%c32, %c0_15] : memref<288x4xf32, #tpu.memory_space<vmem>>, vector<32x4xf32>
    tpu.vector_store %arg19[%c32, %c0_15], %13 {strides = array<i32>} : memref<288x4xf32, #tpu.memory_space<vmem>>, vector<32x4xf32>,
    %c0_16 = arith.constant 0 : index
    %c127 = arith.constant 127 : index
    %15 = vector.load %arg18[%c0_16, %c127] : memref<32x260xf32, #tpu.memory_space<vmem>>, vector<32x4xf32>
    %16 = vector.broadcast %1 : vector<1x4xf32> to vector<32x4xf32>
    %17 = arith.mulf %15, %16 : vector<32x4xf32>
    %c64 = arith.constant 64 : index
    %c0_17 = arith.constant 0 : index
    %18 = vector.load %arg19[%c64, %c0_17] : memref<288x4xf32, #tpu.memory_space<vmem>>, vector<32x4xf32>
    tpu.vector_store %arg19[%c64, %c0_17], %17 {strides = array<i32>} : memref<288x4xf32, #tpu.memory_space<vmem>>, vector<32x4xf32>,
    %c0_18 = arith.constant 0 : index
    %c127_19 = arith.constant 127 : index
    %19 = vector.load %arg18[%c0_18, %c127_19] : memref<32x260xf32, #tpu.memory_space<vmem>>, vector<32x4xf32>
    %20 = vector.broadcast %0 : vector<1x4xf32> to vector<32x4xf32>
    %21 = arith.mulf %19, %20 : vector<32x4xf32>
    %c96 = arith.constant 96 : index
    %c0_20 = arith.constant 0 : index
    %22 = vector.load %arg19[%c96, %c0_20] : memref<288x4xf32, #tpu.memory_space<vmem>>, vector<32x4xf32>
    tpu.vector_store %arg19[%c96, %c0_20], %21 {strides = array<i32>} : memref<288x4xf32, #tpu.memory_space<vmem>>, vector<32x4xf32>,
    %c0_21 = arith.constant 0 : index
    %c128_22 = arith.constant 128 : index
    %23 = vector.load %arg18[%c0_21, %c128_22] : memref<32x260xf32, #tpu.memory_space<vmem>>, vector<32x4xf32>
    %c128_23 = arith.constant 128 : index
    %c0_24 = arith.constant 0 : index
    %24 = vector.load %arg19[%c128_23, %c0_24] : memref<288x4xf32, #tpu.memory_space<vmem>>, vector<32x4xf32>
    tpu.vector_store %arg19[%c128_23, %c0_24], %23 {strides = array<i32>} : memref<288x4xf32, #tpu.memory_space<vmem>>, vector<32x4xf32>,
    %c0_25 = arith.constant 0 : index
    %c129 = arith.constant 129 : index
    %25 = vector.load %arg18[%c0_25, %c129] : memref<32x260xf32, #tpu.memory_space<vmem>>, vector<32x4xf32>
    %26 = vector.broadcast %1 : vector<1x4xf32> to vector<32x4xf32>
    %27 = arith.mulf %25, %26 : vector<32x4xf32>
    %c160 = arith.constant 160 : index
    %c0_26 = arith.constant 0 : index
    %28 = vector.load %arg19[%c160, %c0_26] : memref<288x4xf32, #tpu.memory_space<vmem>>, vector<32x4xf32>
    tpu.vector_store %arg19[%c160, %c0_26], %27 {strides = array<i32>} : memref<288x4xf32, #tpu.memory_space<vmem>>, vector<32x4xf32>,
    %c0_27 = arith.constant 0 : index
    %c129_28 = arith.constant 129 : index
    %29 = vector.load %arg18[%c0_27, %c129_28] : memref<32x260xf32, #tpu.memory_space<vmem>>, vector<32x4xf32>
    %30 = vector.broadcast %0 : vector<1x4xf32> to vector<32x4xf32>
    %31 = arith.mulf %29, %30 : vector<32x4xf32>
    %c192 = arith.constant 192 : index
    %c0_29 = arith.constant 0 : index
    %32 = vector.load %arg19[%c192, %c0_29] : memref<288x4xf32, #tpu.memory_space<vmem>>, vector<32x4xf32>
    tpu.vector_store %arg19[%c192, %c0_29], %31 {strides = array<i32>} : memref<288x4xf32, #tpu.memory_space<vmem>>, vector<32x4xf32>,
    %c0_30 = arith.constant 0 : index
    %c130 = arith.constant 130 : index
    %33 = vector.load %arg18[%c0_30, %c130] : memref<32x260xf32, #tpu.memory_space<vmem>>, vector<32x4xf32>
    %c224 = arith.constant 224 : index
    %c0_31 = arith.constant 0 : index
    %34 = vector.load %arg19[%c224, %c0_31] : memref<288x4xf32, #tpu.memory_space<vmem>>, vector<32x4xf32>
    tpu.vector_store %arg19[%c224, %c0_31], %33 {strides = array<i32>} : memref<288x4xf32, #tpu.memory_space<vmem>>, vector<32x4xf32>,
    %c0_32 = arith.constant 0 : index
    %c131 = arith.constant 131 : index
    %35 = vector.load %arg18[%c0_32, %c131] : memref<32x260xf32, #tpu.memory_space<vmem>>, vector<32x4xf32>
    %36 = vector.broadcast %1 : vector<1x4xf32> to vector<32x4xf32>
    %37 = arith.mulf %35, %36 : vector<32x4xf32>
    %c256 = arith.constant 256 : index
    %c0_33 = arith.constant 0 : index
    %38 = vector.load %arg19[%c256, %c0_33] : memref<288x4xf32, #tpu.memory_space<vmem>>, vector<32x4xf32>
    tpu.vector_store %arg19[%c256, %c0_33], %37 {strides = array<i32>} : memref<288x4xf32, #tpu.memory_space<vmem>>, vector<32x4xf32>,
    %c0_34 = arith.constant 0 : index
    %c0_35 = arith.constant 0 : index
    %39 = vector.load %arg2[%c0_34, %c0_35] : memref<32x288xf32, #tpu.memory_space<vmem>>, vector<32x288xf32>
    %c0_36 = arith.constant 0 : index
    %c0_37 = arith.constant 0 : index
    %40 = vector.load %arg19[%c0_36, %c0_37] : memref<288x4xf32, #tpu.memory_space<vmem>>, vector<288x4xf32>
    %cst_38 = arith.constant dense<0.000000e+00> : vector<32x4xf32>
    %41 = tpu.matmul %39, %40, %cst_38 {dimension_numbers = #tpu.dot_dimension_numbers<[1], [0], [0], [1], [0, 0, 1, 1], [], []>} : vector<32x288xf32>, vector<288x4xf32>, vector<32x4xf32> -> vector<32x4xf32>
    %c0_39 = arith.constant 0 : index
    %c0_40 = arith.constant 0 : index
    %42 = vector.load %arg3[%c0_39, %c0_40] : memref<32x1xf32, #tpu.memory_space<vmem>>, vector<32x1xf32>
    %43 = vector.broadcast %42 : vector<32x1xf32> to vector<32x4xf32>
    %44 = arith.mulf %41, %43 : vector<32x4xf32>
    %c0_41 = arith.constant 0 : index
    %c0_42 = arith.constant 0 : index
    %45 = vector.load %arg4[%c0_41, %c0_42] : memref<32x1xf32, #tpu.memory_space<vmem>>, vector<32x1xf32>
    %46 = vector.broadcast %45 : vector<32x1xf32> to vector<32x4xf32>
    %47 = arith.addf %44, %46 : vector<32x4xf32>
    %cst_43 = arith.constant 0.000000e+00 : f32
    %48 = vector.broadcast %cst_43 : f32 to vector<32x4xf32>
    %49 = arith.cmpf ogt, %47, %48 : vector<32x4xf32>
    %cst_44 = arith.constant 0.00999999977 : f32
    %50 = vector.broadcast %cst_44 : f32 to vector<32x4xf32>
    %51 = arith.mulf %50, %47 : vector<32x4xf32>
    %52 = arith.select %49, %47, %51 : vector<32x4xi1>, vector<32x4xf32>
    %cst_45 = arith.constant 0.000000e+00 : f32
    %53 = vector.broadcast %cst_45 : f32 to vector<32x128xf32>
    %c0_46 = arith.constant 0 : index
    %c0_47 = arith.constant 0 : index
    %54 = vector.load %arg20[%c0_46, %c0_47] : memref<32x260xf32, #tpu.memory_space<vmem>>, vector<32x128xf32>
    tpu.vector_store %arg20[%c0_46, %c0_47], %53 {strides = array<i32>} : memref<32x260xf32, #tpu.memory_space<vmem>>, vector<32x128xf32>,
    %cst_48 = arith.constant 0.000000e+00 : f32
    %55 = vector.broadcast %cst_48 : f32 to vector<32x128xf32>
    %c0_49 = arith.constant 0 : index
    %c132_50 = arith.constant 132 : index
    %56 = vector.load %arg20[%c0_49, %c132_50] : memref<32x260xf32, #tpu.memory_space<vmem>>, vector<32x128xf32>
    tpu.vector_store %arg20[%c0_49, %c132_50], %55 {strides = array<i32>} : memref<32x260xf32, #tpu.memory_space<vmem>>, vector<32x128xf32>,
    %c0_51 = arith.constant 0 : index
    %c128_52 = arith.constant 128 : index
    %57 = vector.load %arg20[%c0_51, %c128_52] : memref<32x260xf32, #tpu.memory_space<vmem>>, vector<32x4xf32>
    tpu.vector_store %arg20[%c0_51, %c128_52], %52 {strides = array<i32>} : memref<32x260xf32, #tpu.memory_space<vmem>>, vector<32x4xf32>,
    %c0_53 = arith.constant 0 : index
    %c125_54 = arith.constant 125 : index
    %58 = vector.load %arg20[%c0_53, %c125_54] : memref<32x260xf32, #tpu.memory_space<vmem>>, vector<32x4xf32>
    %59 = vector.broadcast %0 : vector<1x4xf32> to vector<32x4xf32>
    %60 = arith.mulf %58, %59 : vector<32x4xf32>
    %c0_55 = arith.constant 0 : index
    %c0_56 = arith.constant 0 : index
    %61 = vector.load %arg21[%c0_55, %c0_56] : memref<288x4xf32, #tpu.memory_space<vmem>>, vector<32x4xf32>
    tpu.vector_store %arg21[%c0_55, %c0_56], %60 {strides = array<i32>} : memref<288x4xf32, #tpu.memory_space<vmem>>, vector<32x4xf32>,
    %c0_57 = arith.constant 0 : index
    %c126_58 = arith.constant 126 : index
    %62 = vector.load %arg20[%c0_57, %c126_58] : memref<32x260xf32, #tpu.memory_space<vmem>>, vector<32x4xf32>
    %c32_59 = arith.constant 32 : index
    %c0_60 = arith.constant 0 : index
    %63 = vector.load %arg21[%c32_59, %c0_60] : memref<288x4xf32, #tpu.memory_space<vmem>>, vector<32x4xf32>
    tpu.vector_store %arg21[%c32_59, %c0_60], %62 {strides = array<i32>} : memref<288x4xf32, #tpu.memory_space<vmem>>, vector<32x4xf32>,
    %c0_61 = arith.constant 0 : index
    %c127_62 = arith.constant 127 : index
    %64 = vector.load %arg20[%c0_61, %c127_62] : memref<32x260xf32, #tpu.memory_space<vmem>>, vector<32x4xf32>
    %65 = vector.broadcast %1 : vector<1x4xf32> to vector<32x4xf32>
    %66 = arith.mulf %64, %65 : vector<32x4xf32>
    %c64_63 = arith.constant 64 : index
    %c0_64 = arith.constant 0 : index
    %67 = vector.load %arg21[%c64_63, %c0_64] : memref<288x4xf32, #tpu.memory_space<vmem>>, vector<32x4xf32>
    tpu.vector_store %arg21[%c64_63, %c0_64], %66 {strides = array<i32>} : memref<288x4xf32, #tpu.memory_space<vmem>>, vector<32x4xf32>,
    %c0_65 = arith.constant 0 : index
    %c127_66 = arith.constant 127 : index
    %68 = vector.load %arg20[%c0_65, %c127_66] : memref<32x260xf32, #tpu.memory_space<vmem>>, vector<32x4xf32>
    %69 = vector.broadcast %0 : vector<1x4xf32> to vector<32x4xf32>
    %70 = arith.mulf %68, %69 : vector<32x4xf32>
    %c96_67 = arith.constant 96 : index
    %c0_68 = arith.constant 0 : index
    %71 = vector.load %arg21[%c96_67, %c0_68] : memref<288x4xf32, #tpu.memory_space<vmem>>, vector<32x4xf32>
    tpu.vector_store %arg21[%c96_67, %c0_68], %70 {strides = array<i32>} : memref<288x4xf32, #tpu.memory_space<vmem>>, vector<32x4xf32>,
    %c0_69 = arith.constant 0 : index
    %c128_70 = arith.constant 128 : index
    %72 = vector.load %arg20[%c0_69, %c128_70] : memref<32x260xf32, #tpu.memory_space<vmem>>, vector<32x4xf32>
    %c128_71 = arith.constant 128 : index
    %c0_72 = arith.constant 0 : index
    %73 = vector.load %arg21[%c128_71, %c0_72] : memref<288x4xf32, #tpu.memory_space<vmem>>, vector<32x4xf32>
    tpu.vector_store %arg21[%c128_71, %c0_72], %72 {strides = array<i32>} : memref<288x4xf32, #tpu.memory_space<vmem>>, vector<32x4xf32>,
    %c0_73 = arith.constant 0 : index
    %c129_74 = arith.constant 129 : index
    %74 = vector.load %arg20[%c0_73, %c129_74] : memref<32x260xf32, #tpu.memory_space<vmem>>, vector<32x4xf32>
    %75 = vector.broadcast %1 : vector<1x4xf32> to vector<32x4xf32>
    %76 = arith.mulf %74, %75 : vector<32x4xf32>
    %c160_75 = arith.constant 160 : index
    %c0_76 = arith.constant 0 : index
    %77 = vector.load %arg21[%c160_75, %c0_76] : memref<288x4xf32, #tpu.memory_space<vmem>>, vector<32x4xf32>
    tpu.vector_store %arg21[%c160_75, %c0_76], %76 {strides = array<i32>} : memref<288x4xf32, #tpu.memory_space<vmem>>, vector<32x4xf32>,
    %c0_77 = arith.constant 0 : index
    %c129_78 = arith.constant 129 : index
    %78 = vector.load %arg20[%c0_77, %c129_78] : memref<32x260xf32, #tpu.memory_space<vmem>>, vector<32x4xf32>
    %79 = vector.broadcast %0 : vector<1x4xf32> to vector<32x4xf32>
    %80 = arith.mulf %78, %79 : vector<32x4xf32>
    %c192_79 = arith.constant 192 : index
    %c0_80 = arith.constant 0 : index
    %81 = vector.load %arg21[%c192_79, %c0_80] : memref<288x4xf32, #tpu.memory_space<vmem>>, vector<32x4xf32>
    tpu.vector_store %arg21[%c192_79, %c0_80], %80 {strides = array<i32>} : memref<288x4xf32, #tpu.memory_space<vmem>>, vector<32x4xf32>,
    %c0_81 = arith.constant 0 : index
    %c130_82 = arith.constant 130 : index
    %82 = vector.load %arg20[%c0_81, %c130_82] : memref<32x260xf32, #tpu.memory_space<vmem>>, vector<32x4xf32>
    %c224_83 = arith.constant 224 : index
    %c0_84 = arith.constant 0 : index
    %83 = vector.load %arg21[%c224_83, %c0_84] : memref<288x4xf32, #tpu.memory_space<vmem>>, vector<32x4xf32>
    tpu.vector_store %arg21[%c224_83, %c0_84], %82 {strides = array<i32>} : memref<288x4xf32, #tpu.memory_space<vmem>>, vector<32x4xf32>,
    %c0_85 = arith.constant 0 : index
    %c131_86 = arith.constant 131 : index
    %84 = vector.load %arg20[%c0_85, %c131_86] : memref<32x260xf32, #tpu.memory_space<vmem>>, vector<32x4xf32>
    %85 = vector.broadcast %1 : vector<1x4xf32> to vector<32x4xf32>
    %86 = arith.mulf %84, %85 : vector<32x4xf32>
    %c256_87 = arith.constant 256 : index
    %c0_88 = arith.constant 0 : index
    %87 = vector.load %arg21[%c256_87, %c0_88] : memref<288x4xf32, #tpu.memory_space<vmem>>, vector<32x4xf32>
    tpu.vector_store %arg21[%c256_87, %c0_88], %86 {strides = array<i32>} : memref<288x4xf32, #tpu.memory_space<vmem>>, vector<32x4xf32>,
    %c0_89 = arith.constant 0 : index
    %c0_90 = arith.constant 0 : index
    %88 = vector.load %arg5[%c0_89, %c0_90] : memref<32x288xf32, #tpu.memory_space<vmem>>, vector<32x288xf32>
    %c0_91 = arith.constant 0 : index
    %c0_92 = arith.constant 0 : index
    %89 = vector.load %arg21[%c0_91, %c0_92] : memref<288x4xf32, #tpu.memory_space<vmem>>, vector<288x4xf32>
    %cst_93 = arith.constant dense<0.000000e+00> : vector<32x4xf32>
    %90 = tpu.matmul %88, %89, %cst_93 {dimension_numbers = #tpu.dot_dimension_numbers<[1], [0], [0], [1], [0, 0, 1, 1], [], []>} : vector<32x288xf32>, vector<288x4xf32>, vector<32x4xf32> -> vector<32x4xf32>
    %c0_94 = arith.constant 0 : index
    %c0_95 = arith.constant 0 : index
    %91 = vector.load %arg6[%c0_94, %c0_95] : memref<32x1xf32, #tpu.memory_space<vmem>>, vector<32x1xf32>
    %92 = vector.broadcast %91 : vector<32x1xf32> to vector<32x4xf32>
    %93 = arith.mulf %90, %92 : vector<32x4xf32>
    %c0_96 = arith.constant 0 : index
    %c0_97 = arith.constant 0 : index
    %94 = vector.load %arg7[%c0_96, %c0_97] : memref<32x1xf32, #tpu.memory_space<vmem>>, vector<32x1xf32>
    %95 = vector.broadcast %94 : vector<32x1xf32> to vector<32x4xf32>
    %96 = arith.addf %93, %95 : vector<32x4xf32>
    %cst_98 = arith.constant 0.000000e+00 : f32
    %97 = vector.broadcast %cst_98 : f32 to vector<32x4xf32>
    %98 = arith.cmpf ogt, %96, %97 : vector<32x4xf32>
    %cst_99 = arith.constant 0.00999999977 : f32
    %99 = vector.broadcast %cst_99 : f32 to vector<32x4xf32>
    %100 = arith.mulf %99, %96 : vector<32x4xf32>
    %101 = arith.select %98, %96, %100 : vector<32x4xi1>, vector<32x4xf32>
    %c0_100 = arith.constant 0 : index
    %c0_101 = arith.constant 0 : index
    %c0_102 = arith.constant 0 : index
    %102 = vector.load %arg10[%c0_100, %c0_101, %c0_102] : memref<1x4x1xf32, #tpu.memory_space<vmem>>, vector<1x4x1xf32>
    %103 = vector.shape_cast %102 : vector<1x4x1xf32> to vector<4x1xf32>
    %c0_103 = arith.constant 0 : index
    %c0_104 = arith.constant 0 : index
    %104 = vector.load %arg11[%c0_103, %c0_104] : memref<32x4xf32, #tpu.memory_space<vmem>>, vector<32x4xf32>
    %cst_105 = arith.constant dense<0.000000e+00> : vector<32x1xf32>
    %105 = tpu.matmul %104, %103, %cst_105 {dimension_numbers = #tpu.dot_dimension_numbers<[1], [0], [0], [1], [0, 0, 1, 1], [], []>} : vector<32x4xf32>, vector<4x1xf32>, vector<32x1xf32> -> vector<32x1xf32>
    %cst_106 = arith.constant 0.000000e+00 : f32
    %106 = vector.broadcast %cst_106 : f32 to vector<32x1xf32>
    %107 = arith.maximumf %105, %106 : vector<32x1xf32>
    %c0_107 = arith.constant 0 : index
    %c0_108 = arith.constant 0 : index
    %108 = vector.load %arg12[%c0_107, %c0_108] : memref<32x32xf32, #tpu.memory_space<vmem>>, vector<32x32xf32>
    %cst_109 = arith.constant dense<0.000000e+00> : vector<32x1xf32>
    %109 = tpu.matmul %108, %107, %cst_109 {dimension_numbers = #tpu.dot_dimension_numbers<[1], [0], [0], [1], [0, 0, 1, 1], [], []>} : vector<32x32xf32>, vector<32x1xf32>, vector<32x1xf32> -> vector<32x1xf32>
    %c0_110 = arith.constant 0 : index
    %c0_111 = arith.constant 0 : index
    %110 = vector.load %arg14[%c0_110, %c0_111] : memref<2x32xf32, #tpu.memory_space<vmem>>, vector<2x32xf32>
    %cst_112 = arith.constant dense<0.000000e+00> : vector<2x1xf32>
    %111 = tpu.matmul %110, %109, %cst_112 {dimension_numbers = #tpu.dot_dimension_numbers<[1], [0], [0], [1], [0, 0, 1, 1], [], []>} : vector<2x32xf32>, vector<32x1xf32>, vector<2x1xf32> -> vector<2x1xf32>
    %cst_113 = arith.constant dense<0.000000e+00> : vector<32xf32>
    %112 = vector.multi_reduction <add>, %101, %cst_113 [1] : vector<32x4xf32> to vector<32xf32>
    %113 = vector.shape_cast %112 : vector<32xf32> to vector<32x1xf32>
    %cst_114 = arith.constant 4.000000e+00 : f32
    %114 = vector.broadcast %cst_114 : f32 to vector<32x1xf32>
    %115 = arith.divf %113, %114 : vector<32x1xf32>
    %cst_115 = arith.constant dense<0xFF800000> : vector<32xf32>
    %116 = vector.multi_reduction <maximumf>, %101, %cst_115 [1] : vector<32x4xf32> to vector<32xf32>
    %117 = vector.shape_cast %116 : vector<32xf32> to vector<32x1xf32>
    %c0_116 = arith.constant 0 : index
    %c0_117 = arith.constant 0 : index
    %118 = vector.load %arg13[%c0_116, %c0_117] : memref<2x32xf32, #tpu.memory_space<vmem>>, vector<2x32xf32>
    %cst_118 = arith.constant dense<0.000000e+00> : vector<2x1xf32>
    %119 = tpu.matmul %118, %115, %cst_118 {dimension_numbers = #tpu.dot_dimension_numbers<[1], [0], [0], [1], [0, 0, 1, 1], [], []>} : vector<2x32xf32>, vector<32x1xf32>, vector<2x1xf32> -> vector<2x1xf32>
    %120 = arith.addf %119, %111 : vector<2x1xf32>
    %cst_119 = arith.constant 0.000000e+00 : f32
    %121 = vector.broadcast %cst_119 : f32 to vector<2x1xf32>
    %122 = arith.maximumf %120, %121 : vector<2x1xf32>
    %c0_120 = arith.constant 0 : index
    %c0_121 = arith.constant 0 : index
    %123 = vector.load %arg15[%c0_120, %c0_121] : memref<32x2xf32, #tpu.memory_space<vmem>>, vector<32x2xf32>
    %cst_122 = arith.constant dense<0.000000e+00> : vector<32x1xf32>
    %124 = tpu.matmul %123, %122, %cst_122 {dimension_numbers = #tpu.dot_dimension_numbers<[1], [0], [0], [1], [0, 0, 1, 1], [], []>} : vector<32x2xf32>, vector<2x1xf32>, vector<32x1xf32> -> vector<32x1xf32>
    %c0_123 = arith.constant 0 : index
    %c0_124 = arith.constant 0 : index
    %125 = vector.load %arg13[%c0_123, %c0_124] : memref<2x32xf32, #tpu.memory_space<vmem>>, vector<2x32xf32>
    %cst_125 = arith.constant dense<0.000000e+00> : vector<2x1xf32>
    %126 = tpu.matmul %125, %117, %cst_125 {dimension_numbers = #tpu.dot_dimension_numbers<[1], [0], [0], [1], [0, 0, 1, 1], [], []>} : vector<2x32xf32>, vector<32x1xf32>, vector<2x1xf32> -> vector<2x1xf32>
    %127 = arith.addf %126, %111 : vector<2x1xf32>
    %cst_126 = arith.constant 0.000000e+00 : f32
    %128 = vector.broadcast %cst_126 : f32 to vector<2x1xf32>
    %129 = arith.maximumf %127, %128 : vector<2x1xf32>
    %c0_127 = arith.constant 0 : index
    %c0_128 = arith.constant 0 : index
    %130 = vector.load %arg15[%c0_127, %c0_128] : memref<32x2xf32, #tpu.memory_space<vmem>>, vector<32x2xf32>
    %cst_129 = arith.constant dense<0.000000e+00> : vector<32x1xf32>
    %131 = tpu.matmul %130, %129, %cst_129 {dimension_numbers = #tpu.dot_dimension_numbers<[1], [0], [0], [1], [0, 0, 1, 1], [], []>} : vector<32x2xf32>, vector<2x1xf32>, vector<32x1xf32> -> vector<32x1xf32>
    %132 = arith.addf %124, %131 : vector<32x1xf32>
    %cst_130 = arith.constant 0.000000e+00 : f32
    %133 = vector.broadcast %cst_130 : f32 to vector<32x1xf32>
    %134 = arith.subf %133, %132 : vector<32x1xf32>
    %135 = math.exp %134 : vector<32x1xf32>
    %cst_131 = arith.constant 1.000000e+00 : f32
    %136 = vector.broadcast %cst_131 : f32 to vector<32x1xf32>
    %137 = arith.addf %136, %135 : vector<32x1xf32>
    %cst_132 = arith.constant 1.000000e+00 : f32
    %138 = vector.broadcast %cst_132 : f32 to vector<32x1xf32>
    %139 = arith.divf %138, %137 : vector<32x1xf32>
    %c0_133 = arith.constant 0 : index
    %c0_134 = arith.constant 0 : index
    %c0_135 = arith.constant 0 : index
    %140 = vector.load %arg17[%c0_133, %c0_134, %c0_135] : memref<1x32x1xf32, #tpu.memory_space<vmem>>, vector<1x32x1xf32>
    %141 = vector.shape_cast %140 : vector<1x32x1xf32> to vector<32x1xf32>
    %142 = vector.shape_cast %139 : vector<32x1xf32> to vector<1x32x1xf32>
    tpu.vector_store %arg17[%c0_133, %c0_134, %c0_135], %142 {strides = array<i32>} : memref<1x32x1xf32, #tpu.memory_space<vmem>>, vector<1x32x1xf32>,
    %143 = vector.broadcast %139 : vector<32x1xf32> to vector<32x4xf32>
    %144 = arith.mulf %101, %143 : vector<32x4xf32>
    %145 = arith.addf %144, %101 : vector<32x4xf32>
    %c0_136 = arith.constant 0 : index
    %c0_137 = arith.constant 0 : index
    %c0_138 = arith.constant 0 : index
    %146 = vector.load %arg16[%c0_136, %c0_137, %c0_138] : memref<1x32x4xf32, #tpu.memory_space<vmem>>, vector<1x32x4xf32>
    %147 = vector.shape_cast %146 : vector<1x32x4xf32> to vector<32x4xf32>
    %148 = vector.shape_cast %145 : vector<32x4xf32> to vector<1x32x4xf32>
    tpu.vector_store %arg16[%c0_136, %c0_137, %c0_138], %148 {strides = array<i32>} : memref<1x32x4xf32, #tpu.memory_space<vmem>>, vector<1x32x4xf32>,
    return
  }
  func.func @transform_0(%arg0: i32) -> (i32, i32, i32) {
    %c0_i32 = arith.constant 0 : i32
    %c0_i32_0 = arith.constant 0 : i32
    %c0_i32_1 = arith.constant 0 : i32
    return %arg0, %c0_i32, %c0_i32_0 : i32, i32, i32
  }
  func.func @transform_1(%arg0: i32) -> (i32, i32) {
    %c0_i32 = arith.constant 0 : i32
    %c0_i32_0 = arith.constant 0 : i32
    %c0_i32_1 = arith.constant 0 : i32
    return %c0_i32, %c0_i32_0 : i32, i32
  }
  func.func @transform_2(%arg0: i32) -> (i32, i32) {
    %c0_i32 = arith.constant 0 : i32
    %c0_i32_0 = arith.constant 0 : i32
    %c0_i32_1 = arith.constant 0 : i32
    return %c0_i32, %c0_i32_0 : i32, i32
  }
  func.func @transform_3(%arg0: i32) -> (i32, i32) {
    %c0_i32 = arith.constant 0 : i32
    %c0_i32_0 = arith.constant 0 : i32
    %c0_i32_1 = arith.constant 0 : i32
    return %c0_i32, %c0_i32_0 : i32, i32
  }
  func.func @transform_4(%arg0: i32) -> (i32, i32) {
    %c0_i32 = arith.constant 0 : i32
    %c0_i32_0 = arith.constant 0 : i32
    %c0_i32_1 = arith.constant 0 : i32
    return %c0_i32, %c0_i32_0 : i32, i32
  }
  func.func @transform_5(%arg0: i32) -> (i32, i32) {
    %c0_i32 = arith.constant 0 : i32
    %c0_i32_0 = arith.constant 0 : i32
    %c0_i32_1 = arith.constant 0 : i32
    return %c0_i32, %c0_i32_0 : i32, i32
  }
  func.func @transform_6(%arg0: i32) -> (i32, i32) {
    %c0_i32 = arith.constant 0 : i32
    %c0_i32_0 = arith.constant 0 : i32
    %c0_i32_1 = arith.constant 0 : i32
    return %c0_i32, %c0_i32_0 : i32, i32
  }
  func.func @transform_7(%arg0: i32) -> (i32, i32) {
    %c0_i32 = arith.constant 0 : i32
    %c0_i32_0 = arith.constant 0 : i32
    %c0_i32_1 = arith.constant 0 : i32
    return %c0_i32, %c0_i32_0 : i32, i32
  }
  func.func @transform_8(%arg0: i32) -> (i32, i32) {
    %c0_i32 = arith.constant 0 : i32
    %c0_i32_0 = arith.constant 0 : i32
    %c0_i32_1 = arith.constant 0 : i32
    return %c0_i32, %c0_i32_0 : i32, i32
  }
  func.func @transform_9(%arg0: i32) -> (i32, i32, i32) {
    %c0_i32 = arith.constant 0 : i32
    %c0_i32_0 = arith.constant 0 : i32
    %c0_i32_1 = arith.constant 0 : i32
    return %arg0, %c0_i32, %c0_i32_0 : i32, i32, i32
  }
  func.func @transform_10(%arg0: i32) -> (i32, i32) {
    %c0_i32 = arith.constant 0 : i32
    %c0_i32_0 = arith.constant 0 : i32
    %c0_i32_1 = arith.constant 0 : i32
    return %c0_i32, %c0_i32_0 : i32, i32
  }
  func.func @transform_11(%arg0: i32) -> (i32, i32) {
    %c0_i32 = arith.constant 0 : i32
    %c0_i32_0 = arith.constant 0 : i32
    %c0_i32_1 = arith.constant 0 : i32
    return %c0_i32, %c0_i32_0 : i32, i32
  }
  func.func @transform_12(%arg0: i32) -> (i32, i32) {
    %c0_i32 = arith.constant 0 : i32
    %c0_i32_0 = arith.constant 0 : i32
    %c0_i32_1 = arith.constant 0 : i32
    return %c0_i32, %c0_i32_0 : i32, i32
  }
  func.func @transform_13(%arg0: i32) -> (i32, i32) {
    %c0_i32 = arith.constant 0 : i32
    %c0_i32_0 = arith.constant 0 : i32
    %c0_i32_1 = arith.constant 0 : i32
    return %c0_i32, %c0_i32_0 : i32, i32
  }
  func.func @transform_14(%arg0: i32) -> (i32, i32) {
    %c0_i32 = arith.constant 0 : i32
    %c0_i32_0 = arith.constant 0 : i32
    %c0_i32_1 = arith.constant 0 : i32
    return %c0_i32, %c0_i32_0 : i32, i32
  }
  func.func @transform_15(%arg0: i32) -> (i32, i32, i32) {
    %c0_i32 = arith.constant 0 : i32
    %c0_i32_0 = arith.constant 0 : i32
    %c0_i32_1 = arith.constant 0 : i32
    return %arg0, %c0_i32, %c0_i32_0 : i32, i32, i32
  }
  func.func @transform_16(%arg0: i32) -> (i32, i32, i32) {
    %c0_i32 = arith.constant 0 : i32
    %c0_i32_0 = arith.constant 0 : i32
    %c0_i32_1 = arith.constant 0 : i32
    return %arg0, %c0_i32, %c0_i32_0 : i32, i32, i32
  }
}

</mosaic_0001>

<bundles_post_ra>
// kernel: _lambda_.5
= control target key start
LH: loop header
LB: loop body
LE: loop exit
PB: predicated region body
PF: predicated region fallthrough
CT: control target
= control target key end

     0   :  { %s2842_s30 = smov 0   ;;  %s4233_s0 = inlined_call_operand.vmem [shape: f32[2,4,1024], index: 0, kind: input, shape index: {}]   ;;  %s4234_s1 = inlined_call_operand.vmem [shape: f32[8,36], index: 1, kind: input, shape index: {}]   ;;  %s4235_s2 = inlined_call_operand.vmem [shape: f32[8,1], index: 2, kind: input, shape index: {}]   ;;  %s4236_s3 = inlined_call_operand.vmem [shape: f32[8,1], index: 3, kind: input, shape index: {}]   ;;  %s4237_s4 = inlined_call_operand.vmem [shape: f32[8,72], index: 4, kind: input, shape index: {}]   ;;  %s4238_s5 = inlined_call_operand.vmem [shape: f32[8,1], index: 5, kind: input, shape index: {}]   ;;  %s4239_s6 = inlined_call_operand.vmem [shape: f32[8,1], index: 6, kind: input, shape index: {}]   ;;  %s4240_s7 = inlined_call_operand.vmem [shape: f32[1,1024], index: 7, kind: input, shape index: {}]   ;;  %s4241_s8 = inlined_call_operand.vmem [shape: f32[1,1024], index: 8, kind: input, shape index: {}]   ;;  %s4242_s9 = inlined_call_operand.vmem [shape: f32[2,8,1024], index: 9, kind: output, shape index: {}]  }
   0x1 LB: > { %s2711_s10 = sadd.s32 4294967295, %s2780_s30   ;;  %p2715_p0 = scmp.ge.s32.totalorder %s2780_s30, 1  ;;  %s2780_s30 = sphi %s2842_s30, %s19_s30  }
   0x2   : > { %p287_p1 = scmp.lt.s32.totalorder %s2780_s30, 3 }
   0x4   : > { %p288_p2 = pnand %p2715_p0, %p287_p1 }
   0x5   : > { %p323_p3 = scmp.lt.s32.totalorder (!%p288_p2), %s2711_s10, 1  ;;  %s2783_s19 = smov (!%p288_p2), 33  }
   0x6   : > { %291 = sbr.rel (%p288_p2) target bundleno = 997 (0x3e5), region = 56  ;;  %s2784_s20 = smov (!%p288_p2), 31  }
   0x7   : > { %s2785_s21 = smov (!%p288_p2), 1   ;;  %s2786_s22 = smov (!%p288_p2), 127  }
   0x8   : > { %s2787_s23 = smov (!%p288_p2), 97   ;;  %s2788_s24 = smov (!%p288_p2), 95  }
   0x9   : > { %s2789_s25 = smov (!%p288_p2), 96   ;;  %s2790_s26 = smov (!%p288_p2), 32  }
   0xb   : > { %v351_v0 = vlaneseq  ;;  %v4243_v1 = vmov 0.0   ;;  %v334_v3 = vld [vmem:[%s4241_s8] sm:$0xff]  ;;  %s4249_s10 = smov (!%p323_p3, %s2711_s10), 1  ;;  %vm445_vm0 = vcmask 269312   ;;  %vm627_vm1 = vcmask 252928  }
   0xc   : > { %339 = vst [vmem:[#allocation2] sm:$0xf] %v4243_v1  ;;  %340 = vst [vmem:[#allocation2 + $0x24] sm:$0xf] %v4243_v1  ;;  %1211 = vmatprep.mubr.f32.mxu0 %v4243_v1  ;;  %1282 = vmatprep.mubr.f32.mxu1 %v4243_v1  ;;  %v2862_v4 = vld [vmem:[%s4240_s7] sm:$0xff]  ;;  %s2738_s15 = sshll.u32 %s4249_s10, 5 }
   0xd   : > { %v2854_v2 = vshrl.u32 %v351_v0, 7  ;;  %s327_s18 = scalar_lea.vmem %s4233_s0, %s2738_s15  ;;  %vm401_vm2 = vcmask 1043456   ;;  %vm715_vm3 = vcmask 7168   ;;  %vm669_vm4 = vcmask 1039360  }
   0xe   : > { %v2892_v17 = vld [vmem:[%s327_s18 + $0x8] sm:$0xff]  ;;  %v2894_v18 = vld [vmem:[%s327_s18] sm:$0xff]  ;;  %v2896_v19 = vld [vmem:[%s327_s18 + $0x10] sm:$0xff]  ;;  %vm582_vm5 = vcmask 793600   ;;  %vm399_vm6 = vcmask 777216   ;;  %vm968_vm7 = vcmask 785408  }
   0xf   : > { %v353_v5 = vsub.s32 0, %v2854_v2  ;;  %v357_v6 = vsub.s32 1, %v2854_v2  ;;  %v361_v7 = vsub.s32 2, %v2854_v2  ;;  %v365_v8 = vsub.s32 3, %v2854_v2  ;;  %342 = vst [vmem:[#allocation2 + $0xc] sm:$0xff] %v2892_v17  ;;  %341 = vst [vmem:[#allocation2 + $0x4] sm:$0xff] %v2894_v18 }
  0x10   : > { %343 = vst [vmem:[#allocation2 + $0x14] sm:$0xff] %v2896_v19  ;;  %v2911_v23 = vld [vmem:[%s327_s18 + $0x18] sm:$0xff]  ;;  %756 = vst [vmem:[#allocation3 + $0x128] sm:$0xf] %v2894_v18  ;;  %v369_v25 = vsub.s32 4, %v2854_v2  ;;  %v373_v26 = vsub.s32 5, %v2854_v2  ;;  %v946_v41 = vcombine.low %v2892_v17, %v2892_v17  ;;  %v945_v43 = vcombine.low %v2894_v18, %v2894_v18 }
  0x11   : > { %v2870_v9 = vrot.slane %v334_v3, %v353_v5  ;;  %v2872_v10 = vrot.slane %v334_v3, %v357_v6  ;;  %v2875_v11 = vrot.slane %v2862_v4, %v353_v5  ;;  %v2878_v12 = vrot.slane %v2862_v4, %v357_v6  ;;  %758 = vst [vmem:[#allocation3 + $0x8] sm:$0xf] %v2892_v17 }
  0x12   : > { %v2880_v13 = vrot.slane %v334_v3, %v361_v7  ;;  %v2882_v14 = vrot.slane %v334_v3, %v365_v8  ;;  %v2903_v21 = vrot.slane %v2862_v4, %v361_v7  ;;  %v2906_v22 = vrot.slane %v2862_v4, %v365_v8  ;;  %760 = vst [vmem:[#allocation3 + $0xa8] sm:$0xf] %v2896_v19 }
  0x13   : > { %v566_v15 = vcombine.low %v2870_v9, %v2872_v10  ;;  %v383_v16 = vcombine.low %v2875_v11, %v2878_v12  ;;  %344 = vst [vmem:[#allocation2 + $0x1c] sm:$0xff] %v2911_v23  ;;  %v2929_v27 = vrot.slane %v334_v3, %v369_v25  ;;  %v2931_v28 = vrot.slane %v334_v3, %v373_v26 }
  0x14   : > { %v567_v20 = vcombine.low %v2880_v13, %v2882_v14  ;;  %v384_v24 = vcombine.low %v2903_v21, %v2906_v22  ;;  %v377_v29 = vsub.s32 6, %v2854_v2  ;;  %v381_v30 = vsub.s32 7, %v2854_v2 }
  0x15   : > { %998 = vrot.lane.b32.xlu0 %v566_v15, %s2783_s19  ;;  %855 = vrot.lane.b32.xlu1 %v383_v16, %s2784_s20  ;;  %v2936_v31 = vrot.slane %v2862_v4, %v369_v25  ;;  %v2939_v32 = vrot.slane %v2862_v4, %v373_v26  ;;  %v568_v33 = vcombine.low %v2929_v27, %v2931_v28  ;;  %vm503_vm8 = vcmask 261120  }
  0x16   : > { %v2945_v34 = vrot.slane %v334_v3, %v377_v29  ;;  %v2947_v35 = vrot.slane %v334_v3, %v381_v30  ;;  %v2958_v38 = vrot.slane %v2862_v4, %v377_v29  ;;  %v2961_v39 = vrot.slane %v2862_v4, %v381_v30  ;;  %v2975_v42 = vld [vmem:[#allocation2 + $0x8] sm:$0xff]  ;;  %v2984_v45 = vld [vmem:[#allocation2] sm:$0xff] }
  0x17   : > { %v385_v36 = vcombine.low %v2936_v31, %v2939_v32  ;;  %v481_v44 = vcombine.low %v2975_v42, %v2975_v42  ;;  %v480_v46 = vcombine.low %v2984_v45, %v2984_v45  ;;  %v947_v47 = vcombine.low %v2896_v19, %v2896_v19 }
  0x18   : > { %v569_v37 = vcombine.low %v2945_v34, %v2947_v35  ;;  %v386_v40 = vcombine.low %v2958_v38, %v2961_v39  ;;  %v948_v48 = vcombine.low %v2911_v23, %v2911_v23  ;;  %vm1119_vm9 = vcmask 293888  }
  0x19   : > { %1000 = vrot.lane.b32.xlu0 %v567_v20, %s2783_s19  ;;  %769 = vrot.lane.b32.xlu1 %v566_v15, %s2785_s21 }
  0x1d   : > { %771 = vrot.lane.b32.xlu0 %v567_v20, %s2785_s21  ;;  %857 = vrot.lane.b32.xlu1 %v384_v24, %s2784_s20 }
  0x21   : > { %657 = vrot.lane.b32.xlu0 %v383_v16, %s2786_s22  ;;  %659 = vrot.lane.b32.xlu1 %v384_v24, %s2786_s22 }
  0x25   : > { %570 = vrot.lane.b32.xlu0 %v566_v15, %s2787_s23  ;;  %572 = vrot.lane.b32.xlu1 %v567_v20, %s2787_s23 }
  0x29   : > { %387 = vrot.lane.b32.xlu0 %v383_v16, %s2788_s24  ;;  %389 = vrot.lane.b32.xlu1 %v384_v24, %s2788_s24 }
  0x2d   : > { %1002 = vrot.lane.b32.xlu0 %v568_v33, %s2783_s19  ;;  %773 = vrot.lane.b32.xlu1 %v568_v33, %s2785_s21 }
  0x31   : > { %859 = vrot.lane.b32.xlu0 %v385_v36, %s2784_s20  ;;  %1004 = vrot.lane.b32.xlu1 %v569_v37, %s2783_s19 }
  0x35   : > { %661 = vrot.lane.b32.xlu0 %v385_v36, %s2786_s22  ;;  %775 = vrot.lane.b32.xlu1 %v569_v37, %s2785_s21 }
  0x39   : > { %861 = vrot.lane.b32.xlu0 %v386_v40, %s2784_s20  ;;  %574 = vrot.lane.b32.xlu1 %v568_v33, %s2787_s23 }
  0x3d   : > { %663 = vrot.lane.b32.xlu0 %v386_v40, %s2786_s22  ;;  %391 = vrot.lane.b32.xlu1 %v385_v36, %s2788_s24 }
  0x41   : > { %576 = vrot.lane.b32.xlu0 %v569_v37, %s2787_s23  ;;  %393 = vrot.lane.b32.xlu1 %v386_v40, %s2788_s24 }
  0x45   : > { %954 = vrot.lane.b32.xlu0 %v946_v41, %s2789_s25  ;;  %952 = vrot.lane.b32.xlu1 %v2894_v18, %s2789_s25 }
  0x49   : > { %950 = vrot.lane.b32.xlu0 %v945_v43, %s2789_s25  ;;  %489 = vrot.lane.b32.xlu1 %v481_v44, %s2790_s26 }
  0x4d   : > { %487 = vrot.lane.b32.xlu0 %v2984_v45, %s2790_s26  ;;  %485 = vrot.lane.b32.xlu1 %v480_v46, %s2790_s26 }
  0x51   : > { %956 = vrot.lane.b32.xlu0 %v2892_v17, %s2789_s25  ;;  %958 = vrot.lane.b32.xlu1 %v947_v47, %s2789_s25 }
  0x55   : > { %960 = vrot.lane.b32.xlu0 %v2896_v19, %s2789_s25  ;;  %962 = vrot.lane.b32.xlu1 %v948_v48, %s2789_s25 }
  0x87   : > { %v999_v49 = vpop.permute.xlu0 %998  ;;  %v856_v50 = vpop.permute.xlu1 %855 }
  0x88   : > { %v1006_v51 = vrot.slane %v999_v49, 4  ;;  %v863_v52 = vrot.slane %v856_v50, 4 }
  0x8a   : > { %v1010_v53 = vsel %vm445_vm0, %v1006_v51, %v999_v49  ;;  %v867_v54 = vsel %vm627_vm1, %v863_v52, %v856_v50 }
  0x8b   : > { %v1001_v55 = vpop.permute.xlu0 %1000  ;;  %v770_v56 = vpop.permute.xlu1 %769  ;;  %v3006_v57 = vmul.f32 %v1010_v53, %v2894_v18  ;;  %v3009_v58 = vmul.f32 %v867_v54, %v2894_v18 }
  0x8c   : > { %v1007_v59 = vrot.slane %v1001_v55, 4  ;;  %v777_v60 = vrot.slane %v770_v56, 4 }
  0x8d   : > { %1036 = vrot.lane.b32.xlu0 %v3006_v57, %s2788_s24  ;;  %893 = vrot.lane.b32.xlu1 %v3009_v58, %s2787_s23  ;;  %v889_v1 = vcombine.high %v3009_v58, %v3009_v58  ;;  %v749_v58 = vcombine.high %v2892_v17, %v2892_v17 }
  0x8e   : > { %v1011_v61 = vsel %vm401_vm2, %v1006_v51, %v1007_v59  ;;  %v781_v62 = vsel %vm715_vm3, %v777_v60, %v770_v56 }
  0x8f   : > { %v3017_v63 = vpop.permute.xlu0 %771  ;;  %v858_v0 = vpop.permute.xlu1 %857  ;;  %v3020_v2 = vmul.f32 %v781_v62, %v2894_v18  ;;  %v1012_v3 = vsel %vm445_vm0, %v1011_v61, %v1001_v55  ;;  %759 = vst [vmem:[#allocation3 + $0x98] sm:$0xf] %v749_v58 }
  0x90   : > { %v3028_v6 = vmul.f32 %v1012_v3, %v2892_v17  ;;  %v864_v26 = vrot.slane %v858_v0, 4  ;;  %v778_v46 = vrot.slane %v3017_v63, 4 }
  0x91   : > { %810 = vrot.lane.b32.xlu1 %v3020_v2, %s2786_s22 }
  0x92   : > { %v868_v47 = vsel %vm401_vm2, %v863_v52, %v864_v26  ;;  %v782_v61 = vsel %vm401_vm2, %v777_v60, %v778_v46 }
  0x93   : > { %v658_v4 = vpop.permute.xlu0 %657  ;;  %v3025_v5 = vpop.permute.xlu1 %659  ;;  %v869_v54 = vsel %vm627_vm1, %v868_v47, %v858_v0  ;;  %v783_v60 = vsel %vm715_vm3, %v782_v61, %v3017_v63 }
  0x94   : > { %v665_v7 = vrot.slane %v658_v4, 4  ;;  %v666_v62 = vrot.slane %v3025_v5, 4 }
  0x95   : > { %1040 = vrot.lane.b32.xlu1 %v3028_v6, %s2788_s24 }
  0x96   : > { %v670_v8 = vsel %vm669_vm4, %v665_v7, %v658_v4 }
  0x97   : > { %v571_v15 = vpop.permute.xlu0 %570  ;;  %v3033_v16 = vpop.permute.xlu1 %572  ;;  %v3036_v20 = vmul.f32 %v670_v8, %v2984_v45  ;;  %v3088_v8 = vmul.f32 %v869_v54, %v2892_v17 }
  0x98   : > { %v578_v24 = vrot.slane %v571_v15, 4  ;;  %v579_v25 = vrot.slane %v3033_v16, 4 }
  0x99   : > { %699 = vrot.lane.b32.xlu0 %v3036_v20, %s2785_s21 }
  0x9a   : > { %v583_v29 = vsel %vm582_vm5, %v578_v24, %v571_v15  ;;  %v584_v30 = vsel %vm401_vm2, %v578_v24, %v579_v25 }
  0x9b   : > { %v585_v33 = vsel %vm582_vm5, %v584_v30, %v3033_v16  ;;  %v388_v36 = vpop.permute.xlu0 %387  ;;  %v3047_v37 = vpop.permute.xlu1 %389  ;;  %v3050_v40 = vmul.f32 %v583_v29, %v2984_v45 }
  0x9c   : > { %v395_v41 = vrot.slane %v388_v36, 4  ;;  %v396_v43 = vrot.slane %v3047_v37, 4  ;;  %v3054_v44 = vmul.f32 %v585_v33, %v2975_v42 }
  0x9d   : > { %609 = vrot.lane.b32.xlu0 %v3050_v40, %s2784_s20 }
  0x9e   : > { %v400_v48 = vsel %vm399_vm6, %v395_v41, %v388_v36  ;;  %v402_v49 = vsel %vm401_vm2, %v395_v41, %v396_v43  ;;  %613 = vrot.lane.b32.xlu1 %v3054_v44, %s2784_s20 }
  0x9f   : > { %v403_v50 = vsel %vm399_vm6, %v402_v49, %v3047_v37  ;;  %v1003_v51 = vpop.permute.xlu0 %1002  ;;  %v3068_v53 = vpop.permute.xlu1 %773  ;;  %v3071_v52 = vmul.f32 %v2984_v45, %v400_v48  ;;  %v2791_v49 = vmov 0   ;;  %v606_v37 = vcombine.high %v3054_v44, %v3054_v44 }
  0xa0   : > { %v1008_v55 = vrot.slane %v1003_v51, 4  ;;  %v3075_v56 = vmul.f32 %v2975_v42, %v403_v50  ;;  %v779_v30 = vrot.slane %v3068_v53, 4  ;;  %2759 = vset.pattern.permute.xlu1 %v2791_v49  ;;  %2758 = vset.pattern.permute.xlu0 %v2791_v49 }
  0xa1   : > { %427 = vrot.lane.b32.xlu0 %v3071_v52, %s2783_s19 }
  0xa2   : > { %v1013_v3 = vsel %vm401_vm2, %v1007_v59, %v1008_v55  ;;  %431 = vrot.lane.b32.xlu1 %v3075_v56, %s2783_s19  ;;  %v671_v59 = vsel %vm401_vm2, %v665_v7, %v666_v62  ;;  %v3114_v7 = vmul.f32 %v783_v60, %v2892_v17  ;;  %v784_v50 = vsel %vm401_vm2, %v778_v46, %v779_v30 }
  0xa3   : > { %v1014_v45 = vsel %vm445_vm0, %v1013_v3, %v1003_v51  ;;  %v860_v4 = vpop.permute.xlu0 %859  ;;  %v3085_v0 = vpop.permute.xlu1 %1004  ;;  %v672_v48 = vsel %vm669_vm4, %v671_v59, %v3025_v5  ;;  %v785_v3 = vsel %vm715_vm3, %v784_v50, %v3068_v53  ;;  %v1032_v50 = vcombine.high %v3006_v57, %v3006_v57 }
  0xa4   : > { %v865_v15 = vrot.slane %v860_v4, 4  ;;  %v1009_v24 = vrot.slane %v3085_v0, 4  ;;  %v3094_v29 = vmul.f32 %v1014_v45, %v2896_v19  ;;  %v3135_v61 = vmul.f32 %v672_v48, %v2975_v42 }
  0xa5   : > { %897 = vrot.lane.b32.xlu0 %v3088_v8, %s2787_s23  ;;  %v3163_v48 = vmul.f32 %v785_v3, %v2896_v19  ;;  %v748_v3 = vcombine.high %v2894_v18, %v2894_v18  ;;  %v750_v5 = vcombine.high %v2896_v19, %v2896_v19 }
  0xa6   : > { %v870_v33 = vsel %vm401_vm2, %v864_v26, %v865_v15  ;;  %v1015_v63 = vsel %vm401_vm2, %v1008_v55, %v1009_v24  ;;  %1044 = vrot.lane.b32.xlu1 %v3094_v29, %s2788_s24 }
  0xa7   : > { %v871_v36 = vsel %vm627_vm1, %v870_v33, %v860_v4  ;;  %v3109_v41 = vpop.permute.xlu0 %661  ;;  %v3111_v47 = vpop.permute.xlu1 %775  ;;  %v1016_v51 = vsel %vm445_vm0, %v1015_v63, %v3085_v0  ;;  %757 = vst [vmem:[#allocation3 + $0x110] sm:$0xf] %v748_v3  ;;  %761 = vst [vmem:[#allocation3 + $0x90] sm:$0xf] %v750_v5  ;;  %v2768_v0 = vld [vmem:[#allocation2 + $0x24] ss:$0 sps:$4 sm:$0xff]  }
  0xa8   : > { %v3119_v26 = vmul.f32 %v871_v36, %v2896_v19  ;;  %v3142_v4 = vmul.f32 %v1016_v51, %v2911_v23 }
  0xa9   : > { %814 = vrot.lane.b32.xlu0 %v3114_v7, %s2786_s22 }
  0xaa   : > { %901 = vrot.lane.b32.xlu1 %v3119_v26, %s2787_s23 }
  0xab   : > { %v3130_v54 = vpop.permute.xlu0 %861  ;;  %v3132_v55 = vpop.permute.xlu1 %574 }
  0xac   : > { %v4245_v46 = vrot.slane %v3130_v54, 4  ;;  %v580_v45 = vrot.slane %v3132_v55, 4 }
  0xad   : > { %703 = vrot.lane.b32.xlu0 %v3135_v61, %s2785_s21 }
  0xae   : > { %v872_v60 = vsel %vm401_vm2, %v865_v15, %v4245_v46  ;;  %v586_v59 = vsel %vm401_vm2, %v579_v25, %v580_v45  ;;  %1048 = vrot.lane.b32.xlu1 %v3142_v4, %s2788_s24  ;;  %v3174_v25 = vld [vmem:[#allocation2 + $0x10] sm:$0xff] }
  0xaf   : > { %v873_v33 = vsel %vm627_vm1, %v872_v60, %v3130_v54  ;;  %v3158_v63 = vpop.permute.xlu0 %663  ;;  %v3160_v36 = vpop.permute.xlu1 %391  ;;  %v587_v16 = vsel %vm582_vm5, %v586_v59, %v3132_v55  ;;  %v605_v59 = vcombine.high %v3050_v40, %v3050_v40  ;;  %v803_v40 = vcombine.low %v3020_v2, %v3020_v2 }
  0xb0   : > { %v3166_v15 = vmul.f32 %v873_v33, %v2911_v23  ;;  %v3185_v60 = vmul.f32 %v3174_v25, %v587_v16  ;;  %v423_v16 = vcombine.high %v3071_v52, %v3071_v52  ;;  %v804_v52 = vcombine.low %v3114_v7, %v3114_v7 }
  0xb1   : > { %818 = vrot.lane.b32.xlu0 %v3163_v48, %s2786_s22  ;;  %v692_v2 = vcombine.low %v3036_v20, %v3036_v20  ;;  %v780_v7 = vrot.slane %v3111_v47, 4  ;;  %v1033_v20 = vcombine.high %v3028_v6, %v3028_v6 }
  0xb2   : > { %905 = vrot.lane.b32.xlu1 %v3166_v15, %s2787_s23 }
  0xb3   : > { %v3176_v49 = vpop.permute.xlu0 %576  ;;  %v3180_v51 = vpop.permute.xlu1 %393  ;;  %v786_v6 = vsel %vm401_vm2, %v779_v30, %v780_v7 }
  0xb4   : > { %v787_v30 = vsel %vm715_vm3, %v786_v6, %v3111_v47  ;;  %v398_v55 = vrot.slane %v3180_v51, 4 }
  0xb5   : > { %1038 = vrot.lane.b32.xlu0 %v1032_v50, %s2788_s24 }
  0xb6   : > { %617 = vrot.lane.b32.xlu1 %v3185_v60, %s2784_s20 }
  0xb7   : > { %v955_v33 = vpop.permute.xlu0 %954  ;;  %v953_v57 = vpop.permute.xlu1 %952 }
  0xb8   : > { %v970_v18 = vsel %vm968_vm7, %v953_v57, %v955_v33 }
  0xb9   : > { %611 = vrot.lane.b32.xlu0 %v605_v59, %s2784_s20  ;;  %986 = vst [vmem:[#allocation3 + $0x118] sm:$0xf0] %v970_v18 }
  0xba   : > { %895 = vrot.lane.b32.xlu1 %v889_v1, %s2787_s23  ;;  %v667_v1 = vrot.slane %v3109_v41, 4 }
  0xbb   : > { %v951_v50 = vpop.permute.xlu0 %950  ;;  %v3199_v3 = vpop.permute.xlu1 %489 }
  0xbc   : > { %v969_v46 = vsel %vm968_vm7, %v951_v50, %v953_v57 }
  0xbd   : > { %429 = vrot.lane.b32.xlu0 %v423_v16, %s2783_s19  ;;  %985 = vst [vmem:[#allocation3 + $0xc0] sm:$0xf0] %v969_v46  ;;  %v673_v46 = vsel %vm401_vm2, %v666_v62, %v667_v1 }
  0xbe   : > { %808 = vrot.lane.b32.xlu1 %v803_v40, %s2786_s22  ;;  %v693_v40 = vcombine.low %v3135_v61, %v3135_v61  ;;  %v674_v62 = vsel %vm669_vm4, %v673_v46, %v3109_v41  ;;  %v890_v61 = vcombine.high %v3088_v8, %v3088_v8  ;;  %v397_v8 = vrot.slane %v3160_v36, 4 }
  0xbf   : > { %v488_v59 = vpop.permute.xlu0 %487  ;;  %v486_v18 = vpop.permute.xlu1 %485  ;;  %v684_v41 = vmul.f32 %v674_v62, %v3174_v25  ;;  %v891_v46 = vcombine.high %v3119_v26, %v3119_v26 }
  0xc0   : > { %v505_v17 = vsel %vm503_vm8, %v488_v59, %v3199_v3  ;;  %v504_v57 = vsel %vm503_vm8, %v486_v18, %v488_v59  ;;  %v805_v59 = vcombine.low %v3163_v48, %v3163_v48  ;;  %v3257_v48 = vmul.f32 %v787_v30, %v2911_v23 }
  0xc1   : > { %812 = vrot.lane.b32.xlu0 %v804_v52, %s2786_s22  ;;  %521 = vst [vmem:[#allocation3 + $0xd0] sm:$0xf0] %v505_v17  ;;  %520 = vst [vmem:[#allocation3 + $0xb0] sm:$0xf0] %v504_v57  ;;  %v694_v17 = vcombine.low %v684_v41, %v684_v41  ;;  %v404_v57 = vsel %vm401_vm2, %v396_v43, %v397_v8 }
  0xc2   : > { %697 = vrot.lane.b32.xlu1 %v692_v2, %s2785_s21  ;;  %v1034_v2 = vcombine.high %v3094_v29, %v3094_v29  ;;  %v405_v29 = vsel %vm399_vm6, %v404_v57, %v3160_v36 }
  0xc3   : > { %v957_v16 = vpop.permute.xlu0 %956  ;;  %v959_v50 = vpop.permute.xlu1 %958  ;;  %v415_v43 = vmul.f32 %v3174_v25, %v405_v29  ;;  %v2769_v29 = vld [vmem:[#allocation2 + $0x20] ss:$0 sps:$4 sm:$0xff]  }
  0xc4   : > { %v971_v58 = vsel %vm968_vm7, %v955_v33, %v957_v16  ;;  %v972_v52 = vsel %vm968_vm7, %v957_v16, %v959_v50  ;;  %v668_v16 = vrot.slane %v3158_v63, 4 }
  0xc5   : > { %1042 = vrot.lane.b32.xlu0 %v1033_v20, %s2788_s24  ;;  %987 = vst [vmem:[#allocation3 + $0xd8] sm:$0xf0] %v971_v58  ;;  %988 = vst [vmem:[#allocation3 + $0xa0] sm:$0xf0] %v972_v52  ;;  %v806_v20 = vcombine.low %v3257_v48, %v3257_v48  ;;  %v424_v58 = vcombine.high %v3075_v56, %v3075_v56  ;;  %v3287_v52 = vld [vmem:[#allocation2 + $0x18] sm:$0xff]  ;;  %v406_v56 = vsel %vm401_vm2, %v397_v8, %v398_v55 }
  0xc6   : > { %701 = vrot.lane.b32.xlu1 %v693_v40, %s2785_s21  ;;  %v675_v26 = vsel %vm401_vm2, %v667_v1, %v668_v16  ;;  %v482_v40 = vcombine.low %v3174_v25, %v3174_v25  ;;  %v407_v62 = vsel %vm399_vm6, %v406_v56, %v3180_v51  ;;  %v768_v8 = vld [vmem:[#allocation2 + $0x24] sm:$0xf] }
  0xc7   : > { %v961_v19 = vpop.permute.xlu0 %960  ;;  %v3241_v33 = vpop.permute.xlu1 %962  ;;  %v676_v44 = vsel %vm669_vm4, %v675_v26, %v3158_v63  ;;  %v607_v63 = vcombine.high %v3185_v60, %v3185_v60  ;;  %v416_v6 = vmul.f32 %v3287_v52, %v407_v62  ;;  %v997_v60 = vld [vmem:[#allocation2 + $0x24] sm:$0xf] }
  0xc8   : > { %v973_v18 = vsel %vm968_vm7, %v959_v50, %v961_v19  ;;  %v974_v53 = vsel %vm968_vm7, %v961_v19, %v3241_v33  ;;  %v581_v50 = vrot.slane %v3176_v49, 4  ;;  %v1026_v51 = vmul.f32 %v1009_v24, %v997_v60  ;;  %v854_v19 = vld [vmem:[#allocation2 + $0x24] sm:$0xf] }
  0xc9   : > { %899 = vrot.lane.b32.xlu0 %v890_v61, %s2787_s23  ;;  %989 = vst [vmem:[#allocation3 + $0x68] sm:$0xf0] %v973_v18  ;;  %990 = vst [vmem:[#allocation3 + $0x130] sm:$0xf0] %v974_v53  ;;  %v425_v61 = vcombine.high %v415_v43, %v415_v43  ;;  %v4246_v53 = vrot.slane %v3130_v54, 4  ;;  %v892_v24 = vcombine.high %v3166_v15, %v3166_v15  ;;  %v1431_v26 = vld [vmem:[%s4235_s2] sm:$0xff] }
  0xca   : > { %816 = vrot.lane.b32.xlu1 %v805_v59, %s2786_s22  ;;  %v588_v36 = vsel %vm401_vm2, %v580_v45, %v581_v50  ;;  %v685_v45 = vmul.f32 %v676_v44, %v3287_v52  ;;  %v1035_v59 = vcombine.high %v3142_v4, %v3142_v4  ;;  %v532_v54 = vld [vmem:[#allocation2 + $0x20] sm:$0xf] }
  0xcb   : > { %v589_v1 = vsel %vm582_vm5, %v588_v36, %v3176_v49  ;;  %v883_v30 = vmul.f32 %v4246_v53, %v854_v19 }
  0xcc   : > { %v598_v5 = vmul.f32 %v3287_v52, %v589_v1  ;;  %v695_v49 = vcombine.low %v685_v45, %v685_v45 }
  0xcd   : > { %1046 = vrot.lane.b32.xlu0 %v1034_v2, %s2788_s24  ;;  %v656_v2 = vld [vmem:[#allocation2 + $0x20] sm:$0xf] }
  0xce   : > { %705 = vrot.lane.b32.xlu1 %v694_v17, %s2785_s21  ;;  %v599_v17 = vmul.f32 %v581_v50, %v532_v54  ;;  %v686_v57 = vmul.f32 %v668_v16, %v656_v2  ;;  %v608_v47 = vcombine.high %v598_v5, %v598_v5 }
  0xd1   : > { %903 = vrot.lane.b32.xlu0 %v891_v46, %s2787_s23  ;;  %v349_v46 = vld [vmem:[#allocation2 + $0x20] sm:$0xf] }
  0xd2   : > { %820 = vrot.lane.b32.xlu1 %v806_v20, %s2786_s22 }
  0xd5   : > { %615 = vrot.lane.b32.xlu0 %v606_v37, %s2784_s20  ;;  %v1445_v37 = vld [vmem:[%s4236_s3] sm:$0xff] }
  0xd6   : > { %435 = vrot.lane.b32.xlu1 %v415_v43, %s2783_s19 }
  0xd9   : > { %433 = vrot.lane.b32.xlu0 %v424_v58, %s2783_s19 }
  0xda   : > { %493 = vrot.lane.b32.xlu1 %v482_v40, %s2790_s26 }
  0xdd   : > { %491 = vrot.lane.b32.xlu0 %v2975_v42, %s2790_s26  ;;  %v483_v42 = vcombine.low %v3287_v52, %v3287_v52 }
  0xde   : > { %621 = vrot.lane.b32.xlu1 %v598_v5, %s2784_s20 }
  0xe1   : > { %619 = vrot.lane.b32.xlu0 %v607_v63, %s2784_s20 }
  0xe2   : > { %709 = vrot.lane.b32.xlu1 %v695_v49, %s2785_s21 }
  0xe5   : > { %707 = vrot.lane.b32.xlu0 %v684_v41, %s2785_s21  ;;  %v743_v41 = vld [vmem:[#allocation2 + $0x1c] sm:$0xff] }
  0xe6   : > { %439 = vrot.lane.b32.xlu1 %v416_v6, %s2783_s19  ;;  %v751_v18 = vcombine.high %v743_v41, %v743_v41  ;;  %762 = vst [vmem:[#allocation3 + $0xe0] sm:$0xf] %v743_v41 }
  0xe8   : > { %763 = vst [vmem:[#allocation3 + $0x88] sm:$0xf] %v751_v18 }
  0xe9   : > { %437 = vrot.lane.b32.xlu0 %v425_v61, %s2783_s19 }
  0xea   : > { %497 = vrot.lane.b32.xlu1 %v483_v42, %s2790_s26 }
  0xed   : > { %495 = vrot.lane.b32.xlu0 %v3174_v25, %s2790_s26  ;;  %v797_v25 = vmul.f32 %v780_v7, %v768_v8  ;;  %v696_v7 = vcombine.low %v686_v57, %v686_v57 }
  0xee   : > { %1052 = vrot.lane.b32.xlu1 %v1026_v51, %s2788_s24 }
  0xef   : > { %v807_v4 = vcombine.low %v797_v25, %v797_v25 }
  0xf1   : > { %1050 = vrot.lane.b32.xlu0 %v1035_v59, %s2788_s24 }
  0xf2   : > { %909 = vrot.lane.b32.xlu1 %v883_v30, %s2787_s23 }
  0xf5   : > { %907 = vrot.lane.b32.xlu0 %v892_v24, %s2787_s23 }
  0xf6   : > { %966 = vrot.lane.b32.xlu1 %v2768_v0, %s2789_s25 }
  0xf9   : > { %964 = vrot.lane.b32.xlu0 %v2911_v23, %s2789_s25  ;;  %v417_v23 = vmul.f32 %v398_v55, %v349_v46 }
  0xfa   : > { %824 = vrot.lane.b32.xlu1 %v807_v4, %s2786_s22 }
  0xfd   : > { %822 = vrot.lane.b32.xlu0 %v3257_v48, %s2786_s22  ;;  %v426_v48 = vcombine.high %v416_v6, %v416_v6 }
  0xfe   : > { %625 = vrot.lane.b32.xlu1 %v599_v17, %s2784_s20 }
  0xff   : > { %v894_v15 = vpop.permute.xlu1 %893  ;;  %v1037_v16 = vpop.permute.xlu0 %1036 }
 0x101   : > { %623 = vrot.lane.b32.xlu0 %v608_v47, %s2784_s20 }
 0x102   : > { %713 = vrot.lane.b32.xlu1 %v696_v7, %s2785_s21 }
 0x103   : > { %v3341_v20 = vpop.permute.xlu1 %810 }
 0x105   : > { %711 = vrot.lane.b32.xlu0 %v685_v45, %s2785_s21 }
 0x106   : > { %443 = vrot.lane.b32.xlu1 %v417_v23, %s2783_s19 }
 0x107   : > { %v3351_v43 = vpop.permute.xlu1 %1040 }
 0x109   : > { %441 = vrot.lane.b32.xlu0 %v426_v48, %s2783_s19 }
 0x10a   : > { %501 = vrot.lane.b32.xlu1 %v2769_v29, %s2790_s26 }
 0x10b   : > { %v3346_v50 = vpop.permute.xlu0 %699 }
 0x10d   : > { %499 = vrot.lane.b32.xlu0 %v3287_v52, %s2790_s26 }
 0x10e   : > { %1448 = vperm.xlu1 %2759, %v1445_v37  }
 0x10f   : > { %v610_v36 = vpop.permute.xlu0 %609 }
 0x110   : > { %v3358_v40 = vpop.permute.xlu1 %613 }
 0x111   : > { %1434 = vperm.xlu0 %2758, %v1431_v26  }
 0x112   : > { %2143 = vrot.lane.b32.xlu1 %v2870_v9, %s2783_s19 }
 0x113   : > { %v428_v58 = vpop.permute.xlu0 %427 }
 0x114   : > { %v3362_v44 = vpop.permute.xlu1 %431 }
 0x115   : > { %2145 = vrot.lane.b32.xlu0 %v2872_v10, %s2783_s19 }
 0x116   : > { %2147 = vrot.lane.b32.xlu1 %v2880_v13, %s2783_s19 }
 0x117   : > { %v3368_v52 = vpop.permute.xlu0 %897 }
 0x118   : > { %v3370_v1 = vpop.permute.xlu1 %1044 }
 0x119   : > { %2149 = vrot.lane.b32.xlu0 %v2882_v14, %s2783_s19 }
 0x11a   : > { %2151 = vrot.lane.b32.xlu1 %v2929_v27, %s2783_s19 }
 0x11b   : > { %v3376_v55 = vpop.permute.xlu0 %814 }
 0x11c   : > { %v3378_v45 = vpop.permute.xlu1 %901 }
 0x11d   : > { %1982 = vrot.lane.b32.xlu0 %v2875_v11, %s2784_s20 }
 0x11e   : > { %1984 = vrot.lane.b32.xlu1 %v2878_v12, %s2784_s20 }
 0x11f   : > { %v3384_v5 = vpop.permute.xlu0 %703 }
 0x120   : > { %v3386_v56 = vpop.permute.xlu1 %1048 }
 0x121   : > { %1986 = vrot.lane.b32.xlu0 %v2903_v21, %s2784_s20 }
 0x122   : > { %1988 = vrot.lane.b32.xlu1 %v2906_v22, %s2784_s20 }
 0x123   : > { %v3392_v63 = vpop.permute.xlu0 %818 }
 0x124   : > { %v3394_v49 = vpop.permute.xlu1 %905 }
 0x125   : > { %1990 = vrot.lane.b32.xlu0 %v2936_v31, %s2784_s20 }
 0x126   : > { %1881 = vrot.lane.b32.xlu1 %v2870_v9, %s2785_s21 }
 0x127   : > { %v1039_v62 = vpop.permute.xlu0 %1038 }
 0x128   : > { %v1054_v6 = vsel %vm399_vm6, %v1037_v16, %v1039_v62  ;;  %v1055_v42 = vsel %vm399_vm6, %v1039_v62, %v3351_v43  ;;  %v3403_v61 = vpop.permute.xlu1 %617 }
 0x129   : > { %1070 = vst [vmem:[#allocation3 + $0x58] sm:$0xf] %v1054_v6  ;;  %1071 = vst [vmem:[#allocation3 + $0x78] sm:$0xf] %v1055_v42  ;;  %1883 = vrot.lane.b32.xlu0 %v2872_v10, %s2785_s21 }
 0x12a   : > { %1885 = vrot.lane.b32.xlu1 %v2880_v13, %s2785_s21 }
 0x12b   : > { %v612_v60 = vpop.permute.xlu0 %611 }
 0x12c   : > { %v628_v51 = vsel %vm627_vm1, %v610_v36, %v612_v60  ;;  %v629_v19 = vsel %vm627_vm1, %v612_v60, %v3358_v40  ;;  %v896_v41 = vpop.permute.xlu1 %895 }
 0x12d   : > { %644 = vst [vmem:[#allocation3 + $0x80] sm:$0xf] %v628_v51  ;;  %645 = vst [vmem:[#allocation3 + $0x108] sm:$0xf] %v629_v19  ;;  %v911_v59 = vsel %vm582_vm5, %v894_v15, %v896_v41  ;;  %v912_v18 = vsel %vm582_vm5, %v896_v41, %v3368_v52  ;;  %1887 = vrot.lane.b32.xlu0 %v2882_v14, %s2785_s21 }
 0x12e   : > { %927 = vst [vmem:[#allocation3 + $0xc0] sm:$0xf] %v911_v59  ;;  %928 = vst [vmem:[#allocation3 + $0x118] sm:$0xf] %v912_v18  ;;  %1889 = vrot.lane.b32.xlu1 %v2929_v27, %s2785_s21  ;;  %v3480_v59 = vld [vmem:[%s4234_s1] sm:$0xff] }
 0x12f   : > { %v430_v53 = vpop.permute.xlu0 %429 }
 0x130   : > { %v446_v30 = vsel %vm445_vm0, %v428_v58, %v430_v53  ;;  %v447_v8 = vsel %vm445_vm0, %v430_v53, %v3362_v44  ;;  %v809_v0 = vpop.permute.xlu1 %808  ;;  %v1112_v24 = vld [vmem:[#allocation3 + $0x78] sm:$0xf] }
 0x131   : > { %v1111_v25 = vld [vmem:[#allocation3 + $0x58] sm:$0xf]  ;;  %462 = vst [vmem:[#allocation3 + $0xb0] sm:$0xf] %v446_v30  ;;  %463 = vst [vmem:[#allocation3 + $0xd0] sm:$0xf] %v447_v8  ;;  %v826_v4 = vsel %vm669_vm4, %v809_v0, %v3341_v20  ;;  %2720 = vmatprep.subr.msk.mxu0 %vm401_vm2, %v1112_v24  ;;  %1764 = vrot.lane.b32.xlu0 %v2875_v11, %s2786_s22 }
 0x132   : > { %842 = vst [vmem:[#allocation3 + $0x128] sm:$0xf0] %v826_v4  ;;  %2721 = vmatpush1.msk.msra.mxu0 %vm401_vm2, %v1111_v25  ;;  %1766 = vrot.lane.b32.xlu1 %v2878_v12, %s2786_s22 }
 0x133   : > { %v813_v54 = vpop.permute.xlu0 %812 }
 0x134   : > { %v827_v2 = vsel %vm669_vm4, %v3341_v20, %v813_v54  ;;  %v828_v17 = vsel %vm669_vm4, %v813_v54, %v3376_v55  ;;  %v698_v57 = vpop.permute.xlu1 %697 }
 0x135   : > { %843 = vst [vmem:[#allocation3 + $0x110] sm:$0xf0] %v827_v2  ;;  %844 = vst [vmem:[#allocation3 + $0x8] sm:$0xf0] %v828_v17  ;;  %v716_v47 = vsel %vm715_vm3, %v698_v57, %v3346_v50  ;;  %v1104_v15 = vld [vmem:[#allocation3 + $0x118] sm:$0xff]  ;;  %v1103_v7 = vld [vmem:[#allocation3 + $0xc0] sm:$0xff]  ;;  %1768 = vrot.lane.b32.xlu0 %v2903_v21, %s2786_s22 }
 0x136   : > { %732 = vst [vmem:[#allocation3 + $0x80] sm:$0xf0] %v716_v47  ;;  %1171 = vmatprep.subr.mxu0 %v1104_v15  ;;  %1770 = vrot.lane.b32.xlu1 %v2906_v22, %s2786_s22  ;;  %v4247_v17 = vmov 0.0  }
 0x137   : > { %1172 = vmatpush1.msra.mxu0 %v1103_v7  ;;  %v1043_v46 = vpop.permute.xlu0 %1042 }
 0x138   : > { %v1056_v23 = vsel %vm399_vm6, %v3351_v43, %v1043_v46  ;;  %v1057_v20 = vsel %vm399_vm6, %v1043_v46, %v3370_v1  ;;  %v702_v29 = vpop.permute.xlu1 %701  ;;  %v1080_v41 = vld [vmem:[#allocation3 + $0xd0] sm:$0xff] }
 0x139   : > { %1072 = vst [vmem:[#allocation3 + $0x30] sm:$0xf] %v1056_v23  ;;  %1073 = vst [vmem:[#allocation3 + $0x40] sm:$0xf] %v1057_v20  ;;  %v717_v16 = vsel %vm715_vm3, %v3346_v50, %v702_v29  ;;  %v718_v48 = vsel %vm715_vm3, %v702_v29, %v3384_v5  ;;  %1772 = vrot.lane.b32.xlu0 %v2936_v31, %s2786_s22  ;;  %v1095_v6 = vld [vmem:[#allocation3 + $0x128] sm:$0xff]  ;;  %v1079_v53 = vld [vmem:[#allocation3 + $0xb0] sm:$0xff] }
 0x13a   : > { %733 = vst [vmem:[#allocation3 + $0x108] sm:$0xf0] %v717_v16  ;;  %734 = vst [vmem:[#allocation3 + $0x138] sm:$0xf0] %v718_v48  ;;  %1663 = vrot.lane.b32.xlu1 %v2870_v9, %s2787_s23 }
 0x13b   : > { %v900_v37 = vpop.permute.xlu0 %899 }
 0x13c   : > { %v913_v43 = vsel %vm582_vm5, %v3368_v52, %v900_v37  ;;  %v914_v26 = vsel %vm582_vm5, %v900_v37, %v3378_v45  ;;  %v817_v36 = vpop.permute.xlu1 %816  ;;  %v1096_v50 = vld [vmem:[#allocation3 + $0x110] sm:$0xff]  ;;  %v1097_v24 = vld [vmem:[#allocation3 + $0x8] sm:$0xff] }
 0x13d   : > { %929 = vst [vmem:[#allocation3 + $0xd8] sm:$0xf] %v913_v43  ;;  %930 = vst [vmem:[#allocation3 + $0xa0] sm:$0xf] %v914_v26  ;;  %v829_v58 = vsel %vm669_vm4, %v3376_v55, %v817_v36  ;;  %v830_v62 = vsel %vm669_vm4, %v817_v36, %v3392_v63  ;;  %1173 = vmatprep.subr.mxu0 %v1096_v50  ;;  %1665 = vrot.lane.b32.xlu0 %v2872_v10, %s2787_s23 }
 0x13e   : > { %845 = vst [vmem:[#allocation3 + $0x98] sm:$0xf0] %v829_v58  ;;  %846 = vst [vmem:[#allocation3 + $0xa8] sm:$0xf0] %v830_v62  ;;  %1174 = vmatpush1.msra.mxu0 %v1095_v6  ;;  %1667 = vrot.lane.b32.xlu1 %v2880_v13, %s2787_s23 }
 0x13f   : > { %v1047_v9 = vpop.permute.xlu0 %1046 }
 0x140   : > { %v1058_v52 = vsel %vm399_vm6, %v3370_v1, %v1047_v9  ;;  %v1059_v55 = vsel %vm399_vm6, %v1047_v9, %v3386_v56  ;;  %v3468_v42 = vpop.permute.xlu1 %705  ;;  %v1114_v60 = vld [vmem:[#allocation3 + $0x40] sm:$0xf]  ;;  %v1113_v51 = vld [vmem:[#allocation3 + $0x30] sm:$0xf] }
 0x141   : > { %1074 = vst [vmem:[#allocation3 + $0x28] sm:$0xf] %v1058_v52  ;;  %1075 = vst [vmem:[#allocation3] sm:$0xf] %v1059_v55  ;;  %v719_v10 = vsel %vm715_vm3, %v3384_v5, %v3468_v42  ;;  %2723 = vmatprep.subr.msk.mxu1 %vm401_vm2, %v1114_v60  ;;  %v1088_v13 = vld [vmem:[#allocation3 + $0x108] sm:$0xff]  ;;  %1669 = vrot.lane.b32.xlu0 %v2882_v14, %s2787_s23  ;;  %v1087_v1 = vld [vmem:[#allocation3 + $0x80] sm:$0xff] }
 0x142   : > { %735 = vst [vmem:[#allocation3 + $0xf0] sm:$0xf0] %v719_v10  ;;  %1175 = vmatprep.subr.mxu0 %v1088_v13  ;;  %2724 = vmatpush1.msk.msra.mxu1 %vm401_vm2, %v1113_v51 }
 0x143   : > { %1176 = vmatpush1.msra.mxu0 %v1087_v1  ;;  %v904_v19 = vpop.permute.xlu0 %903  ;;  %1671 = vrot.lane.b32.xlu1 %v2929_v27, %s2787_s23 }
 0x144   : > { %v915_v14 = vsel %vm582_vm5, %v3378_v45, %v904_v19  ;;  %v916_v5 = vsel %vm582_vm5, %v904_v19, %v3394_v49  ;;  %v3488_v18 = vpop.permute.xlu1 %820  ;;  %1177 = vmatprep.subr.mxu0 %v1080_v41  ;;  %v1106_v30 = vld [vmem:[#allocation3 + $0xa0] sm:$0xff]  ;;  %v1105_v8 = vld [vmem:[#allocation3 + $0xd8] sm:$0xff] }
 0x145   : > { %931 = vst [vmem:[#allocation3 + $0x68] sm:$0xf] %v915_v14  ;;  %932 = vst [vmem:[#allocation3 + $0x130] sm:$0xf] %v916_v5  ;;  %v831_v0 = vsel %vm669_vm4, %v3392_v63, %v3488_v18  ;;  %1178 = vmatpush1.msra.mxu0 %v1079_v53  ;;  %1242 = vmatprep.subr.mxu1 %v1106_v30  ;;  %v1098_v27 = vld [vmem:[#allocation3 + $0x98] sm:$0xff]  ;;  %v1099_v23 = vld [vmem:[#allocation3 + $0xa8] sm:$0xff] }
 0x146   : > { %847 = vst [vmem:[#allocation3 + $0x90] sm:$0xf0] %v831_v0  ;;  %2722 = vmatmul.mubr.msk.f32.vlgmr.msra.gmra.mxu0 %vm1119_vm9, %v3480_v59  ;;  %1243 = vmatpush1.msra.mxu1 %v1105_v8 }
 0x147   : > { %1244 = vmatprep.subr.mxu1 %v1098_v27  ;;  %v616_v45 = vpop.permute.xlu0 %615  ;;  %1504 = vrot.lane.b32.xlu1 %v2878_v12, %s2788_s24 }
 0x148   : > { %v630_v25 = vsel %vm627_vm1, %v3358_v40, %v616_v45  ;;  %v631_v63 = vsel %vm627_vm1, %v616_v45, %v3403_v61  ;;  %v436_v4 = vpop.permute.xlu1 %435  ;;  %1245 = vmatpush1.msra.mxu1 %v1097_v24  ;;  %v1116_v54 = vld [vmem:[#allocation3] sm:$0xf]  ;;  %v1115_v2 = vld [vmem:[#allocation3 + $0x28] sm:$0xf]  ;;  %1353 = vmatprep.mubr.f32.mxu0 %v4247_v17 }
 0x149   : > { %646 = vst [vmem:[#allocation3 + $0x138] sm:$0xf] %v630_v25  ;;  %647 = vst [vmem:[#allocation3 + $0xf0] sm:$0xf] %v631_v63  ;;  %2726 = vmatprep.subr.msk.mxu0 %vm401_vm2, %v1116_v54  ;;  %1502 = vrot.lane.b32.xlu0 %v2875_v11, %s2788_s24 }
 0x14a   : > { %2727 = vmatpush1.msk.msra.mxu0 %vm401_vm2, %v1115_v2 }
 0x14b   : > { %v434_v12 = vpop.permute.xlu0 %433  ;;  %1508 = vrot.lane.b32.xlu1 %v2906_v22, %s2788_s24 }
 0x14c   : > { %v448_v40 = vsel %vm445_vm0, %v3362_v44, %v434_v12  ;;  %v449_v57 = vsel %vm445_vm0, %v434_v12, %v436_v4  ;;  %v494_v47 = vpop.permute.xlu1 %493  ;;  %v1108_v15 = vld [vmem:[#allocation3 + $0x130] sm:$0xff]  ;;  %v1107_v7 = vld [vmem:[#allocation3 + $0x68] sm:$0xff] }
 0x14d   : > { %464 = vst [vmem:[#allocation3 + $0x10] sm:$0xf] %v448_v40  ;;  %465 = vst [vmem:[#allocation3 + $0x48] sm:$0xf] %v449_v57  ;;  %1313 = vmatprep.subr.mxu0 %v1108_v15  ;;  %v1100_v46 = vld [vmem:[#allocation3 + $0x90] sm:$0xff]  ;;  %1506 = vrot.lane.b32.xlu0 %v2903_v21, %s2788_s24 }
 0x14e   : > { %1314 = vmatpush1.msra.mxu0 %v1107_v7 }
 0x14f   : > { %1315 = vmatprep.subr.mxu0 %v1100_v46  ;;  %v492_v11 = vpop.permute.xlu0 %491  ;;  %2153 = vrot.lane.b32.xlu1 %v2931_v28, %s2783_s19 }
 0x150   : > { %v506_v22 = vsel %vm503_vm8, %v3199_v3, %v492_v11  ;;  %v507_v44 = vsel %vm503_vm8, %v492_v11, %v494_v47  ;;  %v3518_v20 = vpop.permute.xlu1 %621  ;;  %1316 = vmatpush1.msra.mxu0 %v1099_v23  ;;  %v1090_v29 = vld [vmem:[#allocation3 + $0xf0] sm:$0xff]  ;;  %v1089_v16 = vld [vmem:[#allocation3 + $0x138] sm:$0xff] }
 0x151   : > { %522 = vst [vmem:[#allocation3 + $0x10] sm:$0xf0] %v506_v22  ;;  %523 = vst [vmem:[#allocation3 + $0x48] sm:$0xf0] %v507_v44  ;;  %1246 = vmatprep.subr.mxu1 %v1090_v29  ;;  %1510 = vrot.lane.b32.xlu0 %v2936_v31, %s2788_s24 }
 0x152   : > { %1247 = vmatpush1.msra.mxu1 %v1089_v16 }
 0x153   : > { %v620_v21 = vpop.permute.xlu0 %619  ;;  %2157 = vrot.lane.b32.xlu1 %v2947_v35, %s2783_s19 }
 0x154   : > { %v632_v3 = vsel %vm627_vm1, %v3403_v61, %v620_v21  ;;  %v633_v48 = vsel %vm627_vm1, %v620_v21, %v3518_v20  ;;  %v3528_v37 = vpop.permute.xlu1 %709 }
 0x155   : > { %648 = vst [vmem:[#allocation3 + $0x18] sm:$0xf] %v632_v3  ;;  %649 = vst [vmem:[#allocation3 + $0xc8] sm:$0xf] %v633_v48  ;;  %2155 = vrot.lane.b32.xlu0 %v2945_v34, %s2783_s19 }
 0x157   : > { %v708_v43 = vpop.permute.xlu0 %707  ;;  %1994 = vrot.lane.b32.xlu1 %v2958_v38, %s2784_s20 }
 0x158   : > { %v720_v31 = vsel %vm715_vm3, %v3468_v42, %v708_v43  ;;  %v721_v61 = vsel %vm715_vm3, %v708_v43, %v3528_v37  ;;  %v3538_v26 = vpop.permute.xlu1 %439  ;;  %v1082_v36 = vld [vmem:[#allocation3 + $0x48] sm:$0xff]  ;;  %v1081_v50 = vld [vmem:[#allocation3 + $0x10] sm:$0xff] }
 0x159   : > { %736 = vst [vmem:[#allocation3 + $0x18] sm:$0xf0] %v720_v31  ;;  %737 = vst [vmem:[#allocation3 + $0xc8] sm:$0xf0] %v721_v61  ;;  %1248 = vmatprep.subr.mxu1 %v1082_v36  ;;  %1992 = vrot.lane.b32.xlu0 %v2939_v32, %s2784_s20 }
 0x15a   : > { %1249 = vmatpush1.msra.mxu1 %v1081_v50 }
 0x15b   : > { %2725 = vmatmul.mubr.msk.f32.vlgmr.msra.gmra.mxu1 %vm1119_vm9, %v3480_v59  ;;  %v438_v58 = vpop.permute.xlu0 %437  ;;  %1891 = vrot.lane.b32.xlu1 %v2931_v28, %s2785_s21 }
 0x15c   : > { %v450_v62 = vsel %vm445_vm0, %v436_v4, %v438_v58  ;;  %v451_v6 = vsel %vm445_vm0, %v438_v58, %v3538_v26  ;;  %v3549_v9 = vpop.permute.xlu1 %497  ;;  %1424 = vmatprep.mubr.f32.mxu1 %v4247_v17 }
 0x15d   : > { %466 = vst [vmem:[#allocation3 + $0x120] sm:$0xf] %v450_v62  ;;  %467 = vst [vmem:[#allocation3 + $0x38] sm:$0xf] %v451_v6  ;;  %1996 = vrot.lane.b32.xlu0 %v2961_v39, %s2784_s20 }
 0x15f   : > { %v496_v52 = vpop.permute.xlu0 %495  ;;  %1895 = vrot.lane.b32.xlu1 %v2947_v35, %s2785_s21 }
 0x160   : > { %v508_v55 = vsel %vm503_vm8, %v494_v47, %v496_v52  ;;  %v509_v42 = vsel %vm503_vm8, %v496_v52, %v3549_v9  ;;  %v1053_v60 = vpop.permute.xlu1 %1052  ;;  %v1092_v51 = vld [vmem:[#allocation3 + $0xc8] sm:$0xff]  ;;  %v1091_v10 = vld [vmem:[#allocation3 + $0x18] sm:$0xff] }
 0x161   : > { %524 = vst [vmem:[#allocation3 + $0x120] sm:$0xf0] %v508_v55  ;;  %525 = vst [vmem:[#allocation3 + $0x38] sm:$0xf0] %v509_v42  ;;  %1317 = vmatprep.subr.mxu0 %v1092_v51  ;;  %1893 = vrot.lane.b32.xlu0 %v2945_v34, %s2785_s21 }
 0x162   : > { %1318 = vmatpush1.msra.mxu0 %v1091_v10 }
 0x163   : > { %v1051_v13 = vpop.permute.xlu0 %1050  ;;  %1776 = vrot.lane.b32.xlu1 %v2958_v38, %s2786_s22 }
 0x164   : > { %v1060_v1 = vsel %vm399_vm6, %v3386_v56, %v1051_v13  ;;  %v1061_v19 = vsel %vm399_vm6, %v1051_v13, %v1053_v60  ;;  %v910_v41 = vpop.permute.xlu1 %909 }
 0x165   : > { %1076 = vst [vmem:[#allocation3 + $0xb8] sm:$0xf] %v1060_v1  ;;  %1077 = vst [vmem:[#allocation3 + $0x60] sm:$0xf] %v1061_v19  ;;  %1774 = vrot.lane.b32.xlu0 %v2939_v32, %s2786_s22 }
 0x167   : > { %v908_v14 = vpop.permute.xlu0 %907  ;;  %1673 = vrot.lane.b32.xlu1 %v2931_v28, %s2787_s23 }
 0x168   : > { %v917_v5 = vsel %vm582_vm5, %v3394_v49, %v908_v14  ;;  %v918_v53 = vsel %vm582_vm5, %v908_v14, %v910_v41  ;;  %v967_v30 = vpop.permute.xlu1 %966  ;;  %v1084_v8 = vld [vmem:[#allocation3 + $0x38] sm:$0xff]  ;;  %v1083_v56 = vld [vmem:[#allocation3 + $0x120] sm:$0xff] }
 0x169   : > { %933 = vst [vmem:[#allocation3 + $0x50] sm:$0xf] %v917_v5  ;;  %934 = vst [vmem:[#allocation3 + $0xe8] sm:$0xf] %v918_v53  ;;  %1319 = vmatprep.subr.mxu0 %v1084_v8  ;;  %1778 = vrot.lane.b32.xlu0 %v2961_v39, %s2786_s22 }
 0x16a   : > { %1320 = vmatpush1.msra.mxu0 %v1083_v56 }
 0x16b   : > { %2728 = vmatmul.mubr.msk.f32.vlgmr.msra.gmra.mxu0 %vm1119_vm9, %v3480_v59  ;;  %v965_v0 = vpop.permute.xlu0 %964  ;;  %1677 = vrot.lane.b32.xlu1 %v2947_v35, %s2787_s23 }
 0x16c   : > { %v975_v28 = vsel %vm968_vm7, %v3241_v33, %v965_v0  ;;  %v976_v49 = vsel %vm968_vm7, %v965_v0, %v967_v30  ;;  %v825_v27 = vpop.permute.xlu1 %824  ;;  %v1118_v45 = vld [vmem:[#allocation3 + $0x60] sm:$0xf]  ;;  %v1117_v24 = vld [vmem:[#allocation3 + $0xb8] sm:$0xf]  ;;  %2376 = vmatprep.mubr.f32.mxu0 %v4247_v17 }
 0x16d   : > { %991 = vst [vmem:[#allocation3 + $0x50] sm:$0xf0] %v975_v28  ;;  %992 = vst [vmem:[#allocation3 + $0xe8] sm:$0xf0] %v976_v49  ;;  %2729 = vmatprep.subr.msk.mxu1 %vm401_vm2, %v1118_v45  ;;  %1675 = vrot.lane.b32.xlu0 %v2945_v34, %s2787_s23 }
 0x16e   : > { %2730 = vmatpush1.msk.msra.mxu1 %vm401_vm2, %v1117_v24 }
 0x16f   : > { %v823_v35 = vpop.permute.xlu0 %822  ;;  %1514 = vrot.lane.b32.xlu1 %v2958_v38, %s2788_s24 }
 0x170   : > { %v832_v33 = vsel %vm669_vm4, %v3488_v18, %v823_v35  ;;  %v833_v25 = vsel %vm669_vm4, %v823_v35, %v825_v27  ;;  %v626_v63 = vpop.permute.xlu1 %625 }
 0x171   : > { %848 = vst [vmem:[#allocation3 + $0xe0] sm:$0xf0] %v832_v33  ;;  %849 = vst [vmem:[#allocation3 + $0x88] sm:$0xf0] %v833_v25  ;;  %1512 = vrot.lane.b32.xlu0 %v2939_v32, %s2788_s24 }
 0x173   : > { %v624_v4 = vpop.permute.xlu0 %623 }
 0x174   : > { %v634_v34 = vsel %vm627_vm1, %v3518_v20, %v624_v4  ;;  %v635_v54 = vsel %vm627_vm1, %v624_v4, %v626_v63  ;;  %v714_v2 = vpop.permute.xlu1 %713  ;;  %v1110_v12 = vld [vmem:[#allocation3 + $0xe8] sm:$0xff]  ;;  %v1109_v38 = vld [vmem:[#allocation3 + $0x50] sm:$0xff] }
 0x175   : > { %650 = vst [vmem:[#allocation3 + $0x70] sm:$0xf] %v634_v34  ;;  %651 = vst [vmem:[#allocation3 + $0x20] sm:$0xf] %v635_v54  ;;  %1384 = vmatprep.subr.mxu1 %v1110_v12  ;;  %1516 = vrot.lane.b32.xlu0 %v2961_v39, %s2788_s24 }
 0x176   : > { %1385 = vmatpush1.msra.mxu1 %v1109_v38 }
 0x177   : > { %v712_v18 = vpop.permute.xlu0 %711 }
 0x178   : > { %v722_v32 = vsel %vm715_vm3, %v3528_v37, %v712_v18  ;;  %v723_v40 = vsel %vm715_vm3, %v712_v18, %v714_v2  ;;  %v1102_v57 = vld [vmem:[#allocation3 + $0x88] sm:$0xff]  ;;  %v1101_v47 = vld [vmem:[#allocation3 + $0xe0] sm:$0xff]  ;;  %v444_v15 = vpop.permute.xlu1 %443 }
 0x179   : > { %738 = vst [vmem:[#allocation3 + $0x70] sm:$0xf0] %v722_v32  ;;  %739 = vst [vmem:[#allocation3 + $0x20] sm:$0xf0] %v723_v40  ;;  %1386 = vmatprep.subr.mxu1 %v1102_v57 }
 0x17a   : > { %1387 = vmatpush1.msra.mxu1 %v1101_v47 }
 0x17b   : > { %v442_v7 = vpop.permute.xlu0 %441 }
 0x17c   : > { %v452_v46 = vsel %vm445_vm0, %v3538_v26, %v442_v7  ;;  %v453_v39 = vsel %vm445_vm0, %v442_v7, %v444_v15  ;;  %v502_v11 = vpop.permute.xlu1 %501 }
 0x17d   : > { %468 = vst [vmem:[#allocation3 + $0xf8] sm:$0xf] %v452_v46  ;;  %469 = vst [vmem:[#allocation3 + $0x100] sm:$0xf] %v453_v39 }
 0x17f   : > { %v500_v23 = vpop.permute.xlu0 %499 }
 0x180   : > { %v510_v22 = vsel %vm503_vm8, %v3549_v9, %v500_v23  ;;  %v511_v44 = vsel %vm503_vm8, %v500_v23, %v502_v11  ;;  %v1094_v20 = vld [vmem:[#allocation3 + $0x20] sm:$0xff]  ;;  %v1093_v29 = vld [vmem:[#allocation3 + $0x70] sm:$0xff] }
 0x181   : > { %526 = vst [vmem:[#allocation3 + $0xf8] sm:$0xf0] %v510_v22  ;;  %527 = vst [vmem:[#allocation3 + $0x100] sm:$0xf0] %v511_v44  ;;  %1388 = vmatprep.subr.mxu1 %v1094_v20 }
 0x182   : > { %1389 = vmatpush1.msra.mxu1 %v1093_v29 }
 0x188   : > { %v1086_v16 = vld [vmem:[#allocation3 + $0x100] sm:$0xff]  ;;  %v1085_v21 = vld [vmem:[#allocation3 + $0xf8] sm:$0xff] }
 0x189   : > { %1390 = vmatprep.subr.mxu1 %v1086_v16  ;;  %v3608_v3 = vpop.permute.xlu1 %1448 }
 0x18a   : > { %1391 = vmatpush1.msra.mxu1 %v1085_v21 }
 0x18b   : > { %2731 = vmatmul.mubr.msk.f32.vlgmr.msra.gmra.mxu1 %vm1119_vm9, %v3480_v59 }
 0x18c   : > { %v3612_v48 = vpop.permute.xlu0 %1434  ;;  %2447 = vmatprep.mubr.f32.mxu1 %v4247_v17 }
 0x18d   : > { %v3615_v37 = vpop.permute.xlu1 %2143 }
 0x190   : > { %v3617_v43 = vpop.permute.xlu0 %2145 }
 0x191   : > { %v3619_v31 = vpop.permute.xlu1 %2147 }
 0x194   : > { %v3621_v61 = vpop.permute.xlu0 %2149 }
 0x195   : > { %v3623_v26 = vpop.permute.xlu1 %2151 }
 0x198   : > { %v3625_v36 = vpop.permute.xlu0 %1982 }
 0x199   : > { %v3627_v50 = vpop.permute.xlu1 %1984 }
 0x19c   : > { %v3629_v58 = vpop.permute.xlu0 %1986 }
 0x19d   : > { %v3631_v59 = vpop.permute.xlu1 %1988 }
 0x1a0   : > { %v3633_v62 = vpop.permute.xlu0 %1990 }
 0x1a1   : > { %v3635_v6 = vpop.permute.xlu1 %1881 }
 0x1a4   : > { %v3637_v9 = vpop.permute.xlu0 %1883 }
 0x1a5   : > { %v3639_v52 = vpop.permute.xlu1 %1885 }
 0x1a8   : > { %v3641_v55 = vpop.permute.xlu0 %1887 }
 0x1a9   : > { %v3643_v42 = vpop.permute.xlu1 %1889 }
 0x1ac   : > { %v3645_v60 = vpop.permute.xlu0 %1764 }
 0x1ad   : > { %v3647_v51 = vpop.permute.xlu1 %1766  ;;  %v1796_v10 = vmul.f32 0.0, %v3645_v60 }
 0x1af   : > { %1814 = vrot.lane.b32.xlu1 %v1796_v10, %s2785_s21 }
 0x1b0   : > { %v3651_v13 = vpop.permute.xlu0 %1768 }
 0x1b1   : > { %v3653_v1 = vpop.permute.xlu1 %1770 }
 0x1b3   : > { %1612 = vrot.lane.b32.xlu1 %v4247_v17, %s2790_s26 }
 0x1b4   : > { %v3657_v19 = vpop.permute.xlu0 %1772 }
 0x1b5   : > { %v1664_v41 = vpop.permute.xlu1 %1663 }
 0x1b6   : > { %v1695_v14 = vmul.f32 0.0, %v1664_v41 }
 0x1b8   : > { %v3659_v5 = vpop.permute.xlu0 %1665  ;;  %1713 = vrot.lane.b32.xlu0 %v1695_v14, %s2784_s20 }
 0x1b9   : > { %v3662_v53 = vpop.permute.xlu1 %1667 }
 0x1bc   : > { %v3664_v30 = vpop.permute.xlu0 %1669 }
 0x1bd   : > { %v3666_v8 = vpop.permute.xlu1 %1671 }
 0x1c0   : > { %v1503_v56 = vpop.permute.xlu0 %1502 }
 0x1c1   : > { %v1505_v0 = vpop.permute.xlu1 %1504  ;;  %v1534_v28 = vmul.f32 0.0, %v1503_v56 }
 0x1c2   : > { %v1518_v49 = vsel %vm399_vm6, %v1503_v56, %v1505_v0  ;;  %v1679_v56 = vsel %vm582_vm5, %v1664_v41, %v3659_v5 }
 0x1c3   : > { %1552 = vrot.lane.b32.xlu0 %v1534_v28, %s2783_s19 }
 0x1c4   : > { %v1507_v27 = vpop.permute.xlu0 %1506 }
 0x1c5   : > { %v1509_v45 = vpop.permute.xlu1 %1508  ;;  %v3671_v24 = vsel %vm399_vm6, %v1505_v0, %v1507_v27 }
 0x1c6   : > { %v3674_v35 = vsel %vm399_vm6, %v1507_v27, %v1509_v45 }
 0x1c8   : > { %v3676_v33 = vpop.permute.xlu0 %1510 }
 0x1c9   : > { %v3678_v25 = vpop.permute.xlu1 %2153  ;;  %v3682_v63 = vsel %vm399_vm6, %v1509_v45, %v3676_v33 }
 0x1cc   : > { %v2156_v4 = vpop.permute.xlu0 %2155 }
 0x1cd   : > { %v3686_v34 = vsel %vm445_vm0, %v3678_v25, %v2156_v4  ;;  %v2158_v54 = vpop.permute.xlu1 %2157 }
 0x1ce   : > { %v3689_v2 = vsel %vm445_vm0, %v2156_v4, %v2158_v54  ;;  %v2183_v12 = vmul.f32 0.0, %v2158_v54 }
 0x1d0   : > { %v3691_v38 = vpop.permute.xlu0 %1992  ;;  %2209 = vrot.lane.b32.xlu0 %v2183_v12, %s2788_s24 }
 0x1d1   : > { %v1995_v18 = vpop.permute.xlu1 %1994 }
 0x1d2   : > { %v3696_v32 = vsel %vm627_vm1, %v3691_v38, %v1995_v18 }
 0x1d4   : > { %v1997_v40 = vpop.permute.xlu0 %1996  ;;  %2108 = vrot.lane.b32.xlu0 %v4247_v17, %s2789_s25 }
 0x1d5   : > { %v3700_v57 = vpop.permute.xlu1 %1891  ;;  %v3703_v47 = vsel %vm627_vm1, %v1995_v18, %v1997_v40  ;;  %v2022_v15 = vmul.f32 0.0, %v1997_v40  ;;  %v2160_v40 = vsel %vm445_vm0, %v3617_v43, %v3619_v31 }
 0x1d8   : > { %2048 = vrot.lane.b32.xlu0 %v2022_v15, %s2787_s23 }
 0x1d9   : > { %v3706_v7 = vpop.permute.xlu1 %1895 }
 0x1da   : > { %v1921_v46 = vmul.f32 0.0, %v3706_v7 }
 0x1dc   : > { %1947 = vrot.lane.b32.xlu0 %v1921_v46, %s2786_s22 }
 0x206   : > { %v1213_v39 = vpop.f32.mrf.mxu0 }
 0x207   : > { %v1437_v11 = vmul.f32 %v3612_v48, %v1213_v39 }
 0x208   : > { %v1215_v23 = vpop.f32.mrf.mxu0 }
 0x209   : > { %v1451_v22 = vadd.f32 %v3608_v3, %v1437_v11  ;;  %v1438_v44 = vmul.f32 %v3612_v48, %v1215_v23  ;;  %v1999_v23 = vsel %vm627_vm1, %v3627_v50, %v3629_v58 }
 0x20b   : > { %vm1459_vm10 = vcmp.gt.f32.partialorder %v1451_v22, 0.0  ;;  %v1467_v20 = vmul.f32 0.01, %v1451_v22  ;;  %v1452_v29 = vadd.f32 %v3608_v3, %v1438_v44 }
 0x20d   : > { %v3714_v16 = vsel %vm1459_vm10, %v1451_v22, %v1467_v20  ;;  %v1468_v21 = vmul.f32 0.01, %v1452_v29  ;;  %vm1460_vm11 = vcmp.gt.f32.partialorder %v1452_v29, 0.0  ;;  %v1681_v20 = vsel %vm582_vm5, %v3662_v53, %v3664_v30 }
 0x20e   : > { %1614 = vrot.lane.b32.xlu1 %v3714_v16, %s2790_s26  ;;  %2092 = vrot.lane.b32.xlu0 %v3714_v16, %s2789_s25  ;;  %v1913_v14 = vmul.f32 %v3635_v6, %v3714_v16  ;;  %v1696_v0 = vmul.f32 %v1679_v56, %v3714_v16  ;;  %v1535_v18 = vmul.f32 %v1518_v49, %v3714_v16  ;;  %vm2308_vm10 = vcmask 588800  }
 0x20f   : > { %v3720_v10 = vsel %vm1460_vm11, %v1452_v29, %v1468_v21  ;;  %v2175_v11 = vmul.f32 %v3615_v37, %v3714_v16  ;;  %v2014_v44 = vmul.f32 %v3625_v36, %v3714_v16  ;;  %v1780_v29 = vsel %vm669_vm4, %v3645_v60, %v3647_v51 }
 0x210   : > { %v1898_v56 = vsel %vm715_vm3, %v3637_v9, %v3639_v52  ;;  %v1782_v60 = vsel %vm669_vm4, %v3651_v13, %v3653_v1 }
 0x212   : > { %2094 = vrot.lane.b32.xlu0 %v3720_v10, %s2789_s25 }
 0x216   : > { %1931 = vrot.lane.b32.xlu0 %v1913_v14, %s2786_s22  ;;  %v1797_v14 = vmul.f32 %v1780_v29, %v3714_v16 }
 0x21a   : > { %1715 = vrot.lane.b32.xlu0 %v1696_v0, %s2784_s20 }
 0x21b   : > { %v1284_v28 = vpop.f32.mrf.mxu1 }
 0x21c   : > { %v1439_v27 = vmul.f32 %v3612_v48, %v1284_v28 }
 0x21d   : > { %v1286_v45 = vpop.f32.mrf.mxu1 }
 0x21e   : > { %v1453_v4 = vadd.f32 %v3608_v3, %v1439_v27  ;;  %v1440_v54 = vmul.f32 %v3612_v48, %v1286_v45  ;;  %1616 = vrot.lane.b32.xlu0 %v3720_v10, %s2790_s26  ;;  %v1897_v45 = vsel %vm715_vm3, %v3635_v6, %v3637_v9  ;;  %v1998_v6 = vsel %vm627_vm1, %v3625_v36, %v3627_v50 }
 0x21f   : > { %v1899_v9 = vsel %vm715_vm3, %v3639_v52, %v3641_v55  ;;  %v1783_v52 = vsel %vm669_vm4, %v3653_v1, %v3657_v19  ;;  %v2161_v1 = vsel %vm445_vm0, %v3619_v31, %v3621_v61 }
 0x220   : > { %vm1461_vm12 = vcmp.gt.f32.partialorder %v1453_v4, 0.0  ;;  %v1469_v12 = vmul.f32 0.01, %v1453_v4  ;;  %v1454_v41 = vadd.f32 %v3608_v3, %v1440_v54  ;;  %v1914_v54 = vmul.f32 %v1897_v45, %v3720_v10 }
 0x222   : > { %v3741_v15 = vsel %vm1461_vm12, %v1453_v4, %v1469_v12  ;;  %1554 = vrot.lane.b32.xlu0 %v1535_v18, %s2783_s19  ;;  %v1470_v39 = vmul.f32 0.01, %v1454_v41  ;;  %vm1462_vm13 = vcmp.gt.f32.partialorder %v1454_v41, 0.0  ;;  %v2159_v4 = vsel %vm445_vm0, %v3615_v37, %v3617_v43  ;;  %v3798_v18 = vpop.permute.xlu0 %1893 }
 0x223   : > { %2096 = vrot.lane.b32.xlu1 %v3741_v15, %s2789_s25  ;;  %v2177_v46 = vmul.f32 %v2160_v40, %v3741_v15  ;;  %v2016_v22 = vmul.f32 %v1999_v23, %v3741_v15  ;;  %v1698_v21 = vmul.f32 %v1681_v20, %v3741_v15  ;;  %v1915_v0 = vmul.f32 %v1898_v56, %v3741_v15 }
 0x224   : > { %v3750_v49 = vsel %vm1462_vm13, %v1454_v41, %v1470_v39  ;;  %v1537_v28 = vmul.f32 %v3674_v35, %v3741_v15  ;;  %v1799_v27 = vmul.f32 %v1782_v60, %v3741_v15  ;;  %v2176_v12 = vmul.f32 %v2159_v4, %v3720_v10 }
 0x225   : > { %v1781_v35 = vsel %vm669_vm4, %v3647_v51, %v3651_v13  ;;  %v2015_v43 = vmul.f32 %v1998_v6, %v3720_v10  ;;  %v1680_v51 = vsel %vm582_vm5, %v3659_v5, %v3662_v53  ;;  %v1916_v36 = vmul.f32 %v1899_v9, %v3750_v49  ;;  %v1777_v9 = vpop.permute.xlu1 %1776 }
 0x226   : > { %2197 = vrot.lane.b32.xlu0 %v2177_v46, %s2788_s24  ;;  %v1798_v37 = vmul.f32 %v1781_v35, %v3720_v10  ;;  %v3818_v13 = vpop.permute.xlu0 %1774  ;;  %v1697_v50 = vmul.f32 %v1680_v51, %v3720_v10  ;;  %v1800_v5 = vmul.f32 %v1783_v52, %v3750_v49  ;;  %v1536_v53 = vmul.f32 %v3671_v24, %v3720_v10 }
 0x227   : > { %1618 = vrot.lane.b32.xlu1 %v3741_v15, %s2790_s26 }
 0x229   : > { %v1674_v52 = vpop.permute.xlu1 %1673 }
 0x22a   : > { %2098 = vrot.lane.b32.xlu0 %v3750_v49, %s2789_s25  ;;  %v3828_v46 = vpop.permute.xlu0 %1778 }
 0x22b   : > { %2193 = vrot.lane.b32.xlu1 %v2175_v11, %s2788_s24  ;;  %v1355_v41 = vpop.f32.mrf.mxu0 }
 0x22c   : > { %v1441_v40 = vmul.f32 %v3612_v48, %v1355_v41  ;;  %v1900_v41 = vsel %vm715_vm3, %v3641_v55, %v3643_v42  ;;  %v1785_v55 = vsel %vm669_vm4, %v3818_v13, %v1777_v9 }
 0x22d   : > { %v1357_v29 = vpop.f32.mrf.mxu0 }
 0x22e   : > { %2036 = vrot.lane.b32.xlu0 %v2016_v22, %s2787_s23  ;;  %v1455_v39 = vadd.f32 %v3608_v3, %v1441_v40  ;;  %v2178_v22 = vmul.f32 %v2161_v1, %v3750_v49 }
 0x22f   : > { %2032 = vrot.lane.b32.xlu1 %v2014_v44, %s2787_s23  ;;  %v3841_v44 = vpop.permute.xlu0 %1675 }
 0x230   : > { %v1471_v20 = vmul.f32 0.01, %v1455_v39  ;;  %vm1463_vm14 = vcmp.gt.f32.partialorder %v1455_v39, 0.0 }
 0x232   : > { %1719 = vrot.lane.b32.xlu0 %v1698_v21, %s2784_s20  ;;  %v2000_v21 = vsel %vm627_vm1, %v3629_v58, %v3631_v59  ;;  %v3849_v56 = vsel %vm1463_vm14, %v1455_v39, %v1471_v20  ;;  %v1682_v58 = vsel %vm582_vm5, %v3664_v30, %v3666_v8  ;;  %v1538_v30 = vmul.f32 %v3682_v63, %v3750_v49  ;;  %v1678_v39 = vpop.permute.xlu1 %1677 }
 0x233   : > { %1816 = vrot.lane.b32.xlu1 %v1797_v14, %s2785_s21  ;;  %v2017_v31 = vmul.f32 %v2000_v21, %v3750_v49  ;;  %v1699_v45 = vmul.f32 %v1682_v58, %v3750_v49  ;;  %v1917_v51 = vmul.f32 %v1900_v41, %v3849_v56  ;;  %v1683_v20 = vsel %vm582_vm5, %v3666_v8, %v1674_v52 }
 0x234   : > { %v1786_v21 = vsel %vm669_vm4, %v1777_v9, %v3828_v46 }
 0x236   : > { %1620 = vrot.lane.b32.xlu0 %v3750_v49, %s2790_s26 }
 0x237   : > { %1935 = vrot.lane.b32.xlu1 %v1915_v0, %s2786_s22  ;;  %v1442_v0 = vmul.f32 %v3612_v48, %v1357_v29  ;;  %v1515_v29 = vpop.permute.xlu1 %1514 }
 0x23a   : > { %1558 = vrot.lane.b32.xlu0 %v1537_v28, %s2783_s19  ;;  %v2162_v28 = vsel %vm445_vm0, %v3621_v61, %v3623_v26  ;;  %v2001_v61 = vsel %vm627_vm1, %v3631_v59, %v3633_v62 }
 0x23b   : > { %1820 = vrot.lane.b32.xlu1 %v1799_v27, %s2785_s21  ;;  %v3863_v27 = vpop.permute.xlu0 %1512  ;;  %v2179_v4 = vmul.f32 %v2162_v28, %v3849_v56  ;;  %v2018_v35 = vmul.f32 %v2001_v61, %v3849_v56  ;;  %v1685_v28 = vsel %vm582_vm5, %v3841_v44, %v1678_v39 }
 0x23e   : > { %1933 = vrot.lane.b32.xlu0 %v1914_v54, %s2786_s22  ;;  %v1456_v54 = vadd.f32 %v3608_v3, %v1442_v0 }
 0x23f   : > { %2195 = vrot.lane.b32.xlu1 %v2176_v12, %s2788_s24  ;;  %v3873_v12 = vpop.permute.xlu0 %1516 }
 0x240   : > { %v1472_v6 = vmul.f32 0.01, %v1456_v54  ;;  %vm1464_vm2 = vcmp.gt.f32.partialorder %v1456_v54, 0.0 }
 0x242   : > { %1818 = vrot.lane.b32.xlu0 %v1798_v37, %s2785_s21 }
 0x243   : > { %2034 = vrot.lane.b32.xlu1 %v2015_v43, %s2787_s23  ;;  %v3880_v37 = vpop.permute.xlu0 %1713  ;;  %v3882_v43 = vsel %vm1464_vm2, %v1456_v54, %v1472_v6  ;;  %v2163_v54 = vsel %vm445_vm0, %v3623_v26, %v3678_v25  ;;  %v3971_v26 = vpop.permute.xlu1 %1814  ;;  %v1901_v25 = vsel %vm715_vm3, %v3643_v42, %v3700_v57 }
 0x244   : > { %v2180_v61 = vmul.f32 %v2163_v54, %v3882_v43 }
 0x246   : > { %1937 = vrot.lane.b32.xlu0 %v1916_v36, %s2786_s22 }
 0x247   : > { %1717 = vrot.lane.b32.xlu1 %v1697_v50, %s2784_s20  ;;  %v3890_v63 = vpop.permute.xlu0 %1552  ;;  %v3982_v41 = vpop.permute.xlu1 %1612 }
 0x24a   : > { %1822 = vrot.lane.b32.xlu0 %v1800_v5, %s2785_s21 }
 0x24b   : > { %v1426_v11 = vpop.f32.mrf.mxu1  ;;  %1556 = vrot.lane.b32.xlu1 %v1536_v53, %s2783_s19  ;;  %v3906_v40 = vpop.permute.xlu0 %2209 }
 0x24c   : > { %v1443_v23 = vmul.f32 %v3612_v48, %v1426_v11  ;;  %v1802_v11 = vmul.f32 %v1785_v55, %v3882_v43 }
 0x24d   : > { %v1428_v50 = vpop.f32.mrf.mxu1 }
 0x24e   : > { %v1457_v24 = vadd.f32 %v3608_v3, %v1443_v23  ;;  %v1444_v53 = vmul.f32 %v3612_v48, %v1428_v50  ;;  %v1684_v23 = vsel %vm582_vm5, %v1674_v52, %v3841_v44 }
 0x24f   : > { %2199 = vrot.lane.b32.xlu1 %v2178_v22, %s2788_s24  ;;  %v3923_v48 = vpop.permute.xlu0 %2108 }
 0x250   : > { %vm1465_vm15 = vcmp.gt.f32.partialorder %v1457_v24, 0.0  ;;  %v1473_v14 = vmul.f32 0.01, %v1457_v24  ;;  %v1458_v22 = vadd.f32 %v3608_v3, %v1444_v53 }
 0x252   : > { %v3852_v60 = vsel %vm1465_vm15, %v1457_v24, %v1473_v14  ;;  %v1474_v24 = vmul.f32 0.01, %v1458_v22  ;;  %vm1466_vm9 = vcmp.gt.f32.partialorder %v1458_v22, 0.0  ;;  %v1523_v14 = vsel %vm399_vm6, %v3863_v27, %v1515_v29 }
 0x253   : > { %2038 = vrot.lane.b32.xlu1 %v2017_v31, %s2787_s23  ;;  %2104 = vrot.lane.b32.xlu0 %v3852_v60, %s2789_s25  ;;  %v2181_v59 = vmul.f32 %v3686_v34, %v3852_v60  ;;  %v2020_v36 = vmul.f32 %v3696_v32, %v3852_v60  ;;  %v1902_v34 = vsel %vm715_vm3, %v3700_v57, %v3798_v18  ;;  %v3933_v3 = vpop.permute.xlu0 %2048 }
 0x254   : > { %v1919_v5 = vmul.f32 %v1902_v34, %v3852_v60  ;;  %v1784_v32 = vsel %vm669_vm4, %v3657_v19, %v3818_v13  ;;  %v1700_v19 = vmul.f32 %v1683_v20, %v3849_v56  ;;  %v1701_v13 = vmul.f32 %v1684_v23, %v3882_v43 }
 0x255   : > { %v1801_v1 = vmul.f32 %v1784_v32, %v3849_v56  ;;  %v3939_v8 = vsel %vm1466_vm9, %v1458_v22, %v1474_v24  ;;  %v1540_v31 = vmul.f32 %v1523_v14, %v3882_v43  ;;  %v1803_v0 = vmul.f32 %v1786_v21, %v3852_v60 }
 0x256   : > { %v1542_v6 = vmul.f32 %v3873_v12, %v3939_v8  ;;  %v2021_v50 = vmul.f32 %v3703_v47, %v3939_v8  ;;  %v1903_v34 = vsel %vm715_vm3, %v3798_v18, %v3706_v7  ;;  %v1522_v7 = vsel %vm399_vm6, %v3676_v33, %v3863_v27  ;;  %v2596_v33 = vld [vmem:[%s4238_s5] sm:$0xff] }
 0x257   : > { %1721 = vrot.lane.b32.xlu1 %v1699_v45, %s2784_s20  ;;  %2201 = vrot.lane.b32.xlu0 %v2179_v4, %s2788_s24  ;;  %v3949_v58 = vpop.permute.xlu0 %1947  ;;  %v1702_v45 = vmul.f32 %v1685_v28, %v3852_v60  ;;  %v1804_v4 = vmul.f32 %v3828_v46, %v3939_v8  ;;  %v2002_v46 = vsel %vm627_vm1, %v3633_v62, %v3691_v38  ;;  %v2610_v62 = vld [vmem:[%s4239_s6] sm:$0xff] }
 0x258   : > { %v1918_v38 = vmul.f32 %v1901_v25, %v3882_v43 }
 0x25b   : > { %1560 = vrot.lane.b32.xlu1 %v1538_v30, %s2783_s19  ;;  %2040 = vrot.lane.b32.xlu0 %v2018_v35, %s2787_s23  ;;  %v1703_v30 = vmul.f32 %v1678_v39, %v3939_v8  ;;  %v1539_v39 = vmul.f32 %v1522_v7, %v3849_v56 }
 0x25f   : > { %2100 = vrot.lane.b32.xlu1 %v3849_v56, %s2789_s25  ;;  %1624 = vrot.lane.b32.xlu0 %v3882_v43, %s2790_s26 }
 0x263   : > { %1622 = vrot.lane.b32.xlu1 %v3849_v56, %s2790_s26  ;;  %2205 = vrot.lane.b32.xlu0 %v2181_v59, %s2788_s24  ;;  %v2019_v59 = vmul.f32 %v2002_v46, %v3882_v43 }
 0x267   : > { %1939 = vrot.lane.b32.xlu1 %v1917_v51, %s2786_s22  ;;  %2044 = vrot.lane.b32.xlu0 %v2020_v36, %s2787_s23  ;;  %v2182_v36 = vmul.f32 %v3689_v2, %v3939_v8  ;;  %v1920_v2 = vmul.f32 %v1903_v34, %v3939_v8 }
 0x26b   : > { %2102 = vrot.lane.b32.xlu1 %v3882_v43, %s2789_s25  ;;  %1943 = vrot.lane.b32.xlu0 %v1919_v5, %s2786_s22 }
 0x26f   : > { %1826 = vrot.lane.b32.xlu0 %v1802_v11, %s2785_s21  ;;  %1824 = vrot.lane.b32.xlu1 %v1801_v1, %s2785_s21  ;;  %v1524_v11 = vsel %vm399_vm6, %v1515_v29, %v3873_v12 }
 0x270   : > { %v1541_v23 = vmul.f32 %v1524_v11, %v3852_v60 }
 0x273   : > { %1723 = vrot.lane.b32.xlu1 %v1700_v19, %s2784_s20  ;;  %1725 = vrot.lane.b32.xlu0 %v1701_v13, %s2784_s20 }
 0x277   : > { %2106 = vrot.lane.b32.xlu1 %v3939_v8, %s2789_s25  ;;  %1628 = vrot.lane.b32.xlu0 %v3939_v8, %s2790_s26 }
 0x27b   : > { %1828 = vrot.lane.b32.xlu1 %v1803_v0, %s2785_s21  ;;  %1564 = vrot.lane.b32.xlu0 %v1540_v31, %s2783_s19 }
 0x27f   : > { %1727 = vrot.lane.b32.xlu1 %v1702_v45, %s2784_s20  ;;  %1830 = vrot.lane.b32.xlu0 %v1804_v4, %s2785_s21 }
 0x280   : > { %v2093_v44 = vpop.permute.xlu0 %2092  ;;  %v3992_v57 = vpop.permute.xlu1 %1614 }
 0x283   : > { %2203 = vrot.lane.b32.xlu1 %v2180_v61, %s2788_s24  ;;  %1729 = vrot.lane.b32.xlu0 %v1703_v30, %s2784_s20  ;;  %s2739_s20 = sshll.u32 %s4249_s10, 6 }
 0x284   : > { %v2095_v35 = vpop.permute.xlu0 %2094 }
 0x285   : > { %v2110_v28 = vsel %vm968_vm7, %v2093_v44, %v2095_v35 }
 0x287   : > { %2042 = vrot.lane.b32.xlu1 %v2019_v59, %s2787_s23  ;;  %1568 = vrot.lane.b32.xlu0 %v1542_v6, %s2783_s19 }
 0x288   : > { %v1932_v9 = vpop.permute.xlu0 %1931 }
 0x28b   : > { %1941 = vrot.lane.b32.xlu1 %v1918_v38, %s2786_s22  ;;  %2613 = vperm.xlu0 %2758, %v2610_v62  }
 0x28c   : > { %v3985_v51 = vpop.permute.xlu0 %1715 }
 0x28f   : > { %2207 = vrot.lane.b32.xlu1 %v2182_v36, %s2788_s24 }
 0x290   : > { %v3990_v42 = vpop.permute.xlu0 %1616 }
 0x293   : > { %2046 = vrot.lane.b32.xlu1 %v2021_v50, %s2787_s23  ;;  %s4220_s23 = scalar_lea.vmem %s4242_s9, %s2739_s20 }
 0x294   : > { %v4000_v52 = vpop.permute.xlu0 %1554 }
 0x295   : > { %v4002_v5 = vpop.permute.xlu1 %2096 }
 0x296   : > { %v2111_v0 = vsel %vm968_vm7, %v2095_v35, %v4002_v5 }
 0x297   : > { %1945 = vrot.lane.b32.xlu1 %v1920_v2, %s2786_s22 }
 0x298   : > { %v4006_v55 = vpop.permute.xlu0 %2197 }
 0x299   : > { %v4008_v53 = vpop.permute.xlu1 %1618 }
 0x29a   : > { %v4013_v47 = vsel %vm503_vm8, %v3990_v42, %v4008_v53 }
 0x29b   : > { %1626 = vrot.lane.b32.xlu1 %v3852_v60, %s2790_s26 }
 0x29c   : > { %v4020_v18 = vpop.permute.xlu0 %2098 }
 0x29d   : > { %v2194_v32 = vpop.permute.xlu1 %2193 }
 0x29f   : > { %1562 = vrot.lane.b32.xlu1 %v1539_v39, %s2783_s19  ;;  %v2112_v39 = vsel %vm968_vm7, %v4002_v5, %v4020_v18 }
 0x2a0   : > { %v4026_v1 = vpop.permute.xlu0 %2036 }
 0x2a1   : > { %v2033_v22 = vpop.permute.xlu1 %2032 }
 0x2a3   : > { %1566 = vrot.lane.b32.xlu1 %v1541_v23, %s2783_s19 }
 0x2a4   : > { %v4030_v20 = vpop.permute.xlu0 %1719 }
 0x2a5   : > { %v1817_v27 = vpop.permute.xlu1 %1816 }
 0x2a6   : > { %v1832_v59 = vsel %vm715_vm3, %v3971_v26, %v1817_v27  ;;  %v1630_v26 = vsel %vm503_vm8, %v3982_v41, %v3992_v57 }
 0x2a7   : > { %2599 = vperm.xlu1 %2759, %v2596_v33  }
 0x2a8   : > { %v4035_v19 = vpop.permute.xlu0 %1620 }
 0x2a9   : > { %v4037_v12 = vpop.permute.xlu1 %1935 }
 0x2ac   : > { %v4039_v13 = vpop.permute.xlu0 %1558 }
 0x2ad   : > { %v4041_v24 = vpop.permute.xlu1 %1820 }
 0x2b0   : > { %v1934_v29 = vpop.permute.xlu0 %1933 }
 0x2b1   : > { %v2196_v21 = vpop.permute.xlu1 %2195  ;;  %v1950_v30 = vsel %vm669_vm4, %v1934_v29, %v4037_v12  ;;  %v1949_v46 = vsel %vm669_vm4, %v1932_v9, %v1934_v29 }
 0x2b2   : > { %v2211_v14 = vsel %vm399_vm6, %v2194_v32, %v2196_v21  ;;  %v2212_v31 = vsel %vm399_vm6, %v2196_v21, %v4006_v55 }
 0x2b3   : > { %2326 = vmatprep.subr.mxu0 %v2212_v31 }
 0x2b4   : > { %2327 = vmatpush1.msra.mxu0 %v2211_v14  ;;  %v4049_v45 = vpop.permute.xlu0 %1818 }
 0x2b5   : > { %v2035_v4 = vpop.permute.xlu1 %2034  ;;  %2328 = vmatprep.subr.mxu0 %v2111_v0  ;;  %v1833_v35 = vsel %vm715_vm3, %v1817_v27, %v4049_v45  ;;  %v1834_v21 = vsel %vm715_vm3, %v4049_v45, %v4041_v24 }
 0x2b6   : > { %v2050_v54 = vsel %vm582_vm5, %v2033_v22, %v2035_v4  ;;  %2329 = vmatpush1.msra.mxu0 %v2110_v28  ;;  %v2051_v61 = vsel %vm582_vm5, %v2035_v4, %v4026_v1 }
 0x2b7   : > { %2330 = vmatprep.subr.mxu0 %v2051_v61 }
 0x2b8   : > { %2331 = vmatpush1.msra.mxu0 %v2050_v54  ;;  %v1938_v44 = vpop.permute.xlu0 %1937 }
 0x2b9   : > { %v4057_v6 = vpop.permute.xlu1 %1717  ;;  %2332 = vmatprep.subr.mxu0 %v1950_v30  ;;  %v1951_v29 = vsel %vm669_vm4, %v4037_v12, %v1938_v44 }
 0x2ba   : > { %2333 = vmatpush1.msra.mxu0 %v1949_v46  ;;  %v1732_v9 = vsel %vm627_vm1, %v3985_v51, %v4057_v6 }
 0x2bb   : > { %2334 = vmatprep.subr.mxu0 %v3720_v10  ;;  %v1731_v10 = vsel %vm627_vm1, %v3880_v37, %v3985_v51  ;;  %v4087_v37 = vld [vmem:[%s4237_s4] sm:$0xff]  ;;  %v1570_v51 = vsel %vm445_vm0, %v3890_v63, %v4000_v52 }
 0x2bc   : > { %2335 = vmatpush1.msra.mxu0 %v3714_v16  ;;  %v1631_v16 = vsel %vm503_vm8, %v3992_v57, %v3990_v42  ;;  %v4079_v62 = vpop.permute.xlu0 %1822 }
 0x2bd   : > { %v4065_v25 = vpop.permute.xlu1 %1556  ;;  %2336 = vmatprep.subr.mxu0 %v1833_v35 }
 0x2be   : > { %2337 = vmatpush1.msra.mxu0 %v1832_v59  ;;  %v1571_v36 = vsel %vm445_vm0, %v4000_v52, %v4065_v25  ;;  %v1572_v0 = vsel %vm445_vm0, %v4065_v25, %v4039_v13 }
 0x2bf   : > { %2338 = vmatprep.subr.mxu0 %v1732_v9 }
 0x2c0   : > { %2339 = vmatpush1.msra.mxu0 %v1731_v10 }
 0x2c1   : > { %v2200_v38 = vpop.permute.xlu1 %2199  ;;  %2340 = vmatprep.subr.mxu0 %v1631_v16 }
 0x2c2   : > { %2341 = vmatpush1.msra.mxu0 %v1630_v26  ;;  %v2213_v2 = vsel %vm399_vm6, %v4006_v55, %v2200_v38 }
 0x2c3   : > { %2342 = vmatprep.subr.mxu0 %v1571_v36 }
 0x2c4   : > { %2343 = vmatpush1.msra.mxu0 %v1570_v51 }
 0x2c5   : > { %v2039_v41 = vpop.permute.xlu1 %2038  ;;  %2732 = vmatmul.mubr.msk.f32.vlgmr.msra.gmra.mxu0 %vm2308_vm10, %v4087_v37  ;;  %v4094_v42 = vpop.permute.xlu0 %2104 }
 0x2c6   : > { %2518 = vmatprep.mubr.f32.mxu0 %v4247_v17  ;;  %v2052_v55 = vsel %vm582_vm5, %v4026_v1, %v2039_v41  ;;  %v1835_v1 = vsel %vm715_vm3, %v4041_v24, %v4079_v62 }
 0x2c9   : > { %v4097_v57 = vpop.permute.xlu1 %1721  ;;  %v2202_v50 = vpop.permute.xlu0 %2201 }
 0x2ca   : > { %v2214_v34 = vsel %vm399_vm6, %v2200_v38, %v2202_v50  ;;  %v1734_v12 = vsel %vm627_vm1, %v4030_v20, %v4097_v57 }
 0x2cb   : > { %2397 = vmatprep.subr.mxu1 %v2214_v34 }
 0x2cc   : > { %2398 = vmatpush1.msra.mxu1 %v2213_v2 }
 0x2cd   : > { %v4102_v63 = vpop.permute.xlu1 %1560  ;;  %v2041_v52 = vpop.permute.xlu0 %2040 }
 0x2ce   : > { %v2053_v11 = vsel %vm582_vm5, %v2039_v41, %v2041_v52  ;;  %v1573_v24 = vsel %vm445_vm0, %v4039_v13, %v4102_v63 }
 0x2d1   : > { %v2101_v7 = vpop.permute.xlu1 %2100  ;;  %v4114_v22 = vpop.permute.xlu0 %1624 }
 0x2d2   : > { %v2113_v32 = vsel %vm968_vm7, %v4020_v18, %v2101_v7 }
 0x2d3   : > { %2399 = vmatprep.subr.mxu1 %v2113_v32 }
 0x2d4   : > { %2400 = vmatpush1.msra.mxu1 %v2112_v39 }
 0x2d5   : > { %v4112_v23 = vpop.permute.xlu1 %1622  ;;  %2401 = vmatprep.subr.mxu1 %v2053_v11  ;;  %v2206_v5 = vpop.permute.xlu0 %2205 }
 0x2d6   : > { %2402 = vmatpush1.msra.mxu1 %v2052_v55  ;;  %v1635_v2 = vsel %vm503_vm8, %v4112_v23, %v4114_v22 }
 0x2d9   : > { %v1940_v33 = vpop.permute.xlu1 %1939  ;;  %v2045_v31 = vpop.permute.xlu0 %2044 }
 0x2da   : > { %v1952_v27 = vsel %vm669_vm4, %v1938_v44, %v1940_v33 }
 0x2db   : > { %2403 = vmatprep.subr.mxu1 %v1952_v27 }
 0x2dc   : > { %2404 = vmatpush1.msra.mxu1 %v1951_v29 }
 0x2dd   : > { %v2103_v18 = vpop.permute.xlu1 %2102  ;;  %2405 = vmatprep.subr.mxu1 %v3750_v49  ;;  %v1733_v49 = vsel %vm627_vm1, %v4057_v6, %v4030_v20 }
 0x2de   : > { %2406 = vmatpush1.msra.mxu1 %v3741_v15  ;;  %v1633_v15 = vsel %vm503_vm8, %v4008_v53, %v4035_v19  ;;  %v1944_v53 = vpop.permute.xlu0 %1943  ;;  %v2114_v46 = vsel %vm968_vm7, %v2101_v7, %v2103_v18 }
 0x2df   : > { %2407 = vmatprep.subr.mxu1 %v1835_v1 }
 0x2e0   : > { %2408 = vmatpush1.msra.mxu1 %v1834_v21 }
 0x2e1   : > { %v1825_v14 = vpop.permute.xlu1 %1824  ;;  %2409 = vmatprep.subr.mxu1 %v1734_v12 }
 0x2e2   : > { %2410 = vmatpush1.msra.mxu1 %v1733_v49  ;;  %v1836_v41 = vsel %vm715_vm3, %v4079_v62, %v1825_v14 }
 0x2e3   : > { %2411 = vmatprep.subr.mxu1 %v1633_v15 }
 0x2e4   : > { %2412 = vmatpush1.msra.mxu1 %v4013_v47  ;;  %v4148_v47 = vpop.permute.xlu0 %1826 }
 0x2e5   : > { %v1724_v20 = vpop.permute.xlu1 %1723  ;;  %2413 = vmatprep.subr.mxu1 %v1573_v24  ;;  %v1837_v36 = vsel %vm715_vm3, %v1825_v14, %v4148_v47 }
 0x2e6   : > { %2414 = vmatpush1.msra.mxu1 %v1572_v0 }
 0x2e7   : > { %2733 = vmatmul.mubr.msk.f32.vlgmr.msra.gmra.mxu1 %vm2308_vm10, %v4087_v37 }
 0x2e8   : > { %2589 = vmatprep.mubr.f32.mxu1 %v4247_v17  ;;  %v4152_v54 = vpop.permute.xlu0 %1725  ;;  %v2115_v17 = vsel %vm968_vm7, %v2103_v18, %v4094_v42 }
 0x2e9   : > { %v2107_v28 = vpop.permute.xlu1 %2106 }
 0x2ea   : > { %v2116_v34 = vsel %vm968_vm7, %v4094_v42, %v2107_v28 }
 0x2ec   : > { %v1629_v59 = vpop.permute.xlu0 %1628 }
 0x2ed   : > { %v4146_v45 = vpop.permute.xlu1 %1828 }
 0x2f0   : > { %v1565_v16 = vpop.permute.xlu0 %1564 }
 0x2f1   : > { %v4150_v4 = vpop.permute.xlu1 %1727 }
 0x2f2   : > { %v1737_v55 = vsel %vm627_vm1, %v4152_v54, %v4150_v4 }
 0x2f5   : > { %v2204_v61 = vpop.permute.xlu1 %2203 }
 0x2f6   : > { %v2215_v13 = vsel %vm399_vm6, %v2202_v50, %v2204_v61  ;;  %v2216_v30 = vsel %vm399_vm6, %v2204_v61, %v2206_v5  ;;  %v2117_v50 = vsel %vm968_vm7, %v2107_v28, %v3923_v48 }
 0x2f7   : > { %2468 = vmatprep.subr.mxu0 %v2216_v30 }
 0x2f8   : > { %2469 = vmatpush1.msra.mxu0 %v2215_v13 }
 0x2f9   : > { %v2043_v6 = vpop.permute.xlu1 %2042  ;;  %2470 = vmatprep.subr.mxu0 %v2115_v17 }
 0x2fa   : > { %v2054_v44 = vsel %vm582_vm5, %v2041_v52, %v2043_v6  ;;  %2471 = vmatpush1.msra.mxu0 %v2114_v46  ;;  %v2055_v35 = vsel %vm582_vm5, %v2043_v6, %v2045_v31  ;;  %v1831_v52 = vpop.permute.xlu0 %1830 }
 0x2fb   : > { %2472 = vmatprep.subr.mxu0 %v2055_v35 }
 0x2fc   : > { %2473 = vmatpush1.msra.mxu0 %v2054_v44 }
 0x2fd   : > { %v1942_v25 = vpop.permute.xlu1 %1941 }
 0x2fe   : > { %v1953_v9 = vsel %vm669_vm4, %v1940_v33, %v1942_v25  ;;  %v1954_v10 = vsel %vm669_vm4, %v1942_v25, %v1944_v53  ;;  %v1730_v39 = vpop.permute.xlu0 %1729 }
 0x2ff   : > { %2474 = vmatprep.subr.mxu0 %v1954_v10 }
 0x300   : > { %2475 = vmatpush1.msra.mxu0 %v1953_v9 }
 0x301   : > { %v2208_v26 = vpop.permute.xlu1 %2207  ;;  %2476 = vmatprep.subr.mxu0 %v3882_v43  ;;  %v1736_v43 = vsel %vm627_vm1, %v1724_v20, %v4152_v54 }
 0x302   : > { %v2217_v38 = vsel %vm399_vm6, %v2206_v5, %v2208_v26  ;;  %2477 = vmatpush1.msra.mxu0 %v3849_v56  ;;  %v2218_v51 = vsel %vm399_vm6, %v2208_v26, %v3906_v40  ;;  %v1735_v56 = vsel %vm627_vm1, %v4097_v57, %v1724_v20  ;;  %v1634_v57 = vsel %vm503_vm8, %v4035_v19, %v4112_v23  ;;  %v1569_v29 = vpop.permute.xlu0 %1568 }
 0x303   : > { %2478 = vmatprep.subr.mxu0 %v1837_v36  ;;  %2539 = vmatprep.subr.mxu1 %v2218_v51  ;;  %v1838_v19 = vsel %vm715_vm3, %v4148_v47, %v4146_v45 }
 0x304   : > { %2479 = vmatpush1.msra.mxu0 %v1836_v41  ;;  %2540 = vmatpush1.msra.mxu1 %v2217_v38 }
 0x305   : > { %v2047_v40 = vpop.permute.xlu1 %2046  ;;  %2480 = vmatprep.subr.mxu0 %v1736_v43  ;;  %2541 = vmatprep.subr.mxu1 %v2117_v50 }
 0x306   : > { %v2056_v62 = vsel %vm582_vm5, %v2045_v31, %v2047_v40  ;;  %2481 = vmatpush1.msra.mxu0 %v1735_v56  ;;  %2542 = vmatpush1.msra.mxu1 %v2116_v34  ;;  %v2057_v48 = vsel %vm582_vm5, %v2047_v40, %v3933_v3  ;;  %v1839_v3 = vsel %vm715_vm3, %v4146_v45, %v1831_v52  ;;  %v2614_v12 = vpop.permute.xlu0 %2613 }
 0x307   : > { %2482 = vmatprep.subr.mxu0 %v1635_v2  ;;  %2543 = vmatprep.subr.mxu1 %v2057_v48 }
 0x308   : > { %2483 = vmatpush1.msra.mxu0 %v1634_v57  ;;  %2544 = vmatpush1.msra.mxu1 %v2056_v62 }
 0x309   : > { %v1946_v42 = vpop.permute.xlu1 %1945 }
 0x30a   : > { %v1955_v7 = vsel %vm669_vm4, %v1944_v53, %v1946_v42  ;;  %v1956_v32 = vsel %vm669_vm4, %v1946_v42, %v3949_v58  ;;  %v1738_v58 = vsel %vm627_vm1, %v4150_v4, %v1730_v39 }
 0x30b   : > { %2545 = vmatprep.subr.mxu1 %v1956_v32 }
 0x30c   : > { %2546 = vmatpush1.msra.mxu1 %v1955_v7 }
 0x30d   : > { %v1627_v11 = vpop.permute.xlu1 %1626  ;;  %2547 = vmatprep.subr.mxu1 %v3939_v8 }
 0x30e   : > { %2548 = vmatpush1.msra.mxu1 %v3852_v60  ;;  %v1637_v33 = vsel %vm503_vm8, %v1627_v11, %v1629_v59  ;;  %v1636_v27 = vsel %vm503_vm8, %v4114_v22, %v1627_v11 }
 0x30f   : > { %2549 = vmatprep.subr.mxu1 %v1839_v3 }
 0x310   : > { %2550 = vmatpush1.msra.mxu1 %v1838_v19 }
 0x311   : > { %v1563_v23 = vpop.permute.xlu1 %1562  ;;  %2551 = vmatprep.subr.mxu1 %v1738_v58 }
 0x312   : > { %v1574_v60 = vsel %vm445_vm0, %v4102_v63, %v1563_v23  ;;  %2552 = vmatpush1.msra.mxu1 %v1737_v55  ;;  %v1575_v8 = vsel %vm445_vm0, %v1563_v23, %v1565_v16 }
 0x313   : > { %2484 = vmatprep.subr.mxu0 %v1575_v8  ;;  %2553 = vmatprep.subr.mxu1 %v1637_v33 }
 0x314   : > { %2485 = vmatpush1.msra.mxu0 %v1574_v60  ;;  %2554 = vmatpush1.msra.mxu1 %v1636_v27 }
 0x315   : > { %v1567_v5 = vpop.permute.xlu1 %1566  ;;  %2734 = vmatmul.mubr.msk.f32.vlgmr.msra.gmra.mxu0 %vm2308_vm10, %v4087_v37 }
 0x316   : > { %v1576_v63 = vsel %vm445_vm0, %v1565_v16, %v1567_v5  ;;  %v1577_v18 = vsel %vm445_vm0, %v1567_v5, %v1569_v29 }
 0x317   : > { %2555 = vmatprep.subr.mxu1 %v1577_v18 }
 0x318   : > { %2556 = vmatpush1.msra.mxu1 %v1576_v63 }
 0x319   : > { %2735 = vmatmul.mubr.msk.f32.vlgmr.msra.gmra.mxu1 %vm2308_vm10, %v4087_v37 }
 0x322   : > { %v2600_v22 = vpop.permute.xlu1 %2599 }
 0x385   : > { %v2378_v1 = vpop.f32.mrf.mxu0 }
 0x386   : > { %v2602_v21 = vmul.f32 %v2600_v22, %v2378_v1 }
 0x387   : > { %v2380_v49 = vpop.f32.mrf.mxu0 }
 0x388   : > { %v2616_v14 = vadd.f32 %v2614_v12, %v2602_v21  ;;  %v2603_v15 = vmul.f32 %v2600_v22, %v2380_v49 }
 0x38a   : > { %vm2624_vm0 = vcmp.gt.f32.partialorder %v2616_v14, 0.0  ;;  %v2632_v31 = vmul.f32 0.01, %v2616_v14  ;;  %v2617_v24 = vadd.f32 %v2614_v12, %v2603_v15 }
 0x38c   : > { %v2640_v0 = vsel %vm2624_vm0, %v2616_v14, %v2632_v31  ;;  %vm2625_vm1 = vcmp.gt.f32.partialorder %v2617_v24, 0.0  ;;  %v2633_v37 = vmul.f32 0.01, %v2617_v24 }
 0x38d   : > { %2648 = vst [vmem:[%s4220_s23] sm:$0xff] %v2640_v0 }
 0x38e   : > { %v2641_v20 = vsel %vm2625_vm1, %v2617_v24, %v2633_v37 }
 0x38f   : > { %2649 = vst [vmem:[%s4220_s23 + $0x8] sm:$0xff] %v2641_v20 }
 0x3a7   : > { %v2449_v53 = vpop.f32.mrf.mxu1 }
 0x3a8   : > { %v2604_v28 = vmul.f32 %v2600_v22, %v2449_v53 }
 0x3a9   : > { %v2451_v45 = vpop.f32.mrf.mxu1 }
 0x3aa   : > { %v2618_v47 = vadd.f32 %v2614_v12, %v2604_v28  ;;  %v2605_v4 = vmul.f32 %v2600_v22, %v2451_v45 }
 0x3ac   : > { %vm2626_vm3 = vcmp.gt.f32.partialorder %v2618_v47, 0.0  ;;  %v2634_v54 = vmul.f32 0.01, %v2618_v47  ;;  %v2619_v61 = vadd.f32 %v2614_v12, %v2605_v4 }
 0x3ae   : > { %v2642_v13 = vsel %vm2626_vm3, %v2618_v47, %v2634_v54  ;;  %vm2627_vm4 = vcmp.gt.f32.partialorder %v2619_v61, 0.0  ;;  %v2635_v30 = vmul.f32 0.01, %v2619_v61 }
 0x3af   : > { %2650 = vst [vmem:[%s4220_s23 + $0x10] sm:$0xff] %v2642_v13 }
 0x3b0   : > { %v2643_v17 = vsel %vm2627_vm4, %v2619_v61, %v2635_v30 }
 0x3b1   : > { %2651 = vst [vmem:[%s4220_s23 + $0x18] sm:$0xff] %v2643_v17 }
 0x3d5   : > { %v2520_v46 = vpop.f32.mrf.mxu0 }
 0x3d6   : > { %v2606_v6 = vmul.f32 %v2600_v22, %v2520_v46 }
 0x3d7   : > { %v2522_v44 = vpop.f32.mrf.mxu0 }
 0x3d8   : > { %v2620_v35 = vadd.f32 %v2614_v12, %v2606_v6  ;;  %v2607_v59 = vmul.f32 %v2600_v22, %v2522_v44 }
 0x3d9   : > { %v2591_v25 = vpop.f32.mrf.mxu1 }
 0x3da   : > { %vm2628_vm5 = vcmp.gt.f32.partialorder %v2620_v35, 0.0  ;;  %v2636_v9 = vmul.f32 0.01, %v2620_v35  ;;  %v2621_v10 = vadd.f32 %v2614_v12, %v2607_v59  ;;  %v2608_v16 = vmul.f32 %v2600_v22, %v2591_v25 }
 0x3db   : > { %v2593_v26 = vpop.f32.mrf.mxu1 }
 0x3dc   : > { %v2644_v38 = vsel %vm2628_vm5, %v2620_v35, %v2636_v9  ;;  %vm2629_vm6 = vcmp.gt.f32.partialorder %v2621_v10, 0.0  ;;  %v2637_v36 = vmul.f32 0.01, %v2621_v10  ;;  %v2622_v51 = vadd.f32 %v2614_v12, %v2608_v16 }
 0x3dd   : > { %2652 = vst [vmem:[%s4220_s23 + $0x20] sm:$0xff] %v2644_v38  ;;  %v2609_v41 = vmul.f32 %v2600_v22, %v2593_v26 }
 0x3de   : > { %v2645_v43 = vsel %vm2629_vm6, %v2621_v10, %v2637_v36  ;;  %vm2630_vm7 = vcmp.gt.f32.partialorder %v2622_v51, 0.0  ;;  %v2638_v50 = vmul.f32 0.01, %v2622_v51 }
 0x3df   : > { %2653 = vst [vmem:[%s4220_s23 + $0x28] sm:$0xff] %v2645_v43  ;;  %v2623_v56 = vadd.f32 %v2614_v12, %v2609_v41 }
 0x3e0   : > { %v2646_v34 = vsel %vm2630_vm7, %v2622_v51, %v2638_v50 }
 0x3e1   : > { %2654 = vst [vmem:[%s4220_s23 + $0x30] sm:$0xff] %v2646_v34  ;;  %vm2631_vm8 = vcmp.gt.f32.partialorder %v2623_v56, 0.0  ;;  %v2639_v40 = vmul.f32 0.01, %v2623_v56 }
 0x3e3   : > { %v2647_v62 = vsel %vm2631_vm8, %v2623_v56, %v2639_v40 }
 0x3e4   : > { %2655 = vst [vmem:[%s4220_s23 + $0x38] sm:$0xff] %v2647_v62 }
 0x3e5 PF: > { %s19_s30 = sadd.s32 1, %s2780_s30  }
 0x3e6   : > { %p16_p4 = scmp.ge.s32.totalorder %s19_s30, 4  }
 0x3e8   :  { %18 = sbr.rel (!%p16_p4) target bundleno = 1 (0x1), region = 86 }

// kernel: _lambda_.6
= control target key start
LH: loop header
LB: loop body
LE: loop exit
PB: predicated region body
PF: predicated region fallthrough
CT: control target
= control target key end

     0   :  { %s1410_s30 = smov 0   ;;  %s1796_s0 = inlined_call_operand.vmem [shape: f32[2,8,256], index: 0, kind: input, shape index: {}]   ;;  %s1797_s1 = inlined_call_operand.vmem [shape: f32[16,72], index: 1, kind: input, shape index: {}]   ;;  %s1798_s2 = inlined_call_operand.vmem [shape: f32[16,1], index: 2, kind: input, shape index: {}]   ;;  %s1799_s3 = inlined_call_operand.vmem [shape: f32[16,1], index: 3, kind: input, shape index: {}]   ;;  %s1800_s4 = inlined_call_operand.vmem [shape: f32[16,144], index: 4, kind: input, shape index: {}]   ;;  %s1801_s5 = inlined_call_operand.vmem [shape: f32[16,1], index: 5, kind: input, shape index: {}]   ;;  %s1802_s6 = inlined_call_operand.vmem [shape: f32[16,1], index: 6, kind: input, shape index: {}]   ;;  %s1803_s7 = inlined_call_operand.vmem [shape: f32[1,256], index: 7, kind: input, shape index: {}]   ;;  %s1804_s8 = inlined_call_operand.vmem [shape: f32[1,256], index: 8, kind: input, shape index: {}]   ;;  %s1805_s9 = inlined_call_operand.vmem [shape: f32[2,16,256], index: 9, kind: output, shape index: {}]  }
   0x1 LB: > { %s1295_s10 = sadd.s32 4294967295, %s1348_s30   ;;  %p1299_p0 = scmp.ge.s32.totalorder %s1348_s30, 1  ;;  %s1348_s30 = sphi %s1410_s30, %s19_s30  }
   0x2   : > { %p287_p1 = scmp.lt.s32.totalorder %s1348_s30, 3 }
   0x4   : > { %p288_p2 = pnand %p1299_p0, %p287_p1 }
   0x5   : > { %s1351_s15 = smov (!%p288_p2), 17   ;;  %s1352_s16 = smov (!%p288_p2), 15  }
   0x6   : > { %291 = sbr.rel (%p288_p2) target bundleno = 888 (0x378), region = 56  ;;  %p323_p3 = scmp.lt.s32.totalorder (!%p288_p2), %s1295_s10, 1 }
   0x7   : > { %s1353_s17 = smov (!%p288_p2), 1   ;;  %s1354_s18 = smov (!%p288_p2), 127  }
   0x8   : > { %s1355_s20 = smov (!%p288_p2), 113   ;;  %s1356_s24 = smov (!%p288_p2), 111  }
   0x9   : > { %s1357_s25 = smov (!%p288_p2), 112   ;;  %s1359_s26 = smov (!%p288_p2), 16  }
   0xb   : > { %v345_v0 = vlaneseq  ;;  %v1350_v2 = vmov 0.0   ;;  %v334_v3 = vld [vmem:[%s1804_s8] sm:$0x3]  ;;  %s1807_s10 = smov (!%p323_p3, %s1295_s10), 1  ;;  %v1358_v13 = vmov 0   ;;  %vm374_vm0 = vcmask 138240  }
   0xc   : > { %672 = vmatprep.mubr.f32.mxu0 %v1350_v2  ;;  %v333_v4 = vld [vmem:[%s1803_s7] sm:$0x3]  ;;  %s1310_s19 = sshll.u32 %s1807_s10, 4  ;;  %1331 = vset.pattern.permute.xlu1 %v1358_v13  ;;  %vm433_vm1 = vcmask 121856   ;;  %vm464_vm2 = vcmask 7168   ;;  %vm447_vm3 = vcmask 1039360  }
   0xd   : > { %v346_v1 = vshrl.u32 %v345_v0, 7  ;;  %s327_s23 = scalar_lea.vmem %s1796_s0, %s1310_s19  ;;  %1330 = vset.pattern.permute.xlu0 %v1358_v13  ;;  %vm416_vm4 = vcmask 924672   ;;  %vm357_vm5 = vcmask 908288   ;;  %v686_v50 = vld [vmem:[%s1798_s2 + $0x8] sm:$0xff]  ;;  %v685_v51 = vld [vmem:[%s1798_s2] sm:$0xff]  ;;  %vm545_vm6 = vcmask 916480  }
   0xe   : > { %v1443_v11 = vld [vmem:[%s327_s23 + $0x8] sm:$0xff]  ;;  %v1449_v12 = vld [vmem:[%s327_s23] sm:$0xff]  ;;  %vm393_vm7 = vcmask 130048   ;;  %vm601_vm8 = vcmask 588800   ;;  %s1311_s22 = sshll.u32 %s1807_s10, 5 }
   0xf   : > { %v347_v5 = vsub.s32 0, %v346_v1  ;;  %v351_v6 = vsub.s32 1, %v346_v1  ;;  %v701_v52 = vld [vmem:[%s1799_s3] sm:$0xff]  ;;  %v702_v53 = vld [vmem:[%s1799_s3 + $0x8] sm:$0xff] }
  0x11   : > { %v407_v7 = vrot.slane %v334_v3, %v347_v5  ;;  %v348_v8 = vrot.slane %v333_v4, %v347_v5  ;;  %v411_v9 = vrot.slane %v334_v3, %v351_v6  ;;  %v352_v10 = vrot.slane %v333_v4, %v351_v6 }
  0x13   : > { %555 = vrot.lane.b32.xlu0 %v407_v7, %s1351_s15  ;;  %507 = vrot.lane.b32.xlu1 %v348_v8, %s1352_s16 }
  0x17   : > { %557 = vrot.lane.b32.xlu0 %v411_v9, %s1351_s15  ;;  %509 = vrot.lane.b32.xlu1 %v352_v10, %s1352_s16 }
  0x1b   : > { %478 = vrot.lane.b32.xlu0 %v407_v7, %s1353_s17  ;;  %480 = vrot.lane.b32.xlu1 %v411_v9, %s1353_s17 }
  0x1f   : > { %443 = vrot.lane.b32.xlu0 %v348_v8, %s1354_s18  ;;  %445 = vrot.lane.b32.xlu1 %v352_v10, %s1354_s18 }
  0x23   : > { %412 = vrot.lane.b32.xlu0 %v407_v7, %s1355_s20  ;;  %414 = vrot.lane.b32.xlu1 %v411_v9, %s1355_s20 }
  0x27   : > { %353 = vrot.lane.b32.xlu0 %v348_v8, %s1356_s24  ;;  %355 = vrot.lane.b32.xlu1 %v352_v10, %s1356_s24 }
  0x2b   : > { %541 = vrot.lane.b32.xlu1 %v1443_v11, %s1357_s25  ;;  %543 = vrot.lane.b32.xlu0 %v1350_v2, %s1357_s25 }
  0x2f   : > { %539 = vrot.lane.b32.xlu1 %v1449_v12, %s1357_s25  ;;  %389 = vrot.lane.b32.xlu0 %v1449_v12, %s1359_s26 }
  0x33   : > { %391 = vrot.lane.b32.xlu1 %v1443_v11, %s1359_s26 }
  0x85   : > { %v1457_v14 = vpop.permute.xlu0 %555  ;;  %v1459_v15 = vpop.permute.xlu1 %507 }
  0x86   : > { %v563_v16 = vmul.f32 %v1457_v14, %v1449_v12  ;;  %v515_v20 = vmul.f32 %v1459_v15, %v1449_v12 }
  0x88   : > { %569 = vrot.lane.b32.xlu0 %v563_v16, %s1356_s24 }
  0x89   : > { %v558_v17 = vpop.permute.xlu0 %557  ;;  %v510_v18 = vpop.permute.xlu1 %509 }
  0x8a   : > { %v1464_v19 = vmul.f32 0.0, %v558_v17  ;;  %v517_v23 = vmul.f32 0.0, %v510_v18  ;;  %v1489_v32 = vsel %vm374_vm0, %v1457_v14, %v558_v17  ;;  %v1497_v36 = vsel %vm433_vm1, %v1459_v15, %v510_v18 }
  0x8b   : > { %v564_v35 = vmul.f32 %v1489_v32, %v1443_v11  ;;  %v516_v38 = vmul.f32 %v1497_v36, %v1443_v11 }
  0x8c   : > { %573 = vrot.lane.b32.xlu1 %v1464_v19, %s1356_s24  ;;  %521 = vrot.lane.b32.xlu0 %v515_v20, %s1355_s20 }
  0x8d   : > { %v1471_v21 = vpop.permute.xlu0 %478  ;;  %v481_v22 = vpop.permute.xlu1 %480 }
  0x8e   : > { %v488_v24 = vmul.f32 0.0, %v481_v22  ;;  %v486_v28 = vmul.f32 %v1471_v21, %v1449_v12  ;;  %v1501_v37 = vsel %vm464_vm2, %v1471_v21, %v481_v22 }
  0x8f   : > { %v487_v39 = vmul.f32 %v1501_v37, %v1443_v11 }
  0x90   : > { %525 = vrot.lane.b32.xlu1 %v517_v23, %s1355_s20  ;;  %496 = vrot.lane.b32.xlu0 %v488_v24, %s1354_s18 }
  0x91   : > { %v444_v25 = vpop.permute.xlu0 %443  ;;  %v1475_v26 = vpop.permute.xlu1 %445 }
  0x92   : > { %v452_v27 = vmul.f32 0.0, %v444_v25  ;;  %v454_v31 = vmul.f32 %v1475_v26, %v1443_v11  ;;  %v1513_v42 = vsel %vm447_vm3, %v444_v25, %v1475_v26 }
  0x93   : > { %v453_v45 = vmul.f32 %v1513_v42, %v1449_v12 }
  0x94   : > { %458 = vrot.lane.b32.xlu0 %v452_v27, %s1353_s17  ;;  %492 = vrot.lane.b32.xlu1 %v486_v28, %s1354_s18 }
  0x95   : > { %v1481_v29 = vpop.permute.xlu1 %414  ;;  %v413_v33 = vpop.permute.xlu0 %412 }
  0x96   : > { %v423_v30 = vmul.f32 %v1481_v29, %v1443_v11  ;;  %v421_v34 = vmul.f32 0.0, %v413_v33  ;;  %v1517_v43 = vsel %vm416_vm4, %v413_v33, %v1481_v29 }
  0x97   : > { %v422_v46 = vmul.f32 %v1517_v43, %v1449_v12 }
  0x98   : > { %431 = vrot.lane.b32.xlu0 %v423_v30, %s1352_s16  ;;  %462 = vrot.lane.b32.xlu1 %v454_v31, %s1353_s17 }
  0x99   : > { %v354_v40 = vpop.permute.xlu0 %353  ;;  %v1509_v41 = vpop.permute.xlu1 %355 }
  0x9a   : > { %v1523_v44 = vsel %vm357_vm5, %v354_v40, %v1509_v41  ;;  %v1536_v48 = vmul.f32 0.0, %v354_v40  ;;  %v364_v49 = vmul.f32 %v1509_v41, %v1443_v11  ;;  %v581_v40 = vld [vmem:[%s1797_s1] sm:$0xff] }
  0x9b   : > { %v363_v47 = vmul.f32 %v1523_v44, %v1449_v12 }
  0x9c   : > { %571 = vrot.lane.b32.xlu0 %v564_v35, %s1356_s24  ;;  %427 = vrot.lane.b32.xlu1 %v421_v34, %s1352_s16 }
  0x9d   : > { %v542_v54 = vpop.permute.xlu1 %541  ;;  %v544_v55 = vpop.permute.xlu0 %543 }
  0x9e   : > { %v547_v9 = vsel %vm545_vm6, %v542_v54, %v544_v55 }
  0xa0   : > { %523 = vrot.lane.b32.xlu0 %v516_v38, %s1355_s20  ;;  %494 = vrot.lane.b32.xlu1 %v487_v39, %s1354_s18 }
  0xa1   : > { %v540_v56 = vpop.permute.xlu1 %539  ;;  %v390_v57 = vpop.permute.xlu0 %389 }
  0xa2   : > { %v546_v16 = vsel %vm545_vm6, %v540_v56, %v542_v54 }
  0xa4   : > { %460 = vrot.lane.b32.xlu0 %v453_v45, %s1353_s17  ;;  %429 = vrot.lane.b32.xlu1 %v422_v46, %s1352_s16  ;;  %v582_v45 = vld [vmem:[%s1797_s1 + $0x8] sm:$0xff] }
  0xa5   : > { %v392_v58 = vpop.permute.xlu1 %391 }
  0xa8   : > { %387 = vrot.lane.b32.xlu0 %v1350_v2, %s1359_s26  ;;  %370 = vrot.lane.b32.xlu1 %v363_v47, %s1351_s15 }
  0xac   : > { %372 = vrot.lane.b32.xlu0 %v364_v49, %s1351_s15  ;;  %368 = vrot.lane.b32.xlu1 %v1536_v48, %s1351_s15 }
  0xb0   : > { %694 = vperm.xlu0 %1330, %v686_v50   ;;  %689 = vperm.xlu1 %1331, %v685_v51  }
  0xb4   : > { %705 = vperm.xlu0 %1330, %v701_v52   ;;  %710 = vperm.xlu1 %1331, %v702_v53  }
  0xb8   : > { %1333 = vrot.lane.b32.xlu0 %v1350_v2, %s1357_s25  ;;  %977 = vrot.lane.b32.xlu1 %v517_v23, %s1355_s20 }
  0xbc   : > { %971 = vrot.lane.b32.xlu0 %v517_v23, %s1355_s20  ;;  %935 = vrot.lane.b32.xlu1 %v488_v24, %s1354_s18 }
  0xc0   : > { %929 = vrot.lane.b32.xlu0 %v488_v24, %s1354_s18  ;;  %875 = vrot.lane.b32.xlu1 %v452_v27, %s1353_s17 }
  0xc4   : > { %881 = vrot.lane.b32.xlu0 %v452_v27, %s1353_s17  ;;  %833 = vrot.lane.b32.xlu1 %v421_v34, %s1352_s16 }
  0xc8   : > { %839 = vrot.lane.b32.xlu0 %v421_v34, %s1352_s16  ;;  %v395_v34 = vsel %vm393_vm7, %v390_v57, %v392_v58 }
  0xcc   : > { %1338 = vrot.lane.b32.xlu0 %v1350_v2, %s1359_s26 }
  0xfa   : > { %v570_v59 = vpop.permute.xlu0 %569 }
  0xfe   : > { %v574_v60 = vpop.permute.xlu1 %573  ;;  %v522_v61 = vpop.permute.xlu0 %521 }
 0x102   : > { %v526_v62 = vpop.permute.xlu1 %525  ;;  %v497_v63 = vpop.permute.xlu0 %496 }
 0x106   : > { %v459_v0 = vpop.permute.xlu0 %458  ;;  %v493_v1 = vpop.permute.xlu1 %492 }
 0x10a   : > { %v432_v3 = vpop.permute.xlu0 %431  ;;  %v463_v4 = vpop.permute.xlu1 %462 }
 0x10e   : > { %v572_v5 = vpop.permute.xlu0 %571  ;;  %v428_v6 = vpop.permute.xlu1 %427 }
 0x10f   : > { %v576_v7 = vsel %vm357_vm5, %v572_v5, %v574_v60  ;;  %v575_v8 = vsel %vm357_vm5, %v570_v59, %v572_v5 }
 0x110   : > { %622 = vmatprep.subr.mxu0 %v576_v7 }
 0x111   : > { %623 = vmatpush1.msra.mxu0 %v575_v8 }
 0x112   : > { %624 = vmatprep.subr.mxu0 %v547_v9  ;;  %v524_v10 = vpop.permute.xlu0 %523  ;;  %v495_v13 = vpop.permute.xlu1 %494 }
 0x113   : > { %625 = vmatpush1.msra.mxu0 %v546_v16  ;;  %v528_v17 = vsel %vm416_vm4, %v524_v10, %v526_v62  ;;  %v527_v18 = vsel %vm416_vm4, %v522_v61, %v524_v10  ;;  %v499_v20 = vsel %vm447_vm3, %v495_v13, %v497_v63  ;;  %v498_v24 = vsel %vm447_vm3, %v493_v1, %v495_v13 }
 0x114   : > { %626 = vmatprep.subr.mxu0 %v528_v17 }
 0x115   : > { %627 = vmatpush1.msra.mxu0 %v527_v18 }
 0x116   : > { %628 = vmatprep.subr.mxu0 %v499_v20  ;;  %v461_v22 = vpop.permute.xlu0 %460  ;;  %v430_v23 = vpop.permute.xlu1 %429 }
 0x117   : > { %629 = vmatpush1.msra.mxu0 %v498_v24  ;;  %v466_v25 = vsel %vm464_vm2, %v461_v22, %v463_v4  ;;  %v465_v30 = vsel %vm464_vm2, %v459_v0, %v461_v22  ;;  %v435_v31 = vsel %vm433_vm1, %v430_v23, %v432_v3  ;;  %v434_v33 = vsel %vm433_vm1, %v428_v6, %v430_v23 }
 0x118   : > { %630 = vmatprep.subr.mxu0 %v1443_v11 }
 0x119   : > { %631 = vmatpush1.msra.mxu0 %v1449_v12 }
 0x11a   : > { %632 = vmatprep.subr.mxu0 %v466_v25  ;;  %v388_v27 = vpop.permute.xlu0 %387  ;;  %v371_v28 = vpop.permute.xlu1 %370  ;;  %v1070_v25 = vld [vmem:[%s1800_s4 + $0x8] sm:$0xff] }
 0x11b   : > { %633 = vmatpush1.msra.mxu0 %v465_v30  ;;  %v394_v35 = vsel %vm393_vm7, %v388_v27, %v390_v57  ;;  %1306 = vmatprep.mubr.msk.f32.mxu1 %vm393_vm7, %v1070_v25  ;;  %v1209_v30 = vld [vmem:[%s1802_s6 + $0x8] sm:$0xff] }
 0x11c   : > { %634 = vmatprep.subr.mxu0 %v435_v31 }
 0x11d   : > { %635 = vmatpush1.msra.mxu0 %v434_v33 }
 0x11e   : > { %v373_v11 = vpop.permute.xlu0 %372  ;;  %636 = vmatprep.subr.mxu0 %v395_v34  ;;  %v369_v12 = vpop.permute.xlu1 %368 }
 0x11f   : > { %637 = vmatpush1.msra.mxu0 %v394_v35  ;;  %v376_v38 = vsel %vm374_vm0, %v371_v28, %v373_v11  ;;  %v375_v39 = vsel %vm374_vm0, %v369_v12, %v371_v28  ;;  %v1193_v28 = vld [vmem:[%s1801_s5 + $0x8] sm:$0xff] }
 0x120   : > { %638 = vmatprep.subr.mxu0 %v376_v38 }
 0x121   : > { %639 = vmatpush1.msra.mxu0 %v375_v39 }
 0x122   : > { %1304 = vmatmul.mubr.msk.f32.vlgmr.msra.gmra.mxu0 %vm601_vm8, %v581_v40 }
 0x123   : > { %678 = vmatprep.mubr.f32.mxu0 %v1350_v2 }
 0x126   : > { %1305 = vmatmul.mubr.msk.f32.gmra.mxu0 %vm601_vm8, %v582_v45 }
 0x12b   : > { %v695_v46 = vpop.permute.xlu0 %694  ;;  %v690_v47 = vpop.permute.xlu1 %689 }
 0x12f   : > { %v706_v51 = vpop.permute.xlu0 %705  ;;  %v711_v61 = vpop.permute.xlu1 %710 }
 0x133   : > { %v1334_v31 = vpop.permute.xlu0 %1333  ;;  %v978_v34 = vpop.permute.xlu1 %977 }
 0x137   : > { %v972_v33 = vpop.permute.xlu0 %971  ;;  %v936_v12 = vpop.permute.xlu1 %935 }
 0x13b   : > { %v930_v11 = vpop.permute.xlu0 %929  ;;  %v1714_v38 = vpop.permute.xlu1 %875 }
 0x13f   : > { %v1712_v35 = vpop.permute.xlu0 %881  ;;  %v1718_v39 = vpop.permute.xlu1 %833 }
 0x1e2   : > { %v674_v49 = vpop.f32.mrf.mxu0 }
 0x1e3   : > { %v697_v50 = vmul.f32 %v690_v47, %v674_v49 }
 0x1e4   : > { %v676_v52 = vpop.f32.mrf.mxu0 }
 0x1e5   : > { %v713_v53 = vadd.f32 %v706_v51, %v697_v50  ;;  %v698_v54 = vmul.f32 %v690_v47, %v676_v52 }
 0x1e6   : > { %v680_v57 = vpop.f32.mrf.mxu0 }
 0x1e7   : > { %vm717_vm9 = vcmp.gt.f32.partialorder %v713_v53, 0.0  ;;  %v721_v55 = vmul.f32 0.01, %v713_v53  ;;  %v714_v56 = vadd.f32 %v706_v51, %v698_v54  ;;  %v699_v60 = vmul.f32 %v695_v46, %v680_v57 }
 0x1e8   : > { %v682_v6 = vpop.f32.mrf.mxu0 }
 0x1e9   : > { %v1592_v58 = vsel %vm717_vm9, %v713_v53, %v721_v55  ;;  %vm718_vm10 = vcmp.gt.f32.partialorder %v714_v56, 0.0  ;;  %v722_v59 = vmul.f32 0.01, %v714_v56  ;;  %v715_v63 = vadd.f32 %v711_v61, %v699_v60 }
 0x1ea   : > { %1003 = vrot.lane.b32.xlu1 %v1592_v58, %s1357_s25  ;;  %v955_v0 = vmul.f32 %v1592_v58, %v1459_v15  ;;  %v913_v4 = vmul.f32 %v1592_v58, %v1471_v21  ;;  %v864_v7 = vmul.f32 %v1592_v58, %v1513_v42  ;;  %v700_v9 = vmul.f32 %v695_v46, %v682_v6 }
 0x1eb   : > { %v1596_v2 = vsel %vm718_vm10, %v714_v56, %v722_v59  ;;  %v723_v3 = vmul.f32 0.01, %v715_v63  ;;  %vm719_vm11 = vcmp.gt.f32.partialorder %v715_v63, 0.0  ;;  %v822_v10 = vmul.f32 %v1592_v58, %v1517_v43 }
 0x1ec   : > { %1005 = vrot.lane.b32.xlu0 %v1596_v2, %s1357_s25  ;;  %v865_v62 = vmul.f32 %v1596_v2, %v1475_v26  ;;  %v823_v1 = vmul.f32 %v1596_v2, %v1481_v29  ;;  %v716_v16 = vadd.f32 %v711_v61, %v700_v9  ;;  %v956_v18 = vmul.f32 %v1596_v2, %v1497_v36 }
 0x1ed   : > { %v1614_v5 = vsel %vm719_vm11, %v715_v63, %v723_v3  ;;  %v914_v22 = vmul.f32 %v1596_v2, %v1501_v37 }
 0x1ee   : > { %793 = vrot.lane.b32.xlu1 %v1592_v58, %s1359_s26  ;;  %v958_v8 = vmul.f32 %v1614_v5, %v1459_v15  ;;  %v916_v13 = vmul.f32 %v1614_v5, %v1471_v21  ;;  %v867_v15 = vmul.f32 %v1614_v5, %v1513_v42  ;;  %v724_v17 = vmul.f32 0.01, %v716_v16 }
 0x1ef   : > { %vm720_vm12 = vcmp.gt.f32.partialorder %v716_v16, 0.0  ;;  %v825_v21 = vmul.f32 %v1614_v5, %v1517_v43  ;;  %v747_v23 = vmul.f32 %v1614_v5, %v1523_v44 }
 0x1f0   : > { %879 = vrot.lane.b32.xlu0 %v865_v62, %s1353_s17  ;;  %v1640_v20 = vsel %vm720_vm12, %v716_v16, %v724_v17 }
 0x1f1   : > { %v959_v42 = vmul.f32 %v1640_v20, %v1497_v36  ;;  %v917_v43 = vmul.f32 %v1640_v20, %v1501_v37  ;;  %v744_v36 = vmul.f32 %v1592_v58, %v1523_v44  ;;  %v868_v37 = vmul.f32 %v1640_v20, %v1475_v26 }
 0x1f2   : > { %967 = vrot.lane.b32.xlu1 %v955_v0, %s1355_s20  ;;  %v826_v24 = vmul.f32 %v1640_v20, %v1481_v29  ;;  %v748_v44 = vmul.f32 %v1640_v20, %v1509_v41  ;;  %v1034_v26 = vmul.f32 %v1596_v2, %v1489_v32  ;;  %v1036_v29 = vmul.f32 %v1614_v5, %v1457_v14 }
 0x1f3   : > { %v1037_v27 = vmul.f32 %v1640_v20, %v1489_v32  ;;  %v1208_v32 = vld [vmem:[%s1802_s6] sm:$0xff] }
 0x1f4   : > { %837 = vrot.lane.b32.xlu0 %v823_v1, %s1352_s16  ;;  %v1335_v1 = vunpack.i.l.bf16 %v1334_v31 }
 0x1f6   : > { %925 = vrot.lane.b32.xlu1 %v913_v4, %s1354_s18  ;;  %v1336_v4 = vunpack.i.h.bf16 %v1334_v31 }
 0x1f8   : > { %799 = vrot.lane.b32.xlu0 %v1614_v5, %s1359_s26 }
 0x1fa   : > { %877 = vrot.lane.b32.xlu1 %v864_v7, %s1353_s17 }
 0x1fc   : > { %973 = vrot.lane.b32.xlu0 %v958_v8, %s1355_s20 }
 0x1fe   : > { %835 = vrot.lane.b32.xlu1 %v822_v10, %s1352_s16 }
 0x200   : > { %931 = vrot.lane.b32.xlu0 %v916_v13, %s1354_s18 }
 0x202   : > { %1009 = vrot.lane.b32.xlu1 %v1614_v5, %s1357_s25 }
 0x204   : > { %883 = vrot.lane.b32.xlu0 %v867_v15, %s1353_s17 }
 0x206   : > { %969 = vrot.lane.b32.xlu1 %v956_v18, %s1355_s20 }
 0x208   : > { %841 = vrot.lane.b32.xlu0 %v825_v21, %s1352_s16 }
 0x20a   : > { %927 = vrot.lane.b32.xlu1 %v914_v22, %s1354_s18 }
 0x20c   : > { %975 = vrot.lane.b32.xlu0 %v959_v42, %s1355_s20 }
 0x20e   : > { %1011 = vrot.lane.b32.xlu1 %v1640_v20, %s1357_s25 }
 0x210   : > { %933 = vrot.lane.b32.xlu0 %v917_v43, %s1354_s18 }
 0x212   : > { %801 = vrot.lane.b32.xlu1 %v1640_v20, %s1359_s26 }
 0x214   : > { %795 = vrot.lane.b32.xlu0 %v1596_v2, %s1359_s26 }
 0x216   : > { %763 = vrot.lane.b32.xlu1 %v747_v23, %s1351_s15 }
 0x218   : > { %757 = vrot.lane.b32.xlu0 %v744_v36, %s1351_s15 }
 0x21a   : > { %761 = vrot.lane.b32.xlu1 %v1536_v48, %s1351_s15 }
 0x21c   : > { %755 = vrot.lane.b32.xlu0 %v1536_v48, %s1351_s15  ;;  %v745_v48 = vmul.f32 %v1596_v2, %v1509_v41  ;;  %v1033_v41 = vmul.f32 %v1592_v58, %v1457_v14  ;;  %v1192_v14 = vld [vmem:[%s1801_s5] sm:$0xff] }
 0x21e   : > { %885 = vrot.lane.b32.xlu1 %v868_v37, %s1353_s17  ;;  %s332_s17 = scalar_lea.vmem %s1805_s9, %s1311_s22 }
 0x220   : > { %1055 = vrot.lane.b32.xlu0 %v1464_v19, %s1356_s24 }
 0x222   : > { %843 = vrot.lane.b32.xlu1 %v826_v24, %s1352_s16 }
 0x224   : > { %765 = vrot.lane.b32.xlu0 %v748_v44, %s1351_s15 }
 0x226   : > { %759 = vrot.lane.b32.xlu1 %v745_v48, %s1351_s15 }
 0x228   : > { %1047 = vrot.lane.b32.xlu0 %v1034_v26, %s1356_s24 }
 0x22a   : > { %1051 = vrot.lane.b32.xlu1 %v1036_v29, %s1356_s24 }
 0x22c   : > { %1045 = vrot.lane.b32.xlu0 %v1033_v41, %s1356_s24 }
 0x22e   : > { %1053 = vrot.lane.b32.xlu1 %v1037_v27, %s1356_s24 }
 0x230   : > { %1201 = vperm.xlu0 %1330, %v1193_v28  }
 0x232   : > { %1049 = vrot.lane.b32.xlu1 %v1464_v19, %s1356_s24  ;;  %v1716_v19 = vpop.permute.xlu0 %839 }
 0x234   : > { %1217 = vperm.xlu0 %1330, %v1209_v30  }
 0x236   : > { %1196 = vperm.xlu1 %1331, %v1192_v14   ;;  %v1720_v40 = vpop.permute.xlu0 %1338 }
 0x237   : > { %v1341_v30 = vunpack.i.h.bf16 %v1720_v40  ;;  %v1340_v14 = vunpack.i.l.bf16 %v1720_v40 }
 0x23a   : > { %1212 = vperm.xlu1 %1331, %v1208_v32  }
 0x25c   : > { %v1004_v45 = vpop.permute.xlu1 %1003 }
 0x25e   : > { %v1006_v46 = vpop.permute.xlu0 %1005 }
 0x25f   : > { %v1016_v9 = vsel %vm545_vm6, %v1006_v46, %v1336_v4  ;;  %v1015_v13 = vsel %vm545_vm6, %v1004_v45, %v1006_v46 }
 0x260   : > { %v1722_v47 = vpop.permute.xlu1 %793 }
 0x262   : > { %v880_v49 = vpop.permute.xlu0 %879 }
 0x264   : > { %v968_v50 = vpop.permute.xlu1 %967 }
 0x266   : > { %v1724_v51 = vpop.permute.xlu0 %837 }
 0x268   : > { %v926_v52 = vpop.permute.xlu1 %925 }
 0x26a   : > { %v1726_v53 = vpop.permute.xlu0 %799 }
 0x26c   : > { %v878_v54 = vpop.permute.xlu1 %877 }
 0x26d   : > { %v888_v41 = vsel %vm464_vm2, %v878_v54, %v880_v49 }
 0x26e   : > { %v974_v55 = vpop.permute.xlu0 %973 }
 0x270   : > { %v1728_v56 = vpop.permute.xlu1 %835 }
 0x271   : > { %v846_v28 = vsel %vm433_vm1, %v1728_v56, %v1724_v51  ;;  %v845_v31 = vsel %vm433_vm1, %v1718_v39, %v1728_v56  ;;  %v1071_v56 = vld [vmem:[%s1800_s4 + $0x10] sm:$0xff] }
 0x272   : > { %v932_v57 = vpop.permute.xlu0 %931 }
 0x274   : > { %v1010_v59 = vpop.permute.xlu1 %1009 }
 0x276   : > { %v884_v60 = vpop.permute.xlu0 %883 }
 0x277   : > { %v889_v29 = vsel %vm464_vm2, %v1712_v35, %v884_v60  ;;  %v803_v35 = vsel %vm393_vm7, %v1341_v30, %v1722_v47 }
 0x278   : > { %v970_v61 = vpop.permute.xlu1 %969 }
 0x279   : > { %v980_v18 = vsel %vm416_vm4, %v970_v61, %v972_v33  ;;  %v979_v22 = vsel %vm416_vm4, %v968_v50, %v970_v61 }
 0x27a   : > { %v842_v62 = vpop.permute.xlu0 %841 }
 0x27c   : > { %v928_v63 = vpop.permute.xlu1 %927 }
 0x27d   : > { %v938_v36 = vsel %vm447_vm3, %v928_v63, %v930_v11  ;;  %v937_v24 = vsel %vm447_vm3, %v926_v52, %v928_v63 }
 0x27e   : > { %v976_v0 = vpop.permute.xlu0 %975 }
 0x27f   : > { %v982_v16 = vsel %vm416_vm4, %v976_v0, %v978_v34  ;;  %v981_v17 = vsel %vm416_vm4, %v974_v55, %v976_v0  ;;  %v805_v34 = vsel %vm393_vm7, %v1340_v14, %v1726_v53  ;;  %v1072_v55 = vld [vmem:[%s1800_s4 + $0x18] sm:$0xff] }
 0x280   : > { %v1012_v3 = vpop.permute.xlu1 %1011 }
 0x281   : > { %v1018_v6 = vsel %vm545_vm6, %v1012_v3, %v1335_v1  ;;  %v1017_v7 = vsel %vm545_vm6, %v1010_v59, %v1012_v3 }
 0x282   : > { %v934_v8 = vpop.permute.xlu0 %933  ;;  %1115 = vmatprep.subr.mxu1 %v1018_v6 }
 0x283   : > { %1116 = vmatpush1.msra.mxu1 %v1017_v7  ;;  %v940_v42 = vsel %vm447_vm3, %v934_v8, %v936_v12  ;;  %v939_v23 = vsel %vm447_vm3, %v932_v57, %v934_v8 }
 0x284   : > { %1117 = vmatprep.subr.mxu1 %v1016_v9  ;;  %v802_v10 = vpop.permute.xlu1 %801 }
 0x285   : > { %1118 = vmatpush1.msra.mxu1 %v1015_v13  ;;  %v806_v33 = vsel %vm393_vm7, %v1726_v53, %v802_v10  ;;  %v1069_v53 = vld [vmem:[%s1800_s4] sm:$0xff] }
 0x286   : > { %v796_v15 = vpop.permute.xlu0 %795  ;;  %1119 = vmatprep.subr.mxu1 %v982_v16 }
 0x287   : > { %1120 = vmatpush1.msra.mxu1 %v981_v17  ;;  %v804_v11 = vsel %vm393_vm7, %v1722_v47, %v796_v15 }
 0x288   : > { %1121 = vmatprep.subr.mxu1 %v980_v18  ;;  %v764_v21 = vpop.permute.xlu1 %763 }
 0x289   : > { %1122 = vmatpush1.msra.mxu1 %v979_v22 }
 0x28a   : > { %v758_v43 = vpop.permute.xlu0 %757  ;;  %1123 = vmatprep.subr.mxu1 %v940_v42 }
 0x28b   : > { %1124 = vmatpush1.msra.mxu1 %v939_v23 }
 0x28c   : > { %1125 = vmatprep.subr.mxu1 %v938_v36  ;;  %v762_v37 = vpop.permute.xlu1 %761 }
 0x28d   : > { %1126 = vmatpush1.msra.mxu1 %v937_v24  ;;  %v769_v39 = vsel %vm374_vm0, %v762_v37, %v764_v21 }
 0x28e   : > { %v756_v44 = vpop.permute.xlu0 %755  ;;  %1127 = vmatprep.subr.mxu1 %v1640_v20 }
 0x28f   : > { %1128 = vmatpush1.msra.mxu1 %v1614_v5  ;;  %v887_v5 = vsel %vm464_vm2, %v1714_v38, %v878_v54  ;;  %v767_v46 = vsel %vm374_vm0, %v756_v44, %v758_v43 }
 0x290   : > { %1129 = vmatprep.subr.mxu1 %v1596_v2  ;;  %v886_v48 = vpop.permute.xlu1 %885 }
 0x291   : > { %1130 = vmatpush1.msra.mxu1 %v1592_v58  ;;  %v890_v26 = vsel %vm464_vm2, %v884_v60, %v886_v48  ;;  %v847_v58 = vsel %vm433_vm1, %v1716_v19, %v842_v62 }
 0x292   : > { %v1056_v25 = vpop.permute.xlu0 %1055  ;;  %1131 = vmatprep.subr.mxu1 %v890_v26 }
 0x293   : > { %1132 = vmatpush1.msra.mxu1 %v889_v29 }
 0x294   : > { %1133 = vmatprep.subr.mxu1 %v888_v41  ;;  %v844_v27 = vpop.permute.xlu1 %843 }
 0x295   : > { %1134 = vmatpush1.msra.mxu1 %v887_v5  ;;  %v848_v2 = vsel %vm433_vm1, %v842_v62, %v844_v27 }
 0x296   : > { %1135 = vmatprep.subr.mxu1 %v848_v2  ;;  %v766_v20 = vpop.permute.xlu0 %765 }
 0x297   : > { %1136 = vmatpush1.msra.mxu1 %v847_v58  ;;  %v770_v19 = vsel %vm374_vm0, %v764_v21, %v766_v20 }
 0x298   : > { %1137 = vmatprep.subr.mxu1 %v846_v28  ;;  %v760_v32 = vpop.permute.xlu1 %759 }
 0x299   : > { %1138 = vmatpush1.msra.mxu1 %v845_v31  ;;  %v768_v40 = vsel %vm374_vm0, %v758_v43, %v760_v32 }
 0x29a   : > { %1139 = vmatprep.subr.mxu1 %v806_v33  ;;  %v1048_v38 = vpop.permute.xlu0 %1047 }
 0x29b   : > { %1140 = vmatpush1.msra.mxu1 %v805_v34 }
 0x29c   : > { %1141 = vmatprep.subr.mxu1 %v804_v11  ;;  %v1052_v12 = vpop.permute.xlu1 %1051 }
 0x29d   : > { %1142 = vmatpush1.msra.mxu1 %v803_v35 }
 0x29e   : > { %1143 = vmatprep.subr.mxu1 %v770_v19  ;;  %v1046_v47 = vpop.permute.xlu0 %1045 }
 0x29f   : > { %1144 = vmatpush1.msra.mxu1 %v769_v39  ;;  %v1057_v54 = vsel %vm357_vm5, %v1046_v47, %v1048_v38 }
 0x2a0   : > { %1145 = vmatprep.subr.mxu1 %v768_v40  ;;  %v1054_v45 = vpop.permute.xlu1 %1053 }
 0x2a1   : > { %1146 = vmatpush1.msra.mxu1 %v767_v46  ;;  %v1060_v49 = vsel %vm357_vm5, %v1054_v45, %v1056_v25  ;;  %v1059_v50 = vsel %vm357_vm5, %v1052_v12, %v1054_v45 }
 0x2a2   : > { %1175 = vmatprep.subr.mxu1 %v1060_v49 }
 0x2a3   : > { %1176 = vmatpush2.msra.mxu1 %v1059_v50 }
 0x2a4   : > { %v1050_v51 = vpop.permute.xlu1 %1049 }
 0x2a5   : > { %v1058_v52 = vsel %vm357_vm5, %v1048_v38, %v1050_v51 }
 0x2a6   : > { %1177 = vmatprep.subr.mxu1 %v1058_v52 }
 0x2a7   : > { %1178 = vmatpush2.msra.mxu1 %v1057_v54 }
 0x2a8   : > { %1180 = vmatmul.mubr.f32.vlgmr.msra.gmra.mxu1 %v1069_v53 }
 0x2a9   : > { %1307 = vmatprep.mubr.msk.f32.mxu1 %vm393_vm7, %v1072_v55 }
 0x2ab   : > { %v1202_v59 = vpop.permute.xlu0 %1201 }
 0x2ac   : > { %1186 = vmatmul.mubr.f32.gmra.mxu1 %v1071_v56 }
 0x2af   : > { %v1218_v8 = vpop.permute.xlu0 %1217 }
 0x2b1   : > { %v1197_v57 = vpop.permute.xlu1 %1196 }
 0x2b5   : > { %v1213_v62 = vpop.permute.xlu1 %1212 }
 0x368   : > { %v1181_v60 = vpop.f32.mrf.mxu1 }
 0x369   : > { %v1204_v61 = vmul.f32 %v1197_v57, %v1181_v60 }
 0x36a   : > { %v1183_v63 = vpop.f32.mrf.mxu1 }
 0x36b   : > { %v1220_v0 = vadd.f32 %v1213_v62, %v1204_v61  ;;  %v1205_v1 = vmul.f32 %v1197_v57, %v1183_v63 }
 0x36c   : > { %v1187_v3 = vpop.f32.mrf.mxu1 }
 0x36d   : > { %vm1224_vm13 = vcmp.gt.f32.partialorder %v1220_v0, 0.0  ;;  %v1228_v4 = vmul.f32 0.01, %v1220_v0  ;;  %v1221_v6 = vadd.f32 %v1213_v62, %v1205_v1  ;;  %v1206_v7 = vmul.f32 %v1202_v59, %v1187_v3 }
 0x36e   : > { %v1189_v9 = vpop.f32.mrf.mxu1 }
 0x36f   : > { %v1232_v10 = vsel %vm1224_vm13, %v1220_v0, %v1228_v4  ;;  %vm1225_vm14 = vcmp.gt.f32.partialorder %v1221_v6, 0.0  ;;  %v1229_v13 = vmul.f32 0.01, %v1221_v6  ;;  %v1222_v16 = vadd.f32 %v1218_v8, %v1206_v7 }
 0x370   : > { %1236 = vst [vmem:[%s332_s17] sm:$0xff] %v1232_v10  ;;  %v1207_v15 = vmul.f32 %v1202_v59, %v1189_v9 }
 0x371   : > { %v1233_v17 = vsel %vm1225_vm14, %v1221_v6, %v1229_v13  ;;  %vm1226_vm15 = vcmp.gt.f32.partialorder %v1222_v16, 0.0  ;;  %v1230_v18 = vmul.f32 0.01, %v1222_v16 }
 0x372   : > { %1237 = vst [vmem:[%s332_s17 + $0x8] sm:$0xff] %v1233_v17  ;;  %v1223_v21 = vadd.f32 %v1218_v8, %v1207_v15 }
 0x373   : > { %v1234_v22 = vsel %vm1226_vm15, %v1222_v16, %v1230_v18 }
 0x374   : > { %1238 = vst [vmem:[%s332_s17 + $0x10] sm:$0xff] %v1234_v22  ;;  %vm1227_vm0 = vcmp.gt.f32.partialorder %v1223_v21, 0.0  ;;  %v1231_v42 = vmul.f32 0.01, %v1223_v21 }
 0x376   : > { %v1235_v43 = vsel %vm1227_vm0, %v1223_v21, %v1231_v42 }
 0x377   : > { %1239 = vst [vmem:[%s332_s17 + $0x18] sm:$0xff] %v1235_v43 }
 0x378 PF: > { %s19_s30 = sadd.s32 1, %s1348_s30  }
 0x379   : > { %p16_p4 = scmp.ge.s32.totalorder %s19_s30, 4  }
 0x37b   :  { %18 = sbr.rel (!%p16_p4) target bundleno = 1 (0x1), region = 86 }

// kernel: _lambda_.7
= control target key start
LH: loop header
LB: loop body
LE: loop exit
PB: predicated region body
PF: predicated region fallthrough
CT: control target
= control target key end

     0   :  { %s1152_s30 = smov 0   ;;  %s1459_s0 = inlined_call_operand.vmem [shape: f32[2,16,64], index: 0, kind: input, shape index: {}]   ;;  %s1460_s1 = inlined_call_operand.vmem [shape: f32[16,144], index: 1, kind: input, shape index: {}]   ;;  %s1461_s2 = inlined_call_operand.vmem [shape: f32[16,1], index: 2, kind: input, shape index: {}]   ;;  %s1462_s3 = inlined_call_operand.vmem [shape: f32[16,1], index: 3, kind: input, shape index: {}]   ;;  %s1463_s4 = inlined_call_operand.vmem [shape: f32[16,144], index: 4, kind: input, shape index: {}]   ;;  %s1464_s5 = inlined_call_operand.vmem [shape: f32[16,1], index: 5, kind: input, shape index: {}]   ;;  %s1465_s6 = inlined_call_operand.vmem [shape: f32[16,1], index: 6, kind: input, shape index: {}]   ;;  %s1466_s7 = inlined_call_operand.vmem [shape: f32[1,64], index: 7, kind: input, shape index: {}]   ;;  %s1467_s8 = inlined_call_operand.vmem [shape: f32[1,64], index: 8, kind: input, shape index: {}]   ;;  %s1468_s9 = inlined_call_operand.vmem [shape: f32[2,16,64], index: 9, kind: output, shape index: {}]  }
   0x1 LB: > { %s1035_s10 = sadd.s32 4294967295, %s1090_s30   ;;  %p1039_p0 = scmp.ge.s32.totalorder %s1090_s30, 1  ;;  %s1090_s30 = sphi %s1152_s30, %s19_s30  }
   0x2   : > { %p287_p1 = scmp.lt.s32.totalorder %s1090_s30, 3 }
   0x4   : > { %p288_p2 = pnand %p1039_p0, %p287_p1 }
   0x5   : > { %s1092_s13 = smov (!%p288_p2), 7   ;;  %s1093_s16 = smov (!%p288_p2), 127  }
   0x6   : > { %291 = sbr.rel (%p288_p2) target bundleno = 866 (0x362), region = 56  ;;  %p323_p3 = scmp.lt.s32.totalorder (!%p288_p2), %s1035_s10, 1 }
   0x7   : > { %s1095_s17 = smov (!%p288_p2), 1   ;;  %s1096_s18 = smov (!%p288_p2), 121  }
   0x8   : > { %s1097_s23 = smov (!%p288_p2), 119   ;;  %s1098_s24 = smov (!%p288_p2), 9  }
   0x9   : > { %s1099_s25 = smov (!%p288_p2), 120   ;;  %s1100_s26 = smov (!%p288_p2), 8  }
   0xb   : > { %v1044_v0 = vld [vmem:[%s1466_s7] ss:$0 sm:$0xff]  ;;  %vm339_vm0 = vcmask 1048064   ;;  %vm341_vm1 = vcmask 523264   ;;  %v1094_v2 = vmov 0.0   ;;  %s1470_s10 = smov (!%p323_p3, %s1035_s10), 1 }
   0xc   : > { %493 = vrot.lane.b32.xlu0 %v1044_v0, %s1092_s13  ;;  %v1045_v1 = vld [vmem:[%s1467_s8] ss:$0 sm:$0xff]  ;;  %444 = vrot.lane.b32.xlu1 %v1044_v0, %s1093_s16  ;;  %343 = vst.msk [vmem:[#allocation2 + $0x20] sm:$0xff] %vm339_vm0, %v1094_v2  ;;  %340 = vst.msk [vmem:[#allocation2 + $0x8] sm:$0xff] %vm339_vm0, %v1094_v2  ;;  %s1052_s19 = sshll.u32 %s1470_s10, 4  ;;  %v1101_v7 = vmov 0  }
   0xd   : > { %677 = vst.msk [vmem:[#allocation4 + $0x8] sm:$0xff] %vm339_vm0, %v1094_v2  ;;  %679 = vst.msk [vmem:[#allocation4 + $0x20] sm:$0xff] %vm339_vm0, %v1094_v2  ;;  %566 = vmatprep.subr.mxu0 %v1094_v2  ;;  %869 = vmatprep.subr.mxu1 %v1094_v2  ;;  %s327_s22 = scalar_lea.vmem %s1459_s0, %s1052_s19  ;;  %vm398_vm2 = vcmask 64512   ;;  %v538_v40 = vld [vmem:[%s1460_s1 + $0x8] sm:$0xff]  ;;  %vm559_vm3 = vcmask 130048   ;;  %v641_v41 = vld [vmem:[%s1461_s2] sm:$0xff] }
   0xe   : > { %v336_v3 = vld [vmem:[%s327_s22 + $0x8] sm:$0xff]  ;;  %v335_v4 = vld [vmem:[%s327_s22] sm:$0xff]  ;;  %1078 = vset.pattern.permute.xlu0 %v1101_v7  ;;  %1077 = vset.pattern.permute.xlu1 %v1101_v7  ;;  %vm463_vm4 = vcmask 7168   ;;  %vm433_vm5 = vcmask 56320   ;;  %vm375_vm6 = vcmask 72704  }
   0xf   : > { %346 = vst.msk [vmem:[#allocation2 + $0x20] sm:$0xff] %vm341_vm1, %v336_v3  ;;  %345 = vst.msk [vmem:[#allocation2 + $0x8] sm:$0xff] %vm341_vm1, %v335_v4  ;;  %1046 = vmatprep.mubr.msk.f32.mxu0 %vm559_vm3, %v538_v40  ;;  %v642_v42 = vld [vmem:[%s1461_s2 + $0x8] sm:$0xff]  ;;  %v655_v44 = vld [vmem:[%s1462_s3] sm:$0xff] }
  0x10   : > { %476 = vrot.lane.b32.xlu0 %v1045_v1, %s1095_s17  ;;  %414 = vrot.lane.b32.xlu1 %v1045_v1, %s1096_s18  ;;  %v656_v43 = vld [vmem:[%s1462_s3 + $0x8] sm:$0xff] }
  0x14   : > { %356 = vrot.lane.b32.xlu0 %v1044_v0, %s1097_s23  ;;  %522 = vrot.lane.b32.xlu1 %v1045_v1, %s1098_s24 }
  0x16   : > { %v1188_v5 = vld [vmem:[#allocation2 + $0x20] sm:$0xff]  ;;  %v1190_v6 = vld [vmem:[#allocation2 + $0x8] sm:$0xff] }
  0x17   : > { %473 = vst.msk [vmem:[#allocation3 + $0x48] sm:$0xff] %vm341_vm1, %v1188_v5  ;;  %472 = vst.msk [vmem:[#allocation3 + $0x40] sm:$0xff] %vm341_vm1, %v1190_v6 }
  0x18   : > { %514 = vrot.lane.b32.xlu0 %v1188_v5, %s1099_s25  ;;  %512 = vrot.lane.b32.xlu1 %v1190_v6, %s1099_s25 }
  0x1c   : > { %1073 = vrot.lane.b32.xlu0 %v1094_v2, %s1100_s26  ;;  %396 = vrot.lane.b32.xlu1 %v1188_v5, %s1100_s26 }
  0x1e   : > { %v550_v59 = vld [vmem:[#allocation3 + $0x48] sm:$0xff]  ;;  %v549_v62 = vld [vmem:[#allocation3 + $0x40] sm:$0xff] }
  0x20   : > { %392 = vrot.lane.b32.xlu0 %v1190_v6, %s1100_s26 }
  0x7e   : > { %v1206_v8 = vpop.permute.xlu0 %493  ;;  %v1216_v12 = vpop.permute.xlu1 %444 }
  0x7f   : > { %v496_v9 = vmul.f32 %v1190_v6, %v1206_v8  ;;  %v497_v10 = vmul.f32 %v1188_v5, %v1206_v8  ;;  %v450_v15 = vmul.f32 %v1188_v5, %v1216_v12  ;;  %v449_v16 = vmul.f32 0.0, %v1216_v12 }
  0x80   : > { %v448_v18 = vmul.f32 %v1190_v6, %v1216_v12 }
  0x81   : > { %500 = vrot.lane.b32.xlu1 %v496_v9, %s1096_s18  ;;  %502 = vrot.lane.b32.xlu0 %v497_v10, %s1096_s18 }
  0x82   : > { %v1214_v11 = vpop.permute.xlu0 %476  ;;  %v1227_v17 = vpop.permute.xlu1 %414 }
  0x83   : > { %v479_v13 = vmul.f32 %v1190_v6, %v1214_v11  ;;  %v480_v14 = vmul.f32 %v1188_v5, %v1214_v11  ;;  %v420_v21 = vmul.f32 %v1188_v5, %v1227_v17  ;;  %v1242_v22 = vmul.f32 0.0, %v1227_v17 }
  0x84   : > { %v418_v25 = vmul.f32 %v1190_v6, %v1227_v17 }
  0x85   : > { %483 = vrot.lane.b32.xlu1 %v479_v13, %s1093_s16  ;;  %485 = vrot.lane.b32.xlu0 %v480_v14, %s1093_s16 }
  0x86   : > { %v1233_v19 = vpop.permute.xlu0 %356  ;;  %v1235_v20 = vpop.permute.xlu1 %522 }
  0x87   : > { %v1255_v30 = vmul.f32 0.0, %v1233_v19  ;;  %v362_v31 = vmul.f32 %v1188_v5, %v1233_v19  ;;  %v360_v37 = vmul.f32 %v1190_v6, %v1233_v19  ;;  %v526_v38 = vmul.f32 %v1235_v20, %v1188_v5 }
  0x88   : > { %v525_v39 = vmul.f32 %v1235_v20, %v1190_v6 }
  0x89   : > { %461 = vrot.lane.b32.xlu1 %v450_v15, %s1095_s17  ;;  %459 = vrot.lane.b32.xlu0 %v449_v16, %s1095_s17 }
  0x8a   : > { %v515_v23 = vpop.permute.xlu0 %514  ;;  %v513_v24 = vpop.permute.xlu1 %512 }
  0x8b   : > { %519 = vst.msk [vmem:[#allocation3 + $0x78] sm:$0xff] %vm341_vm1, %v515_v23  ;;  %518 = vst.msk [vmem:[#allocation3 + $0x70] sm:$0xff] %vm341_vm1, %v513_v24 }
  0x8d   : > { %457 = vrot.lane.b32.xlu1 %v448_v18, %s1095_s17  ;;  %455 = vrot.lane.b32.xlu0 %v449_v16, %s1095_s17 }
  0x8e   : > { %v1074_v26 = vpop.permute.xlu0 %1073  ;;  %v397_v27 = vpop.permute.xlu1 %396 }
  0x8f   : > { %v1076_v28 = vunpack.i.h.bf16 %v1074_v26  ;;  %v1075_v29 = vunpack.i.l.bf16 %v1074_v26 }
  0x91   : > { %431 = vrot.lane.b32.xlu1 %v420_v21, %s1092_s13  ;;  %429 = vrot.lane.b32.xlu0 %v1242_v22, %s1092_s13  ;;  %v400_v32 = vsel %vm398_vm2, %v1075_v29, %v397_v27 }
  0x92   : > { %404 = vst.msk [vmem:[#allocation3 + $0x18] sm:$0xff] %vm341_vm1, %v400_v32  ;;  %v393_v33 = vpop.permute.xlu0 %392  ;;  %v556_v34 = vld [vmem:[#allocation3 + $0x78] sm:$0xff]  ;;  %v555_v36 = vld [vmem:[#allocation3 + $0x70] sm:$0xff]  ;;  %v539_v32 = vld [vmem:[%s1460_s1 + $0x10] sm:$0xff] }
  0x93   : > { %v399_v35 = vsel %vm398_vm2, %v1076_v28, %v393_v33  ;;  %567 = vmatpush1.msra.mxu0 %v556_v34  ;;  %v537_v28 = vld [vmem:[%s1460_s1] sm:$0xff] }
  0x94   : > { %403 = vst.msk [vmem:[#allocation3 + $0x10] sm:$0xff] %vm341_vm1, %v399_v35  ;;  %568 = vmatprep.subr.mxu0 %v1094_v2 }
  0x95   : > { %427 = vrot.lane.b32.xlu1 %v418_v25, %s1092_s13  ;;  %425 = vrot.lane.b32.xlu0 %v1242_v22, %s1092_s13 }
  0x96   : > { %569 = vmatpush1.msra.mxu0 %v555_v36 }
  0x97   : > { %570 = vmatprep.subr.mxu0 %v1094_v2 }
  0x99   : > { %371 = vrot.lane.b32.xlu1 %v1255_v30, %s1098_s24  ;;  %373 = vrot.lane.b32.xlu0 %v362_v31, %s1098_s24  ;;  %v544_v18 = vld [vmem:[#allocation3 + $0x18] sm:$0xff]  ;;  %v540_v31 = vld [vmem:[%s1460_s1 + $0x18] sm:$0xff] }
  0x9b   : > { %v543_v24 = vld [vmem:[#allocation3 + $0x10] sm:$0xff] }
  0x9d   : > { %367 = vrot.lane.b32.xlu1 %v1255_v30, %s1098_s24  ;;  %369 = vrot.lane.b32.xlu0 %v360_v37, %s1098_s24 }
  0xa1   : > { %531 = vrot.lane.b32.xlu1 %v526_v38, %s1097_s23  ;;  %529 = vrot.lane.b32.xlu0 %v525_v39, %s1097_s23 }
  0xa5   : > { %645 = vperm.xlu0 %1078, %v641_v41   ;;  %650 = vperm.xlu1 %1077, %v642_v42  }
  0xa9   : > { %773 = vrot.lane.b32.xlu0 %v449_v16, %s1095_s17  ;;  %664 = vperm.xlu1 %1077, %v656_v43  }
  0xad   : > { %769 = vrot.lane.b32.xlu0 %v449_v16, %s1095_s17  ;;  %659 = vperm.xlu1 %1077, %v655_v44  }
  0xf3   : > { %v501_v45 = vpop.permute.xlu1 %500  ;;  %v503_v46 = vpop.permute.xlu0 %502 }
  0xf4   : > { %506 = vst.msk [vmem:[#allocation3 + $0x60] sm:$0xff] %vm341_vm1, %v501_v45  ;;  %507 = vst.msk [vmem:[#allocation3 + $0x68] sm:$0xff] %vm341_vm1, %v503_v46 }
  0xf7   : > { %v484_v47 = vpop.permute.xlu1 %483  ;;  %v486_v48 = vpop.permute.xlu0 %485 }
  0xf8   : > { %489 = vst.msk [vmem:[#allocation3 + $0x50] sm:$0xff] %vm341_vm1, %v484_v47  ;;  %490 = vst.msk [vmem:[#allocation3 + $0x58] sm:$0xff] %vm341_vm1, %v486_v48 }
  0xfb   : > { %v462_v49 = vpop.permute.xlu1 %461  ;;  %v460_v50 = vpop.permute.xlu0 %459  ;;  %v554_v51 = vld [vmem:[#allocation3 + $0x68] sm:$0xff]  ;;  %v553_v53 = vld [vmem:[#allocation3 + $0x60] sm:$0xff] }
  0xfc   : > { %v465_v52 = vsel %vm463_vm4, %v460_v50, %v462_v49  ;;  %571 = vmatpush1.msra.mxu0 %v554_v51 }
  0xfd   : > { %469 = vst.msk [vmem:[#allocation3 + $0x38] sm:$0xff] %vm341_vm1, %v465_v52  ;;  %572 = vmatprep.subr.mxu0 %v1094_v2 }
  0xfe   : > { %573 = vmatpush1.msra.mxu0 %v553_v53 }
  0xff   : > { %v458_v54 = vpop.permute.xlu1 %457  ;;  %574 = vmatprep.subr.mxu0 %v1094_v2  ;;  %v456_v55 = vpop.permute.xlu0 %455  ;;  %v552_v56 = vld [vmem:[#allocation3 + $0x58] sm:$0xff]  ;;  %v551_v58 = vld [vmem:[#allocation3 + $0x50] sm:$0xff] }
 0x100   : > { %v464_v57 = vsel %vm463_vm4, %v456_v55, %v458_v54  ;;  %575 = vmatpush1.msra.mxu0 %v552_v56 }
 0x101   : > { %468 = vst.msk [vmem:[#allocation3 + $0x30] sm:$0xff] %vm341_vm1, %v464_v57  ;;  %576 = vmatprep.subr.mxu0 %v1094_v2 }
 0x102   : > { %577 = vmatpush1.msra.mxu0 %v551_v58 }
 0x103   : > { %v432_v60 = vpop.permute.xlu1 %431  ;;  %578 = vmatprep.subr.mxu0 %v1094_v2  ;;  %v430_v61 = vpop.permute.xlu0 %429 }
 0x104   : > { %v435_v63 = vsel %vm433_vm5, %v430_v61, %v432_v60  ;;  %579 = vmatpush1.msra.mxu0 %v550_v59  ;;  %v548_v3 = vld [vmem:[#allocation3 + $0x38] sm:$0xff] }
 0x105   : > { %439 = vst.msk [vmem:[#allocation3 + $0x28] sm:$0xff] %vm341_vm1, %v435_v63  ;;  %580 = vmatprep.subr.mxu0 %v1094_v2  ;;  %v959_v59 = vld [vmem:[%s1465_s6 + $0x8] sm:$0xff] }
 0x106   : > { %581 = vmatpush1.msra.mxu0 %v549_v62 }
 0x107   : > { %v428_v0 = vpop.permute.xlu1 %427  ;;  %582 = vmatprep.subr.mxu0 %v1094_v2  ;;  %v426_v1 = vpop.permute.xlu0 %425 }
 0x108   : > { %v434_v4 = vsel %vm433_vm5, %v426_v1, %v428_v0  ;;  %583 = vmatpush1.msra.mxu0 %v548_v3  ;;  %v547_v5 = vld [vmem:[#allocation3 + $0x30] sm:$0xff] }
 0x109   : > { %438 = vst.msk [vmem:[#allocation3 + $0x20] sm:$0xff] %vm341_vm1, %v434_v4  ;;  %584 = vmatprep.subr.mxu0 %v1094_v2 }
 0x10a   : > { %585 = vmatpush1.msra.mxu0 %v547_v5 }
 0x10b   : > { %v372_v6 = vpop.permute.xlu1 %371  ;;  %v374_v7 = vpop.permute.xlu0 %373  ;;  %586 = vmatprep.subr.mxu0 %v1094_v2 }
 0x10c   : > { %v377_v9 = vsel %vm375_vm6, %v372_v6, %v374_v7  ;;  %v546_v10 = vld [vmem:[#allocation3 + $0x28] sm:$0xff] }
 0x10d   : > { %381 = vst.msk [vmem:[#allocation3 + $0x8] sm:$0xff] %vm341_vm1, %v377_v9  ;;  %587 = vmatpush1.msra.mxu0 %v546_v10 }
 0x10e   : > { %588 = vmatprep.subr.mxu0 %v1094_v2 }
 0x10f   : > { %v368_v13 = vpop.permute.xlu1 %367  ;;  %v370_v14 = vpop.permute.xlu0 %369 }
 0x110   : > { %v376_v15 = vsel %vm375_vm6, %v368_v13, %v370_v14  ;;  %v545_v16 = vld [vmem:[#allocation3 + $0x20] sm:$0xff] }
 0x111   : > { %380 = vst.msk [vmem:[#allocation3] sm:$0xff] %vm341_vm1, %v376_v15  ;;  %589 = vmatpush1.msra.mxu0 %v545_v16 }
 0x112   : > { %590 = vmatprep.subr.mxu0 %v1094_v2 }
 0x113   : > { %v532_v21 = vpop.permute.xlu1 %531  ;;  %591 = vmatpush1.msra.mxu0 %v544_v18  ;;  %v530_v23 = vpop.permute.xlu0 %529 }
 0x114   : > { %536 = vst.msk [vmem:[#allocation3 + $0x88] sm:$0xff] %vm341_vm1, %v532_v21  ;;  %535 = vst.msk [vmem:[#allocation3 + $0x80] sm:$0xff] %vm341_vm1, %v530_v23  ;;  %592 = vmatprep.subr.mxu0 %v1094_v2  ;;  %v542_v25 = vld [vmem:[#allocation3 + $0x8] sm:$0xff] }
 0x115   : > { %593 = vmatpush1.msra.mxu0 %v543_v24 }
 0x116   : > { %594 = vmatprep.subr.mxu0 %v1094_v2 }
 0x117   : > { %595 = vmatpush1.msra.mxu0 %v542_v25 }
 0x118   : > { %596 = vmatprep.subr.mxu0 %v1094_v2  ;;  %v541_v26 = vld [vmem:[#allocation3] sm:$0xff] }
 0x119   : > { %597 = vmatpush1.msra.mxu0 %v541_v26 }
 0x11a   : > { %626 = vmatprep.subr.mxu0 %v1094_v2 }
 0x11b   : > { %v558_v27 = vld [vmem:[#allocation3 + $0x88] sm:$0xff]  ;;  %v557_v29 = vld [vmem:[#allocation3 + $0x80] sm:$0xff] }
 0x11c   : > { %627 = vmatpush2.msra.mxu0 %v558_v27 }
 0x11d   : > { %628 = vmatprep.subr.mxu0 %v1094_v2 }
 0x11e   : > { %629 = vmatpush2.msra.mxu0 %v557_v29 }
 0x11f   : > { %631 = vmatmul.mubr.f32.vlgmr.msra.gmra.mxu0 %v537_v28 }
 0x120   : > { %1047 = vmatprep.mubr.msk.f32.mxu0 %vm559_vm3, %v540_v31  ;;  %v651_v33 = vpop.permute.xlu1 %650  ;;  %v646_v35 = vpop.permute.xlu0 %645 }
 0x123   : > { %636 = vmatmul.mubr.f32.gmra.mxu0 %v539_v32 }
 0x124   : > { %v665_v34 = vpop.permute.xlu1 %664  ;;  %v774_v60 = vpop.permute.xlu0 %773 }
 0x128   : > { %v660_v38 = vpop.permute.xlu1 %659  ;;  %v770_v61 = vpop.permute.xlu0 %769 }
 0x1df   : > { %v632_v36 = vpop.f32.mrf.mxu0 }
 0x1e0   : > { %v653_v37 = vmul.f32 %v646_v35, %v632_v36 }
 0x1e1   : > { %v634_v39 = vpop.f32.mrf.mxu0 }
 0x1e2   : > { %v667_v40 = vadd.f32 %v660_v38, %v653_v37 }
 0x1e3   : > { %v637_v41 = vpop.f32.mrf.mxu0 }
 0x1e4   : > { %vm669_vm7 = vcmp.gt.f32.partialorder %v667_v40, 0.0  ;;  %v671_v42 = vmul.f32 0.01, %v667_v40  ;;  %v654_v43 = vmul.f32 %v651_v33, %v637_v41 }
 0x1e5   : > { %v639_v44 = vpop.f32.mrf.mxu0 }
 0x1e6   : > { %v673_v45 = vsel %vm669_vm7, %v667_v40, %v671_v42  ;;  %v668_v46 = vadd.f32 %v665_v34, %v654_v43 }
 0x1e7   : > { %681 = vst.msk [vmem:[#allocation4 + $0x8] sm:$0xff] %vm341_vm1, %v673_v45 }
 0x1e8   : > { %vm670_vm8 = vcmp.gt.f32.partialorder %v668_v46, 0.0  ;;  %v672_v47 = vmul.f32 0.01, %v668_v46 }
 0x1ea   : > { %v674_v48 = vsel %vm670_vm8, %v668_v46, %v672_v47 }
 0x1eb   : > { %682 = vst.msk [vmem:[#allocation4 + $0x20] sm:$0xff] %vm341_vm1, %v674_v48 }
 0x1ee   : > { %v815_v49 = vld [vmem:[#allocation4 + $0x8] sm:$0xff] }
 0x1ef   : > { %819 = vrot.lane.b32.xlu1 %v815_v49, %s1099_s25  ;;  %785 = vst.msk [vmem:[#allocation5 + $0x40] sm:$0xff] %vm341_vm1, %v815_v49  ;;  %v803_v50 = vmul.f32 %v815_v49, %v1206_v8  ;;  %v789_v53 = vmul.f32 %v815_v49, %v1214_v11  ;;  %v762_v55 = vmul.f32 %v815_v49, %v1216_v12 }
 0x1f0   : > { %v736_v56 = vmul.f32 %v815_v49, %v1227_v17  ;;  %v829_v58 = vmul.f32 %v815_v49, %v1235_v20 }
 0x1f2   : > { %v816_v51 = vld [vmem:[#allocation4 + $0x20] sm:$0xff] }
 0x1f3   : > { %821 = vrot.lane.b32.xlu0 %v816_v51, %s1099_s25  ;;  %807 = vrot.lane.b32.xlu1 %v803_v50, %s1096_s18  ;;  %786 = vst.msk [vmem:[#allocation5 + $0x48] sm:$0xff] %vm341_vm1, %v816_v51  ;;  %v804_v52 = vmul.f32 %v816_v51, %v1206_v8  ;;  %v790_v54 = vmul.f32 %v816_v51, %v1214_v11 }
 0x1f4   : > { %v764_v8 = vmul.f32 %v816_v51, %v1216_v12  ;;  %v738_v11 = vmul.f32 %v816_v51, %v1227_v17  ;;  %v690_v57 = vmul.f32 %v816_v51, %v1233_v19  ;;  %v688_v12 = vmul.f32 %v815_v49, %v1233_v19  ;;  %v842_v17 = vld [vmem:[%s1463_s4 + $0x8] sm:$0xff]  ;;  %v944_v19 = vld [vmem:[%s1464_s5] sm:$0xff] }
 0x1f5   : > { %1048 = vmatprep.mubr.msk.f32.mxu1 %vm559_vm3, %v842_v17 }
 0x1f6   : > { %v853_v33 = vld [vmem:[#allocation5 + $0x40] sm:$0xff] }
 0x1f7   : > { %809 = vrot.lane.b32.xlu0 %v804_v52, %s1096_s18  ;;  %793 = vrot.lane.b32.xlu1 %v789_v53, %s1093_s16 }
 0x1fa   : > { %v854_v28 = vld [vmem:[#allocation5 + $0x48] sm:$0xff] }
 0x1fb   : > { %795 = vrot.lane.b32.xlu0 %v790_v54, %s1093_s16  ;;  %771 = vrot.lane.b32.xlu1 %v762_v55, %s1095_s17  ;;  %v841_v55 = vld [vmem:[%s1463_s4] sm:$0xff]  ;;  %s332_s16 = scalar_lea.vmem %s1468_s9, %s1052_s19 }
 0x1ff   : > { %747 = vrot.lane.b32.xlu0 %v1242_v22, %s1092_s13  ;;  %745 = vrot.lane.b32.xlu1 %v736_v56, %s1092_s13 }
 0x203   : > { %743 = vrot.lane.b32.xlu0 %v1242_v22, %s1092_s13  ;;  %775 = vrot.lane.b32.xlu1 %v764_v8, %s1095_s17  ;;  %v830_v22 = vmul.f32 %v816_v51, %v1235_v20  ;;  %v958_v20 = vld [vmem:[%s1465_s6] sm:$0xff]  ;;  %v844_v8 = vld [vmem:[%s1463_s4 + $0x18] sm:$0xff] }
 0x207   : > { %1080 = vrot.lane.b32.xlu0 %v1094_v2, %s1100_s26  ;;  %749 = vrot.lane.b32.xlu1 %v738_v11, %s1092_s13  ;;  %v843_v11 = vld [vmem:[%s1463_s4 + $0x10] sm:$0xff] }
 0x20b   : > { %723 = vrot.lane.b32.xlu1 %v816_v51, %s1100_s26  ;;  %719 = vrot.lane.b32.xlu0 %v815_v49, %s1100_s26 }
 0x20f   : > { %699 = vrot.lane.b32.xlu1 %v1255_v30, %s1098_s24  ;;  %701 = vrot.lane.b32.xlu0 %v690_v57, %s1098_s24 }
 0x213   : > { %695 = vrot.lane.b32.xlu1 %v1255_v30, %s1098_s24  ;;  %697 = vrot.lane.b32.xlu0 %v688_v12, %s1098_s24  ;;  %v945_v30 = vld [vmem:[%s1464_s5 + $0x8] sm:$0xff] }
 0x217   : > { %835 = vrot.lane.b32.xlu1 %v830_v22, %s1097_s23  ;;  %833 = vrot.lane.b32.xlu0 %v829_v58, %s1097_s23 }
 0x21b   : > { %948 = vperm.xlu1 %1077, %v944_v19   ;;  %953 = vperm.xlu0 %1078, %v945_v30  }
 0x21f   : > { %962 = vperm.xlu1 %1077, %v958_v20   ;;  %967 = vperm.xlu0 %1078, %v959_v59  }
 0x261   : > { %v820_v62 = vpop.permute.xlu1 %819 }
 0x262   : > { %825 = vst.msk [vmem:[#allocation5 + $0x70] sm:$0xff] %vm341_vm1, %v820_v62 }
 0x265   : > { %v808_v63 = vpop.permute.xlu1 %807  ;;  %v822_v0 = vpop.permute.xlu0 %821 }
 0x266   : > { %813 = vst.msk [vmem:[#allocation5 + $0x60] sm:$0xff] %vm341_vm1, %v808_v63  ;;  %826 = vst.msk [vmem:[#allocation5 + $0x78] sm:$0xff] %vm341_vm1, %v822_v0 }
 0x269   : > { %v794_v1 = vpop.permute.xlu1 %793  ;;  %v810_v3 = vpop.permute.xlu0 %809  ;;  %v859_v9 = vld [vmem:[#allocation5 + $0x70] sm:$0xff] }
 0x26a   : > { %799 = vst.msk [vmem:[#allocation5 + $0x50] sm:$0xff] %vm341_vm1, %v794_v1  ;;  %814 = vst.msk [vmem:[#allocation5 + $0x68] sm:$0xff] %vm341_vm1, %v810_v3 }
 0x26d   : > { %v772_v4 = vpop.permute.xlu1 %771  ;;  %v796_v5 = vpop.permute.xlu0 %795  ;;  %v860_v6 = vld [vmem:[#allocation5 + $0x78] sm:$0xff]  ;;  %v857_v15 = vld [vmem:[#allocation5 + $0x60] sm:$0xff] }
 0x26e   : > { %v777_v7 = vsel %vm463_vm4, %v770_v61, %v772_v4  ;;  %800 = vst.msk [vmem:[#allocation5 + $0x58] sm:$0xff] %vm341_vm1, %v796_v5  ;;  %870 = vmatpush1.msra.mxu1 %v860_v6 }
 0x26f   : > { %781 = vst.msk [vmem:[#allocation5 + $0x30] sm:$0xff] %vm341_vm1, %v777_v7  ;;  %871 = vmatprep.subr.mxu1 %v1094_v2 }
 0x270   : > { %872 = vmatpush1.msra.mxu1 %v859_v9 }
 0x271   : > { %v746_v10 = vpop.permute.xlu1 %745  ;;  %873 = vmatprep.subr.mxu1 %v1094_v2  ;;  %v748_v13 = vpop.permute.xlu0 %747  ;;  %v858_v14 = vld [vmem:[#allocation5 + $0x68] sm:$0xff]  ;;  %v855_v25 = vld [vmem:[#allocation5 + $0x50] sm:$0xff] }
 0x272   : > { %874 = vmatpush1.msra.mxu1 %v858_v14 }
 0x273   : > { %875 = vmatprep.subr.mxu1 %v1094_v2 }
 0x274   : > { %876 = vmatpush1.msra.mxu1 %v857_v15 }
 0x275   : > { %v776_v16 = vpop.permute.xlu1 %775  ;;  %877 = vmatprep.subr.mxu1 %v1094_v2  ;;  %v744_v18 = vpop.permute.xlu0 %743  ;;  %v856_v21 = vld [vmem:[#allocation5 + $0x58] sm:$0xff] }
 0x276   : > { %v778_v23 = vsel %vm463_vm4, %v774_v60, %v776_v16  ;;  %v751_v24 = vsel %vm433_vm5, %v744_v18, %v746_v10  ;;  %878 = vmatpush1.msra.mxu1 %v856_v21  ;;  %v851_v39 = vld [vmem:[#allocation5 + $0x30] sm:$0xff] }
 0x277   : > { %782 = vst.msk [vmem:[#allocation5 + $0x38] sm:$0xff] %vm341_vm1, %v778_v23  ;;  %755 = vst.msk [vmem:[#allocation5 + $0x20] sm:$0xff] %vm341_vm1, %v751_v24  ;;  %879 = vmatprep.subr.mxu1 %v1094_v2 }
 0x278   : > { %880 = vmatpush1.msra.mxu1 %v855_v25 }
 0x279   : > { %v750_v26 = vpop.permute.xlu1 %749  ;;  %881 = vmatprep.subr.mxu1 %v1094_v2  ;;  %v1081_v27 = vpop.permute.xlu0 %1080 }
 0x27a   : > { %v752_v29 = vsel %vm433_vm5, %v748_v13, %v750_v26  ;;  %v1083_v31 = vunpack.i.h.bf16 %v1081_v27  ;;  %v1082_v32 = vunpack.i.l.bf16 %v1081_v27  ;;  %882 = vmatpush1.msra.mxu1 %v854_v28 }
 0x27b   : > { %756 = vst.msk [vmem:[#allocation5 + $0x28] sm:$0xff] %vm341_vm1, %v752_v29  ;;  %883 = vmatprep.subr.mxu1 %v1094_v2 }
 0x27c   : > { %884 = vmatpush1.msra.mxu1 %v853_v33 }
 0x27d   : > { %v724_v34 = vpop.permute.xlu1 %723  ;;  %v720_v35 = vpop.permute.xlu0 %719  ;;  %885 = vmatprep.subr.mxu1 %v1094_v2 }
 0x27e   : > { %v726_v36 = vsel %vm398_vm2, %v1082_v32, %v724_v34  ;;  %v725_v37 = vsel %vm398_vm2, %v1083_v31, %v720_v35  ;;  %v852_v38 = vld [vmem:[#allocation5 + $0x38] sm:$0xff]  ;;  %v849_v44 = vld [vmem:[#allocation5 + $0x20] sm:$0xff] }
 0x27f   : > { %730 = vst.msk [vmem:[#allocation5 + $0x18] sm:$0xff] %vm341_vm1, %v726_v36  ;;  %729 = vst.msk [vmem:[#allocation5 + $0x10] sm:$0xff] %vm341_vm1, %v725_v37  ;;  %886 = vmatpush1.msra.mxu1 %v852_v38 }
 0x280   : > { %887 = vmatprep.subr.mxu1 %v1094_v2 }
 0x281   : > { %v700_v40 = vpop.permute.xlu1 %699  ;;  %888 = vmatpush1.msra.mxu1 %v851_v39  ;;  %v702_v41 = vpop.permute.xlu0 %701 }
 0x282   : > { %v704_v42 = vsel %vm375_vm6, %v700_v40, %v702_v41  ;;  %889 = vmatprep.subr.mxu1 %v1094_v2  ;;  %v850_v43 = vld [vmem:[#allocation5 + $0x28] sm:$0xff] }
 0x283   : > { %708 = vst.msk [vmem:[#allocation5 + $0x8] sm:$0xff] %vm341_vm1, %v704_v42  ;;  %890 = vmatpush1.msra.mxu1 %v850_v43 }
 0x284   : > { %891 = vmatprep.subr.mxu1 %v1094_v2 }
 0x285   : > { %v696_v45 = vpop.permute.xlu1 %695  ;;  %892 = vmatpush1.msra.mxu1 %v849_v44  ;;  %v698_v46 = vpop.permute.xlu0 %697 }
 0x286   : > { %v703_v47 = vsel %vm375_vm6, %v696_v45, %v698_v46  ;;  %893 = vmatprep.subr.mxu1 %v1094_v2  ;;  %v848_v48 = vld [vmem:[#allocation5 + $0x18] sm:$0xff]  ;;  %v847_v49 = vld [vmem:[#allocation5 + $0x10] sm:$0xff] }
 0x287   : > { %707 = vst.msk [vmem:[#allocation5] sm:$0xff] %vm341_vm1, %v703_v47  ;;  %894 = vmatpush1.msra.mxu1 %v848_v48 }
 0x288   : > { %895 = vmatprep.subr.mxu1 %v1094_v2 }
 0x289   : > { %v836_v50 = vpop.permute.xlu1 %835  ;;  %v834_v51 = vpop.permute.xlu0 %833  ;;  %896 = vmatpush1.msra.mxu1 %v847_v49 }
 0x28a   : > { %840 = vst.msk [vmem:[#allocation5 + $0x88] sm:$0xff] %vm341_vm1, %v836_v50  ;;  %839 = vst.msk [vmem:[#allocation5 + $0x80] sm:$0xff] %vm341_vm1, %v834_v51  ;;  %897 = vmatprep.subr.mxu1 %v1094_v2  ;;  %v846_v52 = vld [vmem:[#allocation5 + $0x8] sm:$0xff] }
 0x28b   : > { %898 = vmatpush1.msra.mxu1 %v846_v52 }
 0x28c   : > { %899 = vmatprep.subr.mxu1 %v1094_v2 }
 0x28e   : > { %v845_v53 = vld [vmem:[#allocation5] sm:$0xff] }
 0x28f   : > { %900 = vmatpush1.msra.mxu1 %v845_v53 }
 0x290   : > { %929 = vmatprep.subr.mxu1 %v1094_v2 }
 0x291   : > { %v862_v54 = vld [vmem:[#allocation5 + $0x88] sm:$0xff]  ;;  %v861_v56 = vld [vmem:[#allocation5 + $0x80] sm:$0xff] }
 0x292   : > { %930 = vmatpush2.msra.mxu1 %v862_v54 }
 0x293   : > { %931 = vmatprep.subr.mxu1 %v1094_v2 }
 0x294   : > { %932 = vmatpush2.msra.mxu1 %v861_v56 }
 0x295   : > { %934 = vmatmul.mubr.f32.vlgmr.msra.gmra.mxu1 %v841_v55 }
 0x296   : > { %1049 = vmatprep.mubr.msk.f32.mxu1 %vm559_vm3, %v844_v8  ;;  %v949_v57 = vpop.permute.xlu1 %948  ;;  %v954_v12 = vpop.permute.xlu0 %953 }
 0x299   : > { %939 = vmatmul.mubr.f32.gmra.mxu1 %v843_v11 }
 0x29a   : > { %v963_v2 = vpop.permute.xlu1 %962  ;;  %v968_v60 = vpop.permute.xlu0 %967 }
 0x355   : > { %v935_v17 = vpop.f32.mrf.mxu1 }
 0x356   : > { %v956_v22 = vmul.f32 %v949_v57, %v935_v17 }
 0x357   : > { %v937_v58 = vpop.f32.mrf.mxu1 }
 0x358   : > { %v970_v19 = vadd.f32 %v963_v2, %v956_v22 }
 0x359   : > { %v940_v30 = vpop.f32.mrf.mxu1 }
 0x35a   : > { %vm972_vm9 = vcmp.gt.f32.partialorder %v970_v19, 0.0  ;;  %v974_v20 = vmul.f32 0.01, %v970_v19  ;;  %v957_v59 = vmul.f32 %v954_v12, %v940_v30 }
 0x35b   : > { %v942_v61 = vpop.f32.mrf.mxu1 }
 0x35c   : > { %v976_v62 = vsel %vm972_vm9, %v970_v19, %v974_v20  ;;  %v971_v63 = vadd.f32 %v968_v60, %v957_v59 }
 0x35d   : > { %978 = vst.msk [vmem:[%s332_s16] sm:$0xff] %vm341_vm1, %v976_v62 }
 0x35e   : > { %vm973_vm10 = vcmp.gt.f32.partialorder %v971_v63, 0.0  ;;  %v975_v0 = vmul.f32 0.01, %v971_v63 }
 0x360   : > { %v977_v1 = vsel %vm973_vm10, %v971_v63, %v975_v0 }
 0x361   : > { %979 = vst.msk [vmem:[%s332_s16 + $0x8] sm:$0xff] %vm341_vm1, %v977_v1 }
 0x362 PF: > { %s19_s30 = sadd.s32 1, %s1090_s30  }
 0x363   : > { %p16_p4 = scmp.ge.s32.totalorder %s19_s30, 4  }
 0x365   :  { %18 = sbr.rel (!%p16_p4) target bundleno = 1 (0x1), region = 86 }

// kernel: _lambda_.8
= control target key start
LH: loop header
LB: loop body
LE: loop exit
PB: predicated region body
PF: predicated region fallthrough
CT: control target
= control target key end

     0   :  { %s2773_s21 = smov 0   ;;  %s3339_s0 = inlined_call_operand.vmem [shape: f32[2,16,16], index: 0, kind: input, shape index: {}]   ;;  %s3340_s1 = inlined_call_operand.vmem [shape: f32[32,144], index: 1, kind: input, shape index: {}]   ;;  %s3341_s2 = inlined_call_operand.vmem [shape: f32[32,1], index: 2, kind: input, shape index: {}]   ;;  %s3342_s3 = inlined_call_operand.vmem [shape: f32[32,1], index: 3, kind: input, shape index: {}]   ;;  %s3343_s4 = inlined_call_operand.vmem [shape: f32[32,288], index: 4, kind: input, shape index: {}]   ;;  %s3344_s5 = inlined_call_operand.vmem [shape: f32[32,1], index: 5, kind: input, shape index: {}]   ;;  %s3345_s6 = inlined_call_operand.vmem [shape: f32[32,1], index: 6, kind: input, shape index: {}]   ;;  %s3346_s7 = inlined_call_operand.vmem [shape: f32[1,16], index: 7, kind: input, shape index: {}]   ;;  %s3347_s8 = inlined_call_operand.vmem [shape: f32[1,16], index: 8, kind: input, shape index: {}]   ;;  %s3348_s9 = inlined_call_operand.vmem [shape: f32[2,4,1], index: 9, kind: input, shape index: {}]   ;;  %s3349_s10 = inlined_call_operand.vmem [shape: f32[32,4], index: 10, kind: input, shape index: {}]   ;;  %s3350_s11 = inlined_call_operand.vmem [shape: f32[32,32], index: 11, kind: input, shape index: {}]   ;;  %s3351_s12 = inlined_call_operand.vmem [shape: f32[2,32], index: 12, kind: input, shape index: {}]   ;;  %s3352_s13 = inlined_call_operand.vmem [shape: f32[2,32], index: 13, kind: input, shape index: {}]   ;;  %s3353_s14 = inlined_call_operand.vmem [shape: f32[32,2], index: 14, kind: input, shape index: {}]   ;;  %s3354_s15 = inlined_call_operand.vmem [shape: f32[2,32,16], index: 15, kind: output, shape index: {0}]   ;;  %s3355_s16 = inlined_call_operand.vmem [shape: f32[2,32,1], index: 16, kind: output, shape index: {1}]  }
   0x1   :  { %3366 = sst [smem:[#allocation6_spill]] %s3339_s0 }
   0x2 LB: > { %s2392_s22 = sadd.s32 4294967295, %s2675_s21   ;;  %p2396_p0 = scmp.ge.s32.totalorder %s2675_s21, 1  ;;  %s2675_s21 = sphi %s2773_s21, %s27_s21  }
   0x3   : > { %p474_p1 = scmp.lt.s32.totalorder %s2675_s21, 3 }
   0x5   : > { %p475_p2 = pnand %p2396_p0, %p474_p1 }
   0x6   : > { %s2677_s25 = smov (!%p475_p2), 3   ;;  %s3358_s28 = smov (!%p475_p2), 127  }
   0x7   : > { %478 = sbr.rel (%p475_p2) target bundleno = 1626 (0x65a), region = 80  ;;  %p533_p3 = scmp.lt.s32.totalorder (!%p475_p2), %s2392_s22, 1 }
   0x8   : > { %s2680_s29 = smov (!%p475_p2), 1   ;;  %s3360_s30 = smov (!%p475_p2), 125  }
   0x9   : > { %s3367_s19 = sld [smem:[#allocation6_spill]] (!%p475_p2)  ;;  %s3362_s23 = smov (!%p475_p2), 123  }
   0xa   : > { %s3356_s24 = smov (!%p475_p2), 5   ;;  %s3364_s26 = smov (!%p475_p2), 124  }
   0xb   : > { %s2685_s27 = smov (!%p475_p2), 4   ;;  %s3368_s18 = smov (!%p475_p2), 124  }
   0xc   : > { %v2404_v0 = vld [vmem:[%s3346_s7] ss:$0 sm:$0xff]  ;;  %vm558_vm0 = vcmask 1047680   ;;  %vm560_vm1 = vcmask 130048   ;;  %v2679_v2 = vmov 0.0   ;;  %s3374_s22 = smov (!%p533_p3, %s2392_s22), 1 }
   0xd   : > { %712 = vrot.lane.b32.xlu0 %v2404_v0, %s2677_s25  ;;  %v2405_v1 = vld [vmem:[%s3347_s8] ss:$0 sm:$0xff]  ;;  %663 = vrot.lane.b32.xlu1 %v2404_v0, %s3358_s28  ;;  %562 = vst.msk [vmem:[#allocation2 + $0x20] sm:$0xff] %vm558_vm0, %v2679_v2  ;;  %556 = vst [vmem:[#allocation2] sm:$0xff] %v2679_v2  ;;  %s2438_s0 = sshll.u32 %s3374_s22, 4  ;;  %v2686_v7 = vmov 0  }
   0xe   : > { %559 = vst.msk [vmem:[#allocation2 + $0x8] sm:$0xff] %vm558_vm0, %v2679_v2  ;;  %951 = vst.msk [vmem:[#allocation4 + $0x8] sm:$0xff] %vm558_vm0, %v2679_v2  ;;  %794 = vmatprep.subr.mxu0 %v2679_v2  ;;  %2641 = vset.pattern.permute.xlu0 %v2686_v7  ;;  %vm617_vm2 = vcmask 31744   ;;  %v757_v40 = vld [vmem:[%s3340_s1 + $0x8] sm:$0xff]  ;;  %v882_v41 = vld [vmem:[%s3341_s2 + $0x18] sm:$0xff]  ;;  %vm682_vm3 = vcmask 7168  }
   0xf   : > { %953 = vst.msk [vmem:[#allocation4 + $0x20] sm:$0xff] %vm558_vm0, %v2679_v2  ;;  %955 = vst.msk [vmem:[#allocation4 + $0x38] sm:$0xff] %vm558_vm0, %v2679_v2  ;;  %s537_s20 = scalar_lea.vmem %s3367_s19, %s2438_s0  ;;  %2640 = vset.pattern.permute.xlu1 %v2686_v7  ;;  %2406 = vmatprep.mubr.msk.f32.mxu0 %vm560_vm1, %v757_v40  ;;  %v881_v42 = vld [vmem:[%s3341_s2 + $0x10] sm:$0xff]  ;;  %v910_v43 = vld [vmem:[%s3342_s3 + $0x18] sm:$0xff]  ;;  %vm652_vm4 = vcmask 23552   ;;  %vm594_vm5 = vcmask 39936  }
  0x10   : > { %957 = vst.msk [vmem:[#allocation4 + $0x50] sm:$0xff] %vm558_vm0, %v2679_v2  ;;  %v555_v3 = vld [vmem:[%s537_s20 + $0x8] sm:$0xff]  ;;  %v554_v4 = vld [vmem:[%s537_s20] sm:$0xff]  ;;  %v909_v44 = vld [vmem:[%s3342_s3 + $0x10] sm:$0xff]  ;;  %s2399_s19 = sshll.u32 %s3374_s22, 2  ;;  %vm1595_vm10 = vcmask 1043456  }
  0x11   : > { %695 = vrot.lane.b32.xlu0 %v2405_v1, %s2680_s29  ;;  %633 = vrot.lane.b32.xlu1 %v2405_v1, %s3360_s30  ;;  %565 = vst.msk [vmem:[#allocation2 + $0x20] sm:$0xff] %vm560_vm1, %v555_v3  ;;  %564 = vst.msk [vmem:[#allocation2 + $0x8] sm:$0xff] %vm560_vm1, %v554_v4  ;;  %v880_v45 = vld [vmem:[%s3341_s2 + $0x8] sm:$0xff]  ;;  %v879_v47 = vld [vmem:[%s3341_s2] sm:$0xff]  ;;  %vm1327_vm11 = vcmask 261120   ;;  %vm2687_vm0 = vmmov 0  }
  0x12   : > { %v908_v46 = vld [vmem:[%s3342_s3 + $0x8] sm:$0xff]  ;;  %v907_v48 = vld [vmem:[%s3342_s3] sm:$0xff]  ;;  %s2439_s20 = sshll.u32 %s3374_s22, 5 }
  0x15   : > { %575 = vrot.lane.b32.xlu0 %v2404_v0, %s3362_s23  ;;  %741 = vrot.lane.b32.xlu1 %v2405_v1, %s3356_s24 }
  0x18   : > { %v2809_v5 = vld [vmem:[#allocation2 + $0x20] sm:$0xff]  ;;  %v2811_v6 = vld [vmem:[#allocation2 + $0x8] sm:$0xff] }
  0x19   : > { %733 = vrot.lane.b32.xlu0 %v2809_v5, %s3364_s26  ;;  %731 = vrot.lane.b32.xlu1 %v2811_v6, %s3364_s26  ;;  %692 = vst.msk [vmem:[#allocation3 + $0x48] sm:$0xff] %vm560_vm1, %v2809_v5  ;;  %691 = vst.msk [vmem:[#allocation3 + $0x40] sm:$0xff] %vm560_vm1, %v2811_v6  ;;  %s3369_s26 = smov 125  }
  0x1d   : > { %2636 = vrot.lane.b32.xlu0 %v2679_v2, %s2685_s27  ;;  %615 = vrot.lane.b32.xlu1 %v2809_v5, %s2685_s27 }
  0x20   : > { %v773_v63 = vld [vmem:[#allocation3 + $0x48] sm:$0xff]  ;;  %v772_v3 = vld [vmem:[#allocation3 + $0x40] sm:$0xff] }
  0x21   : > { %611 = vrot.lane.b32.xlu0 %v2811_v6, %s2685_s27 }
  0x7f   : > { %v2827_v8 = vpop.permute.xlu0 %712  ;;  %v2837_v12 = vpop.permute.xlu1 %663 }
  0x80   : > { %v715_v9 = vmul.f32 %v2811_v6, %v2827_v8  ;;  %v716_v10 = vmul.f32 %v2809_v5, %v2827_v8  ;;  %v669_v15 = vmul.f32 %v2809_v5, %v2837_v12  ;;  %v2848_v16 = vmul.f32 0.0, %v2837_v12 }
  0x81   : > { %v667_v18 = vmul.f32 %v2811_v6, %v2837_v12 }
  0x82   : > { %719 = vrot.lane.b32.xlu1 %v715_v9, %s3360_s30  ;;  %721 = vrot.lane.b32.xlu0 %v716_v10, %s3360_s30  ;;  %s3370_s30 = smov 127  }
  0x83   : > { %v2835_v11 = vpop.permute.xlu0 %695  ;;  %v2850_v17 = vpop.permute.xlu1 %633 }
  0x84   : > { %v698_v13 = vmul.f32 %v2811_v6, %v2835_v11  ;;  %v699_v14 = vmul.f32 %v2809_v5, %v2835_v11  ;;  %v639_v21 = vmul.f32 %v2809_v5, %v2850_v17  ;;  %v638_v22 = vmul.f32 0.0, %v2850_v17 }
  0x85   : > { %v637_v25 = vmul.f32 %v2811_v6, %v2850_v17 }
  0x86   : > { %702 = vrot.lane.b32.xlu1 %v698_v13, %s3358_s28  ;;  %704 = vrot.lane.b32.xlu0 %v699_v14, %s3358_s28  ;;  %s541_s28 = scalar_lea.vmem %s3348_s9, %s2399_s19 }
  0x87   : > { %v2857_v19 = vpop.permute.xlu0 %575  ;;  %v2859_v20 = vpop.permute.xlu1 %741 }
  0x88   : > { %v2876_v30 = vmul.f32 0.0, %v2857_v19  ;;  %v581_v31 = vmul.f32 %v2809_v5, %v2857_v19  ;;  %v579_v37 = vmul.f32 %v2811_v6, %v2857_v19  ;;  %v745_v38 = vmul.f32 %v2859_v20, %v2809_v5 }
  0x89   : > { %v744_v39 = vmul.f32 %v2859_v20, %v2811_v6 }
  0x8a   : > { %680 = vrot.lane.b32.xlu1 %v669_v15, %s2680_s29  ;;  %678 = vrot.lane.b32.xlu0 %v2848_v16, %s2680_s29 }
  0x8b   : > { %v734_v23 = vpop.permute.xlu0 %733  ;;  %v732_v24 = vpop.permute.xlu1 %731 }
  0x8c   : > { %738 = vst.msk [vmem:[#allocation3 + $0x78] sm:$0xff] %vm560_vm1, %v734_v23  ;;  %737 = vst.msk [vmem:[#allocation3 + $0x70] sm:$0xff] %vm560_vm1, %v732_v24 }
  0x8e   : > { %676 = vrot.lane.b32.xlu1 %v667_v18, %s2680_s29  ;;  %674 = vrot.lane.b32.xlu0 %v2848_v16, %s2680_s29 }
  0x8f   : > { %v2637_v26 = vpop.permute.xlu0 %2636  ;;  %v616_v27 = vpop.permute.xlu1 %615 }
  0x90   : > { %v2639_v28 = vunpack.i.h.bf16 %v2637_v26  ;;  %v2638_v29 = vunpack.i.l.bf16 %v2637_v26 }
  0x92   : > { %650 = vrot.lane.b32.xlu1 %v639_v21, %s2677_s25  ;;  %648 = vrot.lane.b32.xlu0 %v638_v22, %s2677_s25  ;;  %v619_v32 = vsel %vm617_vm2, %v2638_v29, %v616_v27 }
  0x93   : > { %623 = vst.msk [vmem:[#allocation3 + $0x18] sm:$0xff] %vm560_vm1, %v619_v32  ;;  %v612_v33 = vpop.permute.xlu0 %611  ;;  %v779_v34 = vld [vmem:[#allocation3 + $0x78] sm:$0xff]  ;;  %v778_v36 = vld [vmem:[#allocation3 + $0x70] sm:$0xff] }
  0x94   : > { %v618_v35 = vsel %vm617_vm2, %v2639_v28, %v612_v33  ;;  %795 = vmatpush1.msra.mxu0 %v779_v34  ;;  %v756_v32 = vld [vmem:[%s3340_s1] sm:$0xff]  ;;  %v759_v34 = vld [vmem:[%s3340_s1 + $0x18] sm:$0xff] }
  0x95   : > { %622 = vst.msk [vmem:[#allocation3 + $0x10] sm:$0xff] %vm560_vm1, %v618_v35  ;;  %796 = vmatprep.subr.mxu0 %v2679_v2  ;;  %v758_v35 = vld [vmem:[%s3340_s1 + $0x10] sm:$0xff] }
  0x96   : > { %646 = vrot.lane.b32.xlu1 %v637_v25, %s2677_s25  ;;  %644 = vrot.lane.b32.xlu0 %v638_v22, %s2677_s25 }
  0x97   : > { %797 = vmatpush1.msra.mxu0 %v778_v36  ;;  %v761_v36 = vld [vmem:[%s3340_s1 + $0x28] sm:$0xff] }
  0x98   : > { %798 = vmatprep.subr.mxu0 %v2679_v2 }
  0x9a   : > { %590 = vrot.lane.b32.xlu1 %v2876_v30, %s3356_s24  ;;  %592 = vrot.lane.b32.xlu0 %v581_v31, %s3356_s24  ;;  %v767_v24 = vld [vmem:[#allocation3 + $0x18] sm:$0xff] }
  0x9c   : > { %v766_v27 = vld [vmem:[#allocation3 + $0x10] sm:$0xff] }
  0x9e   : > { %586 = vrot.lane.b32.xlu1 %v2876_v30, %s3356_s24  ;;  %588 = vrot.lane.b32.xlu0 %v579_v37, %s3356_s24  ;;  %v760_v37 = vld [vmem:[%s3340_s1 + $0x20] sm:$0xff] }
  0xa2   : > { %750 = vrot.lane.b32.xlu1 %v745_v38, %s3362_s23  ;;  %748 = vrot.lane.b32.xlu0 %v744_v39, %s3362_s23  ;;  %v763_v38 = vld [vmem:[%s3340_s1 + $0x38] sm:$0xff]  ;;  %v762_v39 = vld [vmem:[%s3340_s1 + $0x30] sm:$0xff] }
  0xa6   : > { %900 = vperm.xlu1 %2640, %v882_v41   ;;  %895 = vperm.xlu0 %2641, %v881_v42  }
  0xaa   : > { %928 = vperm.xlu1 %2640, %v910_v43   ;;  %923 = vperm.xlu0 %2641, %v909_v44  }
  0xae   : > { %890 = vperm.xlu1 %2640, %v880_v45   ;;  %918 = vperm.xlu0 %2641, %v908_v46  }
  0xb2   : > { %885 = vperm.xlu1 %2640, %v879_v47   ;;  %2643 = vrot.lane.b32.xlu0 %v2679_v2, %s2685_s27 }
  0xb6   : > { %913 = vperm.xlu1 %2640, %v907_v48   ;;  %1147 = vrot.lane.b32.xlu0 %v2848_v16, %s2680_s29 }
  0xba   : > { %1143 = vrot.lane.b32.xlu1 %v2848_v16, %s2680_s29  ;;  %1139 = vrot.lane.b32.xlu0 %v2848_v16, %s2680_s29 }
  0xbe   : > { %1135 = vrot.lane.b32.xlu1 %v2848_v16, %s2680_s29  ;;  %1095 = vrot.lane.b32.xlu0 %v638_v22, %s2677_s25 }
  0xc2   : > { %1091 = vrot.lane.b32.xlu1 %v638_v22, %s2677_s25  ;;  %1087 = vrot.lane.b32.xlu0 %v638_v22, %s2677_s25 }
  0xc6   : > { %1083 = vrot.lane.b32.xlu1 %v638_v22, %s2677_s25 }
  0xf4   : > { %v720_v49 = vpop.permute.xlu1 %719  ;;  %v722_v50 = vpop.permute.xlu0 %721 }
  0xf5   : > { %725 = vst.msk [vmem:[#allocation3 + $0x60] sm:$0xff] %vm560_vm1, %v720_v49  ;;  %726 = vst.msk [vmem:[#allocation3 + $0x68] sm:$0xff] %vm560_vm1, %v722_v50 }
  0xf8   : > { %v703_v51 = vpop.permute.xlu1 %702  ;;  %v705_v52 = vpop.permute.xlu0 %704 }
  0xf9   : > { %708 = vst.msk [vmem:[#allocation3 + $0x50] sm:$0xff] %vm560_vm1, %v703_v51  ;;  %709 = vst.msk [vmem:[#allocation3 + $0x58] sm:$0xff] %vm560_vm1, %v705_v52 }
  0xfc   : > { %v681_v53 = vpop.permute.xlu1 %680  ;;  %v679_v54 = vpop.permute.xlu0 %678  ;;  %v777_v55 = vld [vmem:[#allocation3 + $0x68] sm:$0xff]  ;;  %v776_v57 = vld [vmem:[#allocation3 + $0x60] sm:$0xff] }
  0xfd   : > { %v684_v56 = vsel %vm682_vm3, %v679_v54, %v681_v53  ;;  %799 = vmatpush1.msra.mxu0 %v777_v55 }
  0xfe   : > { %688 = vst.msk [vmem:[#allocation3 + $0x38] sm:$0xff] %vm560_vm1, %v684_v56  ;;  %800 = vmatprep.subr.mxu0 %v2679_v2 }
  0xff   : > { %801 = vmatpush1.msra.mxu0 %v776_v57 }
 0x100   : > { %v677_v58 = vpop.permute.xlu1 %676  ;;  %802 = vmatprep.subr.mxu0 %v2679_v2  ;;  %v675_v59 = vpop.permute.xlu0 %674  ;;  %v775_v60 = vld [vmem:[#allocation3 + $0x58] sm:$0xff]  ;;  %v774_v62 = vld [vmem:[#allocation3 + $0x50] sm:$0xff] }
 0x101   : > { %v683_v61 = vsel %vm682_vm3, %v675_v59, %v677_v58  ;;  %803 = vmatpush1.msra.mxu0 %v775_v60 }
 0x102   : > { %687 = vst.msk [vmem:[#allocation3 + $0x30] sm:$0xff] %vm560_vm1, %v683_v61  ;;  %804 = vmatprep.subr.mxu0 %v2679_v2 }
 0x103   : > { %805 = vmatpush1.msra.mxu0 %v774_v62 }
 0x104   : > { %v651_v0 = vpop.permute.xlu1 %650  ;;  %806 = vmatprep.subr.mxu0 %v2679_v2  ;;  %v649_v1 = vpop.permute.xlu0 %648 }
 0x105   : > { %v654_v4 = vsel %vm652_vm4, %v649_v1, %v651_v0  ;;  %807 = vmatpush1.msra.mxu0 %v773_v63  ;;  %v771_v7 = vld [vmem:[#allocation3 + $0x38] sm:$0xff] }
 0x106   : > { %658 = vst.msk [vmem:[#allocation3 + $0x28] sm:$0xff] %vm560_vm1, %v654_v4  ;;  %808 = vmatprep.subr.mxu0 %v2679_v2 }
 0x107   : > { %809 = vmatpush1.msra.mxu0 %v772_v3 }
 0x108   : > { %v647_v5 = vpop.permute.xlu1 %646  ;;  %810 = vmatprep.subr.mxu0 %v2679_v2  ;;  %v645_v6 = vpop.permute.xlu0 %644 }
 0x109   : > { %v653_v9 = vsel %vm652_vm4, %v645_v6, %v647_v5  ;;  %811 = vmatpush1.msra.mxu0 %v771_v7  ;;  %v770_v10 = vld [vmem:[#allocation3 + $0x30] sm:$0xff] }
 0x10a   : > { %657 = vst.msk [vmem:[#allocation3 + $0x20] sm:$0xff] %vm560_vm1, %v653_v9  ;;  %812 = vmatprep.subr.mxu0 %v2679_v2 }
 0x10b   : > { %813 = vmatpush1.msra.mxu0 %v770_v10 }
 0x10c   : > { %v591_v13 = vpop.permute.xlu1 %590  ;;  %v593_v14 = vpop.permute.xlu0 %592  ;;  %814 = vmatprep.subr.mxu0 %v2679_v2 }
 0x10d   : > { %v596_v15 = vsel %vm594_vm5, %v591_v13, %v593_v14  ;;  %v769_v16 = vld [vmem:[#allocation3 + $0x28] sm:$0xff] }
 0x10e   : > { %600 = vst.msk [vmem:[#allocation3 + $0x8] sm:$0xff] %vm560_vm1, %v596_v15  ;;  %815 = vmatpush1.msra.mxu0 %v769_v16  ;;  %v1578_v16 = vld [vmem:[%s541_s28] sm:$0xf] }
 0x10f   : > { %816 = vmatprep.subr.mxu0 %v2679_v2 }
 0x110   : > { %v587_v18 = vpop.permute.xlu1 %586  ;;  %v589_v21 = vpop.permute.xlu0 %588 }
 0x111   : > { %v595_v22 = vsel %vm594_vm5, %v587_v18, %v589_v21  ;;  %v768_v23 = vld [vmem:[#allocation3 + $0x20] sm:$0xff]  ;;  %v1579_v18 = vld [vmem:[%s3349_s10] sm:$0xff] }
 0x112   : > { %599 = vst.msk [vmem:[#allocation3] sm:$0xff] %vm560_vm1, %v595_v22  ;;  %817 = vmatpush1.msra.mxu0 %v768_v23  ;;  %v1580_v22 = vld [vmem:[%s3349_s10 + $0x8] sm:$0xff] }
 0x113   : > { %818 = vmatprep.subr.mxu0 %v2679_v2 }
 0x114   : > { %v751_v25 = vpop.permute.xlu1 %750  ;;  %819 = vmatpush1.msra.mxu0 %v767_v24  ;;  %v749_v26 = vpop.permute.xlu0 %748 }
 0x115   : > { %755 = vst.msk [vmem:[#allocation3 + $0x88] sm:$0xff] %vm560_vm1, %v751_v25  ;;  %754 = vst.msk [vmem:[#allocation3 + $0x80] sm:$0xff] %vm560_vm1, %v749_v26  ;;  %820 = vmatprep.subr.mxu0 %v2679_v2  ;;  %v765_v28 = vld [vmem:[#allocation3 + $0x8] sm:$0xff]  ;;  %v1581_v25 = vld [vmem:[%s3349_s10 + $0x10] sm:$0xff] }
 0x116   : > { %821 = vmatpush1.msra.mxu0 %v766_v27  ;;  %v1582_v26 = vld [vmem:[%s3349_s10 + $0x18] sm:$0xff] }
 0x117   : > { %822 = vmatprep.subr.mxu0 %v2679_v2 }
 0x118   : > { %823 = vmatpush1.msra.mxu0 %v765_v28 }
 0x119   : > { %824 = vmatprep.subr.mxu0 %v2679_v2  ;;  %v764_v29 = vld [vmem:[#allocation3] sm:$0xff] }
 0x11a   : > { %825 = vmatpush1.msra.mxu0 %v764_v29 }
 0x11b   : > { %854 = vmatprep.subr.mxu0 %v2679_v2 }
 0x11c   : > { %v781_v31 = vld [vmem:[#allocation3 + $0x88] sm:$0xff]  ;;  %v780_v33 = vld [vmem:[#allocation3 + $0x80] sm:$0xff] }
 0x11d   : > { %855 = vmatpush2.msra.mxu0 %v781_v31 }
 0x11e   : > { %856 = vmatprep.subr.mxu0 %v2679_v2 }
 0x11f   : > { %857 = vmatpush2.msra.mxu0 %v780_v33 }
 0x120   : > { %859 = vmatmul.mubr.f32.vlgmr.msra.gmra.mxu0 %v756_v32  ;;  %2545 = vmatprep.subr.msk.mxu0 %vm1595_vm10, %v1578_v16 }
 0x121   : > { %2407 = vmatprep.mubr.msk.f32.mxu0 %vm560_vm1, %v759_v34  ;;  %v901_v40 = vpop.permute.xlu1 %900  ;;  %v896_v43 = vpop.permute.xlu0 %895  ;;  %2546 = vmatpush3.msk.msra.mxu0 %vm1595_vm10, %v1578_v16 }
 0x122   : > { %2567 = vmatprep.subr.mxu0 %v2679_v2 }
 0x124   : > { %864 = vmatmul.mubr.f32.gmra.mxu0 %v758_v35 }
 0x125   : > { %2408 = vmatprep.mubr.msk.f32.mxu0 %vm560_vm1, %v761_v36  ;;  %v929_v41 = vpop.permute.xlu1 %928  ;;  %v924_v45 = vpop.permute.xlu0 %923 }
 0x128   : > { %869 = vmatmul.mubr.f32.gmra.mxu0 %v760_v37 }
 0x129   : > { %2409 = vmatprep.mubr.msk.f32.mxu0 %vm560_vm1, %v763_v38  ;;  %v891_v42 = vpop.permute.xlu1 %890  ;;  %v919_v54 = vpop.permute.xlu0 %918 }
 0x12c   : > { %874 = vmatmul.mubr.f32.gmra.mxu0 %v762_v39  ;;  %v1280_v39 = vld [vmem:[%s3343_s4 + $0x8] sm:$0xff] }
 0x12d   : > { %v886_v44 = vpop.permute.xlu1 %885  ;;  %2547 = vmatprep.mubr.msk.f32.mxu0 %vm617_vm2, %v1579_v18  ;;  %1404 = vmatprep.mubr.f32.mxu1 %v1280_v39 }
 0x130   : > { %2548 = vmatmul.mubr.msk.f32.vlgmr.msra.gmra.mxu0 %vm617_vm2, %v1580_v22 }
 0x131   : > { %v914_v48 = vpop.permute.xlu1 %913  ;;  %2550 = vmatprep.mubr.msk.f32.mxu0 %vm617_vm2, %v1581_v25 }
 0x134   : > { %2551 = vmatmul.mubr.msk.f32.gmra.mxu0 %vm617_vm2, %v1582_v26 }
 0x1e0   : > { %v860_v46 = vpop.f32.mrf.mxu0 }
 0x1e1   : > { %v903_v47 = vmul.f32 %v886_v44, %v860_v46  ;;  %v1512_v44 = vld [vmem:[%s3344_s5 + $0x10] sm:$0xff] }
 0x1e2   : > { %v862_v49 = vpop.f32.mrf.mxu0  ;;  %v1540_v46 = vld [vmem:[%s3345_s6 + $0x10] sm:$0xff] }
 0x1e3   : > { %v931_v50 = vadd.f32 %v914_v48, %v903_v47  ;;  %v1510_v47 = vld [vmem:[%s3344_s5] sm:$0xff]  ;;  %v1539_v48 = vld [vmem:[%s3345_s6 + $0x8] sm:$0xff] }
 0x1e4   : > { %v865_v51 = vpop.f32.mrf.mxu0  ;;  %v1538_v49 = vld [vmem:[%s3345_s6] sm:$0xff] }
 0x1e5   : > { %vm935_vm6 = vcmp.gt.f32.partialorder %v931_v50, 0.0  ;;  %v939_v52 = vmul.f32 0.01, %v931_v50  ;;  %v904_v53 = vmul.f32 %v891_v42, %v865_v51  ;;  %v1144_v51 = vpop.permute.xlu1 %1143 }
 0x1e6   : > { %v867_v55 = vpop.f32.mrf.mxu0 }
 0x1e7   : > { %v943_v56 = vsel %vm935_vm6, %v931_v50, %v939_v52  ;;  %v932_v57 = vadd.f32 %v919_v54, %v904_v53  ;;  %v2644_v50 = vpop.permute.xlu0 %2643 }
 0x1e8   : > { %959 = vst.msk [vmem:[#allocation4 + $0x8] sm:$0xff] %vm560_vm1, %v943_v56  ;;  %v870_v58 = vpop.f32.mrf.mxu0 }
 0x1e9   : > { %vm936_vm7 = vcmp.gt.f32.partialorder %v932_v57, 0.0  ;;  %v940_v59 = vmul.f32 0.01, %v932_v57  ;;  %v905_v60 = vmul.f32 %v896_v43, %v870_v58  ;;  %v1136_v53 = vpop.permute.xlu1 %1135 }
 0x1ea   : > { %v872_v61 = vpop.f32.mrf.mxu0 }
 0x1eb   : > { %v944_v62 = vsel %vm936_vm7, %v932_v57, %v940_v59  ;;  %v933_v63 = vadd.f32 %v924_v45, %v905_v60  ;;  %v1541_v45 = vld [vmem:[%s3345_s6 + $0x18] sm:$0xff]  ;;  %v1148_v52 = vpop.permute.xlu0 %1147 }
 0x1ec   : > { %960 = vst.msk [vmem:[#allocation4 + $0x20] sm:$0xff] %vm560_vm1, %v944_v62  ;;  %v875_v0 = vpop.f32.mrf.mxu0 }
 0x1ed   : > { %vm937_vm8 = vcmp.gt.f32.partialorder %v933_v63, 0.0  ;;  %v941_v1 = vmul.f32 0.01, %v933_v63  ;;  %v906_v3 = vmul.f32 %v901_v40, %v875_v0  ;;  %v1092_v55 = vpop.permute.xlu1 %1091 }
 0x1ee   : > { %v877_v4 = vpop.f32.mrf.mxu0 }
 0x1ef   : > { %v945_v5 = vsel %vm937_vm8, %v933_v63, %v941_v1  ;;  %v934_v6 = vadd.f32 %v929_v41, %v906_v3  ;;  %v3001_v7 = vld [vmem:[#allocation4 + $0x8] sm:$0xff]  ;;  %v1140_v54 = vpop.permute.xlu0 %1139 }
 0x1f0   : > { %961 = vst.msk [vmem:[#allocation4 + $0x38] sm:$0xff] %vm560_vm1, %v945_v5  ;;  %1235 = vrot.lane.b32.xlu1 %v3001_v7, %s3368_s18  ;;  %v1120_v9 = vmul.f32 %v3001_v7, %v2837_v12  ;;  %1167 = vst.msk [vmem:[#allocation5 + $0x80] sm:$0xff] %vm560_vm1, %v3001_v7  ;;  %v1203_v13 = vmul.f32 %v3001_v7, %v2827_v8  ;;  %v1068_v21 = vmul.f32 %v3001_v7, %v2850_v17 }
 0x1f1   : > { %vm938_vm9 = vcmp.gt.f32.partialorder %v934_v6, 0.0  ;;  %v942_v10 = vmul.f32 0.01, %v934_v6  ;;  %v972_v40 = vmul.f32 %v3001_v7, %v2857_v19  ;;  %v1084_v57 = vpop.permute.xlu1 %1083 }
 0x1f2   : > { %1137 = vrot.lane.b32.xlu0 %v1120_v9, %s2680_s29 }
 0x1f3   : > { %v946_v14 = vsel %vm938_vm9, %v934_v6, %v942_v10  ;;  %v3017_v15 = vld [vmem:[#allocation4 + $0x20] sm:$0xff]  ;;  %v1096_v56 = vpop.permute.xlu0 %1095 }
 0x1f4   : > { %962 = vst.msk [vmem:[#allocation4 + $0x50] sm:$0xff] %vm560_vm1, %v946_v14  ;;  %1211 = vrot.lane.b32.xlu1 %v1203_v13, %s3369_s26  ;;  %1168 = vst.msk [vmem:[#allocation5 + $0x88] sm:$0xff] %vm560_vm1, %v3017_v15  ;;  %v1122_v23 = vmul.f32 %v3017_v15, %v2837_v12  ;;  %v1070_v27 = vmul.f32 %v3017_v15, %v2850_v17  ;;  %v1204_v29 = vmul.f32 %v3017_v15, %v2827_v8 }
 0x1f5   : > { %v1256_v43 = vmul.f32 %v3017_v15, %v2859_v20  ;;  %v2646_v13 = vunpack.i.h.bf16 %v2644_v50 }
 0x1f6   : > { %1085 = vrot.lane.b32.xlu0 %v1068_v21, %s2677_s25 }
 0x1f7   : > { %v1229_v24 = vld [vmem:[#allocation4 + $0x38] sm:$0xff]  ;;  %v1088_v58 = vpop.permute.xlu0 %1087 }
 0x1f8   : > { %1141 = vrot.lane.b32.xlu1 %v1122_v23, %s2680_s29  ;;  %1169 = vst.msk [vmem:[#allocation5 + $0x90] sm:$0xff] %vm560_vm1, %v1229_v24  ;;  %v1124_v31 = vmul.f32 %v1229_v24, %v2837_v12  ;;  %v1072_v32 = vmul.f32 %v1229_v24, %v2850_v17  ;;  %v1205_v33 = vmul.f32 %v1229_v24, %v2827_v8 }
 0x1f9   : > { %v1177_v34 = vmul.f32 %v1229_v24, %v2835_v11  ;;  %v1257_v42 = vmul.f32 %v1229_v24, %v2859_v20 }
 0x1fa   : > { %1237 = vrot.lane.b32.xlu0 %v3017_v15, %s3368_s18 }
 0x1fb   : > { %v1022_v28 = vld [vmem:[#allocation4 + $0x50] sm:$0xff] }
 0x1fc   : > { %1089 = vrot.lane.b32.xlu1 %v1070_v27, %s2677_s25  ;;  %1170 = vst.msk [vmem:[#allocation5 + $0x98] sm:$0xff] %vm560_vm1, %v1022_v28  ;;  %v1126_v35 = vmul.f32 %v1022_v28, %v2837_v12  ;;  %v1206_v36 = vmul.f32 %v1022_v28, %v2827_v8  ;;  %v1074_v37 = vmul.f32 %v1022_v28, %v2850_v17 }
 0x1fd   : > { %v1176_v12 = vmul.f32 %v3017_v15, %v2835_v11  ;;  %v1178_v38 = vmul.f32 %v1022_v28, %v2835_v11  ;;  %v976_v8 = vmul.f32 %v1229_v24, %v2857_v19  ;;  %v978_v17 = vmul.f32 %v1022_v28, %v2857_v19 }
 0x1fe   : > { %1213 = vrot.lane.b32.xlu0 %v1204_v29, %s3369_s26  ;;  %v1258_v41 = vmul.f32 %v1022_v28, %v2859_v20 }
 0x200   : > { %1239 = vrot.lane.b32.xlu1 %v1229_v24, %s3368_s18 }
 0x202   : > { %1145 = vrot.lane.b32.xlu0 %v1124_v31, %s2680_s29 }
 0x204   : > { %1041 = vrot.lane.b32.xlu1 %v1229_v24, %s2685_s27  ;;  %v2645_v24 = vunpack.i.l.bf16 %v2644_v50 }
 0x206   : > { %1093 = vrot.lane.b32.xlu0 %v1072_v32, %s2677_s25 }
 0x208   : > { %1215 = vrot.lane.b32.xlu1 %v1205_v33, %s3369_s26 }
 0x20a   : > { %1187 = vrot.lane.b32.xlu0 %v1177_v34, %s3370_s30 }
 0x20c   : > { %1045 = vrot.lane.b32.xlu1 %v1022_v28, %s2685_s27 }
 0x20e   : > { %1241 = vrot.lane.b32.xlu0 %v1022_v28, %s3368_s18  ;;  %s3372_s18 = smov 123  }
 0x210   : > { %1149 = vrot.lane.b32.xlu1 %v1126_v35, %s2680_s29  ;;  %s3371_s29 = smov 5  }
 0x212   : > { %1037 = vrot.lane.b32.xlu0 %v3017_v15, %s2685_s27 }
 0x214   : > { %2648 = vrot.lane.b32.xlu1 %v2679_v2, %s2685_s27  ;;  %v1175_v2 = vmul.f32 %v3001_v7, %v2835_v11  ;;  %v974_v11 = vmul.f32 %v3017_v15, %v2857_v19  ;;  %v1513_v19 = vld [vmem:[%s3344_s5 + $0x18] sm:$0xff] }
 0x216   : > { %1217 = vrot.lane.b32.xlu0 %v1206_v36, %s3369_s26 }
 0x218   : > { %1097 = vrot.lane.b32.xlu1 %v1074_v37, %s2677_s25 }
 0x21a   : > { %1033 = vrot.lane.b32.xlu0 %v3001_v7, %s2685_s27  ;;  %s546_s27 = scalar_lea.vmem %s3354_s15, %s2439_s20 }
 0x21c   : > { %1185 = vrot.lane.b32.xlu1 %v1176_v12, %s3370_s30 }
 0x21e   : > { %1189 = vrot.lane.b32.xlu0 %v1178_v38, %s3370_s30 }
 0x220   : > { %1183 = vrot.lane.b32.xlu1 %v1175_v2, %s3370_s30 }
 0x222   : > { %999 = vrot.lane.b32.xlu0 %v2876_v30, %s3371_s29 }
 0x224   : > { %997 = vrot.lane.b32.xlu1 %v976_v8, %s3371_s29 }
 0x226   : > { %995 = vrot.lane.b32.xlu0 %v2876_v30, %s3371_s29 }
 0x228   : > { %1001 = vrot.lane.b32.xlu1 %v978_v17, %s3371_s29 }
 0x22a   : > { %991 = vrot.lane.b32.xlu0 %v2876_v30, %s3371_s29 }
 0x22c   : > { %993 = vrot.lane.b32.xlu1 %v974_v11, %s3371_s29 }
 0x22e   : > { %987 = vrot.lane.b32.xlu0 %v2876_v30, %s3371_s29  ;;  %v1255_v30 = vmul.f32 %v3001_v7, %v2859_v20  ;;  %v1511_v20 = vld [vmem:[%s3344_s5 + $0x8] sm:$0xff] }
 0x230   : > { %989 = vrot.lane.b32.xlu1 %v972_v40, %s3371_s29  ;;  %s551_s29 = scalar_lea.vmem %s3355_s16, %s2439_s20 }
 0x232   : > { %1269 = vrot.lane.b32.xlu0 %v1258_v41, %s3372_s18 }
 0x234   : > { %1267 = vrot.lane.b32.xlu1 %v1257_v42, %s3372_s18 }
 0x236   : > { %1265 = vrot.lane.b32.xlu0 %v1256_v43, %s3372_s18 }
 0x238   : > { %1263 = vrot.lane.b32.xlu1 %v1255_v30, %s3372_s18 }
 0x23a   : > { %1531 = vperm.xlu0 %2641, %v1513_v19  }
 0x23c   : > { %1526 = vperm.xlu1 %2640, %v1512_v44  }
 0x23e   : > { %1559 = vperm.xlu0 %2641, %v1541_v45  }
 0x240   : > { %1521 = vperm.xlu1 %2640, %v1511_v20  }
 0x242   : > { %1554 = vperm.xlu0 %2641, %v1540_v46  }
 0x244   : > { %1516 = vperm.xlu1 %2640, %v1510_v47  }
 0x246   : > { %1549 = vperm.xlu0 %2641, %v1539_v48  }
 0x248   : > { %1544 = vperm.xlu1 %2640, %v1538_v49  }
 0x262   : > { %v1236_v59 = vpop.permute.xlu1 %1235 }
 0x263   : > { %1247 = vst.msk [vmem:[#allocation5 + $0xe0] sm:$0xff] %vm560_vm1, %v1236_v59 }
 0x264   : > { %v1138_v60 = vpop.permute.xlu0 %1137 }
 0x265   : > { %v1151_v61 = vsel %vm682_vm3, %v1136_v53, %v1138_v60 }
 0x266   : > { %1159 = vst.msk [vmem:[#allocation5 + $0x60] sm:$0xff] %vm560_vm1, %v1151_v61  ;;  %v1212_v62 = vpop.permute.xlu1 %1211 }
 0x267   : > { %1223 = vst.msk [vmem:[#allocation5 + $0xc0] sm:$0xff] %vm560_vm1, %v1212_v62 }
 0x268   : > { %v1086_v63 = vpop.permute.xlu0 %1085 }
 0x269   : > { %v1099_v0 = vsel %vm652_vm4, %v1084_v57, %v1086_v63 }
 0x26a   : > { %1107 = vst.msk [vmem:[#allocation5 + $0x40] sm:$0xff] %vm560_vm1, %v1099_v0  ;;  %v1142_v1 = vpop.permute.xlu1 %1141  ;;  %v1319_v30 = vld [vmem:[#allocation5 + $0xe0] sm:$0xff] }
 0x26b   : > { %v1152_v3 = vsel %vm682_vm3, %v1140_v54, %v1142_v1 }
 0x26c   : > { %1160 = vst.msk [vmem:[#allocation5 + $0x68] sm:$0xff] %vm560_vm1, %v1152_v3  ;;  %v1238_v4 = vpop.permute.xlu0 %1237 }
 0x26d   : > { %1248 = vst.msk [vmem:[#allocation5 + $0xe8] sm:$0xff] %vm560_vm1, %v1238_v4  ;;  %v1303_v19 = vld [vmem:[#allocation5 + $0x60] sm:$0xff] }
 0x26e   : > { %v1090_v5 = vpop.permute.xlu1 %1089  ;;  %v1315_v53 = vld [vmem:[#allocation5 + $0xc0] sm:$0xff] }
 0x26f   : > { %v1100_v6 = vsel %vm652_vm4, %v1088_v58, %v1090_v5 }
 0x270   : > { %1108 = vst.msk [vmem:[#allocation5 + $0x48] sm:$0xff] %vm560_vm1, %v1100_v6  ;;  %v1214_v7 = vpop.permute.xlu0 %1213 }
 0x271   : > { %1224 = vst.msk [vmem:[#allocation5 + $0xc8] sm:$0xff] %vm560_vm1, %v1214_v7 }
 0x272   : > { %v1240_v9 = vpop.permute.xlu1 %1239 }
 0x273   : > { %1249 = vst.msk [vmem:[#allocation5 + $0xf0] sm:$0xff] %vm560_vm1, %v1240_v9  ;;  %v1304_v42 = vld [vmem:[#allocation5 + $0x68] sm:$0xff]  ;;  %v1310_v9 = vld [vmem:[#allocation5 + $0x98] sm:$0xff] }
 0x274   : > { %v1146_v10 = vpop.permute.xlu0 %1145  ;;  %v1320_v41 = vld [vmem:[#allocation5 + $0xe8] sm:$0xff] }
 0x275   : > { %v1153_v14 = vsel %vm682_vm3, %v1144_v51, %v1146_v10 }
 0x276   : > { %1161 = vst.msk [vmem:[#allocation5 + $0x70] sm:$0xff] %vm560_vm1, %v1153_v14  ;;  %v1042_v15 = vpop.permute.xlu1 %1041 }
 0x277   : > { %v1049_v16 = vsel %vm617_vm2, %v2646_v13, %v1042_v15  ;;  %v1300_v51 = vld [vmem:[#allocation5 + $0x48] sm:$0xff]  ;;  %v1309_v15 = vld [vmem:[#allocation5 + $0x90] sm:$0xff] }
 0x278   : > { %1057 = vst.msk [vmem:[#allocation5 + $0x30] sm:$0xff] %vm560_vm1, %v1049_v16  ;;  %v1094_v18 = vpop.permute.xlu0 %1093  ;;  %v1316_v50 = vld [vmem:[#allocation5 + $0xc8] sm:$0xff] }
 0x279   : > { %v1101_v21 = vsel %vm652_vm4, %v1092_v55, %v1094_v18  ;;  %v1299_v55 = vld [vmem:[#allocation5 + $0x40] sm:$0xff] }
 0x27a   : > { %1109 = vst.msk [vmem:[#allocation5 + $0x50] sm:$0xff] %vm560_vm1, %v1101_v21  ;;  %v1216_v22 = vpop.permute.xlu1 %1215  ;;  %v1321_v17 = vld [vmem:[#allocation5 + $0xf0] sm:$0xff]  ;;  %v1308_v21 = vld [vmem:[#allocation5 + $0x88] sm:$0xff] }
 0x27b   : > { %1225 = vst.msk [vmem:[#allocation5 + $0xd0] sm:$0xff] %vm560_vm1, %v1216_v22 }
 0x27c   : > { %v1188_v23 = vpop.permute.xlu0 %1187 }
 0x27d   : > { %1197 = vst.msk [vmem:[#allocation5 + $0xb0] sm:$0xff] %vm560_vm1, %v1188_v23  ;;  %v1305_v39 = vld [vmem:[#allocation5 + $0x70] sm:$0xff] }
 0x27e   : > { %v1046_v25 = vpop.permute.xlu1 %1045 }
 0x27f   : > { %v1050_v26 = vsel %vm617_vm2, %v2645_v24, %v1046_v25  ;;  %v1297_v62 = vld [vmem:[#allocation5 + $0x30] sm:$0xff]  ;;  %v1307_v24 = vld [vmem:[#allocation5 + $0x80] sm:$0xff] }
 0x280   : > { %1058 = vst.msk [vmem:[#allocation5 + $0x38] sm:$0xff] %vm560_vm1, %v1050_v26  ;;  %v1242_v27 = vpop.permute.xlu0 %1241  ;;  %v1279_v26 = vld [vmem:[%s3343_s4] sm:$0xff] }
 0x281   : > { %1250 = vst.msk [vmem:[#allocation5 + $0xf8] sm:$0xff] %vm560_vm1, %v1242_v27  ;;  %v1301_v48 = vld [vmem:[#allocation5 + $0x50] sm:$0xff] }
 0x282   : > { %v1150_v28 = vpop.permute.xlu1 %1149  ;;  %v1317_v47 = vld [vmem:[#allocation5 + $0xd0] sm:$0xff] }
 0x283   : > { %v1154_v29 = vsel %vm682_vm3, %v1148_v52, %v1150_v28  ;;  %v1283_v28 = vld [vmem:[%s3343_s4 + $0x20] sm:$0xff] }
 0x284   : > { %1162 = vst.msk [vmem:[#allocation5 + $0x78] sm:$0xff] %vm560_vm1, %v1154_v29  ;;  %v1038_v31 = vpop.permute.xlu0 %1037  ;;  %v1313_v61 = vld [vmem:[#allocation5 + $0xb0] sm:$0xff] }
 0x286   : > { %v2649_v32 = vpop.permute.xlu1 %2648 }
 0x287   : > { %v2650_v33 = vunpack.i.l.bf16 %v2649_v32  ;;  %v2651_v12 = vunpack.i.h.bf16 %v2649_v32  ;;  %v1298_v59 = vld [vmem:[#allocation5 + $0x38] sm:$0xff] }
 0x288   : > { %v1218_v34 = vpop.permute.xlu0 %1217  ;;  %v1322_v35 = vld [vmem:[#allocation5 + $0xf8] sm:$0xff] }
 0x289   : > { %v1048_v36 = vsel %vm617_vm2, %v2650_v33, %v1038_v31  ;;  %1226 = vst.msk [vmem:[#allocation5 + $0xd8] sm:$0xff] %vm560_vm1, %v1218_v34  ;;  %2441 = vmatprep.subr.mxu1 %v1322_v35  ;;  %v1282_v32 = vld [vmem:[%s3343_s4 + $0x18] sm:$0xff] }
 0x28a   : > { %1056 = vst.msk [vmem:[#allocation5 + $0x28] sm:$0xff] %vm560_vm1, %v1048_v36  ;;  %v1098_v37 = vpop.permute.xlu1 %1097  ;;  %v1286_v33 = vld [vmem:[%s3343_s4 + $0x38] sm:$0xff]  ;;  %v1285_v36 = vld [vmem:[%s3343_s4 + $0x30] sm:$0xff] }
 0x28b   : > { %v1102_v38 = vsel %vm652_vm4, %v1096_v56, %v1098_v37  ;;  %v1306_v2 = vld [vmem:[#allocation5 + $0x78] sm:$0xff]  ;;  %v1289_v37 = vld [vmem:[%s3343_s4 + $0x50] sm:$0xff]  ;;  %vm2055_vm4 = vcmask 1041408  }
 0x28c   : > { %1110 = vst.msk [vmem:[#allocation5 + $0x58] sm:$0xff] %vm560_vm1, %v1102_v38  ;;  %2442 = vmatpush3.msra.mxu1 %v1306_v2  ;;  %v1034_v8 = vpop.permute.xlu0 %1033  ;;  %v1281_v38 = vld [vmem:[%s3343_s4 + $0x10] sm:$0xff]  ;;  %v2549_v2 = vpop.f32.mrf.mxu0 }
 0x28d   : > { %v1047_v11 = vsel %vm617_vm2, %v2651_v12, %v1034_v8  ;;  %2443 = vmatprep.subr.mxu1 %v1321_v17  ;;  %v1288_v12 = vld [vmem:[%s3343_s4 + $0x48] sm:$0xff]  ;;  %vm2042_vm2 = vcmask 15360  }
 0x28e   : > { %1055 = vst.msk [vmem:[#allocation5 + $0x20] sm:$0xff] %vm560_vm1, %v1047_v11  ;;  %v1186_v40 = vpop.permute.xlu1 %1185  ;;  %2444 = vmatpush3.msra.mxu1 %v1305_v39  ;;  %v1665_v8 = vpop.f32.mrf.mxu0  ;;  %v1284_v17 = vld [vmem:[%s3343_s4 + $0x28] sm:$0xff]  ;;  %v1287_v11 = vld [vmem:[%s3343_s4 + $0x40] sm:$0xff] }
 0x28f   : > { %1196 = vst.msk [vmem:[#allocation5 + $0xa8] sm:$0xff] %vm560_vm1, %v1186_v40  ;;  %2445 = vmatprep.subr.mxu1 %v1320_v41 }
 0x290   : > { %2446 = vmatpush3.msra.mxu1 %v1304_v42  ;;  %v1190_v43 = vpop.permute.xlu0 %1189  ;;  %v1318_v45 = vld [vmem:[#allocation5 + $0xd8] sm:$0xff]  ;;  %v2552_v39 = vpop.f32.mrf.mxu0 }
 0x291   : > { %1198 = vst.msk [vmem:[#allocation5 + $0xb8] sm:$0xff] %vm560_vm1, %v1190_v43  ;;  %2447 = vmatprep.subr.mxu1 %v1319_v30  ;;  %v1296_v3 = vld [vmem:[#allocation5 + $0x28] sm:$0xff]  ;;  %v1687_v40 = vmax.f32 %v2552_v39, 0.0  ;;  %v1290_v42 = vld [vmem:[%s3343_s4 + $0x58] sm:$0xff]  ;;  %v1685_v30 = vmax.f32 %v2549_v2, 0.0 }
 0x292   : > { %v1184_v44 = vpop.permute.xlu1 %1183  ;;  %2448 = vmatpush3.msra.mxu1 %v1303_v19  ;;  %v1675_v41 = vpop.f32.mrf.mxu0  ;;  %v1688_v19 = vld [vmem:[%s3350_s11] sm:$0xff] }
 0x293   : > { %1195 = vst.msk [vmem:[#allocation5 + $0xa0] sm:$0xff] %vm560_vm1, %v1184_v44  ;;  %2449 = vmatprep.subr.mxu1 %v1318_v45  ;;  %v1302_v20 = vld [vmem:[#allocation5 + $0x58] sm:$0xff]  ;;  %v1686_v43 = vmax.f32 %v1675_v41, 0.0  ;;  %v1684_v44 = vmax.f32 %v1665_v8, 0.0  ;;  %v1689_v45 = vld [vmem:[%s3350_s11 + $0x8] sm:$0xff] }
 0x294   : > { %2450 = vmatpush3.msra.mxu1 %v1302_v20  ;;  %v1000_v46 = vpop.permute.xlu0 %999  ;;  %v1690_v20 = vld [vmem:[%s3350_s11 + $0x10] sm:$0xff] }
 0x295   : > { %2451 = vmatprep.subr.mxu1 %v1317_v47  ;;  %v1295_v6 = vld [vmem:[#allocation5 + $0x20] sm:$0xff]  ;;  %v1691_v47 = vld [vmem:[%s3350_s11 + $0x18] sm:$0xff] }
 0x296   : > { %v998_v49 = vpop.permute.xlu1 %997  ;;  %2452 = vmatpush3.msra.mxu1 %v1301_v48  ;;  %v1312_v0 = vld [vmem:[#allocation5 + $0xa8] sm:$0xff] }
 0x297   : > { %2453 = vmatprep.subr.mxu1 %v1316_v50 }
 0x298   : > { %2454 = vmatpush3.msra.mxu1 %v1300_v51  ;;  %v996_v52 = vpop.permute.xlu0 %995  ;;  %v1314_v57 = vld [vmem:[#allocation5 + $0xb8] sm:$0xff] }
 0x299   : > { %v1005_v54 = vsel %vm594_vm5, %v996_v52, %v998_v49  ;;  %2455 = vmatprep.subr.mxu1 %v1315_v53 }
 0x29a   : > { %1013 = vst.msk [vmem:[#allocation5 + $0x10] sm:$0xff] %vm560_vm1, %v1005_v54  ;;  %v1002_v56 = vpop.permute.xlu1 %1001  ;;  %2456 = vmatpush3.msra.mxu1 %v1299_v55  ;;  %v1311_v5 = vld [vmem:[#allocation5 + $0xa0] sm:$0xff] }
 0x29b   : > { %v1006_v58 = vsel %vm594_vm5, %v1000_v46, %v1002_v56  ;;  %2457 = vmatprep.subr.mxu1 %v1314_v57  ;;  %v3239_v46 = vld [vmem:[#allocation2] sm:$0xff] }
 0x29c   : > { %1014 = vst.msk [vmem:[#allocation5 + $0x18] sm:$0xff] %vm560_vm1, %v1006_v58  ;;  %v992_v60 = vpop.permute.xlu0 %991  ;;  %2458 = vmatpush3.msra.mxu1 %v1298_v59  ;;  %2575 = vmatprep.mubr.msk.f32.mxu0 %vm2687_vm0, %v3239_v46 }
 0x29d   : > { %2459 = vmatprep.subr.mxu1 %v1313_v61 }
 0x29e   : > { %v994_v63 = vpop.permute.xlu1 %993  ;;  %2460 = vmatpush3.msra.mxu1 %v1297_v62 }
 0x29f   : > { %v1004_v1 = vsel %vm594_vm5, %v992_v60, %v994_v63  ;;  %2461 = vmatprep.subr.mxu1 %v1312_v0 }
 0x2a0   : > { %1012 = vst.msk [vmem:[#allocation5 + $0x8] sm:$0xff] %vm560_vm1, %v1004_v1  ;;  %v988_v4 = vpop.permute.xlu0 %987  ;;  %2462 = vmatpush3.msra.mxu1 %v1296_v3 }
 0x2a1   : > { %2463 = vmatprep.subr.mxu1 %v1311_v5  ;;  %v1293_v16 = vld [vmem:[#allocation5 + $0x10] sm:$0xff] }
 0x2a2   : > { %v990_v7 = vpop.permute.xlu1 %989  ;;  %2464 = vmatpush3.msra.mxu1 %v1295_v6 }
 0x2a3   : > { %v1003_v10 = vsel %vm594_vm5, %v988_v4, %v990_v7  ;;  %2465 = vmatprep.subr.mxu1 %v1310_v9  ;;  %v1294_v13 = vld [vmem:[#allocation5 + $0x18] sm:$0xff] }
 0x2a4   : > { %1011 = vst.msk [vmem:[#allocation5] sm:$0xff] %vm560_vm1, %v1003_v10  ;;  %v1270_v14 = vpop.permute.xlu0 %1269  ;;  %2466 = vmatpush3.msra.mxu1 %v1294_v13 }
 0x2a5   : > { %1278 = vst.msk [vmem:[#allocation5 + $0x118] sm:$0xff] %vm560_vm1, %v1270_v14  ;;  %2467 = vmatprep.subr.mxu1 %v1309_v15 }
 0x2a6   : > { %v1268_v18 = vpop.permute.xlu1 %1267  ;;  %2468 = vmatpush3.msra.mxu1 %v1293_v16 }
 0x2a7   : > { %1277 = vst.msk [vmem:[#allocation5 + $0x110] sm:$0xff] %vm560_vm1, %v1268_v18  ;;  %2469 = vmatprep.subr.mxu1 %v1308_v21  ;;  %v1292_v22 = vld [vmem:[#allocation5 + $0x8] sm:$0xff] }
 0x2a8   : > { %v1266_v23 = vpop.permute.xlu0 %1265  ;;  %2470 = vmatpush3.msra.mxu1 %v1292_v22 }
 0x2a9   : > { %1276 = vst.msk [vmem:[#allocation5 + $0x108] sm:$0xff] %vm560_vm1, %v1266_v23  ;;  %2471 = vmatprep.subr.mxu1 %v1307_v24 }
 0x2aa   : > { %v1264_v25 = vpop.permute.xlu1 %1263 }
 0x2ab   : > { %1275 = vst.msk [vmem:[#allocation5 + $0x100] sm:$0xff] %vm560_vm1, %v1264_v25  ;;  %v1291_v27 = vld [vmem:[#allocation5] sm:$0xff] }
 0x2ac   : > { %2472 = vmatpush3.msra.mxu1 %v1291_v27  ;;  %v1326_v29 = vld [vmem:[#allocation5 + $0x118] sm:$0xff] }
 0x2ad   : > { %1405 = vmatmul.mubr.f32.vlgmr.msra.gmra.mxu1 %v1279_v26  ;;  %2531 = vmatprep.subr.mxu1 %v1326_v29 }
 0x2ae   : > { %2532 = vmatpush3.msra.mxu1 %v1326_v29  ;;  %v1325_v31 = vld [vmem:[#allocation5 + $0x110] sm:$0xff]  ;;  %1409 = vmatprep.mubr.f32.mxu1 %v1283_v28 }
 0x2af   : > { %2533 = vmatprep.subr.mxu1 %v1325_v31 }
 0x2b0   : > { %2534 = vmatpush3.msra.mxu1 %v1325_v31  ;;  %v1324_v34 = vld [vmem:[#allocation5 + $0x108] sm:$0xff] }
 0x2b1   : > { %1410 = vmatmul.mubr.f32.gmra.mxu1 %v1282_v32  ;;  %2535 = vmatprep.subr.mxu1 %v1324_v34 }
 0x2b2   : > { %2536 = vmatpush3.msra.mxu1 %v1324_v34  ;;  %v1323_v35 = vld [vmem:[#allocation5 + $0x100] sm:$0xff]  ;;  %1414 = vmatprep.mubr.f32.mxu1 %v1286_v33 }
 0x2b3   : > { %2537 = vmatprep.subr.mxu1 %v1323_v35 }
 0x2b4   : > { %2538 = vmatpush3.msra.mxu1 %v1323_v35 }
 0x2b5   : > { %1415 = vmatmul.mubr.f32.gmra.mxu1 %v1285_v36  ;;  %2553 = vmatprep.subr.mxu1 %v1687_v40  ;;  %v1532_v49 = vpop.permute.xlu0 %1531 }
 0x2b6   : > { %1419 = vmatprep.mubr.f32.mxu1 %v1289_v37 }
 0x2b7   : > { %v1527_v55 = vpop.permute.xlu1 %1526 }
 0x2b9   : > { %1420 = vmatmul.mubr.f32.gmra.mxu1 %v1288_v12  ;;  %v1560_v53 = vpop.permute.xlu0 %1559 }
 0x2ba   : > { %2539 = vmatprep.mubr.msk.f32.mxu1 %vm1327_vm11, %v1281_v38 }
 0x2bb   : > { %v1522_v60 = vpop.permute.xlu1 %1521 }
 0x2bd   : > { %2540 = vmatmul.mubr.msk.f32.vlgmr.msra.gmra.mxu1 %vm1327_vm11, %v1284_v17  ;;  %v1555_v58 = vpop.permute.xlu0 %1554 }
 0x2be   : > { %2542 = vmatprep.mubr.msk.f32.mxu1 %vm1327_vm11, %v1287_v11  ;;  %2554 = vmatpush3.msra.mxu1 %v1687_v40 }
 0x2bf   : > { %2555 = vmatprep.subr.mxu1 %v1686_v43  ;;  %v1517_v9 = vpop.permute.xlu1 %1516 }
 0x2c0   : > { %2556 = vmatpush3.msra.mxu1 %v1686_v43  ;;  %v1789_v43 = vld [vmem:[%s3352_s13] sm:$0x3] }
 0x2c1   : > { %2543 = vmatmul.mubr.msk.f32.gmra.mxu1 %vm1327_vm11, %v1290_v42  ;;  %2557 = vmatprep.subr.mxu1 %v1685_v30  ;;  %v1550_v5 = vpop.permute.xlu0 %1549 }
 0x2c2   : > { %2561 = vmatprep.mubr.msk.f32.mxu1 %vm1327_vm11, %v1688_v19  ;;  %2558 = vmatpush3.msra.mxu1 %v1685_v30 }
 0x2c3   : > { %2559 = vmatprep.subr.mxu1 %v1684_v44  ;;  %v1545_v27 = vpop.permute.xlu1 %1544 }
 0x2c4   : > { %2560 = vmatpush3.msra.mxu1 %v1684_v44 }
 0x2c5   : > { %2562 = vmatmul.mubr.msk.f32.vlgmr.msra.gmra.mxu1 %vm1327_vm11, %v1689_v45  ;;  %2578 = vmatprep.subr.mxu1 %v3239_v46 }
 0x2c6   : > { %2564 = vmatprep.mubr.msk.f32.mxu1 %vm1327_vm11, %v1690_v20 }
 0x2c9   : > { %2565 = vmatmul.mubr.msk.f32.gmra.mxu1 %vm1327_vm11, %v1691_v47 }
 0x2ca   : > { %2586 = vmatprep.mubr.msk.f32.mxu1 %vm2687_vm0, %v3239_v46 }
 0x36d   : > { %v2473_v48 = vpop.f32.mrf.mxu1 }
 0x36f   : > { %v2474_v50 = vpop.f32.mrf.mxu1 }
 0x370   : > { %v2475_v0 = vadd.f32 %v2474_v50, %v2473_v48 }
 0x371   : > { %v2476_v51 = vpop.f32.mrf.mxu1 }
 0x373   : > { %v2477_v52 = vpop.f32.mrf.mxu1 }
 0x374   : > { %v2478_v61 = vadd.f32 %v2477_v52, %v2476_v51 }
 0x375   : > { %v2479_v54 = vpop.f32.mrf.mxu1 }
 0x377   : > { %v2480_v56 = vpop.f32.mrf.mxu1 }
 0x378   : > { %v2481_v10 = vadd.f32 %v2480_v56, %v2479_v54 }
 0x379   : > { %v2482_v57 = vpop.f32.mrf.mxu1 }
 0x37b   : > { %v2483_v59 = vpop.f32.mrf.mxu1 }
 0x37c   : > { %v2484_v3 = vadd.f32 %v2483_v59, %v2482_v57  ;;  %v1967_v57 = vld [vmem:[%s3353_s14] sm:$0xff] }
 0x37d   : > { %v2541_v62 = vpop.f32.mrf.mxu1 }
 0x37e   : > { %v1497_v63 = vadd.f32 %v2541_v62, %v2478_v61 }
 0x37f   : > { %v1491_v1 = vpop.f32.mrf.mxu1 }
 0x380   : > { %v1535_v4 = vmul.f32 %v1522_v60, %v1497_v63  ;;  %v1492_v6 = vadd.f32 %v2475_v0, %v1491_v1  ;;  %v1968_v0 = vld [vmem:[%s3353_s14 + $0x8] sm:$0xff] }
 0x381   : > { %v2544_v7 = vpop.f32.mrf.mxu1 }
 0x382   : > { %v1563_v13 = vadd.f32 %v1550_v5, %v1535_v4  ;;  %v1507_v14 = vadd.f32 %v2544_v7, %v2484_v3  ;;  %v1534_v21 = vmul.f32 %v1517_v9, %v1492_v6  ;;  %v1969_v3 = vld [vmem:[%s3353_s14 + $0x10] sm:$0xff]  ;;  %v1970_v4 = vld [vmem:[%s3353_s14 + $0x18] sm:$0xff] }
 0x383   : > { %v1501_v15 = vpop.f32.mrf.mxu1 }
 0x384   : > { %v1537_v16 = vmul.f32 %v1532_v49, %v1507_v14  ;;  %v1502_v18 = vadd.f32 %v2481_v10, %v1501_v15  ;;  %vm1567_vm12 = vcmp.gt.f32.partialorder %v1563_v13, 0.0  ;;  %v1571_v22 = vmul.f32 0.01, %v1563_v13 }
 0x385   : > { %v2563_v26 = vpop.f32.mrf.mxu1  ;;  %v1562_v32 = vadd.f32 %v1545_v27, %v1534_v21 }
 0x386   : > { %v1565_v23 = vadd.f32 %v1560_v53, %v1537_v16  ;;  %v1536_v24 = vmul.f32 %v1527_v55, %v1502_v18  ;;  %v3247_v25 = vsel %vm1567_vm12, %v1563_v13, %v1571_v22  ;;  %v1892_v53 = vld [vmem:[%s3351_s12] sm:$0x3] }
 0x387   : > { %v1866_v29 = vsel %vm560_vm1, %v3247_v25, 0.0  ;;  %v1770_v33 = vpop.f32.mrf.mxu1  ;;  %v1570_v2 = vmul.f32 0.01, %v1562_v32  ;;  %vm1566_vm15 = vcmp.gt.f32.partialorder %v1562_v32, 0.0  ;;  %v1883_v41 = vsel %vm560_vm1, %v3247_v25, -inf }
 0x388   : > { %v1564_v28 = vadd.f32 %v1555_v58, %v1536_v24  ;;  %vm1569_vm13 = vcmp.gt.f32.partialorder %v1565_v23, 0.0  ;;  %v1573_v31 = vmul.f32 0.01, %v1565_v23  ;;  %1867 = vadd.xlane.f32.xlu0 %v1866_v29 }
 0x389   : > { %v2566_v37 = vpop.f32.mrf.mxu1  ;;  %v3265_v39 = vsel %vm1566_vm15, %v1562_v32, %v1570_v2 }
 0x38a   : > { %v3251_v34 = vsel %vm1569_vm13, %v1565_v23, %v1573_v31  ;;  %vm1568_vm14 = vcmp.gt.f32.partialorder %v1564_v28, 0.0  ;;  %v1572_v35 = vmul.f32 0.01, %v1564_v28  ;;  %2568 = vmatpush3.msra.mxu0 %v2566_v37  ;;  %v1863_v40 = vsel %vm560_vm1, %v3265_v39, 0.0 }
 0x38b   : > { %v1872_v36 = vsel %vm560_vm1, %v3251_v34, 0.0  ;;  %v1780_v8 = vpop.f32.mrf.mxu1  ;;  %2569 = vmatprep.subr.mxu0 %v3239_v46  ;;  %v1889_v17 = vsel %vm560_vm1, %v3251_v34, -inf  ;;  %v1880_v42 = vsel %vm560_vm1, %v3265_v39, -inf }
 0x38c   : > { %v3255_v12 = vsel %vm1568_vm14, %v1564_v28, %v1572_v35  ;;  %1873 = vadd.xlane.f32.xlu0 %v1872_v36  ;;  %2570 = vmatpush3.msra.mxu0 %v1780_v8 }
 0x38d   : > { %v1869_v38 = vsel %vm560_vm1, %v3255_v12, 0.0  ;;  %2571 = vmatprep.subr.mxu0 %v3239_v46  ;;  %v1886_v11 = vsel %vm560_vm1, %v3255_v12, -inf }
 0x38e   : > { %1870 = vadd.xlane.f32.xlu1 %v1869_v38  ;;  %2572 = vmatpush3.msra.mxu0 %v2563_v26 }
 0x38f   : > { %2573 = vmatprep.subr.mxu0 %v3239_v46 }
 0x390   : > { %1890 = vmax.xlane.f32.xlu0 %v1889_v17  ;;  %2574 = vmatpush3.msra.mxu0 %v1770_v33 }
 0x391   : > { %2589 = vmatprep.subr.mxu0 %v3239_v46  ;;  %2576 = vmatmul.mubr.msk.f32.vlgmr.msra.gmra.mxu0 %vm1327_vm11, %v1789_v43 }
 0x392   : > { %1887 = vmax.xlane.f32.xlu1 %v1886_v11  ;;  %2597 = vmatprep.mubr.msk.f32.mxu0 %vm2687_vm0, %v3239_v46 }
 0x394   : > { %1864 = vadd.xlane.f32.xlu0 %v1863_v40 }
 0x396   : > { %1884 = vmax.xlane.f32.xlu1 %v1883_v41 }
 0x398   : > { %1881 = vmax.xlane.f32.xlu0 %v1880_v42 }
 0x411   : > { %v1868_v30 = vpop.xlane.xlu0 %1867 }
 0x412   : > { %v1877_v48 = vmul.f32 0.0625, %v1868_v30 }
 0x415   : > { %v1874_v19 = vpop.xlane.xlu0 %1873 }
 0x416   : > { %v1879_v44 = vmul.f32 0.0625, %v1874_v19 }
 0x417   : > { %v1871_v45 = vpop.xlane.xlu1 %1870 }
 0x418   : > { %v1878_v20 = vmul.f32 0.0625, %v1871_v45  ;;  %2579 = vmatpush3.msra.mxu1 %v1879_v44 }
 0x419   : > { %2580 = vmatprep.subr.mxu1 %v3239_v46  ;;  %v1891_v47 = vpop.xlane.xlu0 %1890 }
 0x41a   : > { %2581 = vmatpush3.msra.mxu1 %v1878_v20  ;;  %2590 = vmatpush3.msra.mxu0 %v1891_v47 }
 0x41b   : > { %v1888_v49 = vpop.xlane.xlu1 %1887  ;;  %2582 = vmatprep.subr.mxu1 %v3239_v46  ;;  %2591 = vmatprep.subr.mxu0 %v3239_v46 }
 0x41c   : > { %2583 = vmatpush3.msra.mxu1 %v1877_v48  ;;  %2592 = vmatpush3.msra.mxu0 %v1888_v49 }
 0x41d   : > { %v1865_v50 = vpop.xlane.xlu0 %1864  ;;  %2584 = vmatprep.subr.mxu1 %v3239_v46  ;;  %2593 = vmatprep.subr.mxu0 %v3239_v46 }
 0x41e   : > { %v1876_v51 = vmul.f32 0.0625, %v1865_v50 }
 0x41f   : > { %v1885_v52 = vpop.xlane.xlu1 %1884 }
 0x420   : > { %2594 = vmatpush3.msra.mxu0 %v1885_v52  ;;  %2585 = vmatpush3.msra.mxu1 %v1876_v51 }
 0x421   : > { %2595 = vmatprep.subr.mxu0 %v3239_v46  ;;  %2587 = vmatmul.mubr.msk.f32.vlgmr.msra.gmra.mxu1 %vm1327_vm11, %v1892_v53  ;;  %v1882_v54 = vpop.xlane.xlu0 %1881 }
 0x422   : > { %2596 = vmatpush3.msra.mxu0 %v1882_v54  ;;  %2602 = vmatprep.mubr.msk.f32.mxu1 %vm2042_vm2, %v1967_v57 }
 0x423   : > { %2598 = vmatmul.mubr.msk.f32.vlgmr.msra.gmra.mxu0 %vm1327_vm11, %v1892_v53 }
 0x424   : > { %2610 = vmatprep.mubr.msk.f32.mxu0 %vm2042_vm2, %v1967_v57 }
 0x451   : > { %v1859_v55 = vpop.f32.mrf.mxu0 }
 0x453   : > { %v2577_v56 = vpop.f32.mrf.mxu0 }
 0x4e1   : > { %v1962_v58 = vpop.f32.mrf.mxu1 }
 0x4e2   : > { %v1963_v59 = vadd.f32 %v1962_v58, %v1859_v55 }
 0x4e3   : > { %v2588_v46 = vpop.f32.mrf.mxu1  ;;  %v2037_v60 = vpop.f32.mrf.mxu0 }
 0x4e4   : > { %v1966_v61 = vmax.f32 %v1963_v59, 0.0  ;;  %v2038_v62 = vadd.f32 %v2037_v60, %v1859_v55 }
 0x4e5   : > { %v2599_v63 = vpop.f32.mrf.mxu0 }
 0x4e6   : > { %v2041_v1 = vmax.f32 %v2038_v62, 0.0  ;;  %2608 = vmatprep.subr.msk.mxu0 %vm2055_vm4, %v1966_v61 }
 0x4e7   : > { %2609 = vmatpush3.msk.msra.mxu0 %vm2055_vm4, %v1966_v61 }
 0x4e8   : > { %2600 = vmatprep.subr.msk.mxu1 %vm2055_vm4, %v2041_v1  ;;  %2611 = vmatmul.mubr.msk.f32.vlgmr.msra.gmra.mxu0 %vm2042_vm2, %v1968_v0 }
 0x4e9   : > { %2601 = vmatpush3.msk.msra.mxu1 %vm2055_vm4, %v2041_v1  ;;  %2613 = vmatprep.mubr.msk.f32.mxu0 %vm2042_vm2, %v1969_v3 }
 0x4ea   : > { %2603 = vmatmul.mubr.msk.f32.vlgmr.msra.gmra.mxu1 %vm2042_vm2, %v1968_v0 }
 0x4eb   : > { %2605 = vmatprep.mubr.msk.f32.mxu1 %vm2042_vm2, %v1969_v3 }
 0x4ec   : > { %2614 = vmatmul.mubr.msk.f32.gmra.mxu0 %vm2042_vm2, %v1970_v4 }
 0x4ee   : > { %2606 = vmatmul.mubr.msk.f32.gmra.mxu1 %vm2042_vm2, %v1970_v4 }
 0x5a8   : > { %v2612_v5 = vpop.f32.mrf.mxu0 }
 0x5aa   : > { %v2604_v6 = vpop.f32.mrf.mxu1  ;;  %v2213_v7 = vpop.f32.mrf.mxu0 }
 0x5ab   : > { %v2219_v9 = vadd.f32 %v2612_v5, %v2604_v6 }
 0x5ac   : > { %v2125_v10 = vpop.f32.mrf.mxu1  ;;  %v2615_v13 = vpop.f32.mrf.mxu0 }
 0x5ad   : > { %v2233_v14 = vsub.f32 0.0, %v2219_v9  ;;  %v2214_v15 = vadd.f32 %v2213_v7, %v2125_v10 }
 0x5ae   : > { %v2607_v16 = vpop.f32.mrf.mxu1  ;;  %v2223_v24 = vpop.f32.mrf.mxu0 }
 0x5af   : > { %v2238_v18 = vmul.f32 1.442695, %v2233_v14  ;;  %v2232_v21 = vsub.f32 0.0, %v2214_v15  ;;  %v2229_v22 = vadd.f32 %v2615_v13, %v2607_v16 }
 0x5b0   : > { %v2135_v23 = vpop.f32.mrf.mxu1 }
 0x5b1   : > { %2652 = vpow2.f32 %v2238_v18  ;;  %v2236_v26 = vmul.f32 1.442695, %v2232_v21  ;;  %v2235_v27 = vsub.f32 0.0, %v2229_v22  ;;  %v2224_v28 = vadd.f32 %v2223_v24, %v2135_v23 }
 0x5b3   : > { %2654 = vpow2.f32 %v2236_v26  ;;  %v2242_v29 = vmul.f32 1.442695, %v2235_v27  ;;  %v2234_v31 = vsub.f32 0.0, %v2224_v28 }
 0x5b5   : > { %2656 = vpow2.f32 %v2242_v29  ;;  %v2240_v32 = vmul.f32 1.442695, %v2234_v31 }
 0x5b7   : > { %2658 = vpow2.f32 %v2240_v32 }
 0x5be   : > { %v2653_v33 = vpop.eup %2652 }
 0x5bf   : > { %v2245_v35 = vadd.f32 1.0, %v2653_v33 }
 0x5c0   : > { %v2655_v36 = vpop.eup %2654 }
 0x5c1   : > { %2660 = vrcp.f32 %v2245_v35  ;;  %v2244_v37 = vadd.f32 1.0, %v2655_v36 }
 0x5c2   : > { %v2657_v38 = vpop.eup %2656 }
 0x5c3   : > { %2662 = vrcp.f32 %v2244_v37  ;;  %v2247_v2 = vadd.f32 1.0, %v2657_v38 }
 0x5c4   : > { %v2659_v8 = vpop.eup %2658 }
 0x5c5   : > { %2664 = vrcp.f32 %v2247_v2  ;;  %v2246_v17 = vadd.f32 1.0, %v2659_v8 }
 0x5c7   : > { %2666 = vrcp.f32 %v2246_v17 }
 0x5ce   : > { %v2661_v11 = vpop.eup %2660 }
 0x5cf   : > { %2267 = vperm.xlu0 %2641, %v2661_v11   ;;  %2257 = vst.msk [vmem:[%s551_s29 + $0x8] sm:$0xff] %vm682_vm3, %v2661_v11 }
 0x5d0   : > { %v2663_v40 = vpop.eup %2662 }
 0x5d1   : > { %2262 = vperm.xlu1 %2640, %v2663_v40   ;;  %2256 = vst.msk [vmem:[%s551_s29] sm:$0xff] %vm682_vm3, %v2663_v40 }
 0x5d2   : > { %v2665_v41 = vpop.eup %2664 }
 0x5d3   : > { %2259 = vst.msk [vmem:[%s551_s29 + $0x18] sm:$0xff] %vm682_vm3, %v2665_v41 }
 0x5d4   : > { %v2667_v42 = vpop.eup %2666 }
 0x5d5   : > { %2272 = vperm.xlu1 %2640, %v2667_v42   ;;  %2258 = vst.msk [vmem:[%s551_s29 + $0x10] sm:$0xff] %vm682_vm3, %v2667_v42 }
 0x5d9   : > { %2277 = vperm.xlu1 %2640, %v2665_v41  }
 0x64a   : > { %v2268_v43 = vpop.permute.xlu0 %2267 }
 0x64b   : > { %v2281_v30 = vmul.f32 %v2268_v43, %v3247_v25 }
 0x64c   : > { %v2263_v19 = vpop.permute.xlu1 %2262 }
 0x64d   : > { %v2285_v44 = vadd.f32 %v2281_v30, %v3247_v25  ;;  %v2280_v45 = vmul.f32 %v2263_v19, %v3265_v39 }
 0x64f   : > { %2289 = vst.msk [vmem:[%s546_s27 + $0x8] sm:$0xff] %vm560_vm1, %v2285_v44  ;;  %v2284_v20 = vadd.f32 %v2280_v45, %v3265_v39 }
 0x650   : > { %v2273_v47 = vpop.permute.xlu1 %2272 }
 0x651   : > { %2288 = vst.msk [vmem:[%s546_s27] sm:$0xff] %vm560_vm1, %v2284_v20  ;;  %v2282_v48 = vmul.f32 %v2273_v47, %v3255_v12 }
 0x653   : > { %v2286_v49 = vadd.f32 %v2282_v48, %v3255_v12 }
 0x654   : > { %v2278_v50 = vpop.permute.xlu1 %2277 }
 0x655   : > { %2290 = vst.msk [vmem:[%s546_s27 + $0x10] sm:$0xff] %vm560_vm1, %v2286_v49  ;;  %v2283_v51 = vmul.f32 %v2278_v50, %v3251_v34 }
 0x657   : > { %v2287_v25 = vadd.f32 %v2283_v51, %v3251_v34 }
 0x659   : > { %2291 = vst.msk [vmem:[%s546_s27 + $0x18] sm:$0xff] %vm560_vm1, %v2287_v25 }
 0x65a PF: > { %s27_s21 = sadd.s32 1, %s2675_s21  }
 0x65b   : > { %p24_p4 = scmp.ge.s32.totalorder %s27_s21, 4  }
 0x65d   :  { %26 = sbr.rel (!%p24_p4) target bundleno = 2 (0x2), region = 125 }

// kernel: _lambda_.9
= control target key start
LH: loop header
LB: loop body
LE: loop exit
PB: predicated region body
PF: predicated region fallthrough
CT: control target
= control target key end

     0   :  { %s3115_s21 = smov 0   ;;  %s3804_s0 = inlined_call_operand.vmem [shape: f32[2,32,4], index: 0, kind: input, shape index: {}]   ;;  %s3805_s1 = inlined_call_operand.vmem [shape: f32[32,288], index: 1, kind: input, shape index: {}]   ;;  %s3806_s2 = inlined_call_operand.vmem [shape: f32[32,1], index: 2, kind: input, shape index: {}]   ;;  %s3807_s3 = inlined_call_operand.vmem [shape: f32[32,1], index: 3, kind: input, shape index: {}]   ;;  %s3808_s4 = inlined_call_operand.vmem [shape: f32[32,288], index: 4, kind: input, shape index: {}]   ;;  %s3809_s5 = inlined_call_operand.vmem [shape: f32[32,1], index: 5, kind: input, shape index: {}]   ;;  %s3810_s6 = inlined_call_operand.vmem [shape: f32[32,1], index: 6, kind: input, shape index: {}]   ;;  %s3811_s7 = inlined_call_operand.vmem [shape: f32[1,4], index: 7, kind: input, shape index: {}]   ;;  %s3812_s8 = inlined_call_operand.vmem [shape: f32[1,4], index: 8, kind: input, shape index: {}]   ;;  %s3813_s9 = inlined_call_operand.vmem [shape: f32[2,4,1], index: 9, kind: input, shape index: {}]   ;;  %s3814_s10 = inlined_call_operand.vmem [shape: f32[32,4], index: 10, kind: input, shape index: {}]   ;;  %s3815_s11 = inlined_call_operand.vmem [shape: f32[32,32], index: 11, kind: input, shape index: {}]   ;;  %s3816_s12 = inlined_call_operand.vmem [shape: f32[2,32], index: 12, kind: input, shape index: {}]   ;;  %s3817_s13 = inlined_call_operand.vmem [shape: f32[2,32], index: 13, kind: input, shape index: {}]   ;;  %s3818_s14 = inlined_call_operand.vmem [shape: f32[32,2], index: 14, kind: input, shape index: {}]   ;;  %s3819_s15 = inlined_call_operand.vmem [shape: f32[2,32,4], index: 15, kind: output, shape index: {0}]   ;;  %s3820_s16 = inlined_call_operand.vmem [shape: f32[2,32,1], index: 16, kind: output, shape index: {1}]  }
   0x1   :  { %3829 = sst [smem:[#allocation6_spill]] %s3804_s0 }
   0x2 LB: > { %s2665_s22 = sadd.s32 4294967295, %s3019_s21   ;;  %p2669_p0 = scmp.ge.s32.totalorder %s3019_s21, 1  ;;  %s3019_s21 = sphi %s3115_s21, %s27_s21  }
   0x3   : > { %p474_p1 = scmp.lt.s32.totalorder %s3019_s21, 3 }
   0x5   : > { %p475_p2 = pnand %p2669_p0, %p474_p1 }
   0x6   : > { %s3825_s25 = smov (!%p475_p2), 127   ;;  %s3022_s26 = smov (!%p475_p2), 1  }
   0x7   : > { %478 = sbr.rel (%p475_p2) target bundleno = 1692 (0x69c), region = 80  ;;  %p533_p3 = scmp.lt.s32.totalorder (!%p475_p2), %s2665_s22, 1 }
   0x8   : > { %s3830_s17 = sld [smem:[#allocation6_spill]] (!%p475_p2)  ;;  %s3024_s19 = smov (!%p475_p2), 125  }
   0x9   : > { %s3821_s20 = smov (!%p475_p2), 3   ;;  %s3827_s23 = smov (!%p475_p2), 126  }
   0xa   : > { %s3823_s24 = smov (!%p475_p2), 2  }
   0xc   : > { %v2677_v0 = vld [vmem:[%s3811_s7] ss:$0 sm:$0xff]  ;;  %vm562_vm0 = vcmask 1047584   ;;  %vm564_vm1 = vcmask 31744   ;;  %v3023_v2 = vmov 0.0   ;;  %s3836_s22 = smov (!%p533_p3, %s2665_s22), 1 }
   0xd   : > { %751 = vrot.lane.b32.xlu0 %v2677_v0, %s3825_s25  ;;  %841 = vrot.lane.b32.xlu1 %v2677_v0, %s3022_s26  ;;  %v2678_v1 = vld [vmem:[%s3812_s8] ss:$0 sm:$0xff]  ;;  %568 = vst.msk [vmem:[#allocation2 + $0x38] sm:$0xff] %vm562_vm0, %v3023_v2  ;;  %558 = vst [vmem:[#allocation2] sm:$0xff] %v3023_v2  ;;  %s3145_s29 = sshll.u32 %s3836_s22, 5  ;;  %vm669_vm2 = vcmask 15360  }
   0xe   : > { %563 = vst.msk [vmem:[#allocation2 + $0x8] sm:$0xff] %vm562_vm0, %v3023_v2  ;;  %566 = vst.msk [vmem:[#allocation2 + $0x20] sm:$0xff] %vm562_vm0, %v3023_v2  ;;  %s537_s18 = scalar_lea.vmem %s3830_s17, %s3145_s29  ;;  %v924_v58 = vld [vmem:[%s3805_s1 + $0x8] sm:$0xff]  ;;  %vm971_vm3 = vcmask 261120   ;;  %vm730_vm4 = vcmask 7168   ;;  %vm624_vm5 = vcmask 23552  }
   0xf   : > { %570 = vst.msk [vmem:[#allocation2 + $0x50] sm:$0xff] %vm562_vm0, %v3023_v2  ;;  %1226 = vst.msk [vmem:[#allocation4 + $0x8] sm:$0xff] %vm562_vm0, %v3023_v2  ;;  %v556_v3 = vld [vmem:[%s537_s18 + $0x10] sm:$0xff]  ;;  %v557_v4 = vld [vmem:[%s537_s18 + $0x18] sm:$0xff]  ;;  %1048 = vmatprep.mubr.f32.mxu0 %v924_v58  ;;  %vm1869_vm10 = vcmask 1043456   ;;  %vm3029_vm15 = vmmov 0  }
  0x10   : > { %1228 = vst.msk [vmem:[#allocation4 + $0x20] sm:$0xff] %vm562_vm0, %v3023_v2  ;;  %1230 = vst.msk [vmem:[#allocation4 + $0x38] sm:$0xff] %vm562_vm0, %v3023_v2  ;;  %v554_v5 = vld [vmem:[%s537_s18] sm:$0xff]  ;;  %v555_v6 = vld [vmem:[%s537_s18 + $0x8] sm:$0xff] }
  0x11   : > { %1232 = vst.msk [vmem:[#allocation4 + $0x50] sm:$0xff] %vm562_vm0, %v3023_v2  ;;  %695 = vrot.lane.b32.xlu0 %v2678_v1, %s3825_s25  ;;  %810 = vrot.lane.b32.xlu1 %v2678_v1, %s3022_s26  ;;  %vm2328_vm0 = vcmask 1041408  }
  0x12   : > { %574 = vst.msk [vmem:[#allocation2 + $0x38] sm:$0xff] %vm564_vm1, %v556_v3  ;;  %575 = vst.msk [vmem:[#allocation2 + $0x50] sm:$0xff] %vm564_vm1, %v557_v4  ;;  %v1156_v3 = vld [vmem:[%s3806_s2 + $0x10] sm:$0xff]  ;;  %v3028_v4 = vmov 0  }
  0x13   : > { %572 = vst.msk [vmem:[#allocation2 + $0x8] sm:$0xff] %vm564_vm1, %v554_v5  ;;  %573 = vst.msk [vmem:[#allocation2 + $0x20] sm:$0xff] %vm564_vm1, %v555_v6  ;;  %2985 = vset.pattern.permute.xlu1 %v3028_v4  ;;  %2984 = vset.pattern.permute.xlu0 %v3028_v4  ;;  %v1155_v5 = vld [vmem:[%s3806_s2 + $0x8] sm:$0xff]  ;;  %v1185_v6 = vld [vmem:[%s3807_s3 + $0x18] sm:$0xff] }
  0x15   : > { %589 = vrot.lane.b32.xlu0 %v2677_v0, %s3024_s19  ;;  %896 = vrot.lane.b32.xlu1 %v2678_v1, %s3821_s20  ;;  %v925_v0 = vld [vmem:[%s3805_s1 + $0x10] sm:$0xff]  ;;  %v1157_v1 = vld [vmem:[%s3806_s2 + $0x18] sm:$0xff] }
  0x16   : > { %2864 = vmatprep.mubr.msk.f32.mxu1 %vm971_vm3, %v925_v0 }
  0x19   : > { %v3157_v7 = vld [vmem:[#allocation2 + $0x38] sm:$0xff]  ;;  %v3159_v8 = vld [vmem:[#allocation2 + $0x50] sm:$0xff] }
  0x1a   : > { %v3161_v9 = vld [vmem:[#allocation2 + $0x8] sm:$0xff]  ;;  %880 = vrot.lane.b32.xlu1 %v3157_v7, %s3827_s23  ;;  %882 = vrot.lane.b32.xlu0 %v3159_v8, %s3827_s23  ;;  %v3167_v10 = vld [vmem:[#allocation2 + $0x20] sm:$0xff]  ;;  %805 = vst.msk [vmem:[#allocation3 + $0x98] sm:$0xff] %vm564_vm1, %v3159_v8  ;;  %804 = vst.msk [vmem:[#allocation3 + $0x90] sm:$0xff] %vm564_vm1, %v3157_v7 }
  0x1b   : > { %802 = vst.msk [vmem:[#allocation3 + $0x80] sm:$0xff] %vm564_vm1, %v3161_v9  ;;  %803 = vst.msk [vmem:[#allocation3 + $0x88] sm:$0xff] %vm564_vm1, %v3167_v10 }
  0x1e   : > { %876 = vrot.lane.b32.xlu1 %v3161_v9, %s3827_s23  ;;  %878 = vrot.lane.b32.xlu0 %v3167_v10, %s3827_s23  ;;  %s3831_s23 = smov 126  }
  0x22   : > { %667 = vrot.lane.b32.xlu1 %v3159_v8, %s3823_s24  ;;  %2975 = vrot.lane.b32.xlu0 %v3023_v2, %s3823_s24 }
  0x26   : > { %663 = vrot.lane.b32.xlu1 %v3157_v7, %s3823_s24  ;;  %659 = vrot.lane.b32.xlu0 %v3167_v10, %s3823_s24 }
  0x2a   : > { %2980 = vrot.lane.b32.xlu1 %v3023_v2, %s3823_s24  ;;  %655 = vrot.lane.b32.xlu0 %v3161_v9, %s3823_s24  ;;  %s3833_s24 = smov 2  }
  0x7f   : > { %v3193_v11 = vpop.permute.xlu0 %751  ;;  %v3203_v14 = vpop.permute.xlu1 %841 }
  0x80   : > { %v761_v12 = vmul.f32 %v3159_v8, %v3193_v11  ;;  %v3198_v13 = vmul.f32 0.0, %v3193_v11  ;;  %v759_v15 = vmul.f32 %v3157_v7, %v3193_v11  ;;  %v757_v18 = vmul.f32 %v3167_v10, %v3193_v11 }
  0x81   : > { %v755_v21 = vmul.f32 %v3161_v9, %v3193_v11  ;;  %v847_v26 = vmul.f32 %v3159_v8, %v3203_v14  ;;  %v846_v32 = vmul.f32 %v3157_v7, %v3203_v14  ;;  %v845_v43 = vmul.f32 %v3167_v10, %v3203_v14 }
  0x82   : > { %784 = vrot.lane.b32.xlu1 %v761_v12, %s3022_s26  ;;  %782 = vrot.lane.b32.xlu0 %v3198_v13, %s3022_s26  ;;  %v844_v48 = vmul.f32 %v3161_v9, %v3203_v14 }
  0x83   : > { %v3210_v16 = vpop.permute.xlu0 %695  ;;  %v3212_v17 = vpop.permute.xlu1 %810 }
  0x84   : > { %v705_v22 = vmul.f32 %v3159_v8, %v3210_v16  ;;  %v3231_v23 = vmul.f32 0.0, %v3210_v16  ;;  %v703_v33 = vmul.f32 %v3157_v7, %v3210_v16  ;;  %v701_v39 = vmul.f32 %v3167_v10, %v3210_v16 }
  0x85   : > { %v699_v49 = vmul.f32 %v3161_v9, %v3210_v16  ;;  %v814_v50 = vmul.f32 %v3167_v10, %v3212_v17  ;;  %v816_v51 = vmul.f32 %v3159_v8, %v3212_v17  ;;  %v813_v52 = vmul.f32 %v3161_v9, %v3212_v17 }
  0x86   : > { %778 = vrot.lane.b32.xlu1 %v3198_v13, %s3022_s26  ;;  %780 = vrot.lane.b32.xlu0 %v759_v15, %s3022_s26  ;;  %v815_v53 = vmul.f32 %v3157_v7, %v3212_v17 }
  0x87   : > { %v3219_v19 = vpop.permute.xlu0 %589  ;;  %v3221_v20 = vpop.permute.xlu1 %896 }
  0x88   : > { %v599_v54 = vmul.f32 %v3159_v8, %v3219_v19  ;;  %v3290_v55 = vmul.f32 0.0, %v3219_v19  ;;  %v597_v56 = vmul.f32 %v3157_v7, %v3219_v19  ;;  %v595_v57 = vmul.f32 %v3167_v10, %v3219_v19 }
  0x89   : > { %v593_v59 = vmul.f32 %v3161_v9, %v3219_v19  ;;  %v902_v60 = vmul.f32 %v3221_v20, %v3159_v8  ;;  %v901_v61 = vmul.f32 %v3221_v20, %v3157_v7  ;;  %v900_v62 = vmul.f32 %v3221_v20, %v3167_v10  ;;  %v1154_v7 = vld [vmem:[%s3806_s2] sm:$0xff]  ;;  %v1184_v8 = vld [vmem:[%s3807_s3 + $0x10] sm:$0xff]  ;;  %v1183_v10 = vld [vmem:[%s3807_s3 + $0x8] sm:$0xff] }
  0x8a   : > { %776 = vrot.lane.b32.xlu1 %v757_v18, %s3022_s26  ;;  %774 = vrot.lane.b32.xlu0 %v3198_v13, %s3022_s26  ;;  %v899_v63 = vmul.f32 %v3221_v20, %v3161_v9  ;;  %v1182_v9 = vld [vmem:[%s3807_s3] sm:$0xff] }
  0x8c   : > { %v881_v24 = vpop.permute.xlu1 %880  ;;  %v883_v25 = vpop.permute.xlu0 %882 }
  0x8d   : > { %890 = vst.msk [vmem:[#allocation3 + $0xf0] sm:$0xff] %vm564_vm1, %v881_v24  ;;  %891 = vst.msk [vmem:[#allocation3 + $0xf8] sm:$0xff] %vm564_vm1, %v883_v25 }
  0x8e   : > { %770 = vrot.lane.b32.xlu1 %v3198_v13, %s3022_s26  ;;  %772 = vrot.lane.b32.xlu0 %v755_v21, %s3022_s26 }
  0x90   : > { %v877_v27 = vpop.permute.xlu1 %876  ;;  %v879_v28 = vpop.permute.xlu0 %878 }
  0x91   : > { %888 = vst.msk [vmem:[#allocation3 + $0xe0] sm:$0xff] %vm564_vm1, %v877_v27  ;;  %889 = vst.msk [vmem:[#allocation3 + $0xe8] sm:$0xff] %vm564_vm1, %v879_v28 }
  0x92   : > { %728 = vrot.lane.b32.xlu1 %v705_v22, %s3022_s26  ;;  %726 = vrot.lane.b32.xlu0 %v3231_v23, %s3022_s26 }
  0x94   : > { %v668_v29 = vpop.permute.xlu1 %667  ;;  %v2976_v30 = vpop.permute.xlu0 %2975  ;;  %v966_v31 = vld [vmem:[#allocation3 + $0xf8] sm:$0xff] }
  0x95   : > { %v2978_v34 = vunpack.i.h.bf16 %v2976_v30  ;;  %v2977_v35 = vunpack.i.l.bf16 %v2976_v30  ;;  %2714 = vmatprep.subr.mxu0 %v966_v31 }
  0x96   : > { %722 = vrot.lane.b32.xlu1 %v3231_v23, %s3022_s26  ;;  %858 = vrot.lane.b32.xlu0 %v847_v26, %s3825_s25 }
  0x97   : > { %v673_v36 = vsel %vm669_vm2, %v2977_v35, %v668_v29  ;;  %v965_v29 = vld [vmem:[#allocation3 + $0xf0] sm:$0xff] }
  0x98   : > { %681 = vst.msk [vmem:[#allocation3 + $0x38] sm:$0xff] %vm564_vm1, %v673_v36  ;;  %v664_v37 = vpop.permute.xlu1 %663  ;;  %v660_v38 = vpop.permute.xlu0 %659 }
  0x99   : > { %v672_v40 = vsel %vm669_vm2, %v2978_v34, %v664_v37  ;;  %v964_v34 = vld [vmem:[#allocation3 + $0xe8] sm:$0xff] }
  0x9a   : > { %856 = vrot.lane.b32.xlu1 %v846_v32, %s3825_s25  ;;  %724 = vrot.lane.b32.xlu0 %v703_v33, %s3022_s26  ;;  %680 = vst.msk [vmem:[#allocation3 + $0x30] sm:$0xff] %vm564_vm1, %v672_v40 }
  0x9c   : > { %v2981_v41 = vpop.permute.xlu1 %2980  ;;  %v656_v42 = vpop.permute.xlu0 %655 }
  0x9d   : > { %v2983_v44 = vunpack.i.h.bf16 %v2981_v41  ;;  %v2982_v45 = vunpack.i.l.bf16 %v2981_v41 }
  0x9e   : > { %720 = vrot.lane.b32.xlu1 %v701_v39, %s3022_s26  ;;  %718 = vrot.lane.b32.xlu0 %v3231_v23, %s3022_s26  ;;  %v963_v39 = vld [vmem:[#allocation3 + $0xe0] sm:$0xff] }
  0x9f   : > { %v671_v46 = vsel %vm669_vm2, %v2982_v45, %v660_v38  ;;  %v670_v47 = vsel %vm669_vm2, %v2983_v44, %v656_v42 }
  0xa0   : > { %679 = vst.msk [vmem:[#allocation3 + $0x28] sm:$0xff] %vm564_vm1, %v671_v46  ;;  %678 = vst.msk [vmem:[#allocation3 + $0x20] sm:$0xff] %vm564_vm1, %v670_v47 }
  0xa2   : > { %714 = vrot.lane.b32.xlu1 %v3231_v23, %s3022_s26  ;;  %854 = vrot.lane.b32.xlu0 %v845_v43, %s3825_s25 }
  0xa6   : > { %852 = vrot.lane.b32.xlu1 %v844_v48, %s3825_s25  ;;  %716 = vrot.lane.b32.xlu0 %v699_v49, %s3022_s26 }
  0xaa   : > { %823 = vrot.lane.b32.xlu1 %v814_v50, %s3825_s25  ;;  %827 = vrot.lane.b32.xlu0 %v816_v51, %s3825_s25 }
  0xae   : > { %821 = vrot.lane.b32.xlu1 %v813_v52, %s3825_s25  ;;  %825 = vrot.lane.b32.xlu0 %v815_v53, %s3825_s25  ;;  %s2672_s25 = sshll.u32 %s3836_s22, 2 }
  0xb2   : > { %622 = vrot.lane.b32.xlu1 %v599_v54, %s3821_s20  ;;  %620 = vrot.lane.b32.xlu0 %v3290_v55, %s3821_s20 }
  0xb6   : > { %618 = vrot.lane.b32.xlu1 %v597_v56, %s3821_s20  ;;  %616 = vrot.lane.b32.xlu0 %v3290_v55, %s3821_s20 }
  0xba   : > { %614 = vrot.lane.b32.xlu1 %v595_v57, %s3821_s20  ;;  %612 = vrot.lane.b32.xlu0 %v3290_v55, %s3821_s20 }
  0xbe   : > { %608 = vrot.lane.b32.xlu0 %v3290_v55, %s3821_s20  ;;  %610 = vrot.lane.b32.xlu1 %v593_v59, %s3821_s20 }
  0xc2   : > { %913 = vrot.lane.b32.xlu0 %v902_v60, %s3024_s19  ;;  %911 = vrot.lane.b32.xlu1 %v901_v61, %s3024_s19 }
  0xc6   : > { %909 = vrot.lane.b32.xlu0 %v900_v62, %s3024_s19  ;;  %907 = vrot.lane.b32.xlu1 %v899_v63, %s3024_s19 }
  0xca   : > { %1175 = vperm.xlu0 %2984, %v1157_v1   ;;  %1170 = vperm.xlu1 %2985, %v1156_v3  }
  0xce   : > { %1165 = vperm.xlu0 %2984, %v1155_v5   ;;  %1203 = vperm.xlu1 %2985, %v1185_v6  }
  0xd2   : > { %1160 = vperm.xlu0 %2984, %v1154_v7   ;;  %1198 = vperm.xlu1 %2985, %v1184_v8   ;;  %v942_v8 = vld [vmem:[#allocation3 + $0x38] sm:$0xff] }
  0xd6   : > { %1188 = vperm.xlu0 %2984, %v1182_v9   ;;  %1193 = vperm.xlu1 %2985, %v1183_v10  }
  0xf4   : > { %v785_v12 = vpop.permute.xlu1 %784  ;;  %v783_v15 = vpop.permute.xlu0 %782 }
  0xf5   : > { %v789_v18 = vsel %vm730_vm4, %v783_v15, %v785_v12 }
  0xf6   : > { %797 = vst.msk [vmem:[#allocation3 + $0x78] sm:$0xff] %vm564_vm1, %v789_v18  ;;  %v941_v18 = vld [vmem:[#allocation3 + $0x30] sm:$0xff] }
  0xf8   : > { %v779_v21 = vpop.permute.xlu1 %778  ;;  %v781_v22 = vpop.permute.xlu0 %780 }
  0xf9   : > { %v788_v24 = vsel %vm730_vm4, %v779_v21, %v781_v22  ;;  %v940_v22 = vld [vmem:[#allocation3 + $0x28] sm:$0xff] }
  0xfa   : > { %796 = vst.msk [vmem:[#allocation3 + $0x70] sm:$0xff] %vm564_vm1, %v788_v24 }
  0xfc   : > { %v777_v25 = vpop.permute.xlu1 %776  ;;  %v775_v26 = vpop.permute.xlu0 %774 }
  0xfd   : > { %v787_v27 = vsel %vm730_vm4, %v775_v26, %v777_v25  ;;  %v950_v28 = vld [vmem:[#allocation3 + $0x78] sm:$0xff] }
  0xfe   : > { %795 = vst.msk [vmem:[#allocation3 + $0x68] sm:$0xff] %vm564_vm1, %v787_v27  ;;  %2715 = vmatpush3.msra.mxu0 %v950_v28  ;;  %v954_v27 = vld [vmem:[#allocation3 + $0x98] sm:$0xff] }
  0xff   : > { %2716 = vmatprep.subr.mxu0 %v965_v29  ;;  %v939_v29 = vld [vmem:[#allocation3 + $0x20] sm:$0xff] }
 0x100   : > { %v771_v30 = vpop.permute.xlu1 %770  ;;  %v773_v31 = vpop.permute.xlu0 %772 }
 0x101   : > { %v786_v32 = vsel %vm730_vm4, %v771_v30, %v773_v31  ;;  %v949_v33 = vld [vmem:[#allocation3 + $0x70] sm:$0xff] }
 0x102   : > { %794 = vst.msk [vmem:[#allocation3 + $0x60] sm:$0xff] %vm564_vm1, %v786_v32  ;;  %2717 = vmatpush3.msra.mxu0 %v949_v33  ;;  %v953_v30 = vld [vmem:[#allocation3 + $0x90] sm:$0xff] }
 0x103   : > { %2718 = vmatprep.subr.mxu0 %v964_v34  ;;  %v952_v34 = vld [vmem:[#allocation3 + $0x88] sm:$0xff] }
 0x104   : > { %v729_v35 = vpop.permute.xlu1 %728  ;;  %v727_v36 = vpop.permute.xlu0 %726 }
 0x105   : > { %v734_v37 = vsel %vm730_vm4, %v727_v36, %v729_v35  ;;  %v948_v38 = vld [vmem:[#allocation3 + $0x68] sm:$0xff] }
 0x106   : > { %742 = vst.msk [vmem:[#allocation3 + $0x58] sm:$0xff] %vm564_vm1, %v734_v37  ;;  %2719 = vmatpush3.msra.mxu0 %v948_v38 }
 0x107   : > { %2720 = vmatprep.subr.mxu0 %v963_v39  ;;  %v951_v39 = vld [vmem:[#allocation3 + $0x80] sm:$0xff] }
 0x108   : > { %v723_v40 = vpop.permute.xlu1 %722  ;;  %v859_v41 = vpop.permute.xlu0 %858 }
 0x109   : > { %867 = vst.msk [vmem:[#allocation3 + $0xd8] sm:$0xff] %vm564_vm1, %v859_v41  ;;  %v947_v42 = vld [vmem:[#allocation3 + $0x60] sm:$0xff] }
 0x10a   : > { %2721 = vmatpush3.msra.mxu0 %v947_v42 }
 0x10c   : > { %v857_v43 = vpop.permute.xlu1 %856  ;;  %v725_v44 = vpop.permute.xlu0 %724 }
 0x10d   : > { %866 = vst.msk [vmem:[#allocation3 + $0xd0] sm:$0xff] %vm564_vm1, %v857_v43  ;;  %v733_v45 = vsel %vm730_vm4, %v723_v40, %v725_v44  ;;  %v946_v50 = vld [vmem:[#allocation3 + $0x58] sm:$0xff]  ;;  %v923_v43 = vld [vmem:[%s3805_s1] sm:$0xff] }
 0x10e   : > { %741 = vst.msk [vmem:[#allocation3 + $0x50] sm:$0xff] %vm564_vm1, %v733_v45  ;;  %v927_v45 = vld [vmem:[%s3805_s1 + $0x20] sm:$0xff] }
 0x110   : > { %v721_v46 = vpop.permute.xlu1 %720  ;;  %v719_v47 = vpop.permute.xlu0 %718  ;;  %v962_v48 = vld [vmem:[#allocation3 + $0xd8] sm:$0xff] }
 0x111   : > { %v732_v49 = vsel %vm730_vm4, %v719_v47, %v721_v46  ;;  %2722 = vmatprep.subr.mxu0 %v962_v48  ;;  %v926_v47 = vld [vmem:[%s3805_s1 + $0x18] sm:$0xff] }
 0x112   : > { %740 = vst.msk [vmem:[#allocation3 + $0x48] sm:$0xff] %vm564_vm1, %v732_v49  ;;  %2723 = vmatpush3.msra.mxu0 %v946_v50  ;;  %v930_v48 = vld [vmem:[%s3805_s1 + $0x38] sm:$0xff] }
 0x114   : > { %v715_v51 = vpop.permute.xlu1 %714  ;;  %v855_v52 = vpop.permute.xlu0 %854  ;;  %v961_v53 = vld [vmem:[#allocation3 + $0xd0] sm:$0xff] }
 0x115   : > { %865 = vst.msk [vmem:[#allocation3 + $0xc8] sm:$0xff] %vm564_vm1, %v855_v52  ;;  %2724 = vmatprep.subr.mxu0 %v961_v53  ;;  %v945_v54 = vld [vmem:[#allocation3 + $0x50] sm:$0xff] }
 0x116   : > { %2725 = vmatpush3.msra.mxu0 %v945_v54  ;;  %v933_v52 = vld [vmem:[%s3805_s1 + $0x50] sm:$0xff]  ;;  %v928_v54 = vld [vmem:[%s3805_s1 + $0x28] sm:$0xff] }
 0x118   : > { %v853_v56 = vpop.permute.xlu1 %852  ;;  %v717_v57 = vpop.permute.xlu0 %716 }
 0x119   : > { %864 = vst.msk [vmem:[#allocation3 + $0xc0] sm:$0xff] %vm564_vm1, %v853_v56  ;;  %v731_v58 = vsel %vm730_vm4, %v715_v51, %v717_v57  ;;  %v944_v62 = vld [vmem:[#allocation3 + $0x48] sm:$0xff]  ;;  %v929_v51 = vld [vmem:[%s3805_s1 + $0x30] sm:$0xff]  ;;  %v931_v56 = vld [vmem:[%s3805_s1 + $0x40] sm:$0xff] }
 0x11a   : > { %739 = vst.msk [vmem:[#allocation3 + $0x40] sm:$0xff] %vm564_vm1, %v731_v58  ;;  %v932_v57 = vld [vmem:[%s3805_s1 + $0x48] sm:$0xff]  ;;  %v934_v58 = vld [vmem:[%s3805_s1 + $0x58] sm:$0xff] }
 0x11c   : > { %v824_v59 = vpop.permute.xlu1 %823  ;;  %v828_v60 = vpop.permute.xlu0 %827  ;;  %v960_v61 = vld [vmem:[#allocation3 + $0xc8] sm:$0xff] }
 0x11d   : > { %834 = vst.msk [vmem:[#allocation3 + $0xa8] sm:$0xff] %vm564_vm1, %v824_v59  ;;  %836 = vst.msk [vmem:[#allocation3 + $0xb8] sm:$0xff] %vm564_vm1, %v828_v60  ;;  %2726 = vmatprep.subr.mxu0 %v960_v61 }
 0x11e   : > { %2727 = vmatpush3.msra.mxu0 %v944_v62 }
 0x120   : > { %v822_v63 = vpop.permute.xlu1 %821  ;;  %v826_v0 = vpop.permute.xlu0 %825  ;;  %v959_v1 = vld [vmem:[#allocation3 + $0xc0] sm:$0xff] }
 0x121   : > { %833 = vst.msk [vmem:[#allocation3 + $0xa0] sm:$0xff] %vm564_vm1, %v822_v63  ;;  %835 = vst.msk [vmem:[#allocation3 + $0xb0] sm:$0xff] %vm564_vm1, %v826_v0  ;;  %2728 = vmatprep.subr.mxu0 %v959_v1  ;;  %v943_v3 = vld [vmem:[#allocation3 + $0x40] sm:$0xff] }
 0x122   : > { %2729 = vmatpush3.msra.mxu0 %v943_v3 }
 0x124   : > { %v623_v4 = vpop.permute.xlu1 %622  ;;  %v621_v5 = vpop.permute.xlu0 %620  ;;  %v958_v6 = vld [vmem:[#allocation3 + $0xb8] sm:$0xff]  ;;  %v956_v21 = vld [vmem:[#allocation3 + $0xa8] sm:$0xff] }
 0x125   : > { %v628_v7 = vsel %vm624_vm5, %v621_v5, %v623_v4  ;;  %2730 = vmatprep.subr.mxu0 %v958_v6 }
 0x126   : > { %636 = vst.msk [vmem:[#allocation3 + $0x18] sm:$0xff] %vm564_vm1, %v628_v7  ;;  %2731 = vmatpush3.msra.mxu0 %v942_v8 }
 0x128   : > { %v619_v9 = vpop.permute.xlu1 %618  ;;  %v617_v10 = vpop.permute.xlu0 %616  ;;  %v957_v12 = vld [vmem:[#allocation3 + $0xb0] sm:$0xff]  ;;  %v955_v26 = vld [vmem:[#allocation3 + $0xa0] sm:$0xff] }
 0x129   : > { %v627_v15 = vsel %vm624_vm5, %v617_v10, %v619_v9  ;;  %2732 = vmatprep.subr.mxu0 %v957_v12 }
 0x12a   : > { %635 = vst.msk [vmem:[#allocation3 + $0x10] sm:$0xff] %vm564_vm1, %v627_v15  ;;  %2733 = vmatpush3.msra.mxu0 %v941_v18 }
 0x12b   : > { %2734 = vmatprep.subr.mxu0 %v956_v21 }
 0x12c   : > { %v615_v24 = vpop.permute.xlu1 %614  ;;  %2735 = vmatpush3.msra.mxu0 %v940_v22  ;;  %v613_v25 = vpop.permute.xlu0 %612 }
 0x12d   : > { %v626_v28 = vsel %vm624_vm5, %v613_v25, %v615_v24  ;;  %2736 = vmatprep.subr.mxu0 %v955_v26  ;;  %v938_v31 = vld [vmem:[#allocation3 + $0x18] sm:$0xff] }
 0x12e   : > { %634 = vst.msk [vmem:[#allocation3 + $0x8] sm:$0xff] %vm564_vm1, %v626_v28  ;;  %2737 = vmatpush3.msra.mxu0 %v939_v29 }
 0x12f   : > { %2738 = vmatprep.subr.mxu0 %v954_v27 }
 0x130   : > { %2739 = vmatpush3.msra.mxu0 %v938_v31  ;;  %v609_v32 = vpop.permute.xlu0 %608  ;;  %v611_v33 = vpop.permute.xlu1 %610 }
 0x131   : > { %v625_v35 = vsel %vm624_vm5, %v609_v32, %v611_v33  ;;  %2740 = vmatprep.subr.mxu0 %v953_v30  ;;  %v937_v36 = vld [vmem:[#allocation3 + $0x10] sm:$0xff] }
 0x132   : > { %633 = vst.msk [vmem:[#allocation3] sm:$0xff] %vm564_vm1, %v625_v35  ;;  %2741 = vmatpush3.msra.mxu0 %v937_v36 }
 0x133   : > { %2742 = vmatprep.subr.mxu0 %v952_v34 }
 0x134   : > { %v914_v37 = vpop.permute.xlu0 %913  ;;  %v912_v38 = vpop.permute.xlu1 %911 }
 0x135   : > { %922 = vst.msk [vmem:[#allocation3 + $0x118] sm:$0xff] %vm564_vm1, %v914_v37  ;;  %921 = vst.msk [vmem:[#allocation3 + $0x110] sm:$0xff] %vm564_vm1, %v912_v38  ;;  %v936_v40 = vld [vmem:[#allocation3 + $0x8] sm:$0xff] }
 0x136   : > { %2743 = vmatpush3.msra.mxu0 %v936_v40 }
 0x137   : > { %2744 = vmatprep.subr.mxu0 %v951_v39 }
 0x138   : > { %v910_v41 = vpop.permute.xlu0 %909  ;;  %v908_v42 = vpop.permute.xlu1 %907 }
 0x139   : > { %920 = vst.msk [vmem:[#allocation3 + $0x108] sm:$0xff] %vm564_vm1, %v910_v41  ;;  %919 = vst.msk [vmem:[#allocation3 + $0x100] sm:$0xff] %vm564_vm1, %v908_v42  ;;  %v935_v44 = vld [vmem:[#allocation3] sm:$0xff] }
 0x13a   : > { %2745 = vmatpush3.msra.mxu0 %v935_v44 }
 0x13b   : > { %1049 = vmatmul.mubr.f32.vlgmr.msra.gmra.mxu0 %v923_v43 }
 0x13c   : > { %v970_v46 = vld [vmem:[#allocation3 + $0x118] sm:$0xff]  ;;  %1053 = vmatprep.mubr.f32.mxu0 %v927_v45  ;;  %v969_v49 = vld [vmem:[#allocation3 + $0x110] sm:$0xff] }
 0x13d   : > { %2856 = vmatprep.subr.mxu1 %v970_v46 }
 0x13e   : > { %2857 = vmatpush3.msra.mxu1 %v970_v46 }
 0x13f   : > { %1054 = vmatmul.mubr.f32.gmra.mxu0 %v926_v47  ;;  %2858 = vmatprep.subr.mxu1 %v969_v49 }
 0x140   : > { %2859 = vmatpush3.msra.mxu1 %v969_v49  ;;  %v968_v50 = vld [vmem:[#allocation3 + $0x108] sm:$0xff]  ;;  %1058 = vmatprep.mubr.f32.mxu0 %v930_v48  ;;  %v967_v53 = vld [vmem:[#allocation3 + $0x100] sm:$0xff] }
 0x141   : > { %2860 = vmatprep.subr.mxu1 %v968_v50 }
 0x142   : > { %2861 = vmatpush3.msra.mxu1 %v968_v50 }
 0x143   : > { %1059 = vmatmul.mubr.f32.gmra.mxu0 %v929_v51  ;;  %2862 = vmatprep.subr.mxu1 %v967_v53 }
 0x144   : > { %2863 = vmatpush3.msra.mxu1 %v967_v53  ;;  %1063 = vmatprep.mubr.f32.mxu0 %v933_v52 }
 0x145   : > { %2865 = vmatmul.mubr.msk.f32.vlgmr.msra.gmra.mxu1 %vm971_vm3, %v928_v54  ;;  %v1171_v59 = vpop.permute.xlu1 %1170  ;;  %v1176_v60 = vpop.permute.xlu0 %1175 }
 0x146   : > { %2867 = vmatprep.mubr.msk.f32.mxu1 %vm971_vm3, %v931_v56 }
 0x147   : > { %1064 = vmatmul.mubr.f32.gmra.mxu0 %v932_v57  ;;  %v1556_v57 = vld [vmem:[%s3808_s4 + $0x10] sm:$0xff] }
 0x148   : > { %2878 = vmatprep.mubr.msk.f32.mxu0 %vm971_vm3, %v1556_v57 }
 0x149   : > { %2868 = vmatmul.mubr.msk.f32.gmra.mxu1 %vm971_vm3, %v934_v58  ;;  %v1204_v62 = vpop.permute.xlu1 %1203  ;;  %v1166_v0 = vpop.permute.xlu0 %1165 }
 0x14d   : > { %v1199_v4 = vpop.permute.xlu1 %1198  ;;  %v1161_v7 = vpop.permute.xlu0 %1160 }
 0x151   : > { %v1194_v24 = vpop.permute.xlu1 %1193  ;;  %v1189_v31 = vpop.permute.xlu0 %1188 }
 0x1fb   : > { %v2746_v61 = vpop.f32.mrf.mxu0 }
 0x1fd   : > { %v2747_v63 = vpop.f32.mrf.mxu0 }
 0x1fe   : > { %v2748_v10 = vadd.f32 %v2747_v63, %v2746_v61 }
 0x1ff   : > { %v2749_v1 = vpop.f32.mrf.mxu0 }
 0x201   : > { %v2750_v3 = vpop.f32.mrf.mxu0 }
 0x202   : > { %v2751_v6 = vadd.f32 %v2750_v3, %v2749_v1 }
 0x203   : > { %v2752_v5 = vpop.f32.mrf.mxu0 }
 0x205   : > { %v2753_v8 = vpop.f32.mrf.mxu0  ;;  %v2866_v9 = vpop.f32.mrf.mxu1 }
 0x206   : > { %v1141_v12 = vadd.f32 %v2866_v9, %v2751_v6  ;;  %v2754_v30 = vadd.f32 %v2753_v8, %v2752_v5  ;;  %v1555_v6 = vld [vmem:[%s3808_s4 + $0x8] sm:$0xff]  ;;  %v1787_v8 = vld [vmem:[%s3809_s5 + $0x18] sm:$0xff]  ;;  %v1786_v9 = vld [vmem:[%s3809_s5 + $0x10] sm:$0xff] }
 0x207   : > { %v2755_v15 = vpop.f32.mrf.mxu0  ;;  %v1135_v18 = vpop.f32.mrf.mxu1  ;;  %1678 = vmatprep.mubr.f32.mxu1 %v1555_v6 }
 0x208   : > { %v1136_v21 = vadd.f32 %v2748_v10, %v1135_v18  ;;  %v1179_v22 = vmul.f32 %v1166_v0, %v1141_v12  ;;  %v1815_v10 = vld [vmem:[%s3810_s6 + $0x18] sm:$0xff]  ;;  %v1784_v12 = vld [vmem:[%s3809_s5] sm:$0xff] }
 0x209   : > { %v2756_v25 = vpop.f32.mrf.mxu0  ;;  %v2869_v26 = vpop.f32.mrf.mxu1  ;;  %v1812_v18 = vld [vmem:[%s3810_s6] sm:$0xff] }
 0x20a   : > { %v1178_v27 = vmul.f32 %v1161_v7, %v1136_v21  ;;  %v1207_v28 = vadd.f32 %v1194_v24, %v1179_v22  ;;  %v2757_v29 = vadd.f32 %v2756_v25, %v2755_v15  ;;  %v1813_v15 = vld [vmem:[%s3810_s6 + $0x8] sm:$0xff] }
 0x20b   : > { %v1145_v32 = vpop.f32.mrf.mxu1 }
 0x20c   : > { %v1206_v33 = vadd.f32 %v1189_v31, %v1178_v27  ;;  %vm1211_vm6 = vcmp.gt.f32.partialorder %v1207_v28, 0.0  ;;  %v1215_v34 = vmul.f32 0.01, %v1207_v28  ;;  %v1151_v35 = vadd.f32 %v2869_v26, %v2757_v29 }
 0x20d   : > { %v1146_v36 = vadd.f32 %v2754_v30, %v1145_v32 }
 0x20e   : > { %vm1210_vm7 = vcmp.gt.f32.partialorder %v1206_v33, 0.0  ;;  %v1214_v37 = vmul.f32 0.01, %v1206_v33  ;;  %v1219_v38 = vsel %vm1211_vm6, %v1207_v28, %v1215_v34  ;;  %v1181_v39 = vmul.f32 %v1176_v60, %v1151_v35  ;;  %v1559_v34 = vld [vmem:[%s3808_s4 + $0x28] sm:$0xff] }
 0x20f   : > { %1235 = vst.msk [vmem:[#allocation4 + $0x20] sm:$0xff] %vm564_vm1, %v1219_v38  ;;  %v1180_v40 = vmul.f32 %v1171_v59, %v1146_v36  ;;  %v1562_v36 = vld [vmem:[%s3808_s4 + $0x40] sm:$0xff] }
 0x210   : > { %v1218_v41 = vsel %vm1210_vm7, %v1206_v33, %v1214_v37  ;;  %v1209_v42 = vadd.f32 %v1204_v62, %v1181_v39 }
 0x211   : > { %1234 = vst.msk [vmem:[#allocation4 + $0x8] sm:$0xff] %vm564_vm1, %v1218_v41  ;;  %v1208_v43 = vadd.f32 %v1199_v4, %v1180_v40  ;;  %v1565_v40 = vld [vmem:[%s3808_s4 + $0x58] sm:$0xff]  ;;  %v1853_v41 = vld [vmem:[%s3814_s10] sm:$0xff] }
 0x212   : > { %vm1213_vm8 = vcmp.gt.f32.partialorder %v1209_v42, 0.0  ;;  %v1217_v44 = vmul.f32 0.01, %v1209_v42 }
 0x213   : > { %vm1212_vm9 = vcmp.gt.f32.partialorder %v1208_v43, 0.0  ;;  %v1216_v45 = vmul.f32 0.01, %v1208_v43 }
 0x214   : > { %v1221_v46 = vsel %vm1213_vm8, %v1209_v42, %v1217_v44  ;;  %v3606_v42 = vld [vmem:[#allocation2] sm:$0xff] }
 0x215   : > { %1237 = vst.msk [vmem:[#allocation4 + $0x50] sm:$0xff] %vm564_vm1, %v1221_v46  ;;  %v1220_v47 = vsel %vm1212_vm9, %v1208_v43, %v1216_v45 }
 0x216   : > { %1236 = vst.msk [vmem:[#allocation4 + $0x38] sm:$0xff] %vm564_vm1, %v1220_v47  ;;  %v3426_v48 = vld [vmem:[#allocation4 + $0x20] sm:$0xff]  ;;  %v1854_v47 = vld [vmem:[%s3814_s10 + $0x8] sm:$0xff] }
 0x217   : > { %1443 = vst.msk [vmem:[#allocation5 + $0x88] sm:$0xff] %vm564_vm1, %v3426_v48  ;;  %v1531_v54 = vmul.f32 %v3426_v48, %v3221_v20  ;;  %v1397_v58 = vmul.f32 %v3426_v48, %v3193_v11  ;;  %v1345_v61 = vmul.f32 %v3426_v48, %v3210_v16  ;;  %v1479_v62 = vmul.f32 %v3426_v48, %v3203_v14 }
 0x218   : > { %v3430_v49 = vld [vmem:[#allocation4 + $0x8] sm:$0xff] }
 0x219   : > { %1442 = vst.msk [vmem:[#allocation5 + $0x80] sm:$0xff] %vm564_vm1, %v3430_v49  ;;  %v1530_v56 = vmul.f32 %v3430_v49, %v3221_v20  ;;  %v1395_v59 = vmul.f32 %v3430_v49, %v3193_v11  ;;  %v1478_v63 = vmul.f32 %v3430_v49, %v3203_v14  ;;  %v1343_v0 = vmul.f32 %v3430_v49, %v3210_v16 }
 0x21a   : > { %v1247_v7 = vmul.f32 %v3430_v49, %v3219_v19 }
 0x21c   : > { %v3434_v50 = vld [vmem:[#allocation4 + $0x50] sm:$0xff] }
 0x21d   : > { %v1533_v51 = vmul.f32 %v3434_v50, %v3221_v20  ;;  %v1528_v52 = vld [vmem:[#allocation4 + $0x38] sm:$0xff]  ;;  %1445 = vst.msk [vmem:[#allocation5 + $0x98] sm:$0xff] %vm564_vm1, %v3434_v50  ;;  %v1401_v1 = vmul.f32 %v3434_v50, %v3193_v11  ;;  %v1481_v3 = vmul.f32 %v3434_v50, %v3203_v14  ;;  %v1349_v4 = vmul.f32 %v3434_v50, %v3210_v16 }
 0x21e   : > { %v1532_v53 = vmul.f32 %v1528_v52, %v3221_v20  ;;  %1444 = vst.msk [vmem:[#allocation5 + $0x90] sm:$0xff] %vm564_vm1, %v1528_v52  ;;  %v1399_v20 = vmul.f32 %v1528_v52, %v3193_v11  ;;  %v1480_v60 = vmul.f32 %v1528_v52, %v3203_v14  ;;  %v1451_v11 = vmul.f32 %v3426_v48, %v3212_v17 }
 0x21f   : > { %1544 = vrot.lane.b32.xlu1 %v1533_v51, %s3024_s19  ;;  %v1450_v14 = vmul.f32 %v3430_v49, %v3212_v17  ;;  %v1253_v5 = vmul.f32 %v3434_v50, %v3219_v19  ;;  %v1856_v51 = vld [vmem:[%s3814_s10 + $0x18] sm:$0xff] }
 0x220   : > { %1542 = vrot.lane.b32.xlu0 %v1532_v53, %s3024_s19 }
 0x223   : > { %1540 = vrot.lane.b32.xlu1 %v1531_v54, %s3024_s19 }
 0x224   : > { %1538 = vrot.lane.b32.xlu0 %v1530_v56, %s3024_s19  ;;  %s3832_s19 = smov 127  }
 0x227   : > { %1422 = vrot.lane.b32.xlu1 %v3198_v13, %s3022_s26 }
 0x228   : > { %1418 = vrot.lane.b32.xlu0 %v3198_v13, %s3022_s26 }
 0x22b   : > { %1516 = vrot.lane.b32.xlu1 %v3434_v50, %s3831_s23 }
 0x22c   : > { %1514 = vrot.lane.b32.xlu0 %v1528_v52, %s3831_s23 }
 0x22f   : > { %1420 = vrot.lane.b32.xlu1 %v1399_v20, %s3022_s26 }
 0x230   : > { %1416 = vrot.lane.b32.xlu0 %v1397_v58, %s3022_s26 }
 0x233   : > { %1414 = vrot.lane.b32.xlu1 %v3198_v13, %s3022_s26 }
 0x234   : > { %1410 = vrot.lane.b32.xlu0 %v3198_v13, %s3022_s26  ;;  %v1347_v13 = vmul.f32 %v1528_v52, %v3210_v16  ;;  %v1251_v16 = vmul.f32 %v1528_v52, %v3219_v19 }
 0x237   : > { %1512 = vrot.lane.b32.xlu1 %v3426_v48, %s3831_s23 }
 0x238   : > { %1510 = vrot.lane.b32.xlu0 %v3430_v49, %s3831_s23  ;;  %s551_s23 = scalar_lea.vmem %s3820_s16, %s3145_s29 }
 0x23b   : > { %1412 = vrot.lane.b32.xlu1 %v1395_v59, %s3022_s26 }
 0x23c   : > { %1366 = vrot.lane.b32.xlu0 %v3231_v23, %s3022_s26 }
 0x23f   : > { %1370 = vrot.lane.b32.xlu1 %v3231_v23, %s3022_s26 }
 0x240   : > { %1490 = vrot.lane.b32.xlu0 %v1480_v60, %s3832_s19 }
 0x243   : > { %1368 = vrot.lane.b32.xlu1 %v1347_v13, %s3022_s26 }
 0x244   : > { %1364 = vrot.lane.b32.xlu0 %v1345_v61, %s3022_s26 }
 0x247   : > { %1362 = vrot.lane.b32.xlu1 %v3231_v23, %s3022_s26 }
 0x248   : > { %1358 = vrot.lane.b32.xlu0 %v3231_v23, %s3022_s26  ;;  %v1452_v23 = vmul.f32 %v1528_v52, %v3212_v17 }
 0x24b   : > { %1488 = vrot.lane.b32.xlu1 %v1479_v62, %s3832_s19 }
 0x24c   : > { %1486 = vrot.lane.b32.xlu0 %v1478_v63, %s3832_s19 }
 0x24f   : > { %1360 = vrot.lane.b32.xlu1 %v1343_v0, %s3022_s26 }
 0x250   : > { %1320 = vrot.lane.b32.xlu0 %v3434_v50, %s3833_s24 }
 0x253   : > { %2987 = vrot.lane.b32.xlu1 %v3023_v2, %s3833_s24 }
 0x254   : > { %1316 = vrot.lane.b32.xlu0 %v1528_v52, %s3833_s24 }
 0x257   : > { %1462 = vrot.lane.b32.xlu1 %v1452_v23, %s3832_s19 }
 0x258   : > { %1424 = vrot.lane.b32.xlu0 %v1401_v1, %s3022_s26 }
 0x25b   : > { %1312 = vrot.lane.b32.xlu1 %v3426_v48, %s3833_s24 }
 0x25c   : > { %2992 = vrot.lane.b32.xlu0 %v3023_v2, %s3833_s24  ;;  %v1453_v2 = vmul.f32 %v3434_v50, %v3212_v17  ;;  %v1249_v17 = vmul.f32 %v3426_v48, %v3219_v19  ;;  %v1785_v19 = vld [vmem:[%s3809_s5 + $0x8] sm:$0xff]  ;;  %v1855_v48 = vld [vmem:[%s3814_s10 + $0x10] sm:$0xff] }
 0x25f   : > { %1492 = vrot.lane.b32.xlu1 %v1481_v3, %s3832_s19 }
 0x260   : > { %1372 = vrot.lane.b32.xlu0 %v1349_v4, %s3022_s26  ;;  %s3834_s26 = smov 3  }
 0x263   : > { %1308 = vrot.lane.b32.xlu1 %v3430_v49, %s3833_s24  ;;  %s546_s24 = scalar_lea.vmem %s3819_s15, %s3145_s29 }
 0x264   : > { %1460 = vrot.lane.b32.xlu0 %v1451_v11, %s3832_s19 }
 0x267   : > { %1464 = vrot.lane.b32.xlu1 %v1453_v2, %s3832_s19 }
 0x268   : > { %1458 = vrot.lane.b32.xlu0 %v1450_v14, %s3832_s19  ;;  %s541_s19 = scalar_lea.vmem %s3813_s9, %s2672_s25 }
 0x269   : > { %v1852_v35 = vld [vmem:[%s541_s19] sm:$0xf] }
 0x26b   : > { %1274 = vrot.lane.b32.xlu1 %v3290_v55, %s3834_s26 }
 0x26c   : > { %1272 = vrot.lane.b32.xlu0 %v1251_v16, %s3834_s26 }
 0x26f   : > { %1270 = vrot.lane.b32.xlu1 %v3290_v55, %s3834_s26 }
 0x270   : > { %1276 = vrot.lane.b32.xlu0 %v1253_v5, %s3834_s26 }
 0x273   : > { %1266 = vrot.lane.b32.xlu1 %v3290_v55, %s3834_s26 }
 0x274   : > { %1268 = vrot.lane.b32.xlu0 %v1249_v17, %s3834_s26 }
 0x277   : > { %1262 = vrot.lane.b32.xlu1 %v3290_v55, %s3834_s26  ;;  %v1814_v55 = vld [vmem:[%s3810_s6 + $0x10] sm:$0xff] }
 0x278   : > { %1264 = vrot.lane.b32.xlu0 %v1247_v7, %s3834_s26 }
 0x27b   : > { %1805 = vperm.xlu1 %2985, %v1787_v8  }
 0x27c   : > { %1800 = vperm.xlu0 %2984, %v1786_v9  }
 0x27f   : > { %1833 = vperm.xlu1 %2985, %v1815_v10  }
 0x280   : > { %1795 = vperm.xlu0 %2984, %v1785_v19  }
 0x283   : > { %1828 = vperm.xlu1 %2985, %v1814_v55  }
 0x284   : > { %1790 = vperm.xlu0 %2984, %v1784_v12  }
 0x287   : > { %1823 = vperm.xlu1 %2985, %v1813_v15  }
 0x288   : > { %1818 = vperm.xlu0 %2984, %v1812_v18  }
 0x291   : > { %v1545_v21 = vpop.permute.xlu1 %1544 }
 0x292   : > { %v1543_v22 = vpop.permute.xlu0 %1542  ;;  %1553 = vst.msk [vmem:[#allocation5 + $0x118] sm:$0xff] %vm564_vm1, %v1545_v21 }
 0x293   : > { %1552 = vst.msk [vmem:[#allocation5 + $0x110] sm:$0xff] %vm564_vm1, %v1543_v22 }
 0x295   : > { %v1541_v24 = vpop.permute.xlu1 %1540 }
 0x296   : > { %v1539_v25 = vpop.permute.xlu0 %1538  ;;  %1551 = vst.msk [vmem:[#allocation5 + $0x108] sm:$0xff] %vm564_vm1, %v1541_v24 }
 0x297   : > { %1550 = vst.msk [vmem:[#allocation5 + $0x100] sm:$0xff] %vm564_vm1, %v1539_v25 }
 0x299   : > { %v3582_v26 = vpop.permute.xlu1 %1422  ;;  %v1601_v27 = vld [vmem:[#allocation5 + $0x118] sm:$0xff] }
 0x29a   : > { %v1419_v28 = vpop.permute.xlu0 %1418  ;;  %2870 = vmatprep.subr.mxu0 %v1601_v27  ;;  %v1600_v29 = vld [vmem:[#allocation5 + $0x110] sm:$0xff] }
 0x29b   : > { %2871 = vmatpush3.msra.mxu0 %v1601_v27 }
 0x29c   : > { %2872 = vmatprep.subr.mxu0 %v1600_v29 }
 0x29d   : > { %2873 = vmatpush3.msra.mxu0 %v1600_v29  ;;  %v1517_v30 = vpop.permute.xlu1 %1516  ;;  %v1599_v31 = vld [vmem:[#allocation5 + $0x108] sm:$0xff] }
 0x29e   : > { %v1515_v32 = vpop.permute.xlu0 %1514  ;;  %1525 = vst.msk [vmem:[#allocation5 + $0xf8] sm:$0xff] %vm564_vm1, %v1517_v30  ;;  %2874 = vmatprep.subr.mxu0 %v1599_v31  ;;  %v1598_v33 = vld [vmem:[#allocation5 + $0x100] sm:$0xff] }
 0x29f   : > { %1524 = vst.msk [vmem:[#allocation5 + $0xf0] sm:$0xff] %vm564_vm1, %v1515_v32  ;;  %2875 = vmatpush3.msra.mxu0 %v1599_v31 }
 0x2a0   : > { %2876 = vmatprep.subr.mxu0 %v1598_v33 }
 0x2a1   : > { %2877 = vmatpush3.msra.mxu0 %v1598_v33  ;;  %v1421_v37 = vpop.permute.xlu1 %1420 }
 0x2a2   : > { %v1417_v38 = vpop.permute.xlu0 %1416  ;;  %v1428_v39 = vsel %vm730_vm4, %v1419_v28, %v1421_v37  ;;  %2879 = vmatmul.mubr.msk.f32.vlgmr.msra.gmra.mxu0 %vm971_vm3, %v1559_v34  ;;  %2884 = vmatprep.subr.msk.mxu0 %vm1869_vm10, %v1852_v35 }
 0x2a3   : > { %1436 = vst.msk [vmem:[#allocation5 + $0x70] sm:$0xff] %vm564_vm1, %v1428_v39  ;;  %2881 = vmatprep.mubr.msk.f32.mxu0 %vm971_vm3, %v1562_v36  ;;  %2885 = vmatpush3.msk.msra.mxu0 %vm1869_vm10, %v1852_v35 }
 0x2a4   : > { %2906 = vmatprep.subr.mxu0 %v3606_v42 }
 0x2a5   : > { %v1415_v43 = vpop.permute.xlu1 %1414  ;;  %v1597_v44 = vld [vmem:[#allocation5 + $0xf8] sm:$0xff] }
 0x2a6   : > { %v1411_v45 = vpop.permute.xlu0 %1410  ;;  %v1427_v46 = vsel %vm730_vm4, %v1415_v43, %v1417_v38  ;;  %2766 = vmatprep.subr.mxu1 %v1597_v44  ;;  %2882 = vmatmul.mubr.msk.f32.gmra.mxu0 %vm971_vm3, %v1565_v40  ;;  %v1596_v21 = vld [vmem:[#allocation5 + $0xf0] sm:$0xff] }
 0x2a7   : > { %1435 = vst.msk [vmem:[#allocation5 + $0x68] sm:$0xff] %vm564_vm1, %v1427_v46  ;;  %2886 = vmatprep.mubr.msk.f32.mxu0 %vm564_vm1, %v1853_v41 }
 0x2a9   : > { %v1513_v49 = vpop.permute.xlu1 %1512 }
 0x2aa   : > { %v1511_v50 = vpop.permute.xlu0 %1510  ;;  %1523 = vst.msk [vmem:[#allocation5 + $0xe8] sm:$0xff] %vm564_vm1, %v1513_v49  ;;  %2887 = vmatmul.mubr.msk.f32.vlgmr.msra.gmra.mxu0 %vm564_vm1, %v1854_v47  ;;  %v1580_v22 = vld [vmem:[#allocation5 + $0x70] sm:$0xff] }
 0x2ab   : > { %1522 = vst.msk [vmem:[#allocation5 + $0xe0] sm:$0xff] %vm564_vm1, %v1511_v50  ;;  %2889 = vmatprep.mubr.msk.f32.mxu0 %vm564_vm1, %v1855_v48 }
 0x2ad   : > { %v1413_v52 = vpop.permute.xlu1 %1412 }
 0x2ae   : > { %v1367_v53 = vpop.permute.xlu0 %1366  ;;  %v1426_v54 = vsel %vm730_vm4, %v1411_v45, %v1413_v52  ;;  %2890 = vmatmul.mubr.msk.f32.gmra.mxu0 %vm564_vm1, %v1856_v51  ;;  %v1579_v28 = vld [vmem:[#allocation5 + $0x68] sm:$0xff] }
 0x2af   : > { %1434 = vst.msk [vmem:[#allocation5 + $0x60] sm:$0xff] %vm564_vm1, %v1426_v54  ;;  %2914 = vmatprep.mubr.msk.f32.mxu0 %vm3029_vm15, %v3606_v42 }
 0x2b1   : > { %v1371_v56 = vpop.permute.xlu1 %1370  ;;  %v1595_v27 = vld [vmem:[#allocation5 + $0xe8] sm:$0xff] }
 0x2b2   : > { %v1491_v57 = vpop.permute.xlu0 %1490  ;;  %v1594_v29 = vld [vmem:[#allocation5 + $0xe0] sm:$0xff] }
 0x2b3   : > { %1500 = vst.msk [vmem:[#allocation5 + $0xd0] sm:$0xff] %vm564_vm1, %v1491_v57 }
 0x2b5   : > { %v1369_v20 = vpop.permute.xlu1 %1368 }
 0x2b6   : > { %v1365_v58 = vpop.permute.xlu0 %1364  ;;  %v1376_v59 = vsel %vm730_vm4, %v1367_v53, %v1369_v20  ;;  %v1578_v30 = vld [vmem:[#allocation5 + $0x60] sm:$0xff] }
 0x2b7   : > { %1384 = vst.msk [vmem:[#allocation5 + $0x50] sm:$0xff] %vm564_vm1, %v1376_v59 }
 0x2b9   : > { %v1363_v60 = vpop.permute.xlu1 %1362 }
 0x2ba   : > { %v1359_v13 = vpop.permute.xlu0 %1358  ;;  %v1375_v61 = vsel %vm730_vm4, %v1363_v60, %v1365_v58  ;;  %v1592_v35 = vld [vmem:[#allocation5 + $0xd0] sm:$0xff] }
 0x2bb   : > { %1383 = vst.msk [vmem:[#allocation5 + $0x48] sm:$0xff] %vm564_vm1, %v1375_v61 }
 0x2bd   : > { %v1489_v62 = vpop.permute.xlu1 %1488 }
 0x2be   : > { %v1487_v63 = vpop.permute.xlu0 %1486  ;;  %1499 = vst.msk [vmem:[#allocation5 + $0xc8] sm:$0xff] %vm564_vm1, %v1489_v62  ;;  %v1576_v36 = vld [vmem:[#allocation5 + $0x50] sm:$0xff] }
 0x2bf   : > { %1498 = vst.msk [vmem:[#allocation5 + $0xc0] sm:$0xff] %vm564_vm1, %v1487_v63  ;;  %v1584_v63 = vld [vmem:[#allocation5 + $0x90] sm:$0xff] }
 0x2c1   : > { %v1361_v0 = vpop.permute.xlu1 %1360 }
 0x2c2   : > { %v1321_v23 = vpop.permute.xlu0 %1320  ;;  %v1374_v1 = vsel %vm730_vm4, %v1359_v13, %v1361_v0  ;;  %v1575_v40 = vld [vmem:[#allocation5 + $0x48] sm:$0xff]  ;;  %v1585_v13 = vld [vmem:[#allocation5 + $0x98] sm:$0xff] }
 0x2c3   : > { %1382 = vst.msk [vmem:[#allocation5 + $0x40] sm:$0xff] %vm564_vm1, %v1374_v1 }
 0x2c5   : > { %v2988_v3 = vpop.permute.xlu1 %2987  ;;  %v1591_v39 = vld [vmem:[#allocation5 + $0xc8] sm:$0xff] }
 0x2c6   : > { %v1317_v4 = vpop.permute.xlu0 %1316  ;;  %v2990_v11 = vunpack.i.h.bf16 %v2988_v3  ;;  %v2989_v2 = vunpack.i.l.bf16 %v2988_v3  ;;  %v1590_v41 = vld [vmem:[#allocation5 + $0xc0] sm:$0xff] }
 0x2c7   : > { %v1582_v3 = vld [vmem:[#allocation5 + $0x80] sm:$0xff] }
 0x2c8   : > { %v1324_v14 = vsel %vm669_vm2, %v2990_v11, %v1317_v4  ;;  %v1325_v16 = vsel %vm669_vm2, %v2989_v2, %v1321_v23  ;;  %v1583_v23 = vld [vmem:[#allocation5 + $0x88] sm:$0xff]  ;;  %v1554_v4 = vld [vmem:[%s3808_s4] sm:$0xff] }
 0x2c9   : > { %1332 = vst.msk [vmem:[#allocation5 + $0x30] sm:$0xff] %vm564_vm1, %v1324_v14  ;;  %1333 = vst.msk [vmem:[#allocation5 + $0x38] sm:$0xff] %vm564_vm1, %v1325_v16  ;;  %v1463_v5 = vpop.permute.xlu1 %1462  ;;  %v1558_v2 = vld [vmem:[%s3808_s4 + $0x20] sm:$0xff]  ;;  %v1557_v14 = vld [vmem:[%s3808_s4 + $0x18] sm:$0xff] }
 0x2ca   : > { %v1425_v17 = vpop.permute.xlu0 %1424  ;;  %1472 = vst.msk [vmem:[#allocation5 + $0xb0] sm:$0xff] %vm564_vm1, %v1463_v5  ;;  %v1574_v43 = vld [vmem:[#allocation5 + $0x40] sm:$0xff]  ;;  %v1561_v16 = vld [vmem:[%s3808_s4 + $0x38] sm:$0xff]  ;;  %v1560_v5 = vld [vmem:[%s3808_s4 + $0x30] sm:$0xff] }
 0x2cb   : > { %v1429_v6 = vsel %vm730_vm4, %v3582_v26, %v1425_v17  ;;  %v1564_v17 = vld [vmem:[%s3808_s4 + $0x50] sm:$0xff] }
 0x2cc   : > { %1437 = vst.msk [vmem:[#allocation5 + $0x78] sm:$0xff] %vm564_vm1, %v1429_v6  ;;  %v1563_v6 = vld [vmem:[%s3808_s4 + $0x48] sm:$0xff] }
 0x2cd   : > { %v1313_v7 = vpop.permute.xlu1 %1312 }
 0x2ce   : > { %v2993_v8 = vpop.permute.xlu0 %2992 }
 0x2cf   : > { %v2994_v9 = vunpack.i.l.bf16 %v2993_v8  ;;  %v2995_v18 = vunpack.i.h.bf16 %v2993_v8 }
 0x2d0   : > { %v1573_v49 = vld [vmem:[#allocation5 + $0x38] sm:$0xff]  ;;  %v1572_v52 = vld [vmem:[#allocation5 + $0x30] sm:$0xff] }
 0x2d1   : > { %v1323_v10 = vsel %vm669_vm2, %v2994_v9, %v1313_v7  ;;  %v1493_v19 = vpop.permute.xlu1 %1492  ;;  %v1588_v50 = vld [vmem:[#allocation5 + $0xb0] sm:$0xff]  ;;  %v1962_v7 = vld [vmem:[%s3815_s11] sm:$0xff] }
 0x2d2   : > { %1331 = vst.msk [vmem:[#allocation5 + $0x28] sm:$0xff] %vm564_vm1, %v1323_v10  ;;  %v1373_v55 = vpop.permute.xlu0 %1372  ;;  %1501 = vst.msk [vmem:[#allocation5 + $0xd8] sm:$0xff] %vm564_vm1, %v1493_v19 }
 0x2d3   : > { %v1377_v12 = vsel %vm730_vm4, %v1371_v56, %v1373_v55  ;;  %v1581_v15 = vld [vmem:[#allocation5 + $0x78] sm:$0xff] }
 0x2d4   : > { %1385 = vst.msk [vmem:[#allocation5 + $0x58] sm:$0xff] %vm564_vm1, %v1377_v12  ;;  %2767 = vmatpush3.msra.mxu1 %v1581_v15 }
 0x2d5   : > { %2768 = vmatprep.subr.mxu1 %v1596_v21  ;;  %v1309_v24 = vpop.permute.xlu1 %1308 }
 0x2d6   : > { %v1461_v25 = vpop.permute.xlu0 %1460  ;;  %2769 = vmatpush3.msra.mxu1 %v1580_v22  ;;  %v1322_v26 = vsel %vm669_vm2, %v2995_v18, %v1309_v24 }
 0x2d7   : > { %1471 = vst.msk [vmem:[#allocation5 + $0xa8] sm:$0xff] %vm564_vm1, %v1461_v25  ;;  %1330 = vst.msk [vmem:[#allocation5 + $0x20] sm:$0xff] %vm564_vm1, %v1322_v26  ;;  %2770 = vmatprep.subr.mxu1 %v1595_v27  ;;  %v1963_v26 = vld [vmem:[%s3815_s11 + $0x8] sm:$0xff]  ;;  %v1964_v27 = vld [vmem:[%s3815_s11 + $0x10] sm:$0xff] }
 0x2d8   : > { %2771 = vmatpush3.msra.mxu1 %v1579_v28  ;;  %v1965_v28 = vld [vmem:[%s3815_s11 + $0x18] sm:$0xff] }
 0x2d9   : > { %2772 = vmatprep.subr.mxu1 %v1594_v29  ;;  %v1465_v31 = vpop.permute.xlu1 %1464  ;;  %v1593_v32 = vld [vmem:[#allocation5 + $0xd8] sm:$0xff]  ;;  %v1571_v57 = vld [vmem:[#allocation5 + $0x28] sm:$0xff] }
 0x2da   : > { %v1459_v33 = vpop.permute.xlu0 %1458  ;;  %2773 = vmatpush3.msra.mxu1 %v1578_v30  ;;  %1473 = vst.msk [vmem:[#allocation5 + $0xb8] sm:$0xff] %vm564_vm1, %v1465_v31 }
 0x2db   : > { %1470 = vst.msk [vmem:[#allocation5 + $0xa0] sm:$0xff] %vm564_vm1, %v1459_v33  ;;  %2774 = vmatprep.subr.mxu1 %v1593_v32  ;;  %v1577_v34 = vld [vmem:[#allocation5 + $0x58] sm:$0xff] }
 0x2dc   : > { %2775 = vmatpush3.msra.mxu1 %v1577_v34 }
 0x2dd   : > { %2776 = vmatprep.subr.mxu1 %v1592_v35  ;;  %v1275_v37 = vpop.permute.xlu1 %1274 }
 0x2de   : > { %v1273_v38 = vpop.permute.xlu0 %1272  ;;  %2777 = vmatpush3.msra.mxu1 %v1576_v36  ;;  %v1587_v54 = vld [vmem:[#allocation5 + $0xa8] sm:$0xff]  ;;  %v1570_v59 = vld [vmem:[#allocation5 + $0x20] sm:$0xff] }
 0x2df   : > { %2778 = vmatprep.subr.mxu1 %v1591_v39 }
 0x2e0   : > { %2779 = vmatpush3.msra.mxu1 %v1575_v40 }
 0x2e1   : > { %2780 = vmatprep.subr.mxu1 %v1590_v41  ;;  %v1271_v44 = vpop.permute.xlu1 %1270  ;;  %v1589_v45 = vld [vmem:[#allocation5 + $0xb8] sm:$0xff] }
 0x2e2   : > { %v1277_v46 = vpop.permute.xlu0 %1276  ;;  %2781 = vmatpush3.msra.mxu1 %v1574_v43  ;;  %v1280_v47 = vsel %vm624_vm5, %v1271_v44, %v1273_v38  ;;  %v1586_v20 = vld [vmem:[#allocation5 + $0xa0] sm:$0xff] }
 0x2e3   : > { %v1281_v48 = vsel %vm624_vm5, %v1275_v37, %v1277_v46  ;;  %1288 = vst.msk [vmem:[#allocation5 + $0x10] sm:$0xff] %vm564_vm1, %v1280_v47  ;;  %2782 = vmatprep.subr.mxu1 %v1589_v45 }
 0x2e4   : > { %1289 = vst.msk [vmem:[#allocation5 + $0x18] sm:$0xff] %vm564_vm1, %v1281_v48  ;;  %2783 = vmatpush3.msra.mxu1 %v1573_v49 }
 0x2e5   : > { %2784 = vmatprep.subr.mxu1 %v1588_v50  ;;  %v1267_v51 = vpop.permute.xlu1 %1266 }
 0x2e6   : > { %v1269_v53 = vpop.permute.xlu0 %1268  ;;  %2785 = vmatpush3.msra.mxu1 %v1572_v52 }
 0x2e7   : > { %v1279_v56 = vsel %vm624_vm5, %v1267_v51, %v1269_v53  ;;  %2786 = vmatprep.subr.mxu1 %v1587_v54 }
 0x2e8   : > { %1287 = vst.msk [vmem:[#allocation5 + $0x8] sm:$0xff] %vm564_vm1, %v1279_v56  ;;  %2787 = vmatpush3.msra.mxu1 %v1571_v57 }
 0x2e9   : > { %2788 = vmatprep.subr.mxu1 %v1586_v20  ;;  %v1263_v58 = vpop.permute.xlu1 %1262 }
 0x2ea   : > { %v1265_v60 = vpop.permute.xlu0 %1264  ;;  %2789 = vmatpush3.msra.mxu1 %v1570_v59  ;;  %v1568_v0 = vld [vmem:[#allocation5 + $0x10] sm:$0xff] }
 0x2eb   : > { %v1278_v61 = vsel %vm624_vm5, %v1263_v58, %v1265_v60  ;;  %2790 = vmatprep.subr.mxu1 %v1585_v13  ;;  %v1569_v62 = vld [vmem:[#allocation5 + $0x18] sm:$0xff] }
 0x2ec   : > { %1286 = vst.msk [vmem:[#allocation5] sm:$0xff] %vm564_vm1, %v1278_v61  ;;  %2791 = vmatpush3.msra.mxu1 %v1569_v62 }
 0x2ed   : > { %2792 = vmatprep.subr.mxu1 %v1584_v63 }
 0x2ee   : > { %2793 = vmatpush3.msra.mxu1 %v1568_v0 }
 0x2ef   : > { %2794 = vmatprep.subr.mxu1 %v1583_v23  ;;  %v1567_v1 = vld [vmem:[#allocation5 + $0x8] sm:$0xff] }
 0x2f0   : > { %2795 = vmatpush3.msra.mxu1 %v1567_v1 }
 0x2f1   : > { %2796 = vmatprep.subr.mxu1 %v1582_v3 }
 0x2f3   : > { %v1566_v11 = vld [vmem:[#allocation5] sm:$0xff] }
 0x2f4   : > { %2797 = vmatpush3.msra.mxu1 %v1566_v11 }
 0x2f5   : > { %1679 = vmatmul.mubr.f32.vlgmr.msra.gmra.mxu1 %v1554_v4 }
 0x2f6   : > { %1683 = vmatprep.mubr.f32.mxu1 %v1558_v2  ;;  %v1806_v29 = vpop.permute.xlu1 %1805 }
 0x2f7   : > { %v1801_v30 = vpop.permute.xlu0 %1800 }
 0x2f9   : > { %1684 = vmatmul.mubr.f32.gmra.mxu1 %v1557_v14 }
 0x2fa   : > { %1688 = vmatprep.mubr.f32.mxu1 %v1561_v16  ;;  %v1834_v31 = vpop.permute.xlu1 %1833 }
 0x2fb   : > { %v1796_v33 = vpop.permute.xlu0 %1795 }
 0x2fd   : > { %1689 = vmatmul.mubr.f32.gmra.mxu1 %v1560_v5 }
 0x2fe   : > { %1693 = vmatprep.mubr.f32.mxu1 %v1564_v17  ;;  %v1829_v37 = vpop.permute.xlu1 %1828 }
 0x2ff   : > { %v1791_v40 = vpop.permute.xlu0 %1790 }
 0x301   : > { %1694 = vmatmul.mubr.f32.gmra.mxu1 %v1563_v6 }
 0x302   : > { %2900 = vmatprep.mubr.msk.f32.mxu1 %vm971_vm3, %v1962_v7  ;;  %v1824_v49 = vpop.permute.xlu1 %1823 }
 0x303   : > { %v1819_v51 = vpop.permute.xlu0 %1818 }
 0x362   : > { %v2880_v8 = vpop.f32.mrf.mxu0 }
 0x364   : > { %v1765_v9 = vpop.f32.mrf.mxu0 }
 0x366   : > { %v2883_v10 = vpop.f32.mrf.mxu0 }
 0x368   : > { %v1775_v19 = vpop.f32.mrf.mxu0 }
 0x36a   : > { %v2888_v55 = vpop.f32.mrf.mxu0 }
 0x36b   : > { %v1959_v22 = vmax.f32 %v2888_v55, 0.0  ;;  %v2063_v55 = vld [vmem:[%s3817_s13] sm:$0x3] }
 0x36c   : > { %v1939_v12 = vpop.f32.mrf.mxu0 }
 0x36d   : > { %v1958_v25 = vmax.f32 %v1939_v12, 0.0 }
 0x36e   : > { %v2891_v15 = vpop.f32.mrf.mxu0 }
 0x36f   : > { %v1961_v18 = vmax.f32 %v2891_v15, 0.0 }
 0x370   : > { %v1949_v21 = vpop.f32.mrf.mxu0 }
 0x371   : > { %v1960_v24 = vmax.f32 %v1949_v21, 0.0  ;;  %2892 = vmatprep.subr.mxu1 %v1961_v18 }
 0x372   : > { %2893 = vmatpush3.msra.mxu1 %v1961_v18 }
 0x373   : > { %2894 = vmatprep.subr.mxu1 %v1960_v24 }
 0x374   : > { %2895 = vmatpush3.msra.mxu1 %v1960_v24 }
 0x375   : > { %2896 = vmatprep.subr.mxu1 %v1959_v22 }
 0x376   : > { %2897 = vmatpush3.msra.mxu1 %v1959_v22 }
 0x377   : > { %2898 = vmatprep.subr.mxu1 %v1958_v25 }
 0x378   : > { %2899 = vmatpush3.msra.mxu1 %v1958_v25  ;;  %v2166_v25 = vld [vmem:[%s3816_s12] sm:$0x3] }
 0x379   : > { %2901 = vmatmul.mubr.msk.f32.vlgmr.msra.gmra.mxu1 %vm971_vm3, %v1963_v26  ;;  %2917 = vmatprep.subr.mxu1 %v3606_v42 }
 0x37a   : > { %2903 = vmatprep.mubr.msk.f32.mxu1 %vm971_vm3, %v1964_v27 }
 0x37d   : > { %2904 = vmatmul.mubr.msk.f32.gmra.mxu1 %vm971_vm3, %v1965_v28 }
 0x37e   : > { %2925 = vmatprep.mubr.msk.f32.mxu1 %vm3029_vm15, %v3606_v42 }
 0x3b5   : > { %v2798_v32 = vpop.f32.mrf.mxu1 }
 0x3b7   : > { %v2799_v34 = vpop.f32.mrf.mxu1 }
 0x3b8   : > { %v2800_v35 = vadd.f32 %v2799_v34, %v2798_v32  ;;  %v2241_v32 = vld [vmem:[%s3818_s14] sm:$0xff] }
 0x3b9   : > { %v2801_v36 = vpop.f32.mrf.mxu1 }
 0x3ba   : > { %v1766_v38 = vadd.f32 %v2800_v35, %v1765_v9 }
 0x3bb   : > { %v2802_v39 = vpop.f32.mrf.mxu1 }
 0x3bc   : > { %v2803_v41 = vadd.f32 %v2802_v39, %v2801_v36  ;;  %v1808_v45 = vmul.f32 %v1791_v40, %v1766_v38  ;;  %v2243_v39 = vld [vmem:[%s3818_s14 + $0x10] sm:$0xff] }
 0x3bd   : > { %v2804_v43 = vpop.f32.mrf.mxu1 }
 0x3be   : > { %v1771_v44 = vadd.f32 %v2880_v8, %v2803_v41  ;;  %v1836_v54 = vadd.f32 %v1819_v51, %v1808_v45  ;;  %v2244_v41 = vld [vmem:[%s3818_s14 + $0x18] sm:$0xff] }
 0x3bf   : > { %v2805_v46 = vpop.f32.mrf.mxu1 }
 0x3c0   : > { %v1809_v47 = vmul.f32 %v1796_v33, %v1771_v44  ;;  %v2806_v48 = vadd.f32 %v2805_v46, %v2804_v43  ;;  %v1844_v0 = vmul.f32 0.01, %v1836_v54  ;;  %vm1840_vm13 = vcmp.gt.f32.partialorder %v1836_v54, 0.0 }
 0x3c1   : > { %v2807_v50 = vpop.f32.mrf.mxu1 }
 0x3c2   : > { %v1837_v52 = vadd.f32 %v1824_v49, %v1809_v47  ;;  %v1776_v53 = vadd.f32 %v2806_v48, %v1775_v19  ;;  %v3710_v11 = vsel %vm1840_vm13, %v1836_v54, %v1844_v0 }
 0x3c3   : > { %v2808_v56 = vpop.f32.mrf.mxu1  ;;  %v2154_v16 = vsel %vm564_vm1, %v3710_v11, -inf  ;;  %v2137_v7 = vsel %vm564_vm1, %v3710_v11, 0.0 }
 0x3c4   : > { %v1810_v57 = vmul.f32 %v1801_v30, %v1776_v53  ;;  %v2809_v20 = vadd.f32 %v2808_v56, %v2807_v50  ;;  %vm1841_vm11 = vcmp.gt.f32.partialorder %v1837_v52, 0.0  ;;  %v1845_v58 = vmul.f32 0.01, %v1837_v52 }
 0x3c6   : > { %v1838_v59 = vadd.f32 %v1829_v37, %v1810_v57  ;;  %v1781_v60 = vadd.f32 %v2883_v10, %v2809_v20  ;;  %v3702_v13 = vsel %vm1841_vm11, %v1837_v52, %v1845_v58 }
 0x3c7   : > { %v2157_v61 = vsel %vm564_vm1, %v3702_v13, -inf  ;;  %v2140_v17 = vsel %vm564_vm1, %v3702_v13, 0.0 }
 0x3c8   : > { %v1811_v62 = vmul.f32 %v1806_v29, %v1781_v60  ;;  %2158 = vmax.xlane.f32.xlu0 %v2157_v61  ;;  %vm1842_vm12 = vcmp.gt.f32.partialorder %v1838_v59, 0.0  ;;  %v1846_v63 = vmul.f32 0.01, %v1838_v59 }
 0x3ca   : > { %v1839_v23 = vadd.f32 %v1834_v31, %v1811_v62  ;;  %v3706_v1 = vsel %vm1842_vm12, %v1838_v59, %v1846_v63 }
 0x3cb   : > { %v2160_v3 = vsel %vm564_vm1, %v3706_v1, -inf  ;;  %v2143_v6 = vsel %vm564_vm1, %v3706_v1, 0.0 }
 0x3cc   : > { %2161 = vmax.xlane.f32.xlu0 %v2160_v3  ;;  %vm1843_vm14 = vcmp.gt.f32.partialorder %v1839_v23, 0.0  ;;  %v1847_v4 = vmul.f32 0.01, %v1839_v23 }
 0x3ce   : > { %v3712_v2 = vsel %vm1843_vm14, %v1839_v23, %v1847_v4 }
 0x3cf   : > { %v2163_v14 = vsel %vm564_vm1, %v3712_v2, -inf  ;;  %v2146_v5 = vsel %vm564_vm1, %v3712_v2, 0.0 }
 0x3d0   : > { %2164 = vmax.xlane.f32.xlu1 %v2163_v14  ;;  %2155 = vmax.xlane.f32.xlu0 %v2154_v16 }
 0x3d4   : > { %2147 = vadd.xlane.f32.xlu1 %v2146_v5  ;;  %2141 = vadd.xlane.f32.xlu0 %v2140_v17 }
 0x3d8   : > { %2144 = vadd.xlane.f32.xlu1 %v2143_v6 }
 0x3dc   : > { %2138 = vadd.xlane.f32.xlu1 %v2137_v7 }
 0x439   : > { %v2902_v8 = vpop.f32.mrf.mxu1 }
 0x43b   : > { %v2044_v9 = vpop.f32.mrf.mxu1 }
 0x43d   : > { %v2905_v10 = vpop.f32.mrf.mxu1 }
 0x43e   : > { %2907 = vmatpush3.msra.mxu0 %v2905_v10 }
 0x43f   : > { %v2054_v19 = vpop.f32.mrf.mxu1  ;;  %2908 = vmatprep.subr.mxu0 %v3606_v42 }
 0x440   : > { %2909 = vmatpush3.msra.mxu0 %v2054_v19 }
 0x441   : > { %2910 = vmatprep.subr.mxu0 %v3606_v42 }
 0x442   : > { %2911 = vmatpush3.msra.mxu0 %v2902_v8 }
 0x443   : > { %2912 = vmatprep.subr.mxu0 %v3606_v42 }
 0x444   : > { %2913 = vmatpush3.msra.mxu0 %v2044_v9 }
 0x445   : > { %2928 = vmatprep.subr.mxu0 %v3606_v42  ;;  %2915 = vmatmul.mubr.msk.f32.vlgmr.msra.gmra.mxu0 %vm971_vm3, %v2063_v55 }
 0x446   : > { %2936 = vmatprep.mubr.msk.f32.mxu0 %vm3029_vm15, %v3606_v42 }
 0x451   : > { %v2159_v12 = vpop.xlane.xlu0 %2158 }
 0x455   : > { %v2162_v15 = vpop.xlane.xlu0 %2161 }
 0x459   : > { %v2165_v18 = vpop.xlane.xlu1 %2164  ;;  %v2156_v21 = vpop.xlane.xlu0 %2155 }
 0x45a   : > { %2929 = vmatpush3.msra.mxu0 %v2165_v18 }
 0x45b   : > { %2930 = vmatprep.subr.mxu0 %v3606_v42 }
 0x45c   : > { %2931 = vmatpush3.msra.mxu0 %v2162_v15 }
 0x45d   : > { %v2148_v22 = vpop.xlane.xlu1 %2147  ;;  %2932 = vmatprep.subr.mxu0 %v3606_v42  ;;  %v2142_v26 = vpop.xlane.xlu0 %2141 }
 0x45e   : > { %v2153_v24 = vmul.f32 0.25, %v2148_v22  ;;  %2933 = vmatpush3.msra.mxu0 %v2159_v12  ;;  %v2151_v29 = vmul.f32 0.25, %v2142_v26 }
 0x45f   : > { %2934 = vmatprep.subr.mxu0 %v3606_v42 }
 0x460   : > { %2918 = vmatpush3.msra.mxu1 %v2153_v24  ;;  %2935 = vmatpush3.msra.mxu0 %v2156_v21 }
 0x461   : > { %v2145_v27 = vpop.xlane.xlu1 %2144  ;;  %2937 = vmatmul.mubr.msk.f32.vlgmr.msra.gmra.mxu0 %vm971_vm3, %v2166_v25  ;;  %2919 = vmatprep.subr.mxu1 %v3606_v42 }
 0x462   : > { %v2152_v28 = vmul.f32 0.25, %v2145_v27  ;;  %2949 = vmatprep.mubr.msk.f32.mxu0 %vm669_vm2, %v2241_v32 }
 0x464   : > { %2920 = vmatpush3.msra.mxu1 %v2152_v28 }
 0x465   : > { %2921 = vmatprep.subr.mxu1 %v3606_v42  ;;  %v2139_v30 = vpop.xlane.xlu1 %2138 }
 0x466   : > { %v2150_v31 = vmul.f32 0.25, %v2139_v30  ;;  %2922 = vmatpush3.msra.mxu1 %v2151_v29 }
 0x467   : > { %2923 = vmatprep.subr.mxu1 %v3606_v42  ;;  %v2242_v42 = vld [vmem:[%s3818_s14 + $0x8] sm:$0xff] }
 0x468   : > { %2924 = vmatpush3.msra.mxu1 %v2150_v31 }
 0x469   : > { %2926 = vmatmul.mubr.msk.f32.vlgmr.msra.gmra.mxu1 %vm971_vm3, %v2166_v25 }
 0x46a   : > { %2941 = vmatprep.mubr.msk.f32.mxu1 %vm669_vm2, %v2241_v32 }
 0x505   : > { %v2133_v33 = vpop.f32.mrf.mxu0 }
 0x507   : > { %v2916_v34 = vpop.f32.mrf.mxu0 }
 0x521   : > { %v2311_v35 = vpop.f32.mrf.mxu0 }
 0x522   : > { %v2312_v36 = vadd.f32 %v2311_v35, %v2133_v33 }
 0x523   : > { %v2938_v37 = vpop.f32.mrf.mxu0 }
 0x524   : > { %v2315_v38 = vmax.f32 %v2312_v36, 0.0 }
 0x526   : > { %2939 = vmatprep.subr.msk.mxu1 %vm2328_vm0, %v2315_v38 }
 0x527   : > { %2940 = vmatpush3.msk.msra.mxu1 %vm2328_vm0, %v2315_v38 }
 0x528   : > { %2942 = vmatmul.mubr.msk.f32.vlgmr.msra.gmra.mxu1 %vm669_vm2, %v2242_v42 }
 0x529   : > { %v2236_v40 = vpop.f32.mrf.mxu1  ;;  %2944 = vmatprep.mubr.msk.f32.mxu1 %vm669_vm2, %v2243_v39 }
 0x52a   : > { %v2237_v43 = vadd.f32 %v2236_v40, %v2133_v33 }
 0x52b   : > { %v2927_v44 = vpop.f32.mrf.mxu1 }
 0x52c   : > { %v2240_v45 = vmax.f32 %v2237_v43, 0.0  ;;  %2945 = vmatmul.mubr.msk.f32.gmra.mxu1 %vm669_vm2, %v2244_v41 }
 0x52d   : > { %2952 = vmatprep.mubr.msk.f32.mxu1 %vm669_vm2, %v2243_v39 }
 0x52e   : > { %2947 = vmatprep.subr.msk.mxu0 %vm2328_vm0, %v2240_v45  ;;  %2955 = vmatprep.subr.msk.mxu1 %vm2328_vm0, %v2240_v45 }
 0x52f   : > { %2948 = vmatpush3.msk.msra.mxu0 %vm2328_vm0, %v2240_v45  ;;  %2956 = vmatpush3.msk.msra.mxu1 %vm2328_vm0, %v2240_v45 }
 0x530   : > { %2950 = vmatmul.mubr.msk.f32.vlgmr.msra.gmra.mxu0 %vm669_vm2, %v2242_v42  ;;  %2953 = vmatmul.mubr.msk.f32.vlgmr.msra.gmra.mxu1 %vm669_vm2, %v2244_v41 }
 0x5e8   : > { %v2943_v46 = vpop.f32.mrf.mxu1 }
 0x5ea   : > { %v2398_v47 = vpop.f32.mrf.mxu1 }
 0x5ec   : > { %v2946_v48 = vpop.f32.mrf.mxu1 }
 0x5ee   : > { %v2408_v49 = vpop.f32.mrf.mxu1 }
 0x5f0   : > { %v2951_v50 = vpop.f32.mrf.mxu0  ;;  %v2954_v51 = vpop.f32.mrf.mxu1 }
 0x5f1   : > { %v2492_v52 = vadd.f32 %v2951_v50, %v2943_v46  ;;  %v2502_v53 = vadd.f32 %v2954_v51, %v2946_v48 }
 0x5f2   : > { %v2486_v54 = vpop.f32.mrf.mxu0  ;;  %v2496_v56 = vpop.f32.mrf.mxu1 }
 0x5f3   : > { %v2506_v57 = vsub.f32 0.0, %v2492_v52  ;;  %v2508_v20 = vsub.f32 0.0, %v2502_v53  ;;  %v2487_v58 = vadd.f32 %v2486_v54, %v2398_v47  ;;  %v2497_v59 = vadd.f32 %v2496_v56, %v2408_v49 }
 0x5f5   : > { %v2511_v60 = vmul.f32 1.442695, %v2506_v57  ;;  %v2515_v61 = vmul.f32 1.442695, %v2508_v20  ;;  %v2505_v62 = vsub.f32 0.0, %v2487_v58  ;;  %v2507_v63 = vsub.f32 0.0, %v2497_v59 }
 0x5f7   : > { %2996 = vpow2.f32 %v2511_v60  ;;  %v2509_v0 = vmul.f32 1.442695, %v2505_v62  ;;  %v2513_v23 = vmul.f32 1.442695, %v2507_v63 }
 0x5f8   : > { %2998 = vpow2.f32 %v2515_v61 }
 0x5f9   : > { %3000 = vpow2.f32 %v2509_v0 }
 0x5fa   : > { %3002 = vpow2.f32 %v2513_v23 }
 0x604   : > { %v2997_v3 = vpop.eup %2996 }
 0x605   : > { %v2999_v4 = vpop.eup %2998  ;;  %v2518_v14 = vadd.f32 1.0, %v2997_v3 }
 0x606   : > { %v3001_v16 = vpop.eup %3000  ;;  %v2520_v5 = vadd.f32 1.0, %v2999_v4 }
 0x607   : > { %v3003_v17 = vpop.eup %3002  ;;  %3004 = vrcp.f32 %v2518_v14  ;;  %v2517_v6 = vadd.f32 1.0, %v3001_v16 }
 0x608   : > { %3006 = vrcp.f32 %v2520_v5  ;;  %v2519_v7 = vadd.f32 1.0, %v3003_v17 }
 0x609   : > { %3008 = vrcp.f32 %v2517_v6 }
 0x60a   : > { %3010 = vrcp.f32 %v2519_v7 }
 0x614   : > { %v3005_v8 = vpop.eup %3004 }
 0x615   : > { %v3007_v9 = vpop.eup %3006  ;;  %2530 = vst.msk [vmem:[%s551_s23 + $0x8] sm:$0xff] %vm730_vm4, %v3005_v8  ;;  %2540 = vperm.xlu1 %2985, %v3005_v8  }
 0x616   : > { %v3009_v10 = vpop.eup %3008  ;;  %2532 = vst.msk [vmem:[%s551_s23 + $0x18] sm:$0xff] %vm730_vm4, %v3007_v9 }
 0x617   : > { %v3011_v19 = vpop.eup %3010  ;;  %2529 = vst.msk [vmem:[%s551_s23] sm:$0xff] %vm730_vm4, %v3009_v10  ;;  %2535 = vperm.xlu0 %2984, %v3009_v10  }
 0x618   : > { %2531 = vst.msk [vmem:[%s551_s23 + $0x10] sm:$0xff] %vm730_vm4, %v3011_v19 }
 0x619   : > { %2545 = vperm.xlu1 %2985, %v3011_v19  }
 0x61b   : > { %2550 = vperm.xlu0 %2984, %v3007_v9  }
 0x690   : > { %v2541_v55 = vpop.permute.xlu1 %2540 }
 0x691   : > { %v2554_v12 = vmul.f32 %v2541_v55, %v3702_v13 }
 0x692   : > { %v2536_v15 = vpop.permute.xlu0 %2535 }
 0x693   : > { %v2558_v18 = vadd.f32 %v2554_v12, %v3702_v13  ;;  %v2553_v21 = vmul.f32 %v2536_v15, %v3710_v11 }
 0x694   : > { %v2546_v22 = vpop.permute.xlu1 %2545 }
 0x695   : > { %2562 = vst.msk [vmem:[%s546_s24 + $0x8] sm:$0xff] %vm564_vm1, %v2558_v18  ;;  %v2557_v24 = vadd.f32 %v2553_v21, %v3710_v11  ;;  %v2555_v25 = vmul.f32 %v2546_v22, %v3706_v1 }
 0x696   : > { %v2551_v26 = vpop.permute.xlu0 %2550 }
 0x697   : > { %2561 = vst.msk [vmem:[%s546_s24] sm:$0xff] %vm564_vm1, %v2557_v24  ;;  %v2559_v27 = vadd.f32 %v2555_v25, %v3706_v1  ;;  %v2556_v28 = vmul.f32 %v2551_v26, %v3712_v2 }
 0x699   : > { %2563 = vst.msk [vmem:[%s546_s24 + $0x10] sm:$0xff] %vm564_vm1, %v2559_v27  ;;  %v2560_v13 = vadd.f32 %v2556_v28, %v3712_v2 }
 0x69b   : > { %2564 = vst.msk [vmem:[%s546_s24 + $0x18] sm:$0xff] %vm564_vm1, %v2560_v13 }
 0x69c PF: > { %s27_s21 = sadd.s32 1, %s3019_s21  }
 0x69d   : > { %p24_p4 = scmp.ge.s32.totalorder %s27_s21, 4  }
 0x69f   :  { %26 = sbr.rel (!%p24_p4) target bundleno = 2 (0x2), region = 125 }

</bundles_post_ra>
